<compile_context>
chip_gen: v5e
topology: v5e:2x2
jax: 0.10.0
libtpu: 0.0.40
codegen_flags: <defaults>
</compile_context>

<pallas_src>
import functools
import math

import jax
import jax.numpy as jnp
from jax.experimental import pallas as pl
from jax.experimental.pallas import tpu as pltpu


# ----------------------------- config --------------------------------------
class Config:
    dec_d_model = 32
    dec_num_heads = 4
    dec_num_layers = 2
    attn_dropout = 0.0
    dec_dim_feedforward = 2048   # nn.TransformerDecoderLayer default


# Row indices inside the packed (L, 16, d) small-parameter slab.
_SA_BQ, _SA_BK, _SA_BV, _SA_BO = 0, 1, 2, 3
_CA_BQ, _CA_BK, _CA_BV, _CA_BO = 4, 5, 6, 7
_B2, _N1W, _N1B, _N2W, _N2B, _N3W, _N3B = 8, 9, 10, 11, 12, 13, 14
_VEC_ROWS = 16  # padded to a sublane multiple

# Column-block order inside the lane-dense (L, d, 8*d) attention weight slab.
# [sa_q | sa_k | sa_v | sa_o | ca_q | ca_k | ca_v | ca_o], d columns each.


# ------------------------- in-kernel helpers --------------------------------
def _layernorm(v, w, b, eps=1e-5):
    mu = jnp.mean(v, axis=-1, keepdims=True)
    var = jnp.mean((v - mu) * (v - mu), axis=-1, keepdims=True)
    return (v - mu) * jax.lax.rsqrt(var + eps) * w + b


def _softmax(s):
    m = jnp.max(s, axis=-1, keepdims=True)
    e = jnp.exp(s - m)
    return e * pl.reciprocal(jnp.sum(e, axis=-1, keepdims=True), approx=True)


def _split_heads(x2d, hd, use_einshape):
    """(rows, nh*hd) -> (nh, rows, hd): move the head axis to a leading (batch)
    position.  Primary path: one lane-aware einshape relayout.  Fallback:
    lane-slice + stack (previously validated op classes)."""
    rows, cols = x2d.shape
    nh = cols // hd
    if use_einshape:
        return pltpu.einshape("mhd->hmd", x2d.reshape(rows, nh, hd))
    return jnp.stack([x2d[:, i * hd:(i + 1) * hd] for i in range(nh)], axis=0)


# ------------------------------ kernel --------------------------------------
def decoder_stack_kernel(
    x_ref,       # (B, T, d)      initial activations (same block every layer)
    mem_ref,     # (B, S, d)      encoder output      (same block every layer)
    attn_w_ref,  # (1, d, 8*d)    lane-dense attention weight slab, bf16
    w1_ref,      # (1, d, dff)    FFN linear1 weight (pre-transposed), bf16
    w2t_ref,     # (1, d, dff)    FFN linear2 weight, lane-dense, bf16
    b1_ref,      # (1, 1, dff)    FFN linear1 bias, f32
    vec_ref,     # (1, 16, d)     packed biases + LayerNorm params, f32
    out_ref,     # (B, T, d)      resident across the layer axis
    *, num_heads, use_einshape,
):
    B, T, d = out_ref.shape
    _, S, _ = mem_ref.shape
    H = num_heads
    hd = d // H
    scale = 1.0 / math.sqrt(hd)

    # Layer 0: bring the initial activations into the resident output block.
    @pl.when(pl.program_id(0) == 0)
    def _():
        out_ref[...] = x_ref[...]

    x = out_ref[...].astype(jnp.float32).reshape(B * T, d)   # (M, d)

    aw = attn_w_ref[0]                       # (d, 8d) bf16
    cdt = aw.dtype                           # bf16 compute dtype (MXU operands)
    w1 = w1_ref[0]                           # (d, dff) bf16
    w2t = w2t_ref[0]                         # (d, dff) bf16
    b1 = b1_ref[0].astype(jnp.float32)       # (1, dff)
    vec = vec_ref[0].astype(jnp.float32)     # (16, d)

    def row(i):
        return vec[i:i + 1, :]               # (1, d)

    def mha_from_heads(qg, kg, vg, wo, bo):
        """qg: (H*B, T, hd), kg/vg: (H*B, S_kv, hd), all bf16.
        One batched score einsum, one batched PV einsum, one out-proj dot."""
        s = jnp.einsum('gtd,gsd->gts', qg, kg,
                       preferred_element_type=jnp.float32) * scale
        p = _softmax(s)
        og = jnp.einsum('gts,gsd->gtd', p.astype(cdt), vg,
                        preferred_element_type=jnp.float32)    # (H*B, T, hd)
        og = og.reshape(H, B * T, hd)
        o = jnp.concatenate([og[h] for h in range(H)], axis=-1)  # (M, d)
        return jnp.dot(o.astype(cdt), wo,
                       preferred_element_type=jnp.float32) + bo

    # --- self-attention block (pre-norm); fused QKV projection ---
    h1 = _layernorm(x, row(_N1W), row(_N1B))
    b_qkv = jnp.concatenate([row(_SA_BQ), row(_SA_BK), row(_SA_BV)], axis=-1)
    qkv = jnp.dot(h1.astype(cdt), aw[:, 0:3 * d],
                  preferred_element_type=jnp.float32) + b_qkv     # (M, 3d)
    heads = _split_heads(qkv.astype(cdt), hd, use_einshape)       # (3H, M, hd)
    qg = heads[0:H].reshape(H * B, T, hd)
    kg = heads[H:2 * H].reshape(H * B, T, hd)
    vg = heads[2 * H:3 * H].reshape(H * B, T, hd)
    x = x + mha_from_heads(qg, kg, vg, aw[:, 3 * d:4 * d], row(_SA_BO))

    # --- cross-attention block (pre-norm); fused KV projection of memory ---
    h2 = _layernorm(x, row(_N2W), row(_N2B))
    q = jnp.dot(h2.astype(cdt), aw[:, 4 * d:5 * d],
                preferred_element_type=jnp.float32) + row(_CA_BQ)  # (M, d)
    mem2d = mem_ref[...].reshape(B * S, d).astype(cdt)             # bf16 directly
    b_kv = jnp.concatenate([row(_CA_BK), row(_CA_BV)], axis=-1)
    kv = jnp.dot(mem2d, aw[:, 5 * d:7 * d],
                 preferred_element_type=jnp.float32) + b_kv        # (B*S, 2d)
    qg = _split_heads(q.astype(cdt), hd, use_einshape).reshape(H * B, T, hd)
    kvh = _split_heads(kv.astype(cdt), hd, use_einshape)           # (2H, B*S, hd)
    kg = kvh[0:H].reshape(H * B, S, hd)
    vg = kvh[H:2 * H].reshape(H * B, S, hd)
    x = x + mha_from_heads(qg, kg, vg, aw[:, 7 * d:8 * d], row(_CA_BO))

    # --- feed-forward block (pre-norm, ReLU); second dot has transposed RHS ---
    h3 = _layernorm(x, row(_N3W), row(_N3B))
    ff = jnp.dot(h3.astype(cdt), w1, preferred_element_type=jnp.float32) + b1
    ff = jnp.maximum(ff, 0.0)
    ff = jax.lax.dot_general(ff.astype(cdt), w2t,
                             dimension_numbers=(((1,), (1,)), ((), ())),
                             preferred_element_type=jnp.float32) + row(_B2)
    x = x + ff

    out_ref[...] = x.reshape(B, T, d).astype(out_ref.dtype)


# ---------------------------- host wrapper ----------------------------------
def run_decoder_stack(x, mem, stacked_params, num_heads, use_einshape=True):
    attn_w, w1, w2t, b1, vec = stacked_params
    B, T, d = x.shape
    _, S, _ = mem.shape
    L = attn_w.shape[0]
    dff = w1.shape[-1]

    kernel = functools.partial(decoder_stack_kernel, num_heads=num_heads,
                               use_einshape=use_einshape)

    return pl.pallas_call(
        kernel,
        out_shape=jax.ShapeDtypeStruct((B, T, d), x.dtype),
        grid_spec=pltpu.PrefetchScalarGridSpec(
            num_scalar_prefetch=0,
            grid=(L,),
            in_specs=[
                pl.BlockSpec((B, T, d), lambda l: (0, 0, 0)),            # x
                pl.BlockSpec((B, S, d), lambda l: (0, 0, 0)),            # enc_output
                pl.BlockSpec((1, d, 8 * d), lambda l: (l, 0, 0)),        # attn slab
                pl.BlockSpec((1, d, dff), lambda l: (l, 0, 0)),          # FFN w1
                pl.BlockSpec((1, d, dff), lambda l: (l, 0, 0)),          # FFN w2 (lane-dense)
                pl.BlockSpec((1, 1, dff), lambda l: (l, 0, 0)),          # FFN b1
                pl.BlockSpec((1, _VEC_ROWS, d), lambda l: (l, 0, 0)),    # small params
            ],
            out_specs=pl.BlockSpec((B, T, d), lambda l: (0, 0, 0)),
        ),
        compiler_params=pltpu.CompilerParams(
            dimension_semantics=("arbitrary",),   # layers are sequential
        ),
    )(x, mem, attn_w, w1, w2t, b1, vec)


def decoder_forward(x, enc_output, stacked_params, num_heads):
    try:
        out = run_decoder_stack(x, enc_output, stacked_params, num_heads,
                                use_einshape=True)
        return jax.block_until_ready(out)
    except Exception:
        # Fallback: identical math; head relayout via previously-validated
        # lane-slice + stack in case einshape cannot lower here.
        out = run_decoder_stack(x, enc_output, stacked_params, num_heads,
                                use_einshape=False)
        return jax.block_until_ready(out)


def init_stacked_params(key, num_layers, d, dff, weight_dtype=jnp.bfloat16):
    """Deterministic init.  Linear weights stored pre-transposed (in, out),
    stacked over the layer axis; large weights bf16 / lane-dense, small f32."""
    s = 0.02
    layer_keys = jax.random.split(key, num_layers)
    attn_ws, w1s, w2ts, b1s, vecs = [], [], [], [], []

    for lk in layer_keys:
        ks = jax.random.split(lk, 10)

        def w(k, shape):
            return s * jax.random.normal(k, shape, dtype=jnp.float32)

        # lane-dense (d, 8d) slab: [sa_q|sa_k|sa_v|sa_o|ca_q|ca_k|ca_v|ca_o]
        attn = jnp.concatenate([w(ks[i], (d, d)) for i in range(8)], axis=1)
        attn_ws.append(attn.astype(weight_dtype))
        # FFN linear1 weight, pre-transposed (in=d, out=dff)
        w1s.append(w(ks[8], (d, dff)).astype(weight_dtype))
        # FFN linear2 weight stored (d, dff)  == PyTorch layout, lane-dense
        w2ts.append(w(ks[9], (d, dff)).astype(weight_dtype))
        b1s.append(jnp.zeros((1, dff), jnp.float32))

        vec = jnp.zeros((_VEC_ROWS, d), jnp.float32)
        vec = vec.at[_N1W].set(1.0).at[_N2W].set(1.0).at[_N3W].set(1.0)
        vecs.append(vec)

    return (jnp.stack(attn_ws), jnp.stack(w1s), jnp.stack(w2ts),
            jnp.stack(b1s), jnp.stack(vecs))


# ------------------------------- main ---------------------------------------
if __name__ == "__main__":
    cfg = Config()
    B, T, S = 2, 8, 8
    d = cfg.dec_d_model
    dff = cfg.dec_dim_feedforward

    key = jax.random.PRNGKey(0)
    kx, kmem, kp = jax.random.split(key, 3)
    x = jax.random.normal(kx, (B, T, d), dtype=jnp.float32)
    enc_output = jax.random.normal(kmem, (B, S, d), dtype=jnp.float32)

    stacked_params = init_stacked_params(kp, cfg.dec_num_layers, d, dff)

    out = decoder_forward(x, enc_output, stacked_params, cfg.dec_num_heads)
    out = jax.block_until_ready(out)
    assert out.shape == (B, T, d)
    assert jnp.all(jnp.isfinite(out))
    print("KERNEL_OK")
</pallas_src>

<mosaic_0001>
module attributes {stable_mosaic.version = 11 : i64} {
  func.func @decoder_stack_kernel(%arg0: i32, %arg1: memref<2x8x32xf32, #tpu.memory_space<vmem>>, %arg2: memref<2x8x32xf32, #tpu.memory_space<vmem>>, %arg3: memref<1x32x256xbf16, #tpu.memory_space<vmem>>, %arg4: memref<1x32x2048xbf16, #tpu.memory_space<vmem>>, %arg5: memref<1x32x2048xbf16, #tpu.memory_space<vmem>>, %arg6: memref<1x1x2048xf32, #tpu.memory_space<vmem>>, %arg7: memref<1x16x32xf32, #tpu.memory_space<vmem>>, %arg8: memref<2x8x32xf32, #tpu.memory_space<vmem>>) attributes {dimension_semantics = [#tpu.dimension_semantics<arbitrary>], iteration_bounds = array<i64: 2>, scalar_prefetch = 0 : i64, scratch_operands = 0 : i64, tpu.core_type = #tpu.core_type<tc>, window_params = [{pipeline_mode = #tpu.pipeline_mode<synchronous>, transform_indices = @transform_0, window_bounds = array<i64: 2, 8, 32>}, {pipeline_mode = #tpu.pipeline_mode<synchronous>, transform_indices = @transform_1, window_bounds = array<i64: 2, 8, 32>}, {transform_indices = @transform_2, window_bounds = array<i64: 1, 32, 256>}, {transform_indices = @transform_3, window_bounds = array<i64: 1, 32, 2048>}, {transform_indices = @transform_4, window_bounds = array<i64: 1, 32, 2048>}, {transform_indices = @transform_5, window_bounds = array<i64: 1, 1, 2048>}, {transform_indices = @transform_6, window_bounds = array<i64: 1, 16, 32>}, {pipeline_mode = #tpu.pipeline_mode<synchronous>, transform_indices = @transform_7, window_bounds = array<i64: 2, 8, 32>}]} {
    %c0_i32 = arith.constant 0 : i32
    %0 = arith.cmpi eq, %arg0, %c0_i32 : i32
    %1 = arith.extui %0 : i1 to i32
    %c0_i32_0 = arith.constant 0 : i32
    %2 = arith.cmpi ne, %1, %c0_i32_0 : i32
    scf.if %2 {
      %c0_56 = arith.constant 0 : index
      %c0_57 = arith.constant 0 : index
      %c0_58 = arith.constant 0 : index
      %216 = vector.load %arg1[%c0_56, %c0_57, %c0_58] : memref<2x8x32xf32, #tpu.memory_space<vmem>>, vector<2x8x32xf32>
      %c0_59 = arith.constant 0 : index
      %c0_60 = arith.constant 0 : index
      %c0_61 = arith.constant 0 : index
      %217 = vector.load %arg8[%c0_59, %c0_60, %c0_61] : memref<2x8x32xf32, #tpu.memory_space<vmem>>, vector<2x8x32xf32>
      tpu.vector_store %arg8[%c0_59, %c0_60, %c0_61], %216 {strides = array<i32>} : memref<2x8x32xf32, #tpu.memory_space<vmem>>, vector<2x8x32xf32>,
    } else {
    }
    %c0 = arith.constant 0 : index
    %c0_1 = arith.constant 0 : index
    %c0_2 = arith.constant 0 : index
    %3 = vector.load %arg8[%c0, %c0_1, %c0_2] : memref<2x8x32xf32, #tpu.memory_space<vmem>>, vector<2x8x32xf32>
    %4 = vector.shape_cast %3 : vector<2x8x32xf32> to vector<16x32xf32>
    %c0_3 = arith.constant 0 : index
    %c0_4 = arith.constant 0 : index
    %c0_5 = arith.constant 0 : index
    %5 = vector.load %arg3[%c0_3, %c0_4, %c0_5] : memref<1x32x256xbf16, #tpu.memory_space<vmem>>, vector<1x32x256xbf16>
    %6 = vector.shape_cast %5 : vector<1x32x256xbf16> to vector<32x256xbf16>
    %c0_6 = arith.constant 0 : index
    %c0_7 = arith.constant 0 : index
    %c0_8 = arith.constant 0 : index
    %7 = vector.load %arg4[%c0_6, %c0_7, %c0_8] : memref<1x32x2048xbf16, #tpu.memory_space<vmem>>, vector<1x32x2048xbf16>
    %8 = vector.shape_cast %7 : vector<1x32x2048xbf16> to vector<32x2048xbf16>
    %c0_9 = arith.constant 0 : index
    %c0_10 = arith.constant 0 : index
    %c0_11 = arith.constant 0 : index
    %9 = vector.load %arg5[%c0_9, %c0_10, %c0_11] : memref<1x32x2048xbf16, #tpu.memory_space<vmem>>, vector<1x32x2048xbf16>
    %10 = vector.shape_cast %9 : vector<1x32x2048xbf16> to vector<32x2048xbf16>
    %c0_12 = arith.constant 0 : index
    %c0_13 = arith.constant 0 : index
    %c0_14 = arith.constant 0 : index
    %11 = vector.load %arg6[%c0_12, %c0_13, %c0_14] : memref<1x1x2048xf32, #tpu.memory_space<vmem>>, vector<1x1x2048xf32>
    %12 = vector.shape_cast %11 : vector<1x1x2048xf32> to vector<1x2048xf32>
    %c0_15 = arith.constant 0 : index
    %c0_16 = arith.constant 0 : index
    %c0_17 = arith.constant 0 : index
    %13 = vector.load %arg7[%c0_15, %c0_16, %c0_17] : memref<1x16x32xf32, #tpu.memory_space<vmem>>, vector<1x16x32xf32>
    %14 = vector.shape_cast %13 : vector<1x16x32xf32> to vector<16x32xf32>
    %15 = vector.extract_strided_slice %14 {offsets = [9, 0], sizes = [1, 32], strides = [1, 1]} : vector<16x32xf32> to vector<1x32xf32>
    %16 = vector.extract_strided_slice %14 {offsets = [10, 0], sizes = [1, 32], strides = [1, 1]} : vector<16x32xf32> to vector<1x32xf32>
    %cst = arith.constant dense<0.000000e+00> : vector<16xf32>
    %17 = vector.multi_reduction <add>, %4, %cst [1] : vector<16x32xf32> to vector<16xf32>
    %18 = vector.shape_cast %17 : vector<16xf32> to vector<16x1xf32>
    %cst_18 = arith.constant 3.200000e+01 : f32
    %19 = vector.broadcast %cst_18 : f32 to vector<16x1xf32>
    %20 = arith.divf %18, %19 : vector<16x1xf32>
    %21 = vector.broadcast %20 : vector<16x1xf32> to vector<16x32xf32>
    %22 = arith.subf %4, %21 : vector<16x32xf32>
    %23 = vector.broadcast %20 : vector<16x1xf32> to vector<16x32xf32>
    %24 = arith.subf %4, %23 : vector<16x32xf32>
    %25 = arith.mulf %22, %24 : vector<16x32xf32>
    %cst_19 = arith.constant dense<0.000000e+00> : vector<16xf32>
    %26 = vector.multi_reduction <add>, %25, %cst_19 [1] : vector<16x32xf32> to vector<16xf32>
    %27 = vector.shape_cast %26 : vector<16xf32> to vector<16x1xf32>
    %cst_20 = arith.constant 3.200000e+01 : f32
    %28 = vector.broadcast %cst_20 : f32 to vector<16x1xf32>
    %29 = arith.divf %27, %28 : vector<16x1xf32>
    %30 = vector.broadcast %20 : vector<16x1xf32> to vector<16x32xf32>
    %31 = arith.subf %4, %30 : vector<16x32xf32>
    %cst_21 = arith.constant 9.99999974E-6 : f32
    %32 = vector.broadcast %cst_21 : f32 to vector<16x1xf32>
    %33 = arith.addf %29, %32 : vector<16x1xf32>
    %34 = math.rsqrt %33 : vector<16x1xf32>
    %35 = vector.broadcast %34 : vector<16x1xf32> to vector<16x32xf32>
    %36 = arith.mulf %31, %35 : vector<16x32xf32>
    %37 = vector.broadcast %15 : vector<1x32xf32> to vector<16x32xf32>
    %38 = arith.mulf %36, %37 : vector<16x32xf32>
    %39 = vector.broadcast %16 : vector<1x32xf32> to vector<16x32xf32>
    %40 = arith.addf %38, %39 : vector<16x32xf32>
    %41 = vector.extract_strided_slice %14 {offsets = [0, 0], sizes = [1, 32], strides = [1, 1]} : vector<16x32xf32> to vector<1x32xf32>
    %42 = vector.extract_strided_slice %14 {offsets = [1, 0], sizes = [1, 32], strides = [1, 1]} : vector<16x32xf32> to vector<1x32xf32>
    %43 = vector.extract_strided_slice %14 {offsets = [2, 0], sizes = [1, 32], strides = [1, 1]} : vector<16x32xf32> to vector<1x32xf32>
    %44 = tpu.concatenate %41, %42, %43 in 1 : vector<1x32xf32>, vector<1x32xf32>, vector<1x32xf32> -> vector<1x96xf32>
    %45 = arith.truncf %40 : vector<16x32xf32> to vector<16x32xbf16>
    %46 = vector.extract_strided_slice %6 {offsets = [0, 0], sizes = [32, 96], strides = [1, 1]} : vector<32x256xbf16> to vector<32x96xbf16>
    %cst_22 = arith.constant dense<0.000000e+00> : vector<16x96xf32>
    %47 = tpu.matmul %45, %46, %cst_22 {dimension_numbers = #tpu.dot_dimension_numbers<[1], [0], [0], [1], [0, 0, 1, 1], [], []>} : vector<16x32xbf16>, vector<32x96xbf16>, vector<16x96xf32> -> vector<16x96xf32>
    %48 = vector.broadcast %44 : vector<1x96xf32> to vector<16x96xf32>
    %49 = arith.addf %47, %48 : vector<16x96xf32>
    %50 = arith.truncf %49 : vector<16x96xf32> to vector<16x96xbf16>
    %51 = vector.shape_cast %50 : vector<16x96xbf16> to vector<16x12x8xbf16>
    %52 = tpu.transpose %51, [1, 0, 2] : vector<16x12x8xbf16> -> vector<12x16x8xbf16>
    %53 = vector.extract_strided_slice %52 {offsets = [0, 0, 0], sizes = [4, 16, 8], strides = [1, 1, 1]} : vector<12x16x8xbf16> to vector<4x16x8xbf16>
    %54 = vector.shape_cast %53 : vector<4x16x8xbf16> to vector<8x8x8xbf16>
    %55 = vector.extract_strided_slice %52 {offsets = [4, 0, 0], sizes = [4, 16, 8], strides = [1, 1, 1]} : vector<12x16x8xbf16> to vector<4x16x8xbf16>
    %56 = vector.shape_cast %55 : vector<4x16x8xbf16> to vector<8x8x8xbf16>
    %57 = vector.extract_strided_slice %52 {offsets = [8, 0, 0], sizes = [4, 16, 8], strides = [1, 1, 1]} : vector<12x16x8xbf16> to vector<4x16x8xbf16>
    %58 = vector.shape_cast %57 : vector<4x16x8xbf16> to vector<8x8x8xbf16>
    %59 = vector.extract_strided_slice %6 {offsets = [0, 96], sizes = [32, 32], strides = [1, 1]} : vector<32x256xbf16> to vector<32x32xbf16>
    %60 = vector.extract_strided_slice %14 {offsets = [3, 0], sizes = [1, 32], strides = [1, 1]} : vector<16x32xf32> to vector<1x32xf32>
    "tpu.trace_start"() <{level = 10 : i32, message = "gtd,gsd->gts"}> : () -> ()
    %cst_23 = arith.constant dense<0.000000e+00> : vector<8x8x8xf32>
    %61 = tpu.matmul %54, %56, %cst_23 {dimension_numbers = #tpu.dot_dimension_numbers<[2], [2], [1], [1], [0, 0, 0, 1, 1, 1], [0], [0]>} : vector<8x8x8xbf16>, vector<8x8x8xbf16>, vector<8x8x8xf32> -> vector<8x8x8xf32>
    "tpu.trace_stop"() : () -> ()
    %cst_24 = arith.constant 0.353553385 : f32
    %62 = vector.broadcast %cst_24 : f32 to vector<8x8x8xf32>
    %63 = arith.mulf %61, %62 : vector<8x8x8xf32>
    %cst_25 = arith.constant dense<0xFF800000> : vector<8x8xf32>
    %64 = vector.multi_reduction <maximumf>, %63, %cst_25 [2] : vector<8x8x8xf32> to vector<8x8xf32>
    %65 = vector.shape_cast %64 : vector<8x8xf32> to vector<8x8x1xf32>
    %66 = vector.broadcast %65 : vector<8x8x1xf32> to vector<8x8x8xf32>
    %67 = arith.subf %63, %66 : vector<8x8x8xf32>
    %68 = math.exp %67 : vector<8x8x8xf32>
    %cst_26 = arith.constant dense<0.000000e+00> : vector<8x8xf32>
    %69 = vector.multi_reduction <add>, %68, %cst_26 [2] : vector<8x8x8xf32> to vector<8x8xf32>
    %70 = vector.shape_cast %69 : vector<8x8xf32> to vector<8x8x1xf32>
    %71 = tpu.reciprocal %70 {approx = true} : vector<8x8x1xf32> -> vector<8x8x1xf32>
    %72 = vector.broadcast %71 : vector<8x8x1xf32> to vector<8x8x8xf32>
    %73 = arith.mulf %68, %72 : vector<8x8x8xf32>
    %74 = arith.truncf %73 : vector<8x8x8xf32> to vector<8x8x8xbf16>
    "tpu.trace_start"() <{level = 10 : i32, message = "gts,gsd->gtd"}> : () -> ()
    %cst_27 = arith.constant dense<0.000000e+00> : vector<8x8x8xf32>
    %75 = tpu.matmul %74, %58, %cst_27 {dimension_numbers = #tpu.dot_dimension_numbers<[2], [1], [1], [2], [0, 0, 0, 1, 1, 2], [0], [0]>} : vector<8x8x8xbf16>, vector<8x8x8xbf16>, vector<8x8x8xf32> -> vector<8x8x8xf32>
    "tpu.trace_stop"() : () -> ()
    %76 = vector.shape_cast %75 : vector<8x8x8xf32> to vector<4x16x8xf32>
    %77 = vector.extract_strided_slice %76 {offsets = [0, 0, 0], sizes = [1, 16, 8], strides = [1, 1, 1]} : vector<4x16x8xf32> to vector<1x16x8xf32>
    %78 = vector.shape_cast %77 : vector<1x16x8xf32> to vector<16x8xf32>
    %79 = vector.extract_strided_slice %76 {offsets = [1, 0, 0], sizes = [1, 16, 8], strides = [1, 1, 1]} : vector<4x16x8xf32> to vector<1x16x8xf32>
    %80 = vector.shape_cast %79 : vector<1x16x8xf32> to vector<16x8xf32>
    %81 = vector.extract_strided_slice %76 {offsets = [2, 0, 0], sizes = [1, 16, 8], strides = [1, 1, 1]} : vector<4x16x8xf32> to vector<1x16x8xf32>
    %82 = vector.shape_cast %81 : vector<1x16x8xf32> to vector<16x8xf32>
    %83 = vector.extract_strided_slice %76 {offsets = [3, 0, 0], sizes = [1, 16, 8], strides = [1, 1, 1]} : vector<4x16x8xf32> to vector<1x16x8xf32>
    %84 = vector.shape_cast %83 : vector<1x16x8xf32> to vector<16x8xf32>
    %85 = tpu.concatenate %78, %80, %82, %84 in 1 : vector<16x8xf32>, vector<16x8xf32>, vector<16x8xf32>, vector<16x8xf32> -> vector<16x32xf32>
    %86 = arith.truncf %85 : vector<16x32xf32> to vector<16x32xbf16>
    %cst_28 = arith.constant dense<0.000000e+00> : vector<16x32xf32>
    %87 = tpu.matmul %86, %59, %cst_28 {dimension_numbers = #tpu.dot_dimension_numbers<[1], [0], [0], [1], [0, 0, 1, 1], [], []>} : vector<16x32xbf16>, vector<32x32xbf16>, vector<16x32xf32> -> vector<16x32xf32>
    %88 = vector.broadcast %60 : vector<1x32xf32> to vector<16x32xf32>
    %89 = arith.addf %87, %88 : vector<16x32xf32>
    %90 = arith.addf %4, %89 : vector<16x32xf32>
    %91 = vector.extract_strided_slice %14 {offsets = [11, 0], sizes = [1, 32], strides = [1, 1]} : vector<16x32xf32> to vector<1x32xf32>
    %92 = vector.extract_strided_slice %14 {offsets = [12, 0], sizes = [1, 32], strides = [1, 1]} : vector<16x32xf32> to vector<1x32xf32>
    %cst_29 = arith.constant dense<0.000000e+00> : vector<16xf32>
    %93 = vector.multi_reduction <add>, %90, %cst_29 [1] : vector<16x32xf32> to vector<16xf32>
    %94 = vector.shape_cast %93 : vector<16xf32> to vector<16x1xf32>
    %cst_30 = arith.constant 3.200000e+01 : f32
    %95 = vector.broadcast %cst_30 : f32 to vector<16x1xf32>
    %96 = arith.divf %94, %95 : vector<16x1xf32>
    %97 = vector.broadcast %96 : vector<16x1xf32> to vector<16x32xf32>
    %98 = arith.subf %90, %97 : vector<16x32xf32>
    %99 = vector.broadcast %96 : vector<16x1xf32> to vector<16x32xf32>
    %100 = arith.subf %90, %99 : vector<16x32xf32>
    %101 = arith.mulf %98, %100 : vector<16x32xf32>
    %cst_31 = arith.constant dense<0.000000e+00> : vector<16xf32>
    %102 = vector.multi_reduction <add>, %101, %cst_31 [1] : vector<16x32xf32> to vector<16xf32>
    %103 = vector.shape_cast %102 : vector<16xf32> to vector<16x1xf32>
    %cst_32 = arith.constant 3.200000e+01 : f32
    %104 = vector.broadcast %cst_32 : f32 to vector<16x1xf32>
    %105 = arith.divf %103, %104 : vector<16x1xf32>
    %106 = vector.broadcast %96 : vector<16x1xf32> to vector<16x32xf32>
    %107 = arith.subf %90, %106 : vector<16x32xf32>
    %cst_33 = arith.constant 9.99999974E-6 : f32
    %108 = vector.broadcast %cst_33 : f32 to vector<16x1xf32>
    %109 = arith.addf %105, %108 : vector<16x1xf32>
    %110 = math.rsqrt %109 : vector<16x1xf32>
    %111 = vector.broadcast %110 : vector<16x1xf32> to vector<16x32xf32>
    %112 = arith.mulf %107, %111 : vector<16x32xf32>
    %113 = vector.broadcast %91 : vector<1x32xf32> to vector<16x32xf32>
    %114 = arith.mulf %112, %113 : vector<16x32xf32>
    %115 = vector.broadcast %92 : vector<1x32xf32> to vector<16x32xf32>
    %116 = arith.addf %114, %115 : vector<16x32xf32>
    %117 = arith.truncf %116 : vector<16x32xf32> to vector<16x32xbf16>
    %118 = vector.extract_strided_slice %6 {offsets = [0, 128], sizes = [32, 32], strides = [1, 1]} : vector<32x256xbf16> to vector<32x32xbf16>
    %cst_34 = arith.constant dense<0.000000e+00> : vector<16x32xf32>
    %119 = tpu.matmul %117, %118, %cst_34 {dimension_numbers = #tpu.dot_dimension_numbers<[1], [0], [0], [1], [0, 0, 1, 1], [], []>} : vector<16x32xbf16>, vector<32x32xbf16>, vector<16x32xf32> -> vector<16x32xf32>
    %120 = vector.extract_strided_slice %14 {offsets = [4, 0], sizes = [1, 32], strides = [1, 1]} : vector<16x32xf32> to vector<1x32xf32>
    %121 = vector.broadcast %120 : vector<1x32xf32> to vector<16x32xf32>
    %122 = arith.addf %119, %121 : vector<16x32xf32>
    %c0_35 = arith.constant 0 : index
    %c0_36 = arith.constant 0 : index
    %c0_37 = arith.constant 0 : index
    %123 = vector.load %arg2[%c0_35, %c0_36, %c0_37] : memref<2x8x32xf32, #tpu.memory_space<vmem>>, vector<2x8x32xf32>
    %124 = vector.shape_cast %123 : vector<2x8x32xf32> to vector<16x32xf32>
    %125 = arith.truncf %124 : vector<16x32xf32> to vector<16x32xbf16>
    %126 = vector.extract_strided_slice %14 {offsets = [5, 0], sizes = [1, 32], strides = [1, 1]} : vector<16x32xf32> to vector<1x32xf32>
    %127 = vector.extract_strided_slice %14 {offsets = [6, 0], sizes = [1, 32], strides = [1, 1]} : vector<16x32xf32> to vector<1x32xf32>
    %128 = tpu.concatenate %126, %127 in 1 : vector<1x32xf32>, vector<1x32xf32> -> vector<1x64xf32>
    %129 = vector.extract_strided_slice %6 {offsets = [0, 160], sizes = [32, 64], strides = [1, 1]} : vector<32x256xbf16> to vector<32x64xbf16>
    %cst_38 = arith.constant dense<0.000000e+00> : vector<16x64xf32>
    %130 = tpu.matmul %125, %129, %cst_38 {dimension_numbers = #tpu.dot_dimension_numbers<[1], [0], [0], [1], [0, 0, 1, 1], [], []>} : vector<16x32xbf16>, vector<32x64xbf16>, vector<16x64xf32> -> vector<16x64xf32>
    %131 = vector.broadcast %128 : vector<1x64xf32> to vector<16x64xf32>
    %132 = arith.addf %130, %131 : vector<16x64xf32>
    %133 = arith.truncf %122 : vector<16x32xf32> to vector<16x32xbf16>
    %134 = vector.shape_cast %133 : vector<16x32xbf16> to vector<16x4x8xbf16>
    %135 = tpu.transpose %134, [1, 0, 2] : vector<16x4x8xbf16> -> vector<4x16x8xbf16>
    %136 = vector.shape_cast %135 : vector<4x16x8xbf16> to vector<8x8x8xbf16>
    %137 = arith.truncf %132 : vector<16x64xf32> to vector<16x64xbf16>
    %138 = vector.shape_cast %137 : vector<16x64xbf16> to vector<16x8x8xbf16>
    %139 = tpu.transpose %138, [1, 0, 2] : vector<16x8x8xbf16> -> vector<8x16x8xbf16>
    %140 = vector.extract_strided_slice %139 {offsets = [0, 0, 0], sizes = [4, 16, 8], strides = [1, 1, 1]} : vector<8x16x8xbf16> to vector<4x16x8xbf16>
    %141 = vector.shape_cast %140 : vector<4x16x8xbf16> to vector<8x8x8xbf16>
    %142 = vector.extract_strided_slice %139 {offsets = [4, 0, 0], sizes = [4, 16, 8], strides = [1, 1, 1]} : vector<8x16x8xbf16> to vector<4x16x8xbf16>
    %143 = vector.shape_cast %142 : vector<4x16x8xbf16> to vector<8x8x8xbf16>
    %144 = vector.extract_strided_slice %6 {offsets = [0, 224], sizes = [32, 32], strides = [1, 1]} : vector<32x256xbf16> to vector<32x32xbf16>
    %145 = vector.extract_strided_slice %14 {offsets = [7, 0], sizes = [1, 32], strides = [1, 1]} : vector<16x32xf32> to vector<1x32xf32>
    "tpu.trace_start"() <{level = 10 : i32, message = "gtd,gsd->gts"}> : () -> ()
    %cst_39 = arith.constant dense<0.000000e+00> : vector<8x8x8xf32>
    %146 = tpu.matmul %136, %141, %cst_39 {dimension_numbers = #tpu.dot_dimension_numbers<[2], [2], [1], [1], [0, 0, 0, 1, 1, 1], [0], [0]>} : vector<8x8x8xbf16>, vector<8x8x8xbf16>, vector<8x8x8xf32> -> vector<8x8x8xf32>
    "tpu.trace_stop"() : () -> ()
    %cst_40 = arith.constant 0.353553385 : f32
    %147 = vector.broadcast %cst_40 : f32 to vector<8x8x8xf32>
    %148 = arith.mulf %146, %147 : vector<8x8x8xf32>
    %cst_41 = arith.constant dense<0xFF800000> : vector<8x8xf32>
    %149 = vector.multi_reduction <maximumf>, %148, %cst_41 [2] : vector<8x8x8xf32> to vector<8x8xf32>
    %150 = vector.shape_cast %149 : vector<8x8xf32> to vector<8x8x1xf32>
    %151 = vector.broadcast %150 : vector<8x8x1xf32> to vector<8x8x8xf32>
    %152 = arith.subf %148, %151 : vector<8x8x8xf32>
    %153 = math.exp %152 : vector<8x8x8xf32>
    %cst_42 = arith.constant dense<0.000000e+00> : vector<8x8xf32>
    %154 = vector.multi_reduction <add>, %153, %cst_42 [2] : vector<8x8x8xf32> to vector<8x8xf32>
    %155 = vector.shape_cast %154 : vector<8x8xf32> to vector<8x8x1xf32>
    %156 = tpu.reciprocal %155 {approx = true} : vector<8x8x1xf32> -> vector<8x8x1xf32>
    %157 = vector.broadcast %156 : vector<8x8x1xf32> to vector<8x8x8xf32>
    %158 = arith.mulf %153, %157 : vector<8x8x8xf32>
    %159 = arith.truncf %158 : vector<8x8x8xf32> to vector<8x8x8xbf16>
    "tpu.trace_start"() <{level = 10 : i32, message = "gts,gsd->gtd"}> : () -> ()
    %cst_43 = arith.constant dense<0.000000e+00> : vector<8x8x8xf32>
    %160 = tpu.matmul %159, %143, %cst_43 {dimension_numbers = #tpu.dot_dimension_numbers<[2], [1], [1], [2], [0, 0, 0, 1, 1, 2], [0], [0]>} : vector<8x8x8xbf16>, vector<8x8x8xbf16>, vector<8x8x8xf32> -> vector<8x8x8xf32>
    "tpu.trace_stop"() : () -> ()
    %161 = vector.shape_cast %160 : vector<8x8x8xf32> to vector<4x16x8xf32>
    %162 = vector.extract_strided_slice %161 {offsets = [0, 0, 0], sizes = [1, 16, 8], strides = [1, 1, 1]} : vector<4x16x8xf32> to vector<1x16x8xf32>
    %163 = vector.shape_cast %162 : vector<1x16x8xf32> to vector<16x8xf32>
    %164 = vector.extract_strided_slice %161 {offsets = [1, 0, 0], sizes = [1, 16, 8], strides = [1, 1, 1]} : vector<4x16x8xf32> to vector<1x16x8xf32>
    %165 = vector.shape_cast %164 : vector<1x16x8xf32> to vector<16x8xf32>
    %166 = vector.extract_strided_slice %161 {offsets = [2, 0, 0], sizes = [1, 16, 8], strides = [1, 1, 1]} : vector<4x16x8xf32> to vector<1x16x8xf32>
    %167 = vector.shape_cast %166 : vector<1x16x8xf32> to vector<16x8xf32>
    %168 = vector.extract_strided_slice %161 {offsets = [3, 0, 0], sizes = [1, 16, 8], strides = [1, 1, 1]} : vector<4x16x8xf32> to vector<1x16x8xf32>
    %169 = vector.shape_cast %168 : vector<1x16x8xf32> to vector<16x8xf32>
    %170 = tpu.concatenate %163, %165, %167, %169 in 1 : vector<16x8xf32>, vector<16x8xf32>, vector<16x8xf32>, vector<16x8xf32> -> vector<16x32xf32>
    %171 = arith.truncf %170 : vector<16x32xf32> to vector<16x32xbf16>
    %cst_44 = arith.constant dense<0.000000e+00> : vector<16x32xf32>
    %172 = tpu.matmul %171, %144, %cst_44 {dimension_numbers = #tpu.dot_dimension_numbers<[1], [0], [0], [1], [0, 0, 1, 1], [], []>} : vector<16x32xbf16>, vector<32x32xbf16>, vector<16x32xf32> -> vector<16x32xf32>
    %173 = vector.broadcast %145 : vector<1x32xf32> to vector<16x32xf32>
    %174 = arith.addf %172, %173 : vector<16x32xf32>
    %175 = arith.addf %90, %174 : vector<16x32xf32>
    %176 = vector.extract_strided_slice %14 {offsets = [13, 0], sizes = [1, 32], strides = [1, 1]} : vector<16x32xf32> to vector<1x32xf32>
    %177 = vector.extract_strided_slice %14 {offsets = [14, 0], sizes = [1, 32], strides = [1, 1]} : vector<16x32xf32> to vector<1x32xf32>
    %cst_45 = arith.constant dense<0.000000e+00> : vector<16xf32>
    %178 = vector.multi_reduction <add>, %175, %cst_45 [1] : vector<16x32xf32> to vector<16xf32>
    %179 = vector.shape_cast %178 : vector<16xf32> to vector<16x1xf32>
    %cst_46 = arith.constant 3.200000e+01 : f32
    %180 = vector.broadcast %cst_46 : f32 to vector<16x1xf32>
    %181 = arith.divf %179, %180 : vector<16x1xf32>
    %182 = vector.broadcast %181 : vector<16x1xf32> to vector<16x32xf32>
    %183 = arith.subf %175, %182 : vector<16x32xf32>
    %184 = vector.broadcast %181 : vector<16x1xf32> to vector<16x32xf32>
    %185 = arith.subf %175, %184 : vector<16x32xf32>
    %186 = arith.mulf %183, %185 : vector<16x32xf32>
    %cst_47 = arith.constant dense<0.000000e+00> : vector<16xf32>
    %187 = vector.multi_reduction <add>, %186, %cst_47 [1] : vector<16x32xf32> to vector<16xf32>
    %188 = vector.shape_cast %187 : vector<16xf32> to vector<16x1xf32>
    %cst_48 = arith.constant 3.200000e+01 : f32
    %189 = vector.broadcast %cst_48 : f32 to vector<16x1xf32>
    %190 = arith.divf %188, %189 : vector<16x1xf32>
    %191 = vector.broadcast %181 : vector<16x1xf32> to vector<16x32xf32>
    %192 = arith.subf %175, %191 : vector<16x32xf32>
    %cst_49 = arith.constant 9.99999974E-6 : f32
    %193 = vector.broadcast %cst_49 : f32 to vector<16x1xf32>
    %194 = arith.addf %190, %193 : vector<16x1xf32>
    %195 = math.rsqrt %194 : vector<16x1xf32>
    %196 = vector.broadcast %195 : vector<16x1xf32> to vector<16x32xf32>
    %197 = arith.mulf %192, %196 : vector<16x32xf32>
    %198 = vector.broadcast %176 : vector<1x32xf32> to vector<16x32xf32>
    %199 = arith.mulf %197, %198 : vector<16x32xf32>
    %200 = vector.broadcast %177 : vector<1x32xf32> to vector<16x32xf32>
    %201 = arith.addf %199, %200 : vector<16x32xf32>
    %202 = arith.truncf %201 : vector<16x32xf32> to vector<16x32xbf16>
    %cst_50 = arith.constant dense<0.000000e+00> : vector<16x2048xf32>
    %203 = tpu.matmul %202, %8, %cst_50 {dimension_numbers = #tpu.dot_dimension_numbers<[1], [0], [0], [1], [0, 0, 1, 1], [], []>} : vector<16x32xbf16>, vector<32x2048xbf16>, vector<16x2048xf32> -> vector<16x2048xf32>
    %204 = vector.broadcast %12 : vector<1x2048xf32> to vector<16x2048xf32>
    %205 = arith.addf %203, %204 : vector<16x2048xf32>
    %cst_51 = arith.constant 0.000000e+00 : f32
    %206 = vector.broadcast %cst_51 : f32 to vector<16x2048xf32>
    %207 = arith.maximumf %205, %206 : vector<16x2048xf32>
    %208 = arith.truncf %207 : vector<16x2048xf32> to vector<16x2048xbf16>
    %cst_52 = arith.constant dense<0.000000e+00> : vector<16x32xf32>
    %209 = tpu.matmul %208, %10, %cst_52 {dimension_numbers = #tpu.dot_dimension_numbers<[1], [1], [0], [0], [0, 0, 1, 0], [], []>} : vector<16x2048xbf16>, vector<32x2048xbf16>, vector<16x32xf32> -> vector<16x32xf32>
    %210 = vector.extract_strided_slice %14 {offsets = [8, 0], sizes = [1, 32], strides = [1, 1]} : vector<16x32xf32> to vector<1x32xf32>
    %211 = vector.broadcast %210 : vector<1x32xf32> to vector<16x32xf32>
    %212 = arith.addf %209, %211 : vector<16x32xf32>
    %213 = arith.addf %175, %212 : vector<16x32xf32>
    %214 = vector.shape_cast %213 : vector<16x32xf32> to vector<2x8x32xf32>
    %c0_53 = arith.constant 0 : index
    %c0_54 = arith.constant 0 : index
    %c0_55 = arith.constant 0 : index
    %215 = vector.load %arg8[%c0_53, %c0_54, %c0_55] : memref<2x8x32xf32, #tpu.memory_space<vmem>>, vector<2x8x32xf32>
    tpu.vector_store %arg8[%c0_53, %c0_54, %c0_55], %214 {strides = array<i32>} : memref<2x8x32xf32, #tpu.memory_space<vmem>>, vector<2x8x32xf32>,
    return
  }
  func.func @transform_0(%arg0: i32) -> (i32, i32, i32) {
    %c0_i32 = arith.constant 0 : i32
    %c0_i32_0 = arith.constant 0 : i32
    %c0_i32_1 = arith.constant 0 : i32
    %c0_i32_2 = arith.constant 0 : i32
    return %c0_i32, %c0_i32_0, %c0_i32_1 : i32, i32, i32
  }
  func.func @transform_1(%arg0: i32) -> (i32, i32, i32) {
    %c0_i32 = arith.constant 0 : i32
    %c0_i32_0 = arith.constant 0 : i32
    %c0_i32_1 = arith.constant 0 : i32
    %c0_i32_2 = arith.constant 0 : i32
    return %c0_i32, %c0_i32_0, %c0_i32_1 : i32, i32, i32
  }
  func.func @transform_2(%arg0: i32) -> (i32, i32, i32) {
    %c0_i32 = arith.constant 0 : i32
    %c0_i32_0 = arith.constant 0 : i32
    %c0_i32_1 = arith.constant 0 : i32
    return %arg0, %c0_i32, %c0_i32_0 : i32, i32, i32
  }
  func.func @transform_3(%arg0: i32) -> (i32, i32, i32) {
    %c0_i32 = arith.constant 0 : i32
    %c0_i32_0 = arith.constant 0 : i32
    %c0_i32_1 = arith.constant 0 : i32
    return %arg0, %c0_i32, %c0_i32_0 : i32, i32, i32
  }
  func.func @transform_4(%arg0: i32) -> (i32, i32, i32) {
    %c0_i32 = arith.constant 0 : i32
    %c0_i32_0 = arith.constant 0 : i32
    %c0_i32_1 = arith.constant 0 : i32
    return %arg0, %c0_i32, %c0_i32_0 : i32, i32, i32
  }
  func.func @transform_5(%arg0: i32) -> (i32, i32, i32) {
    %c0_i32 = arith.constant 0 : i32
    %c0_i32_0 = arith.constant 0 : i32
    %c0_i32_1 = arith.constant 0 : i32
    return %arg0, %c0_i32, %c0_i32_0 : i32, i32, i32
  }
  func.func @transform_6(%arg0: i32) -> (i32, i32, i32) {
    %c0_i32 = arith.constant 0 : i32
    %c0_i32_0 = arith.constant 0 : i32
    %c0_i32_1 = arith.constant 0 : i32
    return %arg0, %c0_i32, %c0_i32_0 : i32, i32, i32
  }
  func.func @transform_7(%arg0: i32) -> (i32, i32, i32) {
    %c0_i32 = arith.constant 0 : i32
    %c0_i32_0 = arith.constant 0 : i32
    %c0_i32_1 = arith.constant 0 : i32
    %c0_i32_2 = arith.constant 0 : i32
    return %c0_i32, %c0_i32_0, %c0_i32_1 : i32, i32, i32
  }
}

module attributes {stable_mosaic.version = 11 : i64} {
  func.func @decoder_stack_kernel(%arg0: i32, %arg1: memref<2x8x32xf32, #tpu.memory_space<vmem>>, %arg2: memref<2x8x32xf32, #tpu.memory_space<vmem>>, %arg3: memref<1x32x256xbf16, #tpu.memory_space<vmem>>, %arg4: memref<1x32x2048xbf16, #tpu.memory_space<vmem>>, %arg5: memref<1x32x2048xbf16, #tpu.memory_space<vmem>>, %arg6: memref<1x1x2048xf32, #tpu.memory_space<vmem>>, %arg7: memref<1x16x32xf32, #tpu.memory_space<vmem>>, %arg8: memref<2x8x32xf32, #tpu.memory_space<vmem>>) attributes {dimension_semantics = [#tpu.dimension_semantics<arbitrary>], iteration_bounds = array<i64: 2>, scalar_prefetch = 0 : i64, scratch_operands = 0 : i64, tpu.core_type = #tpu.core_type<tc>, window_params = [{pipeline_mode = #tpu.pipeline_mode<synchronous>, transform_indices = @transform_0, window_bounds = array<i64: 2, 8, 32>}, {pipeline_mode = #tpu.pipeline_mode<synchronous>, transform_indices = @transform_1, window_bounds = array<i64: 2, 8, 32>}, {transform_indices = @transform_2, window_bounds = array<i64: 1, 32, 256>}, {transform_indices = @transform_3, window_bounds = array<i64: 1, 32, 2048>}, {transform_indices = @transform_4, window_bounds = array<i64: 1, 32, 2048>}, {transform_indices = @transform_5, window_bounds = array<i64: 1, 1, 2048>}, {transform_indices = @transform_6, window_bounds = array<i64: 1, 16, 32>}, {pipeline_mode = #tpu.pipeline_mode<synchronous>, transform_indices = @transform_7, window_bounds = array<i64: 2, 8, 32>}]} {
    %c0_i32 = arith.constant 0 : i32
    %0 = arith.cmpi eq, %arg0, %c0_i32 : i32
    %1 = arith.extui %0 : i1 to i32
    %c0_i32_0 = arith.constant 0 : i32
    %2 = arith.cmpi ne, %1, %c0_i32_0 : i32
    scf.if %2 {
      %c0_56 = arith.constant 0 : index
      %c0_57 = arith.constant 0 : index
      %c0_58 = arith.constant 0 : index
      %261 = vector.load %arg1[%c0_56, %c0_57, %c0_58] : memref<2x8x32xf32, #tpu.memory_space<vmem>>, vector<2x8x32xf32>
      %c0_59 = arith.constant 0 : index
      %c0_60 = arith.constant 0 : index
      %c0_61 = arith.constant 0 : index
      %262 = vector.load %arg8[%c0_59, %c0_60, %c0_61] : memref<2x8x32xf32, #tpu.memory_space<vmem>>, vector<2x8x32xf32>
      tpu.vector_store %arg8[%c0_59, %c0_60, %c0_61], %261 {strides = array<i32>} : memref<2x8x32xf32, #tpu.memory_space<vmem>>, vector<2x8x32xf32>,
    } else {
    }
    %c0 = arith.constant 0 : index
    %c0_1 = arith.constant 0 : index
    %c0_2 = arith.constant 0 : index
    %3 = vector.load %arg8[%c0, %c0_1, %c0_2] : memref<2x8x32xf32, #tpu.memory_space<vmem>>, vector<2x8x32xf32>
    %4 = vector.shape_cast %3 : vector<2x8x32xf32> to vector<16x32xf32>
    %c0_3 = arith.constant 0 : index
    %c0_4 = arith.constant 0 : index
    %c0_5 = arith.constant 0 : index
    %5 = vector.load %arg3[%c0_3, %c0_4, %c0_5] : memref<1x32x256xbf16, #tpu.memory_space<vmem>>, vector<1x32x256xbf16>
    %6 = vector.shape_cast %5 : vector<1x32x256xbf16> to vector<32x256xbf16>
    %c0_6 = arith.constant 0 : index
    %c0_7 = arith.constant 0 : index
    %c0_8 = arith.constant 0 : index
    %7 = vector.load %arg4[%c0_6, %c0_7, %c0_8] : memref<1x32x2048xbf16, #tpu.memory_space<vmem>>, vector<1x32x2048xbf16>
    %8 = vector.shape_cast %7 : vector<1x32x2048xbf16> to vector<32x2048xbf16>
    %c0_9 = arith.constant 0 : index
    %c0_10 = arith.constant 0 : index
    %c0_11 = arith.constant 0 : index
    %9 = vector.load %arg5[%c0_9, %c0_10, %c0_11] : memref<1x32x2048xbf16, #tpu.memory_space<vmem>>, vector<1x32x2048xbf16>
    %10 = vector.shape_cast %9 : vector<1x32x2048xbf16> to vector<32x2048xbf16>
    %c0_12 = arith.constant 0 : index
    %c0_13 = arith.constant 0 : index
    %c0_14 = arith.constant 0 : index
    %11 = vector.load %arg6[%c0_12, %c0_13, %c0_14] : memref<1x1x2048xf32, #tpu.memory_space<vmem>>, vector<1x1x2048xf32>
    %12 = vector.shape_cast %11 : vector<1x1x2048xf32> to vector<1x2048xf32>
    %c0_15 = arith.constant 0 : index
    %c0_16 = arith.constant 0 : index
    %c0_17 = arith.constant 0 : index
    %13 = vector.load %arg7[%c0_15, %c0_16, %c0_17] : memref<1x16x32xf32, #tpu.memory_space<vmem>>, vector<1x16x32xf32>
    %14 = vector.shape_cast %13 : vector<1x16x32xf32> to vector<16x32xf32>
    %15 = vector.extract_strided_slice %14 {offsets = [9, 0], sizes = [1, 32], strides = [1, 1]} : vector<16x32xf32> to vector<1x32xf32>
    %16 = vector.extract_strided_slice %14 {offsets = [10, 0], sizes = [1, 32], strides = [1, 1]} : vector<16x32xf32> to vector<1x32xf32>
    %cst = arith.constant dense<0.000000e+00> : vector<16xf32>
    %17 = vector.multi_reduction <add>, %4, %cst [1] : vector<16x32xf32> to vector<16xf32>
    %18 = vector.shape_cast %17 : vector<16xf32> to vector<16x1xf32>
    %cst_18 = arith.constant 3.200000e+01 : f32
    %19 = vector.broadcast %cst_18 : f32 to vector<16x1xf32>
    %20 = arith.divf %18, %19 : vector<16x1xf32>
    %21 = vector.broadcast %20 : vector<16x1xf32> to vector<16x32xf32>
    %22 = arith.subf %4, %21 : vector<16x32xf32>
    %23 = vector.broadcast %20 : vector<16x1xf32> to vector<16x32xf32>
    %24 = arith.subf %4, %23 : vector<16x32xf32>
    %25 = arith.mulf %22, %24 : vector<16x32xf32>
    %cst_19 = arith.constant dense<0.000000e+00> : vector<16xf32>
    %26 = vector.multi_reduction <add>, %25, %cst_19 [1] : vector<16x32xf32> to vector<16xf32>
    %27 = vector.shape_cast %26 : vector<16xf32> to vector<16x1xf32>
    %cst_20 = arith.constant 3.200000e+01 : f32
    %28 = vector.broadcast %cst_20 : f32 to vector<16x1xf32>
    %29 = arith.divf %27, %28 : vector<16x1xf32>
    %30 = vector.broadcast %20 : vector<16x1xf32> to vector<16x32xf32>
    %31 = arith.subf %4, %30 : vector<16x32xf32>
    %cst_21 = arith.constant 9.99999974E-6 : f32
    %32 = vector.broadcast %cst_21 : f32 to vector<16x1xf32>
    %33 = arith.addf %29, %32 : vector<16x1xf32>
    %34 = math.rsqrt %33 : vector<16x1xf32>
    %35 = vector.broadcast %34 : vector<16x1xf32> to vector<16x32xf32>
    %36 = arith.mulf %31, %35 : vector<16x32xf32>
    %37 = vector.broadcast %15 : vector<1x32xf32> to vector<16x32xf32>
    %38 = arith.mulf %36, %37 : vector<16x32xf32>
    %39 = vector.broadcast %16 : vector<1x32xf32> to vector<16x32xf32>
    %40 = arith.addf %38, %39 : vector<16x32xf32>
    %41 = vector.extract_strided_slice %14 {offsets = [0, 0], sizes = [1, 32], strides = [1, 1]} : vector<16x32xf32> to vector<1x32xf32>
    %42 = vector.extract_strided_slice %14 {offsets = [1, 0], sizes = [1, 32], strides = [1, 1]} : vector<16x32xf32> to vector<1x32xf32>
    %43 = vector.extract_strided_slice %14 {offsets = [2, 0], sizes = [1, 32], strides = [1, 1]} : vector<16x32xf32> to vector<1x32xf32>
    %44 = tpu.concatenate %41, %42, %43 in 1 : vector<1x32xf32>, vector<1x32xf32>, vector<1x32xf32> -> vector<1x96xf32>
    %45 = arith.truncf %40 : vector<16x32xf32> to vector<16x32xbf16>
    %46 = vector.extract_strided_slice %6 {offsets = [0, 0], sizes = [32, 96], strides = [1, 1]} : vector<32x256xbf16> to vector<32x96xbf16>
    %cst_22 = arith.constant dense<0.000000e+00> : vector<16x96xf32>
    %47 = tpu.matmul %45, %46, %cst_22 {dimension_numbers = #tpu.dot_dimension_numbers<[1], [0], [0], [1], [0, 0, 1, 1], [], []>} : vector<16x32xbf16>, vector<32x96xbf16>, vector<16x96xf32> -> vector<16x96xf32>
    %48 = vector.broadcast %44 : vector<1x96xf32> to vector<16x96xf32>
    %49 = arith.addf %47, %48 : vector<16x96xf32>
    %50 = arith.truncf %49 : vector<16x96xf32> to vector<16x96xbf16>
    %51 = vector.extract_strided_slice %50 {offsets = [0, 0], sizes = [16, 8], strides = [1, 1]} : vector<16x96xbf16> to vector<16x8xbf16>
    %52 = vector.extract_strided_slice %50 {offsets = [0, 8], sizes = [16, 8], strides = [1, 1]} : vector<16x96xbf16> to vector<16x8xbf16>
    %53 = vector.extract_strided_slice %50 {offsets = [0, 16], sizes = [16, 8], strides = [1, 1]} : vector<16x96xbf16> to vector<16x8xbf16>
    %54 = vector.extract_strided_slice %50 {offsets = [0, 24], sizes = [16, 8], strides = [1, 1]} : vector<16x96xbf16> to vector<16x8xbf16>
    %55 = vector.extract_strided_slice %50 {offsets = [0, 32], sizes = [16, 8], strides = [1, 1]} : vector<16x96xbf16> to vector<16x8xbf16>
    %56 = vector.extract_strided_slice %50 {offsets = [0, 40], sizes = [16, 8], strides = [1, 1]} : vector<16x96xbf16> to vector<16x8xbf16>
    %57 = vector.extract_strided_slice %50 {offsets = [0, 48], sizes = [16, 8], strides = [1, 1]} : vector<16x96xbf16> to vector<16x8xbf16>
    %58 = vector.extract_strided_slice %50 {offsets = [0, 56], sizes = [16, 8], strides = [1, 1]} : vector<16x96xbf16> to vector<16x8xbf16>
    %59 = vector.extract_strided_slice %50 {offsets = [0, 64], sizes = [16, 8], strides = [1, 1]} : vector<16x96xbf16> to vector<16x8xbf16>
    %60 = vector.extract_strided_slice %50 {offsets = [0, 72], sizes = [16, 8], strides = [1, 1]} : vector<16x96xbf16> to vector<16x8xbf16>
    %61 = vector.extract_strided_slice %50 {offsets = [0, 80], sizes = [16, 8], strides = [1, 1]} : vector<16x96xbf16> to vector<16x8xbf16>
    %62 = vector.extract_strided_slice %50 {offsets = [0, 88], sizes = [16, 8], strides = [1, 1]} : vector<16x96xbf16> to vector<16x8xbf16>
    %63 = vector.shape_cast %51 : vector<16x8xbf16> to vector<1x16x8xbf16>
    %64 = vector.shape_cast %52 : vector<16x8xbf16> to vector<1x16x8xbf16>
    %65 = vector.shape_cast %53 : vector<16x8xbf16> to vector<1x16x8xbf16>
    %66 = vector.shape_cast %54 : vector<16x8xbf16> to vector<1x16x8xbf16>
    %67 = vector.shape_cast %55 : vector<16x8xbf16> to vector<1x16x8xbf16>
    %68 = vector.shape_cast %56 : vector<16x8xbf16> to vector<1x16x8xbf16>
    %69 = vector.shape_cast %57 : vector<16x8xbf16> to vector<1x16x8xbf16>
    %70 = vector.shape_cast %58 : vector<16x8xbf16> to vector<1x16x8xbf16>
    %71 = vector.shape_cast %59 : vector<16x8xbf16> to vector<1x16x8xbf16>
    %72 = vector.shape_cast %60 : vector<16x8xbf16> to vector<1x16x8xbf16>
    %73 = vector.shape_cast %61 : vector<16x8xbf16> to vector<1x16x8xbf16>
    %74 = vector.shape_cast %62 : vector<16x8xbf16> to vector<1x16x8xbf16>
    %75 = tpu.concatenate %63, %64, %65, %66, %67, %68, %69, %70, %71, %72, %73, %74 in 0 : vector<1x16x8xbf16>, vector<1x16x8xbf16>, vector<1x16x8xbf16>, vector<1x16x8xbf16>, vector<1x16x8xbf16>, vector<1x16x8xbf16>, vector<1x16x8xbf16>, vector<1x16x8xbf16>, vector<1x16x8xbf16>, vector<1x16x8xbf16>, vector<1x16x8xbf16>, vector<1x16x8xbf16> -> vector<12x16x8xbf16>
    %76 = vector.extract_strided_slice %75 {offsets = [0, 0, 0], sizes = [4, 16, 8], strides = [1, 1, 1]} : vector<12x16x8xbf16> to vector<4x16x8xbf16>
    %77 = vector.shape_cast %76 : vector<4x16x8xbf16> to vector<8x8x8xbf16>
    %78 = vector.extract_strided_slice %75 {offsets = [4, 0, 0], sizes = [4, 16, 8], strides = [1, 1, 1]} : vector<12x16x8xbf16> to vector<4x16x8xbf16>
    %79 = vector.shape_cast %78 : vector<4x16x8xbf16> to vector<8x8x8xbf16>
    %80 = vector.extract_strided_slice %75 {offsets = [8, 0, 0], sizes = [4, 16, 8], strides = [1, 1, 1]} : vector<12x16x8xbf16> to vector<4x16x8xbf16>
    %81 = vector.shape_cast %80 : vector<4x16x8xbf16> to vector<8x8x8xbf16>
    %82 = vector.extract_strided_slice %6 {offsets = [0, 96], sizes = [32, 32], strides = [1, 1]} : vector<32x256xbf16> to vector<32x32xbf16>
    %83 = vector.extract_strided_slice %14 {offsets = [3, 0], sizes = [1, 32], strides = [1, 1]} : vector<16x32xf32> to vector<1x32xf32>
    "tpu.trace_start"() <{level = 10 : i32, message = "gtd,gsd->gts"}> : () -> ()
    %cst_23 = arith.constant dense<0.000000e+00> : vector<8x8x8xf32>
    %84 = tpu.matmul %77, %79, %cst_23 {dimension_numbers = #tpu.dot_dimension_numbers<[2], [2], [1], [1], [0, 0, 0, 1, 1, 1], [0], [0]>} : vector<8x8x8xbf16>, vector<8x8x8xbf16>, vector<8x8x8xf32> -> vector<8x8x8xf32>
    "tpu.trace_stop"() : () -> ()
    %cst_24 = arith.constant 0.353553385 : f32
    %85 = vector.broadcast %cst_24 : f32 to vector<8x8x8xf32>
    %86 = arith.mulf %84, %85 : vector<8x8x8xf32>
    %cst_25 = arith.constant dense<0xFF800000> : vector<8x8xf32>
    %87 = vector.multi_reduction <maximumf>, %86, %cst_25 [2] : vector<8x8x8xf32> to vector<8x8xf32>
    %88 = vector.shape_cast %87 : vector<8x8xf32> to vector<8x8x1xf32>
    %89 = vector.broadcast %88 : vector<8x8x1xf32> to vector<8x8x8xf32>
    %90 = arith.subf %86, %89 : vector<8x8x8xf32>
    %91 = math.exp %90 : vector<8x8x8xf32>
    %cst_26 = arith.constant dense<0.000000e+00> : vector<8x8xf32>
    %92 = vector.multi_reduction <add>, %91, %cst_26 [2] : vector<8x8x8xf32> to vector<8x8xf32>
    %93 = vector.shape_cast %92 : vector<8x8xf32> to vector<8x8x1xf32>
    %94 = tpu.reciprocal %93 {approx = true} : vector<8x8x1xf32> -> vector<8x8x1xf32>
    %95 = vector.broadcast %94 : vector<8x8x1xf32> to vector<8x8x8xf32>
    %96 = arith.mulf %91, %95 : vector<8x8x8xf32>
    %97 = arith.truncf %96 : vector<8x8x8xf32> to vector<8x8x8xbf16>
    "tpu.trace_start"() <{level = 10 : i32, message = "gts,gsd->gtd"}> : () -> ()
    %cst_27 = arith.constant dense<0.000000e+00> : vector<8x8x8xf32>
    %98 = tpu.matmul %97, %81, %cst_27 {dimension_numbers = #tpu.dot_dimension_numbers<[2], [1], [1], [2], [0, 0, 0, 1, 1, 2], [0], [0]>} : vector<8x8x8xbf16>, vector<8x8x8xbf16>, vector<8x8x8xf32> -> vector<8x8x8xf32>
    "tpu.trace_stop"() : () -> ()
    %99 = vector.shape_cast %98 : vector<8x8x8xf32> to vector<4x16x8xf32>
    %100 = vector.extract_strided_slice %99 {offsets = [0, 0, 0], sizes = [1, 16, 8], strides = [1, 1, 1]} : vector<4x16x8xf32> to vector<1x16x8xf32>
    %101 = vector.shape_cast %100 : vector<1x16x8xf32> to vector<16x8xf32>
    %102 = vector.extract_strided_slice %99 {offsets = [1, 0, 0], sizes = [1, 16, 8], strides = [1, 1, 1]} : vector<4x16x8xf32> to vector<1x16x8xf32>
    %103 = vector.shape_cast %102 : vector<1x16x8xf32> to vector<16x8xf32>
    %104 = vector.extract_strided_slice %99 {offsets = [2, 0, 0], sizes = [1, 16, 8], strides = [1, 1, 1]} : vector<4x16x8xf32> to vector<1x16x8xf32>
    %105 = vector.shape_cast %104 : vector<1x16x8xf32> to vector<16x8xf32>
    %106 = vector.extract_strided_slice %99 {offsets = [3, 0, 0], sizes = [1, 16, 8], strides = [1, 1, 1]} : vector<4x16x8xf32> to vector<1x16x8xf32>
    %107 = vector.shape_cast %106 : vector<1x16x8xf32> to vector<16x8xf32>
    %108 = tpu.concatenate %101, %103, %105, %107 in 1 : vector<16x8xf32>, vector<16x8xf32>, vector<16x8xf32>, vector<16x8xf32> -> vector<16x32xf32>
    %109 = arith.truncf %108 : vector<16x32xf32> to vector<16x32xbf16>
    %cst_28 = arith.constant dense<0.000000e+00> : vector<16x32xf32>
    %110 = tpu.matmul %109, %82, %cst_28 {dimension_numbers = #tpu.dot_dimension_numbers<[1], [0], [0], [1], [0, 0, 1, 1], [], []>} : vector<16x32xbf16>, vector<32x32xbf16>, vector<16x32xf32> -> vector<16x32xf32>
    %111 = vector.broadcast %83 : vector<1x32xf32> to vector<16x32xf32>
    %112 = arith.addf %110, %111 : vector<16x32xf32>
    %113 = arith.addf %4, %112 : vector<16x32xf32>
    %114 = vector.extract_strided_slice %14 {offsets = [11, 0], sizes = [1, 32], strides = [1, 1]} : vector<16x32xf32> to vector<1x32xf32>
    %115 = vector.extract_strided_slice %14 {offsets = [12, 0], sizes = [1, 32], strides = [1, 1]} : vector<16x32xf32> to vector<1x32xf32>
    %cst_29 = arith.constant dense<0.000000e+00> : vector<16xf32>
    %116 = vector.multi_reduction <add>, %113, %cst_29 [1] : vector<16x32xf32> to vector<16xf32>
    %117 = vector.shape_cast %116 : vector<16xf32> to vector<16x1xf32>
    %cst_30 = arith.constant 3.200000e+01 : f32
    %118 = vector.broadcast %cst_30 : f32 to vector<16x1xf32>
    %119 = arith.divf %117, %118 : vector<16x1xf32>
    %120 = vector.broadcast %119 : vector<16x1xf32> to vector<16x32xf32>
    %121 = arith.subf %113, %120 : vector<16x32xf32>
    %122 = vector.broadcast %119 : vector<16x1xf32> to vector<16x32xf32>
    %123 = arith.subf %113, %122 : vector<16x32xf32>
    %124 = arith.mulf %121, %123 : vector<16x32xf32>
    %cst_31 = arith.constant dense<0.000000e+00> : vector<16xf32>
    %125 = vector.multi_reduction <add>, %124, %cst_31 [1] : vector<16x32xf32> to vector<16xf32>
    %126 = vector.shape_cast %125 : vector<16xf32> to vector<16x1xf32>
    %cst_32 = arith.constant 3.200000e+01 : f32
    %127 = vector.broadcast %cst_32 : f32 to vector<16x1xf32>
    %128 = arith.divf %126, %127 : vector<16x1xf32>
    %129 = vector.broadcast %119 : vector<16x1xf32> to vector<16x32xf32>
    %130 = arith.subf %113, %129 : vector<16x32xf32>
    %cst_33 = arith.constant 9.99999974E-6 : f32
    %131 = vector.broadcast %cst_33 : f32 to vector<16x1xf32>
    %132 = arith.addf %128, %131 : vector<16x1xf32>
    %133 = math.rsqrt %132 : vector<16x1xf32>
    %134 = vector.broadcast %133 : vector<16x1xf32> to vector<16x32xf32>
    %135 = arith.mulf %130, %134 : vector<16x32xf32>
    %136 = vector.broadcast %114 : vector<1x32xf32> to vector<16x32xf32>
    %137 = arith.mulf %135, %136 : vector<16x32xf32>
    %138 = vector.broadcast %115 : vector<1x32xf32> to vector<16x32xf32>
    %139 = arith.addf %137, %138 : vector<16x32xf32>
    %140 = arith.truncf %139 : vector<16x32xf32> to vector<16x32xbf16>
    %141 = vector.extract_strided_slice %6 {offsets = [0, 128], sizes = [32, 32], strides = [1, 1]} : vector<32x256xbf16> to vector<32x32xbf16>
    %cst_34 = arith.constant dense<0.000000e+00> : vector<16x32xf32>
    %142 = tpu.matmul %140, %141, %cst_34 {dimension_numbers = #tpu.dot_dimension_numbers<[1], [0], [0], [1], [0, 0, 1, 1], [], []>} : vector<16x32xbf16>, vector<32x32xbf16>, vector<16x32xf32> -> vector<16x32xf32>
    %143 = vector.extract_strided_slice %14 {offsets = [4, 0], sizes = [1, 32], strides = [1, 1]} : vector<16x32xf32> to vector<1x32xf32>
    %144 = vector.broadcast %143 : vector<1x32xf32> to vector<16x32xf32>
    %145 = arith.addf %142, %144 : vector<16x32xf32>
    %c0_35 = arith.constant 0 : index
    %c0_36 = arith.constant 0 : index
    %c0_37 = arith.constant 0 : index
    %146 = vector.load %arg2[%c0_35, %c0_36, %c0_37] : memref<2x8x32xf32, #tpu.memory_space<vmem>>, vector<2x8x32xf32>
    %147 = vector.shape_cast %146 : vector<2x8x32xf32> to vector<16x32xf32>
    %148 = arith.truncf %147 : vector<16x32xf32> to vector<16x32xbf16>
    %149 = vector.extract_strided_slice %14 {offsets = [5, 0], sizes = [1, 32], strides = [1, 1]} : vector<16x32xf32> to vector<1x32xf32>
    %150 = vector.extract_strided_slice %14 {offsets = [6, 0], sizes = [1, 32], strides = [1, 1]} : vector<16x32xf32> to vector<1x32xf32>
    %151 = tpu.concatenate %149, %150 in 1 : vector<1x32xf32>, vector<1x32xf32> -> vector<1x64xf32>
    %152 = vector.extract_strided_slice %6 {offsets = [0, 160], sizes = [32, 64], strides = [1, 1]} : vector<32x256xbf16> to vector<32x64xbf16>
    %cst_38 = arith.constant dense<0.000000e+00> : vector<16x64xf32>
    %153 = tpu.matmul %148, %152, %cst_38 {dimension_numbers = #tpu.dot_dimension_numbers<[1], [0], [0], [1], [0, 0, 1, 1], [], []>} : vector<16x32xbf16>, vector<32x64xbf16>, vector<16x64xf32> -> vector<16x64xf32>
    %154 = vector.broadcast %151 : vector<1x64xf32> to vector<16x64xf32>
    %155 = arith.addf %153, %154 : vector<16x64xf32>
    %156 = arith.truncf %145 : vector<16x32xf32> to vector<16x32xbf16>
    %157 = vector.extract_strided_slice %156 {offsets = [0, 0], sizes = [16, 8], strides = [1, 1]} : vector<16x32xbf16> to vector<16x8xbf16>
    %158 = vector.extract_strided_slice %156 {offsets = [0, 8], sizes = [16, 8], strides = [1, 1]} : vector<16x32xbf16> to vector<16x8xbf16>
    %159 = vector.extract_strided_slice %156 {offsets = [0, 16], sizes = [16, 8], strides = [1, 1]} : vector<16x32xbf16> to vector<16x8xbf16>
    %160 = vector.extract_strided_slice %156 {offsets = [0, 24], sizes = [16, 8], strides = [1, 1]} : vector<16x32xbf16> to vector<16x8xbf16>
    %161 = vector.shape_cast %157 : vector<16x8xbf16> to vector<1x16x8xbf16>
    %162 = vector.shape_cast %158 : vector<16x8xbf16> to vector<1x16x8xbf16>
    %163 = vector.shape_cast %159 : vector<16x8xbf16> to vector<1x16x8xbf16>
    %164 = vector.shape_cast %160 : vector<16x8xbf16> to vector<1x16x8xbf16>
    %165 = tpu.concatenate %161, %162, %163, %164 in 0 : vector<1x16x8xbf16>, vector<1x16x8xbf16>, vector<1x16x8xbf16>, vector<1x16x8xbf16> -> vector<4x16x8xbf16>
    %166 = vector.shape_cast %165 : vector<4x16x8xbf16> to vector<8x8x8xbf16>
    %167 = arith.truncf %155 : vector<16x64xf32> to vector<16x64xbf16>
    %168 = vector.extract_strided_slice %167 {offsets = [0, 0], sizes = [16, 8], strides = [1, 1]} : vector<16x64xbf16> to vector<16x8xbf16>
    %169 = vector.extract_strided_slice %167 {offsets = [0, 8], sizes = [16, 8], strides = [1, 1]} : vector<16x64xbf16> to vector<16x8xbf16>
    %170 = vector.extract_strided_slice %167 {offsets = [0, 16], sizes = [16, 8], strides = [1, 1]} : vector<16x64xbf16> to vector<16x8xbf16>
    %171 = vector.extract_strided_slice %167 {offsets = [0, 24], sizes = [16, 8], strides = [1, 1]} : vector<16x64xbf16> to vector<16x8xbf16>
    %172 = vector.extract_strided_slice %167 {offsets = [0, 32], sizes = [16, 8], strides = [1, 1]} : vector<16x64xbf16> to vector<16x8xbf16>
    %173 = vector.extract_strided_slice %167 {offsets = [0, 40], sizes = [16, 8], strides = [1, 1]} : vector<16x64xbf16> to vector<16x8xbf16>
    %174 = vector.extract_strided_slice %167 {offsets = [0, 48], sizes = [16, 8], strides = [1, 1]} : vector<16x64xbf16> to vector<16x8xbf16>
    %175 = vector.extract_strided_slice %167 {offsets = [0, 56], sizes = [16, 8], strides = [1, 1]} : vector<16x64xbf16> to vector<16x8xbf16>
    %176 = vector.shape_cast %168 : vector<16x8xbf16> to vector<1x16x8xbf16>
    %177 = vector.shape_cast %169 : vector<16x8xbf16> to vector<1x16x8xbf16>
    %178 = vector.shape_cast %170 : vector<16x8xbf16> to vector<1x16x8xbf16>
    %179 = vector.shape_cast %171 : vector<16x8xbf16> to vector<1x16x8xbf16>
    %180 = vector.shape_cast %172 : vector<16x8xbf16> to vector<1x16x8xbf16>
    %181 = vector.shape_cast %173 : vector<16x8xbf16> to vector<1x16x8xbf16>
    %182 = vector.shape_cast %174 : vector<16x8xbf16> to vector<1x16x8xbf16>
    %183 = vector.shape_cast %175 : vector<16x8xbf16> to vector<1x16x8xbf16>
    %184 = tpu.concatenate %176, %177, %178, %179, %180, %181, %182, %183 in 0 : vector<1x16x8xbf16>, vector<1x16x8xbf16>, vector<1x16x8xbf16>, vector<1x16x8xbf16>, vector<1x16x8xbf16>, vector<1x16x8xbf16>, vector<1x16x8xbf16>, vector<1x16x8xbf16> -> vector<8x16x8xbf16>
    %185 = vector.extract_strided_slice %184 {offsets = [0, 0, 0], sizes = [4, 16, 8], strides = [1, 1, 1]} : vector<8x16x8xbf16> to vector<4x16x8xbf16>
    %186 = vector.shape_cast %185 : vector<4x16x8xbf16> to vector<8x8x8xbf16>
    %187 = vector.extract_strided_slice %184 {offsets = [4, 0, 0], sizes = [4, 16, 8], strides = [1, 1, 1]} : vector<8x16x8xbf16> to vector<4x16x8xbf16>
    %188 = vector.shape_cast %187 : vector<4x16x8xbf16> to vector<8x8x8xbf16>
    %189 = vector.extract_strided_slice %6 {offsets = [0, 224], sizes = [32, 32], strides = [1, 1]} : vector<32x256xbf16> to vector<32x32xbf16>
    %190 = vector.extract_strided_slice %14 {offsets = [7, 0], sizes = [1, 32], strides = [1, 1]} : vector<16x32xf32> to vector<1x32xf32>
    "tpu.trace_start"() <{level = 10 : i32, message = "gtd,gsd->gts"}> : () -> ()
    %cst_39 = arith.constant dense<0.000000e+00> : vector<8x8x8xf32>
    %191 = tpu.matmul %166, %186, %cst_39 {dimension_numbers = #tpu.dot_dimension_numbers<[2], [2], [1], [1], [0, 0, 0, 1, 1, 1], [0], [0]>} : vector<8x8x8xbf16>, vector<8x8x8xbf16>, vector<8x8x8xf32> -> vector<8x8x8xf32>
    "tpu.trace_stop"() : () -> ()
    %cst_40 = arith.constant 0.353553385 : f32
    %192 = vector.broadcast %cst_40 : f32 to vector<8x8x8xf32>
    %193 = arith.mulf %191, %192 : vector<8x8x8xf32>
    %cst_41 = arith.constant dense<0xFF800000> : vector<8x8xf32>
    %194 = vector.multi_reduction <maximumf>, %193, %cst_41 [2] : vector<8x8x8xf32> to vector<8x8xf32>
    %195 = vector.shape_cast %194 : vector<8x8xf32> to vector<8x8x1xf32>
    %196 = vector.broadcast %195 : vector<8x8x1xf32> to vector<8x8x8xf32>
    %197 = arith.subf %193, %196 : vector<8x8x8xf32>
    %198 = math.exp %197 : vector<8x8x8xf32>
    %cst_42 = arith.constant dense<0.000000e+00> : vector<8x8xf32>
    %199 = vector.multi_reduction <add>, %198, %cst_42 [2] : vector<8x8x8xf32> to vector<8x8xf32>
    %200 = vector.shape_cast %199 : vector<8x8xf32> to vector<8x8x1xf32>
    %201 = tpu.reciprocal %200 {approx = true} : vector<8x8x1xf32> -> vector<8x8x1xf32>
    %202 = vector.broadcast %201 : vector<8x8x1xf32> to vector<8x8x8xf32>
    %203 = arith.mulf %198, %202 : vector<8x8x8xf32>
    %204 = arith.truncf %203 : vector<8x8x8xf32> to vector<8x8x8xbf16>
    "tpu.trace_start"() <{level = 10 : i32, message = "gts,gsd->gtd"}> : () -> ()
    %cst_43 = arith.constant dense<0.000000e+00> : vector<8x8x8xf32>
    %205 = tpu.matmul %204, %188, %cst_43 {dimension_numbers = #tpu.dot_dimension_numbers<[2], [1], [1], [2], [0, 0, 0, 1, 1, 2], [0], [0]>} : vector<8x8x8xbf16>, vector<8x8x8xbf16>, vector<8x8x8xf32> -> vector<8x8x8xf32>
    "tpu.trace_stop"() : () -> ()
    %206 = vector.shape_cast %205 : vector<8x8x8xf32> to vector<4x16x8xf32>
    %207 = vector.extract_strided_slice %206 {offsets = [0, 0, 0], sizes = [1, 16, 8], strides = [1, 1, 1]} : vector<4x16x8xf32> to vector<1x16x8xf32>
    %208 = vector.shape_cast %207 : vector<1x16x8xf32> to vector<16x8xf32>
    %209 = vector.extract_strided_slice %206 {offsets = [1, 0, 0], sizes = [1, 16, 8], strides = [1, 1, 1]} : vector<4x16x8xf32> to vector<1x16x8xf32>
    %210 = vector.shape_cast %209 : vector<1x16x8xf32> to vector<16x8xf32>
    %211 = vector.extract_strided_slice %206 {offsets = [2, 0, 0], sizes = [1, 16, 8], strides = [1, 1, 1]} : vector<4x16x8xf32> to vector<1x16x8xf32>
    %212 = vector.shape_cast %211 : vector<1x16x8xf32> to vector<16x8xf32>
    %213 = vector.extract_strided_slice %206 {offsets = [3, 0, 0], sizes = [1, 16, 8], strides = [1, 1, 1]} : vector<4x16x8xf32> to vector<1x16x8xf32>
    %214 = vector.shape_cast %213 : vector<1x16x8xf32> to vector<16x8xf32>
    %215 = tpu.concatenate %208, %210, %212, %214 in 1 : vector<16x8xf32>, vector<16x8xf32>, vector<16x8xf32>, vector<16x8xf32> -> vector<16x32xf32>
    %216 = arith.truncf %215 : vector<16x32xf32> to vector<16x32xbf16>
    %cst_44 = arith.constant dense<0.000000e+00> : vector<16x32xf32>
    %217 = tpu.matmul %216, %189, %cst_44 {dimension_numbers = #tpu.dot_dimension_numbers<[1], [0], [0], [1], [0, 0, 1, 1], [], []>} : vector<16x32xbf16>, vector<32x32xbf16>, vector<16x32xf32> -> vector<16x32xf32>
    %218 = vector.broadcast %190 : vector<1x32xf32> to vector<16x32xf32>
    %219 = arith.addf %217, %218 : vector<16x32xf32>
    %220 = arith.addf %113, %219 : vector<16x32xf32>
    %221 = vector.extract_strided_slice %14 {offsets = [13, 0], sizes = [1, 32], strides = [1, 1]} : vector<16x32xf32> to vector<1x32xf32>
    %222 = vector.extract_strided_slice %14 {offsets = [14, 0], sizes = [1, 32], strides = [1, 1]} : vector<16x32xf32> to vector<1x32xf32>
    %cst_45 = arith.constant dense<0.000000e+00> : vector<16xf32>
    %223 = vector.multi_reduction <add>, %220, %cst_45 [1] : vector<16x32xf32> to vector<16xf32>
    %224 = vector.shape_cast %223 : vector<16xf32> to vector<16x1xf32>
    %cst_46 = arith.constant 3.200000e+01 : f32
    %225 = vector.broadcast %cst_46 : f32 to vector<16x1xf32>
    %226 = arith.divf %224, %225 : vector<16x1xf32>
    %227 = vector.broadcast %226 : vector<16x1xf32> to vector<16x32xf32>
    %228 = arith.subf %220, %227 : vector<16x32xf32>
    %229 = vector.broadcast %226 : vector<16x1xf32> to vector<16x32xf32>
    %230 = arith.subf %220, %229 : vector<16x32xf32>
    %231 = arith.mulf %228, %230 : vector<16x32xf32>
    %cst_47 = arith.constant dense<0.000000e+00> : vector<16xf32>
    %232 = vector.multi_reduction <add>, %231, %cst_47 [1] : vector<16x32xf32> to vector<16xf32>
    %233 = vector.shape_cast %232 : vector<16xf32> to vector<16x1xf32>
    %cst_48 = arith.constant 3.200000e+01 : f32
    %234 = vector.broadcast %cst_48 : f32 to vector<16x1xf32>
    %235 = arith.divf %233, %234 : vector<16x1xf32>
    %236 = vector.broadcast %226 : vector<16x1xf32> to vector<16x32xf32>
    %237 = arith.subf %220, %236 : vector<16x32xf32>
    %cst_49 = arith.constant 9.99999974E-6 : f32
    %238 = vector.broadcast %cst_49 : f32 to vector<16x1xf32>
    %239 = arith.addf %235, %238 : vector<16x1xf32>
    %240 = math.rsqrt %239 : vector<16x1xf32>
    %241 = vector.broadcast %240 : vector<16x1xf32> to vector<16x32xf32>
    %242 = arith.mulf %237, %241 : vector<16x32xf32>
    %243 = vector.broadcast %221 : vector<1x32xf32> to vector<16x32xf32>
    %244 = arith.mulf %242, %243 : vector<16x32xf32>
    %245 = vector.broadcast %222 : vector<1x32xf32> to vector<16x32xf32>
    %246 = arith.addf %244, %245 : vector<16x32xf32>
    %247 = arith.truncf %246 : vector<16x32xf32> to vector<16x32xbf16>
    %cst_50 = arith.constant dense<0.000000e+00> : vector<16x2048xf32>
    %248 = tpu.matmul %247, %8, %cst_50 {dimension_numbers = #tpu.dot_dimension_numbers<[1], [0], [0], [1], [0, 0, 1, 1], [], []>} : vector<16x32xbf16>, vector<32x2048xbf16>, vector<16x2048xf32> -> vector<16x2048xf32>
    %249 = vector.broadcast %12 : vector<1x2048xf32> to vector<16x2048xf32>
    %250 = arith.addf %248, %249 : vector<16x2048xf32>
    %cst_51 = arith.constant 0.000000e+00 : f32
    %251 = vector.broadcast %cst_51 : f32 to vector<16x2048xf32>
    %252 = arith.maximumf %250, %251 : vector<16x2048xf32>
    %253 = arith.truncf %252 : vector<16x2048xf32> to vector<16x2048xbf16>
    %cst_52 = arith.constant dense<0.000000e+00> : vector<16x32xf32>
    %254 = tpu.matmul %253, %10, %cst_52 {dimension_numbers = #tpu.dot_dimension_numbers<[1], [1], [0], [0], [0, 0, 1, 0], [], []>} : vector<16x2048xbf16>, vector<32x2048xbf16>, vector<16x32xf32> -> vector<16x32xf32>
    %255 = vector.extract_strided_slice %14 {offsets = [8, 0], sizes = [1, 32], strides = [1, 1]} : vector<16x32xf32> to vector<1x32xf32>
    %256 = vector.broadcast %255 : vector<1x32xf32> to vector<16x32xf32>
    %257 = arith.addf %254, %256 : vector<16x32xf32>
    %258 = arith.addf %220, %257 : vector<16x32xf32>
    %259 = vector.shape_cast %258 : vector<16x32xf32> to vector<2x8x32xf32>
    %c0_53 = arith.constant 0 : index
    %c0_54 = arith.constant 0 : index
    %c0_55 = arith.constant 0 : index
    %260 = vector.load %arg8[%c0_53, %c0_54, %c0_55] : memref<2x8x32xf32, #tpu.memory_space<vmem>>, vector<2x8x32xf32>
    tpu.vector_store %arg8[%c0_53, %c0_54, %c0_55], %259 {strides = array<i32>} : memref<2x8x32xf32, #tpu.memory_space<vmem>>, vector<2x8x32xf32>,
    return
  }
  func.func @transform_0(%arg0: i32) -> (i32, i32, i32) {
    %c0_i32 = arith.constant 0 : i32
    %c0_i32_0 = arith.constant 0 : i32
    %c0_i32_1 = arith.constant 0 : i32
    %c0_i32_2 = arith.constant 0 : i32
    return %c0_i32, %c0_i32_0, %c0_i32_1 : i32, i32, i32
  }
  func.func @transform_1(%arg0: i32) -> (i32, i32, i32) {
    %c0_i32 = arith.constant 0 : i32
    %c0_i32_0 = arith.constant 0 : i32
    %c0_i32_1 = arith.constant 0 : i32
    %c0_i32_2 = arith.constant 0 : i32
    return %c0_i32, %c0_i32_0, %c0_i32_1 : i32, i32, i32
  }
  func.func @transform_2(%arg0: i32) -> (i32, i32, i32) {
    %c0_i32 = arith.constant 0 : i32
    %c0_i32_0 = arith.constant 0 : i32
    %c0_i32_1 = arith.constant 0 : i32
    return %arg0, %c0_i32, %c0_i32_0 : i32, i32, i32
  }
  func.func @transform_3(%arg0: i32) -> (i32, i32, i32) {
    %c0_i32 = arith.constant 0 : i32
    %c0_i32_0 = arith.constant 0 : i32
    %c0_i32_1 = arith.constant 0 : i32
    return %arg0, %c0_i32, %c0_i32_0 : i32, i32, i32
  }
  func.func @transform_4(%arg0: i32) -> (i32, i32, i32) {
    %c0_i32 = arith.constant 0 : i32
    %c0_i32_0 = arith.constant 0 : i32
    %c0_i32_1 = arith.constant 0 : i32
    return %arg0, %c0_i32, %c0_i32_0 : i32, i32, i32
  }
  func.func @transform_5(%arg0: i32) -> (i32, i32, i32) {
    %c0_i32 = arith.constant 0 : i32
    %c0_i32_0 = arith.constant 0 : i32
    %c0_i32_1 = arith.constant 0 : i32
    return %arg0, %c0_i32, %c0_i32_0 : i32, i32, i32
  }
  func.func @transform_6(%arg0: i32) -> (i32, i32, i32) {
    %c0_i32 = arith.constant 0 : i32
    %c0_i32_0 = arith.constant 0 : i32
    %c0_i32_1 = arith.constant 0 : i32
    return %arg0, %c0_i32, %c0_i32_0 : i32, i32, i32
  }
  func.func @transform_7(%arg0: i32) -> (i32, i32, i32) {
    %c0_i32 = arith.constant 0 : i32
    %c0_i32_0 = arith.constant 0 : i32
    %c0_i32_1 = arith.constant 0 : i32
    %c0_i32_2 = arith.constant 0 : i32
    return %c0_i32, %c0_i32_0, %c0_i32_1 : i32, i32, i32
  }
}

</mosaic_0001>

<bundles_post_ra>
// kernel: tpu_custom_call.1
= control target key start
LH: loop header
LB: loop body
LE: loop exit
PB: predicated region body
PF: predicated region fallthrough
CT: control target
= control target key end

     0   :  { %s6267_s0 = inlined_call_operand.hbm [shape: f32[2,8,32], index: 0, kind: input, shape index: {}]   ;;  %s6268_s1 = inlined_call_operand.hbm [shape: f32[2,8,32], index: 1, kind: input, shape index: {}]   ;;  %s6269_s2 = inlined_call_operand.hbm [shape: bf16[2,32,256], index: 2, kind: input, shape index: {}]   ;;  %s6270_s3 = inlined_call_operand.hbm [shape: bf16[2,32,2048], index: 3, kind: input, shape index: {}]   ;;  %s6271_s4 = inlined_call_operand.hbm [shape: bf16[2,32,2048], index: 4, kind: input, shape index: {}]   ;;  %s6272_s5 = inlined_call_operand.hbm [shape: f32[2,1,2048], index: 5, kind: input, shape index: {}]   ;;  %s6273_s6 = inlined_call_operand.hbm [shape: f32[2,16,32], index: 6, kind: input, shape index: {}]   ;;  %s6274_s7 = inlined_call_operand.hbm [shape: f32[2,8,32], index: 7, kind: output, shape index: {}]  }
   0x1   :  { %6285 = sst [smem:[#allocation21_spill]] %s6267_s0 }
   0x2   :  { %6286 = sst [smem:[#allocation22_spill]] %s6269_s2 }
   0x3   :  { %6287 = sst [smem:[#allocation23_spill]] %s6270_s3 }
   0x4   :  { %6288 = sst [smem:[#allocation24_spill]] %s6274_s7 }
   0x5   :  { %12 = vsyncpa [#allocation3], 0 }
   0x6   :  { %13 = vsyncpa [#allocation6], 0 }
   0x7   :  { %14 = vsyncpa [#allocation4], 0  ;;  %s5003_s24 = smov 0   ;;  %s5005_s25 = smov 0  }
   0x8   :  { %s5007_s26 = smov 0   ;;  %s5009_s27 = smov 0  }
   0x9 LB: > { %6289 = sst [smem:[#allocation17_spill]] %s4931_s26  ;;  %s5022_s28 = sadd.s32 4294967295, %s4935_s27   ;;  %s4935_s27 = sphi %s5009_s27, %s6308_s27   ;;  %s4931_s26 = sphi %s5007_s26, %s6310_s26   ;;  %s4927_s25 = sphi %s5005_s25, %s6312_s25   ;;  %s4923_s24 = sphi %s5003_s24, %s6311_s24  }
   0xa   : > { %p82_p0 = scmp.ne.s32.totalorder %s4927_s25, %s4923_s24  ;;  %p83_p1 = scmp.eq.s32.totalorder %s5022_s28, 0 }
   0xb   : > { %p3999_p2 = scmp.ge.s32.totalorder %s4935_s27, 1  ;;  %p218_p3 = scmp.lt.s32.totalorder %s4935_s27, 3 }
   0xc   : > { %p4000_p4 = scmp.ne.s32.totalorder %s5022_s28, 0  ;;  %p5031_p5 = por %p83_p1, %p82_p0 }
   0xd   : > { %s6292_s0 = sld [smem:[#allocation21_spill]]  ;;  %p5038_p6 = pnand %p3999_p2, %p218_p3 }
   0xe   : > { %s6290_s29 = scalar_select %p5031_p5, 1, 0 }
   0xf   : > { %p4449_p7 = pneg %p5038_p6  ;;  %s4937_s11 = smov [#allocation2]  }
  0x10   : > { %6291 = sst [smem:[#allocation18_spill]] %s6290_s29  ;;  %s231_s12 = sshll.u32 %s4937_s11, 4  ;;  %s232_s12 = int_to_ptr.vmem [resolvable:$true] %s231_s12 }
  0x11   : > { %p5046_p8 = pnand %p4449_p7, %p83_p1  ;;  %s5051_s14 = sadd.s32 1, %s4935_s27  }
  0x12   : > { %6295 = sst [smem:[#allocation19_spill]] %s5051_s14  ;;  %s6275_s15 = smov 128  }
  0x13   : > { %s229_s9 = sshll.u32 %s6292_s0, 4  ;;  %s6277_s16 = smov 8   ;;  %s230_s9 = int_to_ptr.hbm [resolvable:$true] %s229_s9 }
  0x14   : > { %4452 = dma.hbm_to_vmem [thread:$0]  (!%p5046_p8), %s230_s9, 256, %s232_s12, [#allocation3], %s6275_s15, %s6275_s15, %s6277_s16  }
  0x15   : > { %s66_s17 = ssub.s32 %s4935_s27, %s5051_s14  ;;  %s69_s18 = sadd.s32 1, %s4931_s26 }
  0x16   : > { %p67_p9 = scmp.eq.s32.totalorder %s66_s17, 0  ;;  %p76_p10 = scmp.ne.s32.totalorder %s4931_s26, %s4927_s25 }
  0x17   : > { %p77_p11 = scmp.eq.s32.totalorder %s4935_s27, 0  ;;  %p4474_p12 = scmp.lt.s32.totalorder %s4935_s27, 2 }
  0x18   : > { %s5066_s19 = scalar_select %p67_p9, %s4931_s26, %s69_s18  }
  0x19   : > { %p78_p13 = por %p77_p11, %p76_p10  ;;  %s259_s20 = sand.u32 1, %s4935_s27  }
  0x1a   : > { %6296 = sst [smem:[#allocation20_spill]] %s5066_s19  ;;  %s5070_s21 = sand.u32 1, %s4931_s26  }
  0x1b   : > { %s4003_s22 = sshll.u32 %s5070_s21, 5  ;;  %s4355_s23 = sshll.u32 %s4935_s27, 5 }
  0x1c   : > { %s6297_s2 = sld [smem:[#allocation22_spill]]  ;;  %s263_s11 = scalar_lea.vmem [#allocation7], %s4003_s22 }
  0x1d   : > { %s271_s12 = sshll.u32 %s263_s11, 4  ;;  %p5079_p0 = pnand %p4474_p12, %p78_p13  ;;  %s272_s12 = int_to_ptr.vmem [resolvable:$true] %s271_s12 }
  0x1e   : > { %s6279_s15 = sshll.u32 %s4935_s27, 8  ;;  %s6299_s3 = sld [smem:[#allocation23_spill]] }
  0x1f   : > { %s5090_s24 = scalar_lea.sflag [#allocation3], %s259_s20  ;;  %p5094_p3 = pneg %p5079_p0 }
  0x22   : > { %s268_s8 = scalar_lea.hbm %s6297_s2, %s4355_s23  ;;  %s4688_s0 = scalar_lea.hbm %s6297_s2, 64 }
  0x23   : > { %s269_s9 = sshll.u32 %s268_s8, 4  ;;  %s270_s9 = int_to_ptr.hbm [resolvable:$true] %s269_s9 }
  0x24   : > { %s290_s19 = scalar_lea.hbm %s6299_s3, %s6279_s15  ;;  %s4681_s23 = sshra.s32 %s270_s9, 4  ;;  %s4682_s23 = int_to_ptr.hbm [resolvable:$true] %s4681_s23 }
  0x25   : > { %s4683_s22 = scalar_lea.hbm %s4682_s23, 32  ;;  %p4689_p10 = scmp.lt.s32.totalorder %s4682_s23, %s6297_s2 }
  0x26   : > { %p4684_p2 = scmp.ne.s32.totalorder %s4682_s23, %s4683_s22  ;;  %p4690_p11 = scmp.lt.s32.totalorder %s4688_s0, %s4683_s22 }
  0x28   : > { %p4686_p7 = pnand %p5094_p3, %p4684_p2  ;;  %p4691_p12 = por %p4690_p11, %p4689_p10 }
  0x2a   : > { %p4687_p9 = pneg %p4686_p7 }
  0x2c   : > { %p4692_p13 = pnand %p4691_p12, %p4687_p9 }
  0x2e   : > { %4695 = shalt.err (!%p4692_p13)
}
  0x2f   : > { %s6301_s15 = smov 8   ;;  %s6302_s18 = smov 128  }
  0x30   : > { %4459 = dma.hbm_to_vmem [thread:$0]  (!%p5079_p0), %s270_s9, 512, %s272_s12, %s5090_s24, %s6302_s18, %s6302_s18, %s6301_s15  }
  0x31   : > { %s291_s26 = sshll.u32 %s290_s19, 4  ;;  %s6303_s8 = sshll.u32 %s5070_s21, 8  ;;  %s292_s26 = int_to_ptr.hbm [resolvable:$true] %s291_s26 }
  0x32   : > { %s285_s11 = scalar_lea.vmem [#allocation8], %s6303_s8  ;;  %s4711_s23 = sshra.s32 %s292_s26, 4  ;;  %s4712_s23 = int_to_ptr.hbm [resolvable:$true] %s4711_s23 }
  0x33   : > { %s293_s14 = sshll.u32 %s285_s11, 4  ;;  %s4713_s22 = scalar_lea.hbm %s4712_s23, 256  ;;  %s294_s14 = int_to_ptr.vmem [resolvable:$true] %s293_s14 }
  0x34   : > { %p4714_p2 = scmp.ne.s32.totalorder %s4712_s23, %s4713_s22  ;;  %s4718_s20 = scalar_lea.hbm %s6299_s3, 512 }
  0x35   : > { %p4719_p10 = scmp.lt.s32.totalorder %s4712_s23, %s6299_s3  ;;  %p4720_p11 = scmp.lt.s32.totalorder %s4718_s20, %s4713_s22 }
  0x36   : > { %p4716_p7 = pnand %p4714_p2, %p5094_p3 }
  0x37   : > { %p4721_p12 = por %p4720_p11, %p4719_p10 }
  0x38   : > { %p4717_p9 = pneg %p4716_p7 }
  0x3a   : > { %p4722_p13 = pnand %p4721_p12, %p4717_p9 }
  0x3c   : > { %4725 = shalt.err (!%p4722_p13)
}
  0x3d   : > { %s4940_s19 = smov 1024   ;;  %s4941_s9 = smov 64  }
  0x3e   : > { %4462 = dma.hbm_to_vmem [thread:$0]  (!%p5079_p0), %s292_s26, 4096, %s294_s14, %s5090_s24, %s4940_s19, %s4940_s19, %s4941_s9  }
  0x3f   : > { %s6304_s12 = sshll.u32 %s4935_s27, 8  ;;  %s6305_s7 = sshll.u32 %s5070_s21, 8 }
  0x40   : > { %s312_s0 = scalar_lea.hbm %s6271_s4, %s6304_s12  ;;  %s307_s23 = scalar_lea.vmem [#allocation9], %s6305_s7 }
  0x41   : > { %s313_s2 = sshll.u32 %s312_s0, 4  ;;  %s315_s22 = sshll.u32 %s307_s23, 4  ;;  %s314_s2 = int_to_ptr.hbm [resolvable:$true] %s313_s2  ;;  %s316_s22 = int_to_ptr.vmem [resolvable:$true] %s315_s22 }
  0x42   : > { %s4741_s16 = sshra.s32 %s314_s2, 4  ;;  %s4748_s14 = scalar_lea.hbm %s6271_s4, 512  ;;  %s4742_s16 = int_to_ptr.hbm [resolvable:$true] %s4741_s16 }
  0x43   : > { %s4743_s20 = scalar_lea.hbm %s4742_s16, 256  ;;  %p4749_p10 = scmp.lt.s32.totalorder %s4742_s16, %s6271_s4 }
  0x44   : > { %p4744_p2 = scmp.ne.s32.totalorder %s4742_s16, %s4743_s20  ;;  %p4750_p11 = scmp.lt.s32.totalorder %s4748_s14, %s4743_s20 }
  0x46   : > { %p4746_p7 = pnand %p4744_p2, %p5094_p3  ;;  %p4751_p12 = por %p4750_p11, %p4749_p10 }
  0x48   : > { %p4747_p9 = pneg %p4746_p7 }
  0x4a   : > { %p4752_p13 = pnand %p4751_p12, %p4747_p9 }
  0x4c   : > { %4755 = shalt.err (!%p4752_p13)
}
  0x4d   : > { %4465 = dma.hbm_to_vmem [thread:$0]  (!%p5079_p0), %s314_s2, 4096, %s316_s22, %s5090_s24, %s4940_s19, %s4940_s19, %s4941_s9  }
  0x4e   : > { %s4012_s12 = sshll.u32 %s5070_s21, 4  ;;  %s4013_s11 = sshll.u32 %s4935_s27, 4 }
  0x4f   : > { %s333_s7 = scalar_lea.hbm %s6272_s5, %s4013_s11  ;;  %s329_s29 = scalar_lea.vmem [#allocation10], %s4012_s12 }
  0x50   : > { %s335_s23 = sshll.u32 %s333_s7, 4  ;;  %s337_s16 = sshll.u32 %s329_s29, 4  ;;  %s336_s23 = int_to_ptr.hbm [resolvable:$true] %s335_s23  ;;  %s338_s16 = int_to_ptr.vmem [resolvable:$true] %s337_s16 }
  0x51   : > { %s4771_s20 = sshra.s32 %s336_s23, 4  ;;  %s4778_s27 = scalar_lea.hbm %s6272_s5, 32  ;;  %s4772_s20 = int_to_ptr.hbm [resolvable:$true] %s4771_s20 }
  0x52   : > { %s4773_s26 = scalar_lea.hbm %s4772_s20, 16  ;;  %p4779_p10 = scmp.lt.s32.totalorder %s4772_s20, %s6272_s5 }
  0x53   : > { %p4774_p2 = scmp.ne.s32.totalorder %s4772_s20, %s4773_s26  ;;  %p4780_p11 = scmp.lt.s32.totalorder %s4778_s27, %s4773_s26 }
  0x55   : > { %p4776_p7 = pnand %p4774_p2, %p5094_p3  ;;  %p4781_p12 = por %p4780_p11, %p4779_p10 }
  0x57   : > { %p4777_p9 = pneg %p4776_p7 }
  0x59   : > { %p4782_p13 = pnand %p4781_p12, %p4777_p9 }
  0x5b   : > { %4785 = shalt.err (!%p4782_p13)
}
  0x5c   : > { %4468 = dma.hbm_to_vmem [thread:$0]  (!%p5079_p0), %s336_s23, 256, %s338_s16, %s5090_s24  }
  0x5d   : > { %s353_s8 = scalar_lea.hbm %s6273_s6, %s4013_s11  ;;  %s348_s3 = scalar_lea.vmem [#allocation11], %s4012_s12 }
  0x5e   : > { %s354_s0 = sshll.u32 %s353_s8, 4  ;;  %s356_s7 = sshll.u32 %s348_s3, 4  ;;  %s355_s0 = int_to_ptr.hbm [resolvable:$true] %s354_s0  ;;  %s357_s7 = int_to_ptr.vmem [resolvable:$true] %s356_s7 }
  0x5f   : > { %s243_s26 = sshll.u32 %s6268_s1, 4  ;;  %s4942_s14 = smov [#allocation5]   ;;  %s244_s26 = int_to_ptr.hbm [resolvable:$true] %s243_s26 }
  0x60   : > { %s245_s19 = sshll.u32 %s4942_s14, 4  ;;  %s4831_s11 = sshra.s32 %s355_s0, 4  ;;  %s246_s19 = int_to_ptr.vmem [resolvable:$true] %s245_s19  ;;  %s4832_s11 = int_to_ptr.hbm [resolvable:$true] %s4831_s11 }
  0x61   : > { %4455 = dma.hbm_to_vmem [thread:$0]  (!%p5046_p8), %s244_s26, 256, %s246_s19, [#allocation6], %s6302_s18, %s6302_s18, %s6301_s15  }
  0x62   : > { %s4833_s23 = scalar_lea.hbm %s4832_s11, 16  ;;  %s4838_s27 = scalar_lea.hbm %s6273_s6, 32 }
  0x63   : > { %p4834_p2 = scmp.ne.s32.totalorder %s4832_s11, %s4833_s23  ;;  %p4839_p10 = scmp.lt.s32.totalorder %s4832_s11, %s6273_s6 }
  0x64   : > { %p4840_p11 = scmp.lt.s32.totalorder %s4838_s27, %s4833_s23 }
  0x65   : > { %p4836_p7 = pnand %p4834_p2, %p5094_p3 }
  0x66   : > { %p4841_p12 = por %p4840_p11, %p4839_p10 }
  0x67   : > { %p4837_p9 = pneg %p4836_p7 }
  0x69   : > { %p4842_p13 = pnand %p4841_p12, %p4837_p9 }
  0x6b   : > { %4845 = shalt.err (!%p4842_p13)
}
  0x6c   : > { %4471 = dma.hbm_to_vmem [thread:$0]  (!%p5079_p0), %s355_s0, 256, %s357_s7, %s5090_s24, %s6302_s18, %s6302_s18, %s6301_s15  }
  0x6d   : > { %368 = sbr.rel (%p5038_p6) target bundleno = 3549 (0xddd), region = 48 }
  0x72   : > { %4906 = dma.done.wait (%p83_p1), [#allocation3], 256  }
  0x73   : > { %4908 = vsyncadd (%p83_p1), [#allocation3], 4294967040 }
  0x74   : > { %4910 = dma.done.wait (%p83_p1), [#allocation6], 256  }
  0x75   : > { %4912 = vsyncadd (%p83_p1), [#allocation6], 4294967040  ;;  %s380_s17 = sand.u32 1, %s5022_s28   ;;  %s382_s15 = sand.u32 1, %s4927_s25  }
  0x76   : > { %s4020_s18 = sshll.u32 %s382_s15, 5  ;;  %s381_s10 = scalar_lea.sflag [#allocation3], %s380_s17 }
  0x77   : > { %s5196_s24 = scalar_lea.vmem [#allocation7], %s4020_s18 }
  0x78   : > { %4914 = dma.done.wait (%p5031_p5), %s381_s10, 9216  }
  0x79   : > { %4916 = vsyncadd (%p5031_p5), %s381_s10, 4294958080  ;;  %s4021_s30 = sshll.u32 %s382_s15, 8  ;;  %s4023_s2 = sshll.u32 %s382_s15, 4 }
  0x7a   : > { %s5202_s22 = scalar_lea.vmem [#allocation8], %s4021_s30  ;;  %s5204_s8 = scalar_lea.vmem [#allocation9], %s4021_s30 }
  0x7b   : > { %s5206_s0 = scalar_lea.vmem [#allocation10], %s4023_s2  ;;  %s5208_s3 = scalar_lea.vmem [#allocation11], %s4023_s2 }
  0x7c   : > { %475 = sbr.rel (%p4000_p4) target bundleno = 132 (0x84), region = 80 }
  0x81   : > { %v476_v0 = vld [vmem:[#allocation2] sm:$0xff]  ;;  %vm478_vm0 = vcmask 261120   ;;  %v477_v1 = vld [vmem:[#allocation2 + $0x8] sm:$0xff] }
  0x82   : > { %479 = vst.msk [vmem:[#allocation12] sm:$0xff] %vm478_vm0, %v476_v0 }
  0x83   : > { %480 = vst.msk [vmem:[#allocation12 + $0x8] sm:$0xff] %vm478_vm0, %v477_v1 }
  0x84 PF: > { %vm555_vm1 = vcmask 261120   ;;  %v4943_v6 = vmov 32.0   ;;  %v4032_v23 = vld [vmem:[%s5196_s24 + $0x10] sm:$0xf]  ;;  %v4362_v24 = vld [vmem:[%s5196_s24 + $0x14] sm:$0xf0] }
  0x85   : > { %4567 = vrcp.f32 %v4943_v6  ;;  %v5222_v25 = vor.u32 %v4362_v24, %v4032_v23  ;;  %v4028_v26 = vld [vmem:[%s5196_s24] sm:$0xf]  ;;  %v4360_v27 = vld [vmem:[%s5196_s24 + $0x4] sm:$0xf0]  ;;  %s4944_s7 = smov 32   ;;  %s4945_s29 = smov 64  }
  0x86   : > { %v5227_v29 = vor.u32 %v4360_v27, %v4028_v26  ;;  %v553_v32 = vld [vmem:[%s5208_s3] sm:$0xff]  ;;  %v554_v49 = vld [vmem:[%s5208_s3 + $0x8] sm:$0xff]  ;;  %vm623_vm9 = vcmask 523264   ;;  %s4946_s20 = smov 120   ;;  %s4947_s26 = smov 88   ;;  %vm793_vm10 = vcmask 1047556  }
  0x87   : > { %648 = vmatpush.bf16.msra.mxu0 %v5222_v25  ;;  %v614_v34 = vrot.slane %v553_v32, 1  ;;  %v618_v40 = vrot.slane %v553_v32, 2  ;;  %v607_v52 = vperm.slane %v554_v49, 1  ;;  %v610_v57 = vperm.slane %v554_v49, 2  ;;  %s4948_s14 = smov 96   ;;  %s4949_s19 = smov 72  }
  0x88   : > { %s4950_s11 = smov 112   ;;  %s4951_s23 = smov 80   ;;  %v4955_v26 = vmov 1983009808   ;;  %vm1265_vm11 = vcmask 64512   ;;  %vm1525_vm12 = vcmask 1043456  }
  0x89   : > { %v481_v2 = vld [vmem:[#allocation12] sm:$0xff]  ;;  %615 = vrot.lane.b32.xlu2 %v614_v34, %s4944_s7  ;;  %s4952_s12 = smov 104   ;;  %s4953_s16 = smov 56   ;;  %v796_v27 = vunpack.c.l.s4 %v4955_v26  ;;  %vm1701_vm13 = vcmask 130048   ;;  %vm1704_vm14 = vcmask 195584  }
  0x8a   : > { %v556_v3 = vsel %vm555_vm1, %v481_v2, 0.0  ;;  %v482_v4 = vld [vmem:[#allocation12 + $0x8] sm:$0xff]  ;;  %s4954_s27 = smov 48   ;;  %s4957_s21 = smov 40  }
  0x8b   : > { %557 = vadd.xlane.f32.xlu0 %v556_v3  ;;  %v559_v5 = vsel %vm555_vm1, %v482_v4, 0.0  ;;  %v4568_v7 = vpop.eup %4567  ;;  %649 = vmatpush.bf16.msra.mxu0 %v5227_v29  ;;  %s4958_s9 = smov 8   ;;  %s4959_s13 = smov 16  }
  0x8c   : > { %v563_v8 = vmul.f32 32.0, %v4568_v7  ;;  %vm567_vm2 = vweird.f32 %v4568_v7  ;;  %s4960_s17 = smov 24   ;;  %s4961_s15 = smov [#allocation12]  }
  0x8d   : > { %s3843_s18 = sshll.u32 %s4961_s15, 4  ;;  %s6307_s30 = sld [smem:[#allocation24_spill]]  ;;  %s3844_s18 = int_to_ptr.vmem [resolvable:$true] %s3843_s18 }
  0x8e   : > { %v564_v9 = vsub.f32 1.0, %v563_v8  ;;  %p4477_p1 = scmp.eq.s32.totalorder %s5022_s28, 1 }
  0x90   : > { %v565_v10 = vmul.f32 %v4568_v7, %v564_v9 }
  0x91   : > { %619 = vrot.lane.b32.xlu2 %v618_v40, %s4945_s29 }
  0x92   : > { %v566_v11 = vadd.f32 %v4568_v7, %v565_v10 }
  0x93   : > { %560 = vadd.xlane.f32.xlu0 %v559_v5  ;;  %s3845_s2 = sshll.u32 %s6307_s30, 4  ;;  %s3846_s2 = int_to_ptr.hbm [resolvable:$true] %s3845_s2 }
  0x94   : > { %v5214_v12 = vsel %vm567_vm2, %v4568_v7, %v566_v11 }
  0xe3   : > { %v616_v62 = vpop.permute.xlu2 %615 }
  0xe4   : > { %v5238_v63 = vsel %vm555_vm1, %v553_v32, %v616_v62 }
  0xeb   : > { %v620_v0 = vpop.permute.xlu2 %619 }
  0xec   : > { %v624_v1 = vsel %vm623_vm9, %v5238_v63, %v620_v0 }
  0xfe   : > { %v558_v13 = vpop.xlane.xlu0 %557 }
  0xff   : > { %v569_v14 = vmul.f32 %v5214_v12, %v558_v13 }
 0x101   : > { %v571_v15 = vsub.f32 %v481_v2, %v569_v14  ;;  %v626_v2 = vperm.slane %v624_v1, 0 }
 0x103   : > { %v573_v16 = vmul.f32 %v571_v15, %v571_v15 }
 0x105   : > { %v575_v17 = vsel %vm555_vm1, %v573_v16, 0.0 }
 0x106   : > { %576 = vadd.xlane.f32.xlu1 %v575_v17  ;;  %v561_v18 = vpop.xlane.xlu0 %560 }
 0x107   : > { %v570_v19 = vmul.f32 %v5214_v12, %v561_v18 }
 0x109   : > { %v572_v20 = vsub.f32 %v482_v4, %v570_v19 }
 0x10b   : > { %v574_v21 = vmul.f32 %v572_v20, %v572_v20 }
 0x10d   : > { %v578_v22 = vsel %vm555_vm1, %v574_v21, 0.0 }
 0x10e   : > { %579 = vadd.xlane.f32.xlu1 %v578_v22 }
 0x179   : > { %v577_v28 = vpop.xlane.xlu1 %576 }
 0x17a   : > { %v581_v30 = vmul.f32 %v577_v28, %v5214_v12 }
 0x17c   : > { %v583_v31 = vadd.f32 1e-05, %v581_v30 }
 0x17e   : > { %4569 = vrsqrt.f32 %v583_v31  ;;  %vm591_vm4 = vweird.f32 %v583_v31 }
 0x181   : > { %v580_v33 = vpop.xlane.xlu1 %579 }
 0x182   : > { %v582_v35 = vmul.f32 %v580_v33, %v5214_v12 }
 0x184   : > { %v4570_v36 = vpop.eup %4569  ;;  %v584_v37 = vadd.f32 1e-05, %v582_v35 }
 0x185   : > { %v586_v38 = vmul.f32 %v4570_v36, %v583_v31  ;;  %vm592_vm3 = vweird.f32 %v4570_v36 }
 0x186   : > { %4571 = vrsqrt.f32 %v584_v37  ;;  %vm593_vm5 = vmor %vm591_vm4, %vm592_vm3  ;;  %vm601_vm7 = vweird.f32 %v584_v37 }
 0x187   : > { %v587_v39 = vmul.f32 %v4570_v36, %v586_v38 }
 0x189   : > { %v588_v41 = vmul.f32 0.5, %v587_v39 }
 0x18b   : > { %v589_v42 = vsub.f32 1.5, %v588_v41 }
 0x18c   : > { %v4572_v43 = vpop.eup %4571 }
 0x18d   : > { %v590_v44 = vmul.f32 %v4570_v36, %v589_v42  ;;  %v596_v45 = vmul.f32 %v4572_v43, %v584_v37  ;;  %vm602_vm6 = vweird.f32 %v4572_v43 }
 0x18e   : > { %vm603_vm8 = vmor %vm601_vm7, %vm602_vm6 }
 0x18f   : > { %v597_v46 = vmul.f32 %v4572_v43, %v596_v45  ;;  %v594_v47 = vsel %vm593_vm5, %v4570_v36, %v590_v44 }
 0x190   : > { %v605_v51 = vmul.f32 %v594_v47, %v571_v15 }
 0x191   : > { %v598_v48 = vmul.f32 0.5, %v597_v46  ;;  %v5287_v46 = vunpack.c.0.s8 %v796_v27 }
 0x192   : > { %v608_v56 = vmul.f32 %v607_v52, %v605_v51 }
 0x193   : > { %v599_v50 = vsub.f32 1.5, %v598_v48 }
 0x194   : > { %v611_v59 = vadd.f32 %v610_v57, %v608_v56 }
 0x195   : > { %v600_v53 = vmul.f32 %v4572_v43, %v599_v50 }
 0x197   : > { %v604_v54 = vsel %vm603_vm8, %v4572_v43, %v600_v53  ;;  %v4956_v43 = vmov 1934713408  }
 0x198   : > { %v606_v55 = vmul.f32 %v604_v54, %v572_v20  ;;  %v810_v44 = vunpack.c.l.s4 %v4956_v43 }
 0x19a   : > { %v609_v58 = vmul.f32 %v607_v52, %v606_v55 }
 0x19c   : > { %v612_v60 = vadd.f32 %v610_v57, %v609_v58 }
 0x19e   : > { %v625_v61 = vpack.c.bf16 %v612_v60, %v611_v59  ;;  %v5292_v60 = vunpack.c.0.s8 %v810_v44 }
 0x1a0   : > { %4034 = vmatmul.msk.bf16.vlgmr.msra.gmra.mxu0 %vm555_vm1, %v625_v61 }
 0x21d   : > { %v651_v3 = vpop.f32.mrf.mxu0 }
 0x21e   : > { %v652_v4 = vadd.f32 %v651_v3, %v626_v2 }
 0x220   : > { %v5241_v5 = vpack.c.bf16 %v652_v4, %v652_v4 }
 0x222   : > { %660 = vrot.lane.b32.xlu2 %v5241_v5, %s4946_s20  ;;  %676 = vrot.lane.b32.xlu1 %v5241_v5, %s4947_s26  ;;  %v708_v23 = vshrl.u32 %v5241_v5, 16 }
 0x223   : > { %672 = vrot.lane.b32.xlu0 %v5241_v5, %s4948_s14 }
 0x225   : > { %v653_v6 = vpop.f32.mrf.mxu0 }
 0x226   : > { %v654_v7 = vadd.f32 %v653_v6, %v626_v2 }
 0x228   : > { %v5255_v8 = vpack.c.bf16 %v654_v7, %v654_v7 }
 0x22a   : > { %684 = vrot.lane.b32.xlu2 %v5241_v5, %s4949_s19  ;;  %664 = vrot.lane.b32.xlu1 %v5241_v5, %s4950_s11  ;;  %v752_v30 = vshrl.u32 %v5255_v8, 16 }
 0x22b   : > { %680 = vrot.lane.b32.xlu0 %v5241_v5, %s4951_s23 }
 0x232   : > { %674 = vrot.lane.b32.xlu2 %v5255_v8, %s4948_s14  ;;  %662 = vrot.lane.b32.xlu1 %v5255_v8, %s4946_s20 }
 0x233   : > { %682 = vrot.lane.b32.xlu0 %v5255_v8, %s4951_s23 }
 0x23a   : > { %678 = vrot.lane.b32.xlu2 %v5255_v8, %s4947_s26  ;;  %670 = vrot.lane.b32.xlu1 %v5255_v8, %s4952_s12 }
 0x23b   : > { %668 = vrot.lane.b32.xlu0 %v5241_v5, %s4952_s12 }
 0x242   : > { %686 = vrot.lane.b32.xlu2 %v5255_v8, %s4949_s19  ;;  %688 = vrot.lane.b32.xlu1 %v5241_v5, %s4945_s29 }
 0x243   : > { %692 = vrot.lane.b32.xlu0 %v5241_v5, %s4953_s16 }
 0x24a   : > { %666 = vrot.lane.b32.xlu2 %v5255_v8, %s4950_s11  ;;  %696 = vrot.lane.b32.xlu1 %v5241_v5, %s4954_s27 }
 0x24b   : > { %694 = vrot.lane.b32.xlu0 %v5255_v8, %s4953_s16 }
 0x252   : > { %690 = vrot.lane.b32.xlu2 %v5255_v8, %s4945_s29 }
 0x27c   : > { %v661_v9 = vpop.permute.xlu2 %660 }
 0x27d   : > { %v709_v37 = vshrl.u32 %v661_v9, 16  ;;  %v706_v40 = vpack.i.b16 %v661_v9, %v5241_v5 }
 0x27f   : > { %v710_v54 = vpack.i.b16 %v709_v37, %v708_v23 }
 0x284   : > { %v685_v10 = vpop.permute.xlu2 %684 }
 0x285   : > { %v733_v45 = vshrl.u32 %v685_v10, 16 }
 0x28c   : > { %v675_v11 = vpop.permute.xlu2 %674 }
 0x28d   : > { %v768_v32 = vshrl.u32 %v675_v11, 16 }
 0x294   : > { %v677_v13 = vpop.permute.xlu1 %676  ;;  %v679_v14 = vpop.permute.xlu2 %678 }
 0x295   : > { %v673_v15 = vpop.permute.xlu0 %672  ;;  %v725_v19 = vshrl.u32 %v677_v13, 16  ;;  %v766_v22 = vpack.i.b16 %v679_v14, %v675_v11  ;;  %v769_v24 = vshrl.u32 %v679_v14, 16 }
 0x296   : > { %v724_v20 = vshrl.u32 %v673_v15, 16  ;;  %v722_v21 = vpack.i.b16 %v677_v13, %v673_v15 }
 0x297   : > { %v901_v38 = vrot.slane %v766_v22, 4  ;;  %v770_v41 = vpack.i.b16 %v769_v24, %v768_v32 }
 0x298   : > { %v726_v28 = vpack.i.b16 %v725_v19, %v724_v20  ;;  %v792_v33 = vrot.slane %v722_v21, 4 }
 0x299   : > { %v929_v57 = vrot.slane %v770_v41, 4 }
 0x29a   : > { %v821_v47 = vrot.slane %v726_v28, 4  ;;  %v794_v49 = vsel %vm793_vm10, %v792_v33, %v706_v40 }
 0x29b   : > { %v798_v61 = vperm.slane %v794_v49, %v5287_v46 }
 0x29c   : > { %v5281_v16 = vpop.permute.xlu1 %664  ;;  %v687_v18 = vpop.permute.xlu2 %686  ;;  %v822_v62 = vsel %vm793_vm10, %v821_v47, %v710_v54 }
 0x29d   : > { %v681_v17 = vpop.permute.xlu0 %680  ;;  %v777_v50 = vshrl.u32 %v687_v18, 16  ;;  %v716_v0 = vshrl.u32 %v5281_v16, 16  ;;  %v807_v24 = vrot.slane %v798_v61, 4  ;;  %v826_v26 = vperm.slane %v822_v62, %v5287_v46 }
 0x29e   : > { %v732_v39 = vshrl.u32 %v681_v17, 16  ;;  %v730_v55 = vpack.i.b16 %v685_v10, %v681_v17 }
 0x29f   : > { %v835_v47 = vrot.slane %v826_v26, 4 }
 0x2a0   : > { %v734_v56 = vpack.i.b16 %v733_v45, %v732_v39  ;;  %v799_v10 = vrot.slane %v730_v55, 4 }
 0x2a2   : > { %v827_v11 = vrot.slane %v734_v56, 4 }
 0x2a4   : > { %v663_v31 = vpop.permute.xlu1 %662  ;;  %v667_v51 = vpop.permute.xlu2 %666 }
 0x2a5   : > { %v750_v34 = vpack.i.b16 %v663_v31, %v5255_v8  ;;  %v753_v35 = vshrl.u32 %v663_v31, 16  ;;  %v683_v36 = vpop.permute.xlu0 %682  ;;  %v760_v1 = vshrl.u32 %v667_v51, 16 }
 0x2a6   : > { %v776_v42 = vshrl.u32 %v683_v36, 16  ;;  %v774_v53 = vpack.i.b16 %v687_v18, %v683_v36 }
 0x2a7   : > { %v902_v48 = vsel %vm793_vm10, %v901_v38, %v750_v34  ;;  %v754_v52 = vpack.i.b16 %v753_v35, %v752_v30 }
 0x2a8   : > { %v906_v58 = vperm.slane %v902_v48, %v5287_v46  ;;  %v778_v59 = vpack.i.b16 %v777_v50, %v776_v42  ;;  %v907_v4 = vrot.slane %v774_v53, 4 }
 0x2a9   : > { %v930_v3 = vsel %vm793_vm10, %v929_v57, %v754_v52 }
 0x2aa   : > { %v915_v15 = vrot.slane %v906_v58, 4  ;;  %v935_v17 = vrot.slane %v778_v59, 4  ;;  %v934_v20 = vperm.slane %v930_v3, %v5287_v46 }
 0x2ac   : > { %v671_v2 = vpop.permute.xlu1 %670  ;;  %v943_v37 = vrot.slane %v934_v20, 4 }
 0x2ad   : > { %v758_v6 = vpack.i.b16 %v671_v2, %v667_v51  ;;  %v761_v7 = vshrl.u32 %v671_v2, 16  ;;  %v669_v9 = vpop.permute.xlu0 %668 }
 0x2ae   : > { %v714_v13 = vpack.i.b16 %v669_v9, %v5281_v16  ;;  %v717_v14 = vshrl.u32 %v669_v9, 16 }
 0x2af   : > { %v762_v18 = vpack.i.b16 %v761_v7, %v760_v1  ;;  %v908_v19 = vsel %vm793_vm10, %v907_v4, %v758_v6 }
 0x2b0   : > { %v912_v21 = vperm.slane %v908_v19, %v5287_v46  ;;  %v718_v22 = vpack.i.b16 %v717_v14, %v716_v0  ;;  %v800_v23 = vsel %vm793_vm10, %v799_v10, %v714_v13 }
 0x2b1   : > { %v936_v27 = vsel %vm793_vm10, %v935_v17, %v762_v18  ;;  %v804_v16 = vperm.slane %v800_v23, %v5287_v46 }
 0x2b2   : > { %v913_v28 = vrot.slane %v912_v21, 4  ;;  %v916_v30 = vsel %vm793_vm10, %v912_v21, %v915_v15  ;;  %v940_v31 = vperm.slane %v936_v27, %v5287_v46  ;;  %v828_v32 = vsel %vm793_vm10, %v827_v11, %v718_v22 }
 0x2b3   : > { %v924_v33 = vperm.slane %v916_v30, %v5292_v60  ;;  %v805_v34 = vrot.slane %v804_v16, 4  ;;  %v808_v35 = vsel %vm793_vm10, %v804_v16, %v807_v24  ;;  %v832_v36 = vperm.slane %v828_v32, %v5287_v46 }
 0x2b4   : > { %v941_v38 = vrot.slane %v940_v31, 4  ;;  %v816_v39 = vperm.slane %v808_v35, %v5292_v60  ;;  %v914_v40 = vsel %vm793_vm10, %v913_v28, %v906_v58  ;;  %v944_v42 = vsel %vm793_vm10, %v940_v31, %v943_v37 }
 0x2b5   : > { %v806_v41 = vsel %vm793_vm10, %v805_v34, %v798_v61  ;;  %v833_v45 = vrot.slane %v832_v36, 4  ;;  %v927_v48 = vrot.slane %v924_v33, 4  ;;  %v920_v50 = vperm.slane %v914_v40, %v5292_v60 }
 0x2b6   : > { %v812_v43 = vperm.slane %v806_v41, %v5292_v60  ;;  %v819_v44 = vrot.slane %v816_v39, 4  ;;  %v942_v49 = vsel %vm793_vm10, %v941_v38, %v934_v20  ;;  %v952_v54 = vperm.slane %v944_v42, %v5292_v60 }
 0x2b7   : > { %v834_v53 = vsel %vm793_vm10, %v833_v45, %v826_v26  ;;  %v836_v55 = vsel %vm793_vm10, %v832_v36, %v835_v47  ;;  %v948_v58 = vperm.slane %v942_v49, %v5292_v60  ;;  %v928_v61 = vsel %vm793_vm10, 0, %v927_v48 }
 0x2b8   : > { %v817_v51 = vrot.slane %v812_v43, 4  ;;  %v820_v52 = vsel %vm793_vm10, 0, %v819_v44  ;;  %v840_v56 = vperm.slane %v834_v53, %v5292_v60  ;;  %v844_v59 = vperm.slane %v836_v55, %v5292_v60 }
 0x2b9   : > { %v1014_v57 = vrot.slane %v820_v52, 4  ;;  %v1009_v1 = vsel %vm793_vm10, %v819_v44, %v812_v43  ;;  %v925_v2 = vrot.slane %v920_v50, 4  ;;  %v955_v6 = vrot.slane %v952_v54, 4 }
 0x2ba   : > { %v818_v62 = vsel %vm793_vm10, 0, %v817_v51  ;;  %v845_v0 = vrot.slane %v840_v56, 4  ;;  %v847_v3 = vrot.slane %v844_v59, 4  ;;  %v5330_v4 = vperm.slane %v1009_v1, %v5287_v46 }
 0x2bb   : > { %v1015_v7 = vsel %vm793_vm10, %v1014_v57, %v818_v62  ;;  %v1068_v9 = vrot.slane %v928_v61, 4  ;;  %v953_v11 = vrot.slane %v948_v58, 4  ;;  %v926_v20 = vsel %vm793_vm10, 0, %v925_v2 }
 0x2bc   : > { %v848_v10 = vsel %vm793_vm10, 0, %v847_v3  ;;  %v846_v13 = vsel %vm793_vm10, 0, %v845_v0  ;;  %v1019_v14 = vperm.slane %v1015_v7, %v5287_v46  ;;  %v1022_v15 = vrot.slane %v5330_v4, 4 }
 0x2bd   : > { %v1036_v17 = vsel %vm793_vm10, %v847_v3, %v840_v56  ;;  %v1041_v19 = vrot.slane %v848_v10, 4  ;;  %v956_v21 = vsel %vm793_vm10, 0, %v955_v6  ;;  %v954_v26 = vsel %vm793_vm10, 0, %v953_v11 }
 0x2be   : > { %v5339_v18 = vperm.slane %v1036_v17, %v5287_v46  ;;  %v1023_v22 = vsel %vm793_vm10, %v1019_v14, %v1022_v15  ;;  %v1063_v28 = vsel %vm793_vm10, %v927_v48, %v920_v50  ;;  %v1069_v30 = vsel %vm793_vm10, %v1068_v9, %v926_v20 }
 0x2bf   : > { %v1042_v23 = vsel %vm793_vm10, %v1041_v19, %v846_v13  ;;  %v1031_v27 = vperm.slane %v1023_v22, %v5292_v60  ;;  %v1067_v31 = vperm.slane %v1063_v28, %v5287_v46  ;;  %v1073_v32 = vperm.slane %v1069_v30, %v5287_v46 }
 0x2c0   : > { %v1049_v24 = vrot.slane %v5339_v18, 4  ;;  %v1046_v16 = vperm.slane %v1042_v23, %v5287_v46  ;;  %v1090_v33 = vsel %vm793_vm10, %v955_v6, %v948_v58  ;;  %v1095_v34 = vrot.slane %v956_v21, 4 }
 0x2c1   : > { %v1020_v35 = vrot.slane %v1019_v14, 4  ;;  %v1094_v38 = vperm.slane %v1090_v33, %v5287_v46  ;;  %v1074_v40 = vrot.slane %v1073_v32, 4  ;;  %v1076_v41 = vrot.slane %v1067_v31, 4 }
 0x2c2   : > { %v1047_v36 = vrot.slane %v1046_v16, 4  ;;  %v1050_v37 = vsel %vm793_vm10, %v1046_v16, %v1049_v24  ;;  %v1096_v42 = vsel %vm793_vm10, %v1095_v34, %v954_v26  ;;  %v1208_v45 = vshrl.u32 %v1031_v27, 16 }
 0x2c3   : > { %v1058_v39 = vperm.slane %v1050_v37, %v5292_v60  ;;  %v1100_v43 = vperm.slane %v1096_v42, %v5287_v46  ;;  %v1103_v44 = vrot.slane %v1094_v38, 4  ;;  %v1034_v47 = vrot.slane %v1031_v27, 4 }
 0x2c4   : > { %v1077_v49 = vsel %vm793_vm10, %v1073_v32, %v1076_v41  ;;  %v1021_v13 = vsel %vm793_vm10, %v1020_v35, %v5330_v4  ;;  %v1048_v26 = vsel %vm793_vm10, %v1047_v36, %v5339_v18  ;;  %v1075_v4 = vsel %vm793_vm10, %v1074_v40, %v1067_v31 }
 0x2c5   : > { %v1207_v48 = vpack.i.b16 %v1058_v39, %v1031_v27  ;;  %v1209_v50 = vshrl.u32 %v1058_v39, 16  ;;  %v1061_v51 = vrot.slane %v1058_v39, 4  ;;  %v1085_v52 = vperm.slane %v1077_v49, %v5292_v60 }
 0x2c6   : > { %v1101_v53 = vrot.slane %v1100_v43, 4  ;;  %v1104_v54 = vsel %vm793_vm10, %v1100_v43, %v1103_v44  ;;  %v1035_v55 = vsel %vm793_vm10, 0, %v1034_v47  ;;  %v1027_v23 = vperm.slane %v1021_v13, %v5292_v60 }
 0x2c7   : > { %v1270_v56 = vsel %vm1265_vm11, %v1207_v48, 0  ;;  %v1112_v57 = vperm.slane %v1104_v54, %v5292_v60  ;;  %v1210_v58 = vpack.i.b16 %v1209_v50, %v1208_v45  ;;  %v1062_v59 = vsel %vm793_vm10, 0, %v1061_v51 }
 0x2c8   : > { %1279 = vmatpush.bf16.xpose.msra.mxu1 %v1270_v56  ;;  %v1244_v61 = vshrl.u32 %v1085_v52, 16  ;;  %v1213_v62 = vpack.i.b16 %v1062_v59, %v1035_v55  ;;  %v1088_v0 = vrot.slane %v1085_v52, 4  ;;  %v1214_v1 = vshrl.u32 %v1035_v55, 16 }
 0x2c9   : > { %v1243_v2 = vpack.i.b16 %v1112_v57, %v1085_v52  ;;  %v1308_v3 = vsel %vm1265_vm11, %v1210_v58, 0  ;;  %v1245_v6 = vshrl.u32 %v1112_v57, 16  ;;  %v1115_v7 = vrot.slane %v1112_v57, 4 }
 0x2ca   : > { %1317 = vmatpush.bf16.xpose.msra.mxu3 %v1308_v3  ;;  %v1346_v9 = vsel %vm1265_vm11, %v1213_v62, 0  ;;  %v1089_v10 = vsel %vm793_vm10, 0, %v1088_v0  ;;  %v1215_v11 = vshrl.u32 %v1062_v59, 16  ;;  %v1102_v27 = vsel %vm793_vm10, %v1101_v53, %v1094_v38 }
 0x2cb   : > { %v1289_v14 = vsel %vm1265_vm11, %v1243_v2, 0  ;;  %v1246_v15 = vpack.i.b16 %v1245_v6, %v1244_v61  ;;  %v1116_v17 = vsel %vm793_vm10, 0, %v1115_v7  ;;  %v1250_v19 = vshrl.u32 %v1089_v10, 16 }
 0x2cc   : > { %1298 = vmatpush.bf16.xpose.msra.mxu2 %v1289_v14  ;;  %v1249_v20 = vpack.i.b16 %v1116_v17, %v1089_v10  ;;  %v1251_v21 = vshrl.u32 %v1116_v17, 16  ;;  %v1216_v22 = vpack.i.b16 %v1215_v11, %v1214_v1  ;;  %v1054_v32 = vperm.slane %v1048_v26, %v5292_v60 }
 0x2cd   : > { %v1327_v24 = vsel %vm1265_vm11, %v1246_v15, 0  ;;  %v1081_v33 = vperm.slane %v1075_v4, %v5292_v60  ;;  %v1108_v34 = vperm.slane %v1102_v27, %v5292_v60  ;;  %v1196_v31 = vshrl.u32 %v1027_v23, 16 }
 0x2ce   : > { %1336 = vmatpush.bf16.xpose.msrb.mxu0 %v1327_v24  ;;  %v1365_v16 = vsel %vm1265_vm11, %v1249_v20, 0  ;;  %v1384_v28 = vsel %vm1265_vm11, %v1216_v22, 0  ;;  %v1252_v30 = vpack.i.b16 %v1251_v21, %v1250_v19  ;;  %v1195_v35 = vpack.i.b16 %v1054_v32, %v1027_v23 }
 0x2cf   : > { %v1197_v36 = vshrl.u32 %v1054_v32, 16  ;;  %v1231_v37 = vpack.i.b16 %v1108_v34, %v1081_v33  ;;  %v1232_v38 = vshrl.u32 %v1081_v33, 16  ;;  %v1233_v39 = vshrl.u32 %v1108_v34, 16 }
 0x2d0   : > { %1355 = vmatpush.bf16.xpose.msrb.mxu1 %v1346_v9  ;;  %v1403_v18 = vsel %vm1265_vm11, %v1252_v30, 0  ;;  %v1059_v42 = vrot.slane %v1054_v32, 4  ;;  %v1113_v43 = vrot.slane %v1108_v34, 4  ;;  %v1032_v44 = vrot.slane %v1027_v23, 4 }
 0x2d1   : > { %4035 = vmatmul.msk.bf16.vlgmr.msra.gmra.mxu1 %vm1265_vm11, %v1195_v35  ;;  %v1198_v40 = vpack.i.b16 %v1197_v36, %v1196_v31  ;;  %v1234_v41 = vpack.i.b16 %v1233_v39, %v1232_v38  ;;  %v1086_v45 = vrot.slane %v1081_v33, 4  ;;  %v689_v35 = vpop.permute.xlu1 %688  ;;  %v693_v31 = vpop.permute.xlu0 %692 }
 0x2d2   : > { %1393 = vmatpush.bf16.xpose.msrb.mxu3 %v1384_v28  ;;  %v1060_v47 = vsel %vm793_vm10, 0, %v1059_v42  ;;  %v1114_v48 = vsel %vm793_vm10, 0, %v1113_v43  ;;  %v1033_v49 = vsel %vm793_vm10, 0, %v1032_v44  ;;  %v5416_v38 = vpop.permute.xlu2 %690 }
 0x2d3   : > { %4036 = vmatmul.msk.bf16.vlgmr.msra.gmra.mxu2 %vm1265_vm11, %v1231_v37  ;;  %4037 = vmatmul.msk.bf16.vlgmr.msra.gmra.mxu3 %vm1265_vm11, %v1198_v40  ;;  %v1087_v50 = vsel %vm793_vm10, 0, %v1086_v45  ;;  %v1203_v51 = vshrl.u32 %v1060_v47, 16  ;;  %v1239_v52 = vshrl.u32 %v1114_v48, 16  ;;  %v1201_v53 = vpack.i.b16 %v1060_v47, %v1033_v49 }
 0x2d4   : > { %1374 = vmatpush.bf16.xpose.msrb.mxu2 %v1365_v16  ;;  %v1202_v54 = vshrl.u32 %v1033_v49, 16  ;;  %v1237_v55 = vpack.i.b16 %v1114_v48, %v1087_v50  ;;  %v1238_v56 = vshrl.u32 %v1087_v50, 16 }
 0x2d5   : > { %4038 = vmatmul.msk.bf16.vlgmr.msrb.gmra.mxu0 %vm1265_vm11, %v1234_v41 }
 0x2d6   : > { %1412 = vmatpush.bf16.xpose.msra.mxu0 %v1403_v18  ;;  %v1204_v57 = vpack.i.b16 %v1203_v51, %v1202_v54  ;;  %v1240_v58 = vpack.i.b16 %v1239_v52, %v1238_v56 }
 0x2d9   : > { %v5412_v36 = vpop.permute.xlu1 %696  ;;  %v5414_v37 = vpop.permute.xlu0 %694 }
 0x2e1   : > { %4039 = vmatmul.msk.bf16.vlgmr.msrb.gmra.mxu1 %vm1265_vm11, %v1201_v53 }
 0x2e3   : > { %4040 = vmatmul.msk.bf16.vlgmr.msrb.gmra.mxu2 %vm1265_vm11, %v1237_v55  ;;  %4041 = vmatmul.msk.bf16.vlgmr.msrb.gmra.mxu3 %vm1265_vm11, %v1204_v57 }
 0x2e5   : > { %4042 = vmatmul.msk.bf16.vlgmr.msra.gmra.mxu0 %vm1265_vm11, %v1240_v58 }
 0x34e   : > { %v1281_v59 = vpop.f32.mrf.mxu1 }
 0x34f   : > { %v1418_v61 = vmul.f32 0.35355338, %v1281_v59 }
 0x351   : > { %v1426_v0 = vsel %vm1265_vm11, %v1418_v61, -inf }
 0x352   : > { %v1338_v62 = vpop.f32.mrf.mxu0  ;;  %1427 = vmax.xlane.f32.xlu1 %v1426_v0 }
 0x353   : > { %v1421_v1 = vmul.f32 0.35355338, %v1338_v62 }
 0x355   : > { %v1435_v2 = vsel %vm1265_vm11, %v1421_v1, -inf }
 0x356   : > { %1436 = vmax.xlane.f32.xlu0 %v1435_v2  ;;  %v1300_v3 = vpop.f32.mrf.mxu2  ;;  %v1283_v6 = vpop.f32.mrf.mxu1 }
 0x357   : > { %v1319_v7 = vpop.f32.mrf.mxu3  ;;  %v1419_v10 = vmul.f32 0.35355338, %v1300_v3  ;;  %v739_v3 = vshrl.u32 %v689_v35, 16  ;;  %v740_v6 = vshrl.u32 %v693_v31, 16 }
 0x358   : > { %v1420_v9 = vmul.f32 0.35355338, %v1319_v7 }
 0x359   : > { %v1429_v14 = vsel %vm1265_vm11, %v1419_v10, -inf }
 0x35a   : > { %v1340_v11 = vpop.f32.mrf.mxu0  ;;  %v1432_v13 = vsel %vm1265_vm11, %v1420_v9, -inf }
 0x35b   : > { %1433 = vmax.xlane.f32.xlu2 %v1432_v13 }
 0x35e   : > { %1430 = vmax.xlane.f32.xlu0 %v1429_v14  ;;  %v1302_v15 = vpop.f32.mrf.mxu2  ;;  %v1357_v19 = vpop.f32.mrf.mxu1  ;;  %v741_v14 = vpack.i.b16 %v740_v6, %v739_v3 }
 0x35f   : > { %v1321_v17 = vpop.f32.mrf.mxu3  ;;  %v1422_v20 = vmul.f32 0.35355338, %v1357_v19 }
 0x361   : > { %v1438_v24 = vsel %vm1265_vm11, %v1422_v20, -inf }
 0x362   : > { %v1414_v21 = vpop.f32.mrf.mxu0 }
 0x363   : > { %v5401_v22 = vmul.f32 0.35355338, %v1414_v21 }
 0x365   : > { %v1447_v23 = vsel %vm1265_vm11, %v5401_v22, -inf }
 0x366   : > { %v1376_v26 = vpop.f32.mrf.mxu2  ;;  %1448 = vmax.xlane.f32.xlu2 %v1447_v23  ;;  %1439 = vmax.xlane.f32.xlu0 %v1438_v24  ;;  %v1359_v4 = vpop.f32.mrf.mxu1 }
 0x367   : > { %v1395_v27 = vpop.f32.mrf.mxu3  ;;  %v1423_v28 = vmul.f32 0.35355338, %v1376_v26 }
 0x368   : > { %v1424_v16 = vmul.f32 0.35355338, %v1395_v27 }
 0x369   : > { %v1441_v33 = vsel %vm1265_vm11, %v1423_v28, -inf }
 0x36a   : > { %v1416_v30 = vpop.f32.mrf.mxu0  ;;  %v1444_v32 = vsel %vm1265_vm11, %v1424_v16, -inf }
 0x36b   : > { %1445 = vmax.xlane.f32.xlu1 %v1444_v32  ;;  %v784_v32 = vshrl.u32 %v5414_v37, 16 }
 0x36e   : > { %v1378_v34 = vpop.f32.mrf.mxu2  ;;  %1442 = vmax.xlane.f32.xlu2 %v1441_v33 }
 0x36f   : > { %v1397_v18 = vpop.f32.mrf.mxu3 }
 0x37a   : > { %698 = vrot.lane.b32.xlu0 %v5255_v8, %s4954_s27 }
 0x384   : > { %702 = vrot.lane.b32.xlu1 %v5255_v8, %s4957_s21 }
 0x386   : > { %700 = vrot.lane.b32.xlu2 %v5241_v5, %s4957_s21 }
 0x3c5   : > { %v1428_v39 = vpop.xlane.xlu1 %1427 }
 0x3c6   : > { %v1450_v40 = vsub.f32 %v1418_v61, %v1428_v39  ;;  %v783_v39 = vshrl.u32 %v5416_v38, 16 }
 0x3c8   : > { %v1458_v41 = vmul.f32 1.442695, %v1450_v40 }
 0x3c9   : > { %v1437_v42 = vpop.xlane.xlu0 %1436 }
 0x3ca   : > { %4573 = vpow2.f32 %v1458_v41  ;;  %v1453_v49 = vsub.f32 %v1421_v1, %v1437_v42  ;;  %v782_v41 = vpack.i.b16 %v5414_v37, %v5416_v38 }
 0x3cc   : > { %v1464_v51 = vmul.f32 1.442695, %v1453_v49  ;;  %v785_v49 = vpack.i.b16 %v784_v32, %v783_v39 }
 0x3ce   : > { %v1434_v43 = vpop.xlane.xlu2 %1433 }
 0x3cf   : > { %v1452_v44 = vsub.f32 %v1420_v9, %v1434_v43 }
 0x3d0   : > { %v5418_v45 = vpop.eup %4573 }
 0x3d1   : > { %v1462_v8 = vmul.f32 1.442695, %v1452_v44  ;;  %v1431_v47 = vpop.xlane.xlu0 %1430  ;;  %v1474_v48 = vsel %vm1265_vm11, %v5418_v45, 0.0 }
 0x3d2   : > { %v1451_v5 = vsub.f32 %v1419_v10, %v1431_v47  ;;  %1475 = vadd.xlane.f32.xlu1 %v1474_v48  ;;  %v738_v10 = vpack.i.b16 %v693_v31, %v689_v35 }
 0x3d3   : > { %4575 = vpow2.f32 %v1462_v8 }
 0x3d4   : > { %v1460_v50 = vmul.f32 1.442695, %v1451_v5  ;;  %v853_v17 = vperm.slane %v738_v10, %v5287_v46 }
 0x3d6   : > { %4577 = vpow2.f32 %v1460_v50 }
 0x3d7   : > { %4579 = vpow2.f32 %v1464_v51 }
 0x3d9   : > { %v5422_v52 = vpop.eup %4575  ;;  %v1449_v53 = vpop.xlane.xlu2 %1448 }
 0x3da   : > { %v1440_v54 = vpop.xlane.xlu0 %1439  ;;  %v1480_v55 = vsel %vm1265_vm11, %v5422_v52, 0.0  ;;  %v1457_v9 = vsub.f32 %v5401_v22, %v1449_v53  ;;  %v879_v22 = vperm.slane %v741_v14, %v5287_v46 }
 0x3db   : > { %1481 = vadd.xlane.f32.xlu0 %v1480_v55  ;;  %v1454_v57 = vsub.f32 %v1422_v20, %v1440_v54  ;;  %v745_v20 = vshrl.u32 %v5412_v36, 16  ;;  %v961_v55 = vperm.slane %v782_v41, %v5287_v46 }
 0x3dc   : > { %v5426_v56 = vpop.eup %4577  ;;  %v1472_v15 = vmul.f32 1.442695, %v1457_v9  ;;  %v887_v18 = vrot.slane %v879_v22, 4 }
 0x3dd   : > { %v1477_v58 = vsel %vm1265_vm11, %v5426_v56, 0.0  ;;  %v1466_v62 = vmul.f32 1.442695, %v1454_v57  ;;  %v5430_v2 = vpop.eup %4579 }
 0x3de   : > { %1478 = vadd.xlane.f32.xlu2 %v1477_v58  ;;  %v1446_v59 = vpop.xlane.xlu1 %1445  ;;  %v1483_v13 = vsel %vm1265_vm11, %v5430_v2, 0.0 }
 0x3df   : > { %v1456_v61 = vsub.f32 %v1424_v16, %v1446_v59  ;;  %v861_v16 = vrot.slane %v853_v17, 4 }
 0x3e1   : > { %v1470_v0 = vmul.f32 1.442695, %v1456_v61  ;;  %v1443_v1 = vpop.xlane.xlu2 %1442 }
 0x3e2   : > { %v1455_v7 = vsub.f32 %v1423_v28, %v1443_v1  ;;  %v987_v1 = vperm.slane %v785_v49, %v5287_v46 }
 0x3e3   : > { %4581 = vpow2.f32 %v1470_v0 }
 0x3e4   : > { %4583 = vpow2.f32 %v1466_v62  ;;  %v1468_v11 = vmul.f32 1.442695, %v1455_v7 }
 0x3e6   : > { %4585 = vpow2.f32 %v1468_v11  ;;  %1484 = vadd.xlane.f32.xlu2 %v1483_v13 }
 0x3e7   : > { %4587 = vpow2.f32 %v1472_v15  ;;  %v969_v15 = vrot.slane %v961_v55, 4 }
 0x3e9   : > { %v5436_v19 = vpop.eup %4581  ;;  %v701_v21 = vpop.permute.xlu2 %700 }
 0x3ea   : > { %v5439_v23 = vpop.eup %4583  ;;  %v744_v24 = vpack.i.b16 %v701_v21, %v5412_v36  ;;  %v746_v26 = vshrl.u32 %v701_v21, 16  ;;  %v1492_v4 = vsel %vm1265_vm11, %v5436_v19, 0.0 }
 0x3eb   : > { %1493 = vadd.xlane.f32.xlu1 %v1492_v4  ;;  %v1486_v34 = vsel %vm1265_vm11, %v5439_v23, 0.0 }
 0x3ec   : > { %v5445_v27 = vpop.eup %4585  ;;  %v747_v28 = vpack.i.b16 %v746_v26, %v745_v20  ;;  %v858_v30 = vperm.slane %v744_v24, %v5287_v46  ;;  %v699_v54 = vpop.permute.xlu0 %698 }
 0x3ed   : > { %v1489_v33 = vsel %vm1265_vm11, %v5445_v27, 0.0  ;;  %v5461_v8 = vpop.eup %4587  ;;  %v789_v7 = vshrl.u32 %v699_v54, 16 }
 0x3ee   : > { %v859_v35 = vrot.slane %v858_v30, 4  ;;  %v862_v31 = vsel %vm793_vm10, %v858_v30, %v861_v16  ;;  %v884_v36 = vperm.slane %v747_v28, %v5287_v46  ;;  %1490 = vadd.xlane.f32.xlu0 %v1489_v33  ;;  %1487 = vadd.xlane.f32.xlu2 %v1486_v34  ;;  %v1495_v58 = vsel %vm1265_vm11, %v5461_v8, 0.0 }
 0x3ef   : > { %v870_v40 = vperm.slane %v862_v31, %v5292_v60  ;;  %v995_v16 = vrot.slane %v987_v1, 4 }
 0x3f0   : > { %v860_v42 = vsel %vm793_vm10, %v859_v35, %v853_v17  ;;  %v885_v43 = vrot.slane %v884_v36, 4  ;;  %v888_v44 = vsel %vm793_vm10, %v884_v36, %v887_v18 }
 0x3f1   : > { %v866_v47 = vperm.slane %v860_v42, %v5292_v60  ;;  %v873_v5 = vrot.slane %v870_v40, 4  ;;  %v896_v48 = vperm.slane %v888_v44, %v5292_v60 }
 0x3f2   : > { %v886_v50 = vsel %vm793_vm10, %v885_v43, %v879_v22 }
 0x3f3   : > { %v871_v51 = vrot.slane %v866_v47, 4  ;;  %v874_v53 = vsel %vm793_vm10, 0, %v873_v5  ;;  %v892_v37 = vperm.slane %v886_v50, %v5292_v60  ;;  %v899_v38 = vrot.slane %v896_v48, 4 }
 0x3f4   : > { %v1122_v57 = vrot.slane %v874_v53, 4  ;;  %v1117_v0 = vsel %vm793_vm10, %v873_v5, %v866_v47 }
 0x3f5   : > { %v872_v59 = vsel %vm793_vm10, 0, %v871_v51  ;;  %v897_v61 = vrot.slane %v892_v37, 4  ;;  %v900_v62 = vsel %vm793_vm10, 0, %v899_v38  ;;  %v1121_v17 = vperm.slane %v1117_v0, %v5287_v46 }
 0x3f6   : > { %v1123_v3 = vsel %vm793_vm10, %v1122_v57, %v872_v59  ;;  %v1141_v6 = vrot.slane %v900_v62, 4  ;;  %1496 = vadd.xlane.f32.xlu0 %v1495_v58  ;;  %v703_v9 = vpop.permute.xlu1 %702  ;;  %v1136_v20 = vsel %vm793_vm10, %v899_v38, %v892_v37 }
 0x3f7   : > { %v898_v10 = vsel %vm793_vm10, 0, %v897_v61  ;;  %v788_v11 = vpack.i.b16 %v703_v9, %v699_v54  ;;  %v790_v13 = vshrl.u32 %v703_v9, 16  ;;  %v1127_v14 = vperm.slane %v1123_v3, %v5287_v46 }
 0x3f8   : > { %v1142_v21 = vsel %vm793_vm10, %v1141_v6, %v898_v10  ;;  %v1140_v35 = vperm.slane %v1136_v20, %v5287_v46 }
 0x3f9   : > { %v791_v22 = vpack.i.b16 %v790_v13, %v789_v7  ;;  %v966_v24 = vperm.slane %v788_v11, %v5287_v46  ;;  %v1128_v26 = vrot.slane %v1127_v14, 4  ;;  %v1146_v4 = vperm.slane %v1142_v21, %v5287_v46 }
 0x3fb   : > { %v967_v28 = vrot.slane %v966_v24, 4  ;;  %v970_v30 = vsel %vm793_vm10, %v966_v24, %v969_v15  ;;  %v992_v32 = vperm.slane %v791_v22, %v5287_v46  ;;  %v1129_v33 = vsel %vm793_vm10, %v1128_v26, %v1121_v17 }
 0x3fc   : > { %v978_v34 = vperm.slane %v970_v30, %v5292_v60  ;;  %v1133_v18 = vperm.slane %v1129_v33, %v5292_v60  ;;  %v1147_v31 = vrot.slane %v1146_v4, 4 }
 0x3fd   : > { %v968_v36 = vsel %vm793_vm10, %v967_v28, %v961_v55  ;;  %v993_v39 = vrot.slane %v992_v32, 4  ;;  %v996_v40 = vsel %vm793_vm10, %v992_v32, %v995_v16 }
 0x3fe   : > { %v974_v41 = vperm.slane %v968_v36, %v5292_v60  ;;  %v981_v42 = vrot.slane %v978_v34, 4  ;;  %v1004_v43 = vperm.slane %v996_v40, %v5292_v60  ;;  %v1148_v44 = vsel %vm793_vm10, %v1147_v31, %v1140_v35 }
 0x3ff   : > { %v994_v47 = vsel %vm793_vm10, %v993_v39, %v987_v1  ;;  %v1152_v5 = vperm.slane %v1148_v44, %v5292_v60  ;;  %v1134_v48 = vrot.slane %v1133_v18, 4  ;;  %v1220_v59 = vshrl.u32 %v1133_v18, 16 }
 0x400   : > { %v979_v49 = vrot.slane %v974_v41, 4  ;;  %v982_v50 = vsel %vm793_vm10, 0, %v981_v42  ;;  %v1000_v51 = vperm.slane %v994_v47, %v5292_v60  ;;  %v1007_v53 = vrot.slane %v1004_v43, 4 }
 0x401   : > { %v1160_v37 = vrot.slane %v982_v50, 4  ;;  %v1219_v38 = vpack.i.b16 %v1152_v5, %v1133_v18  ;;  %v1221_v54 = vshrl.u32 %v1152_v5, 16  ;;  %v1155_v61 = vsel %vm793_vm10, %v981_v42, %v974_v41 }
 0x402   : > { %v980_v55 = vsel %vm793_vm10, 0, %v979_v49  ;;  %v1005_v57 = vrot.slane %v1000_v51, 4  ;;  %v1008_v58 = vsel %vm793_vm10, 0, %v1007_v53  ;;  %v1135_v7 = vsel %vm793_vm10, 0, %v1134_v48 }
 0x403   : > { %v1161_v62 = vsel %vm793_vm10, %v1160_v37, %v980_v55  ;;  %v1179_v0 = vrot.slane %v1008_v58, 4  ;;  %v1527_v1 = vsel %vm1525_vm12, %v1219_v38, 0  ;;  %v1222_v6 = vpack.i.b16 %v1221_v54, %v1220_v59 }
 0x404   : > { %v1006_v3 = vsel %vm793_vm10, 0, %v1005_v57  ;;  %1536 = vmatpush.bf16.msra.mxu1 %v1527_v1  ;;  %v1153_v9 = vrot.slane %v1152_v5, 4  ;;  %1711 = vrot.lane.b32.xlu1 %v5222_v25, %s4944_s7  ;;  %v1174_v10 = vsel %vm793_vm10, %v1007_v53, %v1000_v51  ;;  %v1165_v11 = vperm.slane %v1161_v62, %v5287_v46 }
 0x405   : > { %v1180_v13 = vsel %vm793_vm10, %v1179_v0, %v1006_v3  ;;  %v1159_v14 = vperm.slane %v1155_v61, %v5287_v46  ;;  %v1565_v15 = vsel %vm1525_vm12, %v1222_v6, 0  ;;  %v1226_v22 = vshrl.u32 %v1135_v7, 16 }
 0x406   : > { %v1154_v17 = vsel %vm793_vm10, 0, %v1153_v9  ;;  %v1184_v20 = vperm.slane %v1180_v13, %v5287_v46  ;;  %1574 = vmatpush.bf16.msra.mxu3 %v1565_v15  ;;  %v1166_v26 = vrot.slane %v1165_v11, 4  ;;  %v1178_v25 = vperm.slane %v1174_v10, %v5287_v46 }
 0x407   : > { %v1225_v21 = vpack.i.b16 %v1154_v17, %v1135_v7  ;;  %v1227_v24 = vshrl.u32 %v1154_v17, 16 }
 0x408   : > { %v1185_v4 = vrot.slane %v1184_v20, 4  ;;  %v1167_v30 = vsel %vm793_vm10, %v1166_v26, %v1159_v14 }
 0x409   : > { %v1603_v16 = vsel %vm1525_vm12, %v1225_v21, 0  ;;  %v1228_v28 = vpack.i.b16 %v1227_v24, %v1226_v22  ;;  %v1171_v32 = vperm.slane %v1167_v30, %v5292_v60 }
 0x40a   : > { %1612 = vmatpush.bf16.msrb.mxu1 %v1603_v16  ;;  %v1186_v33 = vsel %vm793_vm10, %v1185_v4, %v1178_v25 }
 0x40b   : > { %v1641_v34 = vsel %vm1525_vm12, %v1228_v28, 0  ;;  %v1190_v18 = vperm.slane %v1186_v33, %v5292_v60  ;;  %v1172_v35 = vrot.slane %v1171_v32, 4  ;;  %v1256_v36 = vshrl.u32 %v1171_v32, 16 }
 0x40c   : > { %1650 = vmatpush.bf16.msrb.mxu3 %v1641_v34 }
 0x40d   : > { %v1255_v31 = vpack.i.b16 %v1190_v18, %v1171_v32  ;;  %v1257_v39 = vshrl.u32 %v1190_v18, 16  ;;  %v1191_v40 = vrot.slane %v1190_v18, 4  ;;  %v1173_v41 = vsel %vm793_vm10, 0, %v1172_v35 }
 0x40e   : > { %v1262_v5 = vshrl.u32 %v1173_v41, 16 }
 0x40f   : > { %v1546_v42 = vsel %vm1525_vm12, %v1255_v31, 0  ;;  %v1258_v43 = vpack.i.b16 %v1257_v39, %v1256_v36  ;;  %v1192_v44 = vsel %vm793_vm10, 0, %v1191_v40 }
 0x410   : > { %1555 = vmatpush.bf16.msra.mxu2 %v1546_v42  ;;  %v1261_v47 = vpack.i.b16 %v1192_v44, %v1173_v41  ;;  %v1263_v48 = vshrl.u32 %v1192_v44, 16 }
 0x411   : > { %v1584_v49 = vsel %vm1525_vm12, %v1258_v43, 0 }
 0x412   : > { %1593 = vmatpush.bf16.msrb.mxu0 %v1584_v49  ;;  %v1622_v50 = vsel %vm1525_vm12, %v1261_v47, 0  ;;  %v1264_v51 = vpack.i.b16 %v1263_v48, %v1262_v5 }
 0x414   : > { %1631 = vmatpush.bf16.msrb.mxu2 %v1622_v50  ;;  %v1660_v53 = vsel %vm1525_vm12, %v1264_v51, 0 }
 0x416   : > { %1669 = vmatpush.bf16.msra.mxu0 %v1660_v53 }
 0x445   : > { %v1476_v37 = vpop.xlane.xlu1 %1475 }
 0x446   : > { %4589 = vrcp.f32 %v1476_v37 }
 0x44c   : > { %v4590_v38 = vpop.eup %4589 }
 0x44d   : > { %v1506_v54 = vmul.f32 %v4590_v38, %v5418_v45 }
 0x44e   : > { %v1482_v55 = vpop.xlane.xlu0 %1481 }
 0x44f   : > { %4591 = vrcp.f32 %v1482_v55  ;;  %v1514_v57 = vpack.c.bf16 %v1506_v54, %v1506_v54 }
 0x451   : > { %v1479_v58 = vpop.xlane.xlu2 %1478  ;;  %4043 = vmatmul.msk.bf16.vlgmr.msra.gmra.mxu1 %vm1265_vm11, %v1514_v57 }
 0x452   : > { %4593 = vrcp.f32 %v1479_v58 }
 0x455   : > { %v4592_v59 = vpop.eup %4591 }
 0x456   : > { %v1508_v61 = vmul.f32 %v4592_v59, %v5422_v52 }
 0x458   : > { %v4594_v62 = vpop.eup %4593  ;;  %v1516_v0 = vpack.c.bf16 %v1508_v61, %v1508_v61 }
 0x459   : > { %v1507_v1 = vmul.f32 %v4594_v62, %v5426_v56  ;;  %v1485_v3 = vpop.xlane.xlu2 %1484 }
 0x45a   : > { %4595 = vrcp.f32 %v1485_v3  ;;  %4045 = vmatmul.msk.bf16.vlgmr.msra.gmra.mxu3 %vm1265_vm11, %v1516_v0  ;;  %v5556_v0 = vld [vmem:[%s5208_s3] sm:$0xff] }
 0x45b   : > { %v1515_v6 = vpack.c.bf16 %v1507_v1, %v1507_v1  ;;  %v1708_v1 = vperm.slane %v5556_v0, 3 }
 0x45d   : > { %4044 = vmatmul.msk.bf16.vlgmr.msra.gmra.mxu2 %vm1265_vm11, %v1515_v6 }
 0x45e   : > { %v1494_v45 = vpop.xlane.xlu1 %1493 }
 0x45f   : > { %4597 = vrcp.f32 %v1494_v45  ;;  %v4646_v45 = vld [vmem:[#allocation12] sm:$0xff] }
 0x460   : > { %v4596_v7 = vpop.eup %4595 }
 0x461   : > { %v1509_v9 = vmul.f32 %v4596_v7, %v5430_v2  ;;  %v1488_v10 = vpop.xlane.xlu2 %1487  ;;  %v1491_v11 = vpop.xlane.xlu0 %1490 }
 0x462   : > { %4599 = vrcp.f32 %v1488_v10 }
 0x463   : > { %v1517_v52 = vpack.c.bf16 %v1509_v9, %v1509_v9  ;;  %4601 = vrcp.f32 %v1491_v11 }
 0x465   : > { %v4598_v13 = vpop.eup %4597  ;;  %4046 = vmatmul.msk.bf16.vlgmr.msrb.gmra.mxu0 %vm1265_vm11, %v1517_v52  ;;  %v4647_v52 = vld [vmem:[#allocation12 + $0x8] sm:$0xff] }
 0x466   : > { %v1512_v56 = vmul.f32 %v4598_v13, %v5436_v19 }
 0x468   : > { %v4600_v14 = vpop.eup %4599  ;;  %v1520_v15 = vpack.c.bf16 %v1512_v56, %v1512_v56 }
 0x469   : > { %v4602_v17 = vpop.eup %4601  ;;  %v1510_v20 = vmul.f32 %v4600_v14, %v5439_v23  ;;  %v1497_v21 = vpop.xlane.xlu0 %1496  ;;  %v4361_v14 = vld [vmem:[%s5196_s24 + $0x14] sm:$0xf] }
 0x46a   : > { %v1511_v22 = vmul.f32 %v4602_v17, %v5445_v27  ;;  %4603 = vrcp.f32 %v1497_v21  ;;  %4049 = vmatmul.msk.bf16.vlgmr.msrb.gmra.mxu3 %vm1265_vm11, %v1520_v15  ;;  %v4056_v15 = vld [vmem:[%s5196_s24 + $0x18] sm:$0xf0]  ;;  %v4052_v21 = vld [vmem:[%s5196_s24 + $0x8] sm:$0xf0] }
 0x46b   : > { %v1518_v2 = vpack.c.bf16 %v1510_v20, %v1510_v20  ;;  %v5569_v17 = vor.u32 %v4361_v14, %v4056_v15  ;;  %v4359_v20 = vld [vmem:[%s5196_s24 + $0x4] sm:$0xf]  ;;  %v1785_v15 = vperm.slane %v5556_v0, 4 }
 0x46c   : > { %v1519_v24 = vpack.c.bf16 %v1511_v22, %v1511_v22  ;;  %v5576_v22 = vor.u32 %v4359_v20, %v4052_v21 }
 0x46d   : > { %4047 = vmatmul.msk.bf16.vlgmr.msrb.gmra.mxu1 %vm1265_vm11, %v1518_v2  ;;  %1803 = vmatpush.bf16.msra.mxu2 %v5569_v17 }
 0x46e   : > { %4048 = vmatmul.msk.bf16.vlgmr.msrb.gmra.mxu2 %vm1265_vm11, %v1519_v24 }
 0x470   : > { %v4604_v26 = vpop.eup %4603 }
 0x471   : > { %v1513_v19 = vmul.f32 %v4604_v26, %v5461_v8  ;;  %1804 = vmatpush.bf16.msra.mxu2 %v5576_v22 }
 0x473   : > { %v1521_v25 = vpack.c.bf16 %v1513_v19, %v1513_v19 }
 0x475   : > { %4050 = vmatmul.msk.bf16.vlgmr.msra.gmra.mxu0 %vm1265_vm11, %v1521_v25 }
 0x476   : > { %v1712_v44 = vpop.permute.xlu1 %1711 }
 0x477   : > { %1724 = vmatpush.bf16.msra.mxu1 %v1712_v44 }
 0x4ce   : > { %v1538_v4 = vpop.f32.mrf.mxu1 }
 0x4d6   : > { %v1540_v23 = vpop.f32.mrf.mxu1 }
 0x4dd   : > { %v1576_v16 = vpop.f32.mrf.mxu3 }
 0x4e0   : > { %v1557_v28 = vpop.f32.mrf.mxu2 }
 0x4e2   : > { %v1595_v27 = vpop.f32.mrf.mxu0 }
 0x4e3   : > { %v4537_v30 = vpack.i.bf16 %v1595_v27, %v1576_v16 }
 0x4e5   : > { %4538 = vrot.lane.b32.xlu2 %v4537_v30, %s4958_s9  ;;  %v1578_v32 = vpop.f32.mrf.mxu3 }
 0x4e8   : > { %v1559_v33 = vpop.f32.mrf.mxu2 }
 0x4ea   : > { %v1597_v34 = vpop.f32.mrf.mxu0  ;;  %v1614_v18 = vpop.f32.mrf.mxu1 }
 0x4ed   : > { %v1652_v35 = vpop.f32.mrf.mxu3 }
 0x4f1   : > { %v1633_v31 = vpop.f32.mrf.mxu2 }
 0x4f2   : > { %v4547_v36 = vpack.i.bf16 %v1633_v31, %v1614_v18  ;;  %v1616_v8 = vpop.f32.mrf.mxu1  ;;  %v1671_v39 = vpop.f32.mrf.mxu0 }
 0x4f3   : > { %v4542_v40 = vpack.i.bf16 %v1671_v39, %v1652_v35 }
 0x4f4   : > { %4548 = vrot.lane.b32.xlu0 %v4547_v36, %s4959_s13 }
 0x4f5   : > { %4543 = vrot.lane.b32.xlu1 %v4542_v40, %s4960_s17  ;;  %v1654_v41 = vpop.f32.mrf.mxu3 }
 0x4f6   : > { %v1811_v41 = vld [vmem:[#allocation5] sm:$0xff] }
 0x4f9   : > { %v1635_v42 = vpop.f32.mrf.mxu2 }
 0x4fa   : > { %v1673_v43 = vpop.f32.mrf.mxu0  ;;  %v1812_v42 = vld [vmem:[#allocation5 + $0x8] sm:$0xff] }
 0x4fc   : > { %1709 = vrot.lane.b32.xlu0 %v5227_v29, %s4944_s7 }
 0x53f   : > { %v4539_v47 = vpop.permute.xlu2 %4538 }
 0x540   : > { %v4541_v5 = vunpack.i.h.bf16 %v4539_v47  ;;  %v4540_v48 = vunpack.i.l.bf16 %v4539_v47 }
 0x542   : > { %v1700_v37 = vsel %vm1265_vm11, %v1557_v28, %v4541_v5  ;;  %v1699_v38 = vsel %vm1265_vm11, %v1538_v4, %v4540_v48  ;;  %v1813_v5 = vpack.c.bf16 %v1812_v42, %v1811_v41 }
 0x566   : > { %v4549_v49 = vpop.permute.xlu0 %4548 }
 0x567   : > { %v4551_v50 = vunpack.i.h.bf16 %v4549_v49  ;;  %v4550_v51 = vunpack.i.l.bf16 %v4549_v49  ;;  %v4544_v53 = vpop.permute.xlu1 %4543 }
 0x568   : > { %v4546_v54 = vunpack.i.h.bf16 %v4544_v53  ;;  %v4545_v55 = vunpack.i.l.bf16 %v4544_v53 }
 0x569   : > { %v1703_v57 = vsel %vm1701_vm13, %v1700_v37, %v4551_v50  ;;  %v1702_v29 = vsel %vm1701_vm13, %v1699_v38, %v4550_v51  ;;  %v4648_v38 = vld [vmem:[%s5208_s3 + $0x8] sm:$0xff] }
 0x56a   : > { %v1705_v58 = vsel %vm1704_vm14, %v1702_v29, %v4545_v55  ;;  %v1706_v59 = vsel %vm1704_vm14, %v1703_v57, %v4546_v54  ;;  %v1778_v54 = vperm.slane %v4648_v38, 3 }
 0x56b   : > { %v1707_v62 = vpack.c.bf16 %v1706_v59, %v1705_v58  ;;  %v1781_v58 = vperm.slane %v4648_v38, 4 }
 0x56e   : > { %v1710_v61 = vpop.permute.xlu0 %1709 }
 0x56f   : > { %1725 = vmatpush.bf16.msra.mxu1 %v1710_v61 }
 0x572   : > { %4051 = vmatmul.msk.bf16.vlgmr.msra.gmra.mxu1 %vm555_vm1, %v1707_v62 }
 0x5ef   : > { %v1727_v3 = vpop.f32.mrf.mxu1 }
 0x5f0   : > { %v1728_v6 = vadd.f32 %v1727_v3, %v1708_v1 }
 0x5f2   : > { %v5559_v7 = vadd.f32 %v4646_v45, %v1728_v6  ;;  %v1814_v45 = vperm.slane %v5238_v63, 5 }
 0x5f4   : > { %v1734_v9 = vsel %vm555_vm1, %v5559_v7, 0.0 }
 0x5f5   : > { %1735 = vadd.xlane.f32.xlu2 %v1734_v9 }
 0x5f7   : > { %v1729_v10 = vpop.f32.mrf.mxu1 }
 0x5f8   : > { %v1730_v11 = vadd.f32 %v1729_v10, %v1708_v1 }
 0x5fa   : > { %v5563_v13 = vadd.f32 %v4647_v52, %v1730_v11 }
 0x5fc   : > { %v1737_v56 = vsel %vm555_vm1, %v5563_v13, 0.0 }
 0x5fd   : > { %1738 = vadd.xlane.f32.xlu1 %v1737_v56 }
 0x616   : > { %1817 = vrot.lane.b32.xlu1 %v5569_v17, %s4948_s14 }
 0x668   : > { %v1736_v2 = vpop.xlane.xlu2 %1735 }
 0x669   : > { %v1740_v24 = vmul.f32 %v1736_v2, %v5214_v12 }
 0x66b   : > { %v1742_v26 = vsub.f32 %v5559_v7, %v1740_v24 }
 0x66d   : > { %v1744_v19 = vmul.f32 %v1742_v26, %v1742_v26 }
 0x66f   : > { %v1746_v25 = vsel %vm555_vm1, %v1744_v19, 0.0 }
 0x670   : > { %v1739_v4 = vpop.xlane.xlu1 %1738  ;;  %1747 = vadd.xlane.f32.xlu0 %v1746_v25 }
 0x671   : > { %v1741_v23 = vmul.f32 %v1739_v4, %v5214_v12 }
 0x673   : > { %v1743_v16 = vsub.f32 %v5563_v13, %v1741_v23 }
 0x675   : > { %v1745_v28 = vmul.f32 %v1743_v16, %v1743_v16 }
 0x677   : > { %v1749_v27 = vsel %vm555_vm1, %v1745_v28, 0.0 }
 0x678   : > { %1750 = vadd.xlane.f32.xlu2 %v1749_v27 }
 0x684   : > { %1815 = vrot.lane.b32.xlu0 %v5576_v22, %s4948_s14 }
 0x688   : > { %v1818_v30 = vpop.permute.xlu1 %1817 }
 0x689   : > { %1830 = vmatpush.bf16.msra.mxu3 %v1818_v30 }
 0x6e3   : > { %v1748_v32 = vpop.xlane.xlu0 %1747 }
 0x6e4   : > { %v1752_v33 = vmul.f32 %v1748_v32, %v5214_v12 }
 0x6e6   : > { %v1754_v34 = vadd.f32 1e-05, %v1752_v33 }
 0x6e8   : > { %4605 = vrsqrt.f32 %v1754_v34  ;;  %vm1762_vm0 = vweird.f32 %v1754_v34 }
 0x6eb   : > { %v1751_v18 = vpop.xlane.xlu2 %1750 }
 0x6ec   : > { %v1753_v35 = vmul.f32 %v1751_v18, %v5214_v12 }
 0x6ee   : > { %v4606_v31 = vpop.eup %4605  ;;  %v1755_v36 = vadd.f32 1e-05, %v1753_v35 }
 0x6ef   : > { %v1757_v8 = vmul.f32 %v4606_v31, %v1754_v34  ;;  %vm1763_vm15 = vweird.f32 %v4606_v31 }
 0x6f0   : > { %4607 = vrsqrt.f32 %v1755_v36  ;;  %vm1764_vm2 = vmor %vm1762_vm0, %vm1763_vm15  ;;  %vm1772_vm4 = vweird.f32 %v1755_v36 }
 0x6f1   : > { %v1758_v39 = vmul.f32 %v4606_v31, %v1757_v8 }
 0x6f3   : > { %v1759_v40 = vmul.f32 0.5, %v1758_v39 }
 0x6f5   : > { %v1760_v43 = vsub.f32 1.5, %v1759_v40 }
 0x6f6   : > { %v4608_v44 = vpop.eup %4607  ;;  %v1816_v47 = vpop.permute.xlu0 %1815 }
 0x6f7   : > { %v1761_v48 = vmul.f32 %v4606_v31, %v1760_v43  ;;  %v1767_v49 = vmul.f32 %v4608_v44, %v1755_v36  ;;  %1831 = vmatpush.bf16.msra.mxu3 %v1816_v47  ;;  %vm1773_vm3 = vweird.f32 %v4608_v44 }
 0x6f8   : > { %vm1774_vm5 = vmor %vm1772_vm4, %vm1773_vm3 }
 0x6f9   : > { %v1768_v50 = vmul.f32 %v4608_v44, %v1767_v49  ;;  %v1765_v51 = vsel %vm1764_vm2, %v4606_v31, %v1761_v48 }
 0x6fa   : > { %4061 = vmatmul.msk.bf16.vlgmr.msra.gmra.mxu3 %vm555_vm1, %v1813_v5  ;;  %v1776_v55 = vmul.f32 %v1765_v51, %v1742_v26 }
 0x6fb   : > { %v1769_v53 = vmul.f32 0.5, %v1768_v50 }
 0x6fc   : > { %v1779_v59 = vmul.f32 %v1778_v54, %v1776_v55 }
 0x6fd   : > { %v1770_v37 = vsub.f32 1.5, %v1769_v53 }
 0x6fe   : > { %v1782_v1 = vadd.f32 %v1781_v58, %v1779_v59 }
 0x6ff   : > { %v1771_v57 = vmul.f32 %v4608_v44, %v1770_v37 }
 0x701   : > { %v1775_v29 = vsel %vm1774_vm5, %v4608_v44, %v1771_v57 }
 0x702   : > { %v1777_v61 = vmul.f32 %v1775_v29, %v1743_v16 }
 0x704   : > { %v1780_v62 = vmul.f32 %v1778_v54, %v1777_v61 }
 0x706   : > { %v1783_v3 = vadd.f32 %v1781_v58, %v1780_v62 }
 0x708   : > { %v1784_v6 = vpack.c.bf16 %v1783_v3, %v1782_v1 }
 0x70a   : > { %4060 = vmatmul.msk.bf16.vlgmr.msra.gmra.mxu2 %vm555_vm1, %v1784_v6 }
 0x77d   : > { %v1833_v9 = vpop.f32.mrf.mxu3 }
 0x77e   : > { %v1834_v10 = vadd.f32 %v1833_v9, %v1814_v45 }
 0x780   : > { %v2082_v11 = vpack.c.bf16 %v1834_v10, %v1834_v10 }
 0x782   : > { %2110 = vrot.lane.b32.xlu1 %v2082_v11, %s4947_s26  ;;  %2104 = vrot.lane.b32.xlu2 %v2082_v11, %s4948_s14 }
 0x785   : > { %v1835_v52 = vpop.f32.mrf.mxu3 }
 0x786   : > { %v1836_v56 = vadd.f32 %v1835_v52, %v1814_v45 }
 0x788   : > { %v2083_v14 = vpack.c.bf16 %v1836_v56, %v1836_v56 }
 0x78a   : > { %2106 = vrot.lane.b32.xlu0 %v2083_v14, %s4948_s14  ;;  %2088 = vrot.lane.b32.xlu1 %v2083_v14, %s4946_s20 }
 0x78b   : > { %2112 = vrot.lane.b32.xlu2 %v2083_v14, %s4947_s26 }
 0x78d   : > { %v1806_v63 = vpop.f32.mrf.mxu2 }
 0x78e   : > { %v1807_v20 = vadd.f32 %v1806_v63, %v1785_v15 }
 0x790   : > { %v5605_v21 = vpack.c.bf16 %v1807_v20, %v1807_v20 }
 0x792   : > { %2086 = vrot.lane.b32.xlu0 %v2082_v11, %s4946_s20  ;;  %2122 = vrot.lane.b32.xlu1 %v2082_v11, %s4949_s19  ;;  %v1857_v56 = vshrl.u32 %v5605_v21, 16 }
 0x793   : > { %2116 = vrot.lane.b32.xlu2 %v2082_v11, %s4951_s23 }
 0x795   : > { %v1808_v2 = vpop.f32.mrf.mxu2 }
 0x796   : > { %v1809_v24 = vadd.f32 %v1808_v2, %v1785_v15 }
 0x798   : > { %v1839_v26 = vpack.c.bf16 %v1809_v24, %v1809_v24 }
 0x79a   : > { %2118 = vrot.lane.b32.xlu0 %v2083_v14, %s4951_s23  ;;  %2094 = vrot.lane.b32.xlu1 %v2083_v14, %s4950_s11  ;;  %v1869_v48 = vshrl.u32 %v1839_v26, 16 }
 0x79b   : > { %2124 = vrot.lane.b32.xlu2 %v2083_v14, %s4949_s19 }
 0x7a2   : > { %2092 = vrot.lane.b32.xlu0 %v2082_v11, %s4950_s11  ;;  %1842 = vrot.lane.b32.xlu1 %v5605_v21, %s4946_s20 }
 0x7a3   : > { %2098 = vrot.lane.b32.xlu2 %v2082_v11, %s4952_s12 }
 0x7aa   : > { %2100 = vrot.lane.b32.xlu0 %v2083_v14, %s4952_s12  ;;  %1848 = vrot.lane.b32.xlu1 %v1839_v26, %s4950_s11 }
 0x7ab   : > { %1844 = vrot.lane.b32.xlu2 %v1839_v26, %s4946_s20 }
 0x7b2   : > { %1846 = vrot.lane.b32.xlu0 %v5605_v21, %s4950_s11 }
 0x7b3   : > { %1850 = vrot.lane.b32.xlu2 %v5605_v21, %s4952_s12 }
 0x7ba   : > { %1852 = vrot.lane.b32.xlu0 %v1839_v26, %s4952_s12 }
 0x7dc   : > { %v2105_v0 = vpop.permute.xlu2 %2104 }
 0x7dd   : > { %v2128_v8 = vrot.slane %v2105_v0, 4 }
 0x7df   : > { %v2129_v49 = vsel %vm793_vm10, %v2128_v8, %v2082_v11 }
 0x7e0   : > { %v2133_v58 = vperm.slane %v2129_v49, %v5287_v46 }
 0x7e2   : > { %v2142_v10 = vrot.slane %v2133_v58, 4 }
 0x7e5   : > { %v2113_v19 = vpop.permute.xlu2 %2112 }
 0x7e6   : > { %v2212_v43 = vrot.slane %v2113_v19, 4 }
 0x7ed   : > { %v2117_v25 = vpop.permute.xlu2 %2116 }
 0x7f4   : > { %v2111_v4 = vpop.permute.xlu1 %2110 }
 0x7f5   : > { %v5619_v23 = vpop.permute.xlu2 %2124  ;;  %v2156_v30 = vrot.slane %v2111_v4, 4 }
 0x7f6   : > { %v2218_v63 = vrot.slane %v5619_v23, 4 }
 0x7fc   : > { %v2107_v16 = vpop.permute.xlu0 %2106  ;;  %v2089_v28 = vpop.permute.xlu1 %2088 }
 0x7fd   : > { %v2099_v27 = vpop.permute.xlu2 %2098  ;;  %v2184_v34 = vrot.slane %v2107_v16, 4  ;;  %v2213_v50 = vsel %vm793_vm10, %v2212_v43, %v2089_v28 }
 0x7fe   : > { %v5636_v59 = vperm.slane %v2213_v50, %v5287_v46 }
 0x7ff   : > { %v2185_v44 = vsel %vm793_vm10, %v2184_v34, %v2083_v14  ;;  %v2134_v14 = vrot.slane %v2117_v25, 4 }
 0x800   : > { %v2189_v51 = vperm.slane %v2185_v44, %v5287_v46  ;;  %v2226_v24 = vrot.slane %v5636_v59, 4 }
 0x802   : > { %v2198_v1 = vrot.slane %v2189_v51, 4 }
 0x804   : > { %v2087_v32 = vpop.permute.xlu0 %2086  ;;  %v2123_v33 = vpop.permute.xlu1 %2122 }
 0x805   : > { %v2157_v18 = vsel %vm793_vm10, %v2156_v30, %v2087_v32  ;;  %v2162_v35 = vrot.slane %v2123_v33, 4  ;;  %v1845_v31 = vpop.permute.xlu2 %1844 }
 0x806   : > { %v2161_v36 = vperm.slane %v2157_v18, %v5287_v46  ;;  %v1870_v42 = vshrl.u32 %v1845_v31, 16  ;;  %v1868_v37 = vpack.i.b16 %v1845_v31, %v1839_v26 }
 0x807   : > { %v2163_v39 = vsel %vm793_vm10, %v2162_v35, %v2099_v27 }
 0x808   : > { %v2170_v40 = vrot.slane %v2161_v36, 4  ;;  %v2167_v41 = vperm.slane %v2163_v39, %v5287_v46  ;;  %v1871_v38 = vpack.i.b16 %v1870_v42, %v1869_v48  ;;  %v5643_v3 = vperm.slane %v1868_v37, %v5287_v46 }
 0x80a   : > { %v2168_v47 = vrot.slane %v2167_v41, 4  ;;  %v2171_v5 = vsel %vm793_vm10, %v2167_v41, %v2170_v40  ;;  %v5646_v6 = vperm.slane %v1871_v38, %v5287_v46  ;;  %v1942_v26 = vrot.slane %v5643_v3, 4 }
 0x80b   : > { %v5632_v57 = vperm.slane %v2171_v5, %v5292_v60 }
 0x80c   : > { %v2169_v53 = vsel %vm793_vm10, %v2168_v47, %v2161_v36  ;;  %v2119_v54 = vpop.permute.xlu0 %2118  ;;  %v2095_v55 = vpop.permute.xlu1 %2094  ;;  %v1968_v0 = vrot.slane %v5646_v6, 4 }
 0x80d   : > { %v2190_v29 = vrot.slane %v2119_v54, 4  ;;  %v5639_v61 = vperm.slane %v2169_v53, %v5292_v60  ;;  %v2182_v9 = vrot.slane %v5632_v57, 4  ;;  %v5657_v2 = vpop.permute.xlu2 %1850  ;;  %v2261_v30 = vshrl.u32 %v5632_v57, 16 }
 0x80e   : > { %v1864_v31 = vshrl.u32 %v5657_v2, 16 }
 0x80f   : > { %v2191_v62 = vsel %vm793_vm10, %v2190_v29, %v2095_v55  ;;  %v2180_v15 = vrot.slane %v5639_v61, 4  ;;  %v2183_v27 = vsel %vm793_vm10, 0, %v2182_v9  ;;  %v2245_v18 = vshrl.u32 %v5639_v61, 16 }
 0x810   : > { %v2195_v45 = vperm.slane %v2191_v62, %v5287_v46  ;;  %v2269_v40 = vshrl.u32 %v2183_v27, 16 }
 0x811   : > { %v2181_v36 = vsel %vm793_vm10, 0, %v2180_v15 }
 0x812   : > { %v2196_v11 = vrot.slane %v2195_v45, 4  ;;  %v2199_v52 = vsel %vm793_vm10, %v2195_v45, %v2198_v1  ;;  %v2253_v48 = vshrl.u32 %v2181_v36, 16 }
 0x813   : > { %v5655_v20 = vperm.slane %v2199_v52, %v5292_v60 }
 0x814   : > { %v2197_v19 = vsel %vm793_vm10, %v2196_v11, %v2189_v51  ;;  %v2093_v4 = vpop.permute.xlu0 %2092  ;;  %v1843_v16 = vpop.permute.xlu1 %1842 }
 0x815   : > { %v5664_v25 = vperm.slane %v2197_v19, %v5292_v60  ;;  %v2210_v23 = vrot.slane %v5655_v20, 4  ;;  %v2135_v28 = vsel %vm793_vm10, %v2134_v14, %v2093_v4  ;;  %v1856_v33 = vpack.i.b16 %v1843_v16, %v5605_v21 }
 0x816   : > { %v2139_v32 = vperm.slane %v2135_v28, %v5287_v46  ;;  %v1858_v34 = vshrl.u32 %v1843_v16, 16  ;;  %v2292_v47 = vshrl.u32 %v5655_v20, 16 }
 0x817   : > { %v2208_v35 = vrot.slane %v5664_v25, 4  ;;  %v5681_v43 = vsel %vm793_vm10, 0, %v2210_v23  ;;  %v5685_v44 = vperm.slane %v1856_v33, %v5287_v46  ;;  %v2276_v38 = vshrl.u32 %v5664_v25, 16 }
 0x818   : > { %v2140_v8 = vrot.slane %v2139_v32, 4  ;;  %v2143_v39 = vsel %vm793_vm10, %v2139_v32, %v2142_v10  ;;  %v1859_v41 = vpack.i.b16 %v1858_v34, %v1857_v56  ;;  %v2300_v55 = vshrl.u32 %v5681_v43, 16 }
 0x819   : > { %v5678_v42 = vsel %vm793_vm10, 0, %v2208_v35  ;;  %v2151_v21 = vperm.slane %v2143_v39, %v5292_v60  ;;  %v1890_v29 = vrot.slane %v5685_v44, 4 }
 0x81a   : > { %v2141_v5 = vsel %vm793_vm10, %v2140_v8, %v2133_v58  ;;  %v5690_v49 = vperm.slane %v1859_v41, %v5287_v46  ;;  %v2284_v54 = vshrl.u32 %v5678_v42, 16 }
 0x81b   : > { %v2147_v50 = vperm.slane %v2141_v5, %v5292_v60  ;;  %v2154_v51 = vrot.slane %v2151_v21, 4  ;;  %v2258_v53 = vpack.i.b16 %v5632_v57, %v2151_v21  ;;  %v2260_v37 = vshrl.u32 %v2151_v21, 16 }
 0x81c   : > { %v2101_v62 = vpop.permute.xlu0 %2100  ;;  %v5700_v56 = vpop.permute.xlu1 %1848  ;;  %v1916_v19 = vrot.slane %v5690_v49, 4 }
 0x81d   : > { %v2152_v58 = vrot.slane %v2147_v50, 4  ;;  %v2155_v1 = vsel %vm793_vm10, 0, %v2154_v51  ;;  %v2242_v45 = vpack.i.b16 %v5639_v61, %v2147_v50  ;;  %v2244_v9 = vshrl.u32 %v2147_v50, 16 }
 0x81e   : > { %v2262_v10 = vpack.i.b16 %v2261_v30, %v2260_v37  ;;  %v2266_v11 = vpack.i.b16 %v2183_v27, %v2155_v1  ;;  %v2268_v52 = vshrl.u32 %v2155_v1, 16  ;;  %v2304_v57 = vrot.slane %v2258_v53, 4 }
 0x81f   : > { %v2153_v14 = vsel %vm793_vm10, 0, %v2152_v58  ;;  %v2246_v15 = vpack.i.b16 %v2245_v18, %v2244_v9  ;;  %v2219_v4 = vsel %vm793_vm10, %v2218_v63, %v2101_v62  ;;  %v1875_v27 = vshrl.u32 %v5700_v56, 16 }
 0x820   : > { %v2250_v16 = vpack.i.b16 %v2181_v36, %v2153_v14  ;;  %v2252_v23 = vshrl.u32 %v2153_v14, 16  ;;  %v2270_v28 = vpack.i.b16 %v2269_v40, %v2268_v52  ;;  %v2310_v32 = vrot.slane %v2266_v11, 4 }
 0x821   : > { %v2332_v33 = vrot.slane %v2262_v10, 4  ;;  %v2223_v61 = vperm.slane %v2219_v4, %v5287_v46  ;;  %v2305_v30 = vsel %vm793_vm10, %v2304_v57, %v2242_v45 }
 0x822   : > { %v2254_v34 = vpack.i.b16 %v2253_v48, %v2252_v23  ;;  %v2338_v35 = vrot.slane %v2270_v28, 4  ;;  %v5709_v8 = vperm.slane %v2305_v30, %v5287_v46  ;;  %v2311_v18 = vsel %vm793_vm10, %v2310_v32, %v2250_v16 }
 0x823   : > { %v2224_v39 = vrot.slane %v2223_v61, 4  ;;  %v2227_v63 = vsel %vm793_vm10, %v2223_v61, %v2226_v24  ;;  %v5716_v36 = vperm.slane %v2311_v18, %v5287_v46  ;;  %v2333_v40 = vsel %vm793_vm10, %v2332_v33, %v2246_v15 }
 0x824   : > { %v2235_v41 = vperm.slane %v2227_v63, %v5292_v60  ;;  %v1847_v21 = vpop.permute.xlu0 %1846  ;;  %v5721_v5 = vperm.slane %v2333_v40, %v5287_v46  ;;  %v2339_v48 = vsel %vm793_vm10, %v2338_v35, %v2254_v34  ;;  %v2318_v50 = vrot.slane %v5709_v8, 4 }
 0x825   : > { %v2225_v51 = vsel %vm793_vm10, %v2224_v39, %v5636_v59  ;;  %v1862_v24 = vpack.i.b16 %v5657_v2, %v1847_v21  ;;  %v1863_v53 = vshrl.u32 %v1847_v21, 16  ;;  %v2316_v37 = vrot.slane %v5716_v36, 4 }
 0x826   : > { %v5730_v62 = vperm.slane %v2225_v51, %v5292_v60  ;;  %v2238_v58 = vrot.slane %v2235_v41, 4  ;;  %v2290_v1 = vpack.i.b16 %v2235_v41, %v5655_v20  ;;  %v2293_v45 = vshrl.u32 %v2235_v41, 16 }
 0x827   : > { %v1865_v9 = vpack.i.b16 %v1864_v31, %v1863_v53  ;;  %v1887_v10 = vperm.slane %v1862_v24, %v5287_v46  ;;  %v2317_v59 = vsel %vm793_vm10, %v2316_v37, %v5709_v8  ;;  %v5739_v11 = vperm.slane %v2339_v48, %v5287_v46 }
 0x828   : > { %v2236_v52 = vrot.slane %v5730_v62, 4  ;;  %v2239_v57 = vsel %vm793_vm10, 0, %v2238_v58  ;;  %v2274_v14 = vpack.i.b16 %v5730_v62, %v5664_v25  ;;  %v2277_v15 = vshrl.u32 %v5730_v62, 16 }
 0x829   : > { %v5748_v2 = vpack.i.b16 %v2293_v45, %v2292_v47  ;;  %v2298_v31 = vpack.i.b16 %v2239_v57, %v5681_v43  ;;  %v2301_v4 = vshrl.u32 %v2239_v57, 16  ;;  %v5751_v16 = vrot.slane %v2290_v1, 4 }
 0x82a   : > { %v5754_v23 = vsel %vm793_vm10, 0, %v2236_v52  ;;  %v5756_v28 = vpack.i.b16 %v2277_v15, %v2276_v38  ;;  %v1888_v32 = vrot.slane %v1887_v10, 4  ;;  %v1891_v33 = vsel %vm793_vm10, %v1887_v10, %v1890_v29 }
 0x82b   : > { %v2282_v61 = vpack.i.b16 %v5754_v23, %v5678_v42  ;;  %v2285_v20 = vshrl.u32 %v5754_v23, 16  ;;  %v5764_v47 = vpack.i.b16 %v2301_v4, %v2300_v55  ;;  %v5766_v30 = vrot.slane %v2298_v31, 4 }
 0x82c   : > { %v2388_v34 = vrot.slane %v5748_v2, 4  ;;  %v1889_v38 = vsel %vm793_vm10, %v1888_v32, %v5685_v44  ;;  %v1899_v35 = vperm.slane %v1891_v33, %v5292_v60  ;;  %v1913_v29 = vperm.slane %v1865_v9, %v5287_v46  ;;  %v1853_v18 = vpop.permute.xlu0 %1852 }
 0x82d   : > { %v5775_v39 = vpack.i.b16 %v2285_v20, %v2284_v54  ;;  %v2394_v43 = vrot.slane %v5764_v47, 4  ;;  %v1895_v55 = vperm.slane %v1889_v38, %v5292_v60  ;;  %v1874_v63 = vpack.i.b16 %v1853_v18, %v5700_v56 }
 0x82e   : > { %v1902_v40 = vrot.slane %v1899_v35, 4  ;;  %v1914_v41 = vrot.slane %v1913_v29, 4  ;;  %v1917_v44 = vsel %vm793_vm10, %v1913_v29, %v1916_v19  ;;  %v1876_v21 = vshrl.u32 %v1853_v18, 16 }
 0x82f   : > { %v1900_v48 = vrot.slane %v1895_v55, 4  ;;  %v1925_v51 = vperm.slane %v1917_v44, %v5292_v60  ;;  %v1939_v24 = vperm.slane %v1874_v63, %v5287_v46  ;;  %v5786_v54 = vperm.slane %v2317_v59, %v5292_v60 }
 0x830   : > { %v1903_v53 = vsel %vm793_vm10, 0, %v1902_v40  ;;  %v1915_v37 = vsel %vm793_vm10, %v1914_v41, %v5690_v49  ;;  %v5792_v58 = vsel %vm793_vm10, %v1902_v40, %v1895_v55  ;;  %v1877_v19 = vpack.i.b16 %v1876_v21, %v1875_v27 }
 0x831   : > { %v1901_v1 = vsel %vm793_vm10, 0, %v1900_v48  ;;  %v1921_v45 = vperm.slane %v1915_v37, %v5292_v60  ;;  %v1928_v9 = vrot.slane %v1925_v51, 4  ;;  %v1986_v10 = vperm.slane %v5792_v58, %v5287_v46 }
 0x832   : > { %v1987_v59 = vrot.slane %v1903_v53, 4  ;;  %v1940_v52 = vrot.slane %v1939_v24, 4  ;;  %v1943_v49 = vsel %vm793_vm10, %v1939_v24, %v1942_v26  ;;  %v1965_v57 = vperm.slane %v1877_v19, %v5287_v46 }
 0x833   : > { %v1926_v15 = vrot.slane %v1921_v45, 4  ;;  %v1929_v56 = vsel %vm793_vm10, 0, %v1928_v9  ;;  %v5806_v27 = vsel %vm793_vm10, %v1928_v9, %v1921_v45  ;;  %v1951_v31 = vperm.slane %v1943_v49, %v5292_v60 }
 0x834   : > { %v1988_v4 = vsel %vm793_vm10, %v1987_v59, %v1901_v1  ;;  %v2005_v32 = vperm.slane %v5806_v27, %v5287_v46  ;;  %v2006_v33 = vrot.slane %v1929_v56, 4  ;;  %v1941_v20 = vsel %vm793_vm10, %v1940_v52, %v5643_v3 }
 0x835   : > { %v1927_v26 = vsel %vm793_vm10, 0, %v1926_v15  ;;  %v1992_v38 = vperm.slane %v1988_v4, %v5287_v46  ;;  %v1947_v35 = vperm.slane %v1941_v20, %v5292_v60  ;;  %v1954_v29 = vrot.slane %v1951_v31, 4 }
 0x836   : > { %v2007_v18 = vsel %vm793_vm10, %v2006_v33, %v1927_v26  ;;  %v1966_v55 = vrot.slane %v1965_v57, 4  ;;  %v1969_v63 = vsel %vm793_vm10, %v1965_v57, %v1968_v0  ;;  %v2344_v40 = vrot.slane %v5739_v11, 4 }
 0x837   : > { %v1993_v41 = vrot.slane %v1992_v38, 4  ;;  %v2011_v44 = vperm.slane %v2007_v18, %v5287_v46  ;;  %v1952_v3 = vrot.slane %v1947_v35, 4  ;;  %v1955_v21 = vsel %vm793_vm10, 0, %v1954_v29 }
 0x838   : > { %v1967_v48 = vsel %vm793_vm10, %v1966_v55, %v5646_v6  ;;  %v1977_v51 = vperm.slane %v1969_v63, %v5292_v60  ;;  %v5828_v24 = vsel %vm793_vm10, %v1954_v29, %v1947_v35  ;;  %v2025_v53 = vrot.slane %v1955_v21, 4 }
 0x839   : > { %v2012_v37 = vrot.slane %v2011_v44, 4  ;;  %v1953_v0 = vsel %vm793_vm10, 0, %v1952_v3  ;;  %v1973_v19 = vperm.slane %v1967_v48, %v5292_v60  ;;  %v2024_v1 = vperm.slane %v5828_v24, %v5287_v46 }
 0x83a   : > { %v1980_v45 = vrot.slane %v1977_v51, 4  ;;  %v2026_v9 = vsel %vm793_vm10, %v2025_v53, %v1953_v0  ;;  %v2345_v6 = vsel %vm793_vm10, %v2344_v40, %v5721_v5  ;;  %v2419_v59 = vshrl.u32 %v5786_v54, 16 }
 0x83b   : > { %v1978_v52 = vrot.slane %v1973_v19, 4  ;;  %v2030_v49 = vperm.slane %v2026_v9, %v5287_v46  ;;  %v2351_v57 = vperm.slane %v2345_v6, %v5292_v60  ;;  %v2328_v15 = vrot.slane %v5786_v54, 4 }
 0x83c   : > { %v1981_v56 = vsel %vm793_vm10, 0, %v1980_v45  ;;  %v5843_v31 = vsel %vm793_vm10, %v1980_v45, %v1973_v19  ;;  %v2361_v4 = vsel %vm793_vm10, %v5751_v16, %v2274_v14  ;;  %v2367_v33 = vsel %vm793_vm10, %v5766_v30, %v2282_v61 }
 0x83d   : > { %v1979_v20 = vsel %vm793_vm10, 0, %v1978_v52  ;;  %v2031_v26 = vrot.slane %v2030_v49, 4  ;;  %v2043_v38 = vperm.slane %v5843_v31, %v5287_v46  ;;  %v2044_v35 = vrot.slane %v1981_v56, 4 }
 0x83e   : > { %v2418_v29 = vpack.i.b16 %v2351_v57, %v5786_v54  ;;  %v2420_v18 = vshrl.u32 %v2351_v57, 16  ;;  %v2329_v25 = vsel %vm793_vm10, 0, %v2328_v15  ;;  %v2356_v62 = vrot.slane %v2351_v57, 4 }
 0x83f   : > { %v2045_v14 = vsel %vm793_vm10, %v2044_v35, %v1979_v20  ;;  %v2425_v16 = vshrl.u32 %v2329_v25, 16  ;;  %v5862_v42 = vperm.slane %v2361_v4, %v5287_v46  ;;  %v5865_v23 = vperm.slane %v2367_v33, %v5287_v46 }
 0x840   : > { %v2049_v61 = vperm.slane %v2045_v14, %v5287_v46  ;;  %v2468_v30 = vsel %vm1265_vm11, %v2418_v29, 0  ;;  %v2421_v55 = vpack.i.b16 %v2420_v18, %v2419_v59  ;;  %v2357_v54 = vsel %vm793_vm10, 0, %v2356_v62 }
 0x841   : > { %2477 = vmatpush.bf16.xpose.msrb.mxu0 %v2468_v30  ;;  %v2424_v63 = vpack.i.b16 %v2357_v54, %v2329_v25  ;;  %v2426_v40 = vshrl.u32 %v2357_v54, 16  ;;  %v2372_v44 = vrot.slane %v5865_v23, 4  ;;  %v2389_v3 = vsel %vm793_vm10, %v2388_v34, %v5756_v28 }
 0x842   : > { %v2050_v21 = vrot.slane %v2049_v61, 4  ;;  %v2506_v48 = vsel %vm1265_vm11, %v2421_v55, 0  ;;  %v5877_v51 = vperm.slane %v2389_v3, %v5287_v46  ;;  %v2395_v53 = vsel %vm793_vm10, %v2394_v43, %v5775_v39 }
 0x843   : > { %2515 = vmatpush.bf16.xpose.msrb.mxu2 %v2506_v48  ;;  %v2544_v0 = vsel %vm1265_vm11, %v2424_v63, 0  ;;  %v2427_v19 = vpack.i.b16 %v2426_v40, %v2425_v16  ;;  %v2373_v2 = vsel %vm793_vm10, %v2372_v44, %v5862_v42  ;;  %v2399_v28 = vperm.slane %v2395_v53, %v5287_v46 }
 0x844   : > { %v2379_v34 = vperm.slane %v2373_v2, %v5292_v60  ;;  %v1994_v45 = vsel %vm793_vm10, %v1993_v41, %v1986_v10  ;;  %v2013_v47 = vsel %vm793_vm10, %v2012_v37, %v2005_v32  ;;  %v2319_v39 = vsel %vm793_vm10, %v5716_v36, %v2318_v50 }
 0x845   : > { %v2582_v43 = vsel %vm1265_vm11, %v2427_v19, 0  ;;  %v2400_v9 = vrot.slane %v2399_v28, 4  ;;  %v5902_v6 = vperm.slane %v1994_v45, %v5292_v60  ;;  %v5905_v58 = vperm.slane %v2013_v47, %v5292_v60 }
 0x846   : > { %v2443_v10 = vshrl.u32 %v2379_v34, 16  ;;  %v2384_v41 = vrot.slane %v2379_v34, 4  ;;  %v5908_v27 = vperm.slane %v2319_v39, %v5292_v60  ;;  %v2346_v8 = vrot.slane %v5721_v5, 4 }
 0x847   : > { %v2401_v36 = vsel %vm793_vm10, %v2400_v9, %v5877_v51  ;;  %v2060_v50 = vpack.i.b16 %v5905_v58, %v5902_v6  ;;  %v2061_v32 = vshrl.u32 %v5902_v6, 16  ;;  %v2062_v37 = vshrl.u32 %v5905_v58, 16 }
 0x848   : > { %v2407_v59 = vperm.slane %v2401_v36, %v5292_v60  ;;  %v2385_v52 = vsel %vm793_vm10, 0, %v2384_v41  ;;  %v2347_v49 = vsel %vm793_vm10, %v5739_v11, %v2346_v8  ;;  %v2431_v57 = vshrl.u32 %v5908_v27, 16 }
 0x849   : > { %2553 = vmatpush.bf16.xpose.msra.mxu0 %v2544_v0  ;;  %v2449_v5 = vshrl.u32 %v2385_v52, 16  ;;  %v2355_v15 = vperm.slane %v2347_v49, %v5292_v60  ;;  %v2063_v56 = vpack.i.b16 %v2062_v37, %v2061_v32  ;;  %v2032_v4 = vsel %vm793_vm10, %v2031_v26, %v2024_v1 }
 0x84a   : > { %4062 = vmatmul.msk.bf16.vlgmr.msrb.gmra.mxu0 %vm1265_vm11, %v2060_v50  ;;  %v2442_v33 = vpack.i.b16 %v2407_v59, %v2379_v34  ;;  %v2444_v20 = vshrl.u32 %v2407_v59, 16  ;;  %v2412_v35 = vrot.slane %v2407_v59, 4  ;;  %v5929_v29 = vperm.slane %v2032_v4, %v5292_v60 }
 0x84b   : > { %2591 = vmatpush.bf16.xpose.msra.mxu2 %v2582_v43  ;;  %v2430_v11 = vpack.i.b16 %v2355_v15, %v5908_v27  ;;  %v2432_v18 = vshrl.u32 %v2355_v15, 16  ;;  %v2051_v25 = vsel %vm793_vm10, %v2050_v21, %v2043_v38  ;;  %v2374_v24 = vrot.slane %v5862_v42, 4 }
 0x84c   : > { %4064 = vmatmul.msk.bf16.vlgmr.msrb.gmra.mxu2 %vm1265_vm11, %v2063_v56  ;;  %v2487_v1 = vsel %vm1265_vm11, %v2442_v33, 0  ;;  %v2445_v26 = vpack.i.b16 %v2444_v20, %v2443_v10  ;;  %v2413_v62 = vsel %vm793_vm10, 0, %v2412_v35  ;;  %v5941_v14 = vperm.slane %v2051_v25, %v5292_v60 }
 0x84d   : > { %2496 = vmatpush.bf16.xpose.msrb.mxu1 %v2487_v1  ;;  %v2448_v16 = vpack.i.b16 %v2413_v62, %v2385_v52  ;;  %v2450_v61 = vshrl.u32 %v2413_v62, 16  ;;  %v2724_v30 = vsel %vm1525_vm12, %v2430_v11, 0  ;;  %v2433_v55 = vpack.i.b16 %v2432_v18, %v2431_v57 }
 0x84e   : > { %v2525_v46 = vsel %vm1265_vm11, %v2445_v26, 0  ;;  %v2072_v31 = vpack.i.b16 %v5941_v14, %v5929_v29  ;;  %v2375_v38 = vsel %vm793_vm10, %v5865_v23, %v2374_v24  ;;  %v2402_v42 = vrot.slane %v5877_v51, 4 }
 0x84f   : > { %2534 = vmatpush.bf16.xpose.msrb.mxu3 %v2525_v46  ;;  %v2563_v54 = vsel %vm1265_vm11, %v2448_v16, 0  ;;  %v2451_v63 = vpack.i.b16 %v2450_v61, %v2449_v5  ;;  %v2762_v40 = vsel %vm1525_vm12, %v2433_v55, 0  ;;  %v2383_v44 = vperm.slane %v2375_v38, %v5292_v60 }
 0x850   : > { %v2403_v3 = vsel %vm793_vm10, %v2399_v28, %v2402_v42  ;;  %v2073_v21 = vshrl.u32 %v5929_v29, 16  ;;  %v2074_v48 = vshrl.u32 %v5941_v14, 16  ;;  %v1999_v23 = vrot.slane %v5902_v6, 4 }
 0x851   : > { %2733 = vmatpush.bf16.msrb.mxu0 %v2724_v30  ;;  %v2601_v51 = vsel %vm1265_vm11, %v2451_v63, 0  ;;  %v2411_v53 = vperm.slane %v2403_v3, %v5292_v60  ;;  %v2018_v0 = vrot.slane %v5905_v58, 4  ;;  %v2330_v2 = vrot.slane %v5908_v27, 4 }
 0x852   : > { %v2075_v19 = vpack.i.b16 %v2074_v48, %v2073_v21  ;;  %v2358_v34 = vrot.slane %v2355_v15, 4  ;;  %v2455_v47 = vshrl.u32 %v2383_v44, 16  ;;  %v2000_v43 = vsel %vm793_vm10, 0, %v1999_v23 }
 0x853   : > { %2771 = vmatpush.bf16.msrb.mxu2 %v2762_v40  ;;  %v2454_v45 = vpack.i.b16 %v2411_v53, %v2383_v44  ;;  %v2456_v28 = vshrl.u32 %v2411_v53, 16  ;;  %v2019_v39 = vsel %vm793_vm10, 0, %v2018_v0  ;;  %v2331_v9 = vsel %vm793_vm10, 0, %v2330_v2 }
 0x854   : > { %4063 = vmatmul.msk.bf16.vlgmr.msrb.gmra.mxu1 %vm1265_vm11, %v2072_v31  ;;  %v2359_v60 = vsel %vm793_vm10, 0, %v2358_v34  ;;  %v2068_v41 = vshrl.u32 %v2019_v39, 16  ;;  %v2437_v27 = vshrl.u32 %v2331_v9, 16  ;;  %v2066_v50 = vpack.i.b16 %v2019_v39, %v2000_v43 }
 0x855   : > { %2572 = vmatpush.bf16.xpose.msra.mxu1 %v2563_v54  ;;  %v2743_v6 = vsel %vm1525_vm12, %v2454_v45, 0  ;;  %v2457_v58 = vpack.i.b16 %v2456_v28, %v2455_v47  ;;  %v2436_v10 = vpack.i.b16 %v2359_v60, %v2331_v9  ;;  %v2438_v8 = vshrl.u32 %v2359_v60, 16 }
 0x856   : > { %4065 = vmatmul.msk.bf16.vlgmr.msrb.gmra.mxu3 %vm1265_vm11, %v2075_v19  ;;  %v2067_v32 = vshrl.u32 %v2000_v43, 16  ;;  %v2414_v37 = vrot.slane %v2411_v53, 4  ;;  %v2056_v57 = vrot.slane %v5941_v14, 4  ;;  %v2386_v5 = vrot.slane %v2383_v44, 4 }
 0x857   : > { %2610 = vmatpush.bf16.xpose.msra.mxu3 %v2601_v51  ;;  %v2781_v36 = vsel %vm1525_vm12, %v2457_v58, 0  ;;  %v2439_v59 = vpack.i.b16 %v2438_v8, %v2437_v27  ;;  %v2800_v52 = vsel %vm1525_vm12, %v2436_v10, 0  ;;  %v2037_v56 = vrot.slane %v5929_v29, 4 }
 0x858   : > { %v2069_v49 = vpack.i.b16 %v2068_v41, %v2067_v32  ;;  %v2415_v4 = vsel %vm793_vm10, 0, %v2414_v37  ;;  %v2057_v33 = vsel %vm793_vm10, 0, %v2056_v57  ;;  %v2387_v20 = vsel %vm793_vm10, 0, %v2386_v5 }
 0x859   : > { %v2838_v15 = vsel %vm1525_vm12, %v2439_v59, 0  ;;  %v2462_v35 = vshrl.u32 %v2415_v4, 16  ;;  %v2038_v11 = vsel %vm793_vm10, 0, %v2037_v56  ;;  %v2460_v18 = vpack.i.b16 %v2415_v4, %v2387_v20 }
 0x85a   : > { %4066 = vmatmul.msk.bf16.vlgmr.msra.gmra.mxu0 %vm1265_vm11, %v2066_v50  ;;  %v2080_v25 = vshrl.u32 %v2057_v33, 16  ;;  %v2461_v24 = vshrl.u32 %v2387_v20, 16  ;;  %v2078_v1 = vpack.i.b16 %v2057_v33, %v2038_v11  ;;  %v2079_v26 = vshrl.u32 %v2038_v11, 16 }
 0x85b   : > { %2809 = vmatpush.bf16.msra.mxu0 %v2800_v52  ;;  %v2819_v29 = vsel %vm1525_vm12, %v2460_v18, 0 }
 0x85c   : > { %4068 = vmatmul.msk.bf16.vlgmr.msra.gmra.mxu2 %vm1265_vm11, %v2069_v49  ;;  %v2463_v62 = vpack.i.b16 %v2462_v35, %v2461_v24  ;;  %v2081_v14 = vpack.i.b16 %v2080_v25, %v2079_v26 }
 0x85d   : > { %2752 = vmatpush.bf16.msrb.mxu1 %v2743_v6  ;;  %2847 = vmatpush.bf16.msra.mxu2 %v2838_v15 }
 0x85e   : > { %v2857_v16 = vsel %vm1525_vm12, %v2463_v62, 0 }
 0x85f   : > { %2790 = vmatpush.bf16.msrb.mxu3 %v2781_v36 }
 0x864   : > { %4067 = vmatmul.msk.bf16.vlgmr.msra.gmra.mxu1 %vm1265_vm11, %v2078_v1 }
 0x865   : > { %2828 = vmatpush.bf16.msra.mxu1 %v2819_v29 }
 0x866   : > { %4069 = vmatmul.msk.bf16.vlgmr.msra.gmra.mxu3 %vm1265_vm11, %v2081_v14 }
 0x867   : > { %2866 = vmatpush.bf16.msra.mxu3 %v2857_v16 }
 0x8c7   : > { %v2479_v61 = vpop.f32.mrf.mxu0 }
 0x8c8   : > { %v2616_v30 = vmul.f32 0.35355338, %v2479_v61 }
 0x8ca   : > { %v2624_v55 = vsel %vm1265_vm11, %v2616_v30, -inf }
 0x8cb   : > { %2625 = vmax.xlane.f32.xlu0 %v2624_v55 }
 0x8cf   : > { %v2481_v46 = vpop.f32.mrf.mxu0  ;;  %v2517_v31 = vpop.f32.mrf.mxu2 }
 0x8d0   : > { %v2618_v38 = vmul.f32 0.35355338, %v2517_v31 }
 0x8d1   : > { %v2498_v42 = vpop.f32.mrf.mxu1 }
 0x8d2   : > { %v2630_v54 = vsel %vm1265_vm11, %v2618_v38, -inf  ;;  %v2617_v63 = vmul.f32 0.35355338, %v2498_v42 }
 0x8d3   : > { %2631 = vmax.xlane.f32.xlu1 %v2630_v54 }
 0x8d4   : > { %v2627_v48 = vsel %vm1265_vm11, %v2617_v63, -inf }
 0x8d7   : > { %v2519_v40 = vpop.f32.mrf.mxu2  ;;  %v2555_v44 = vpop.f32.mrf.mxu0 }
 0x8d8   : > { %v2620_v53 = vmul.f32 0.35355338, %v2555_v44 }
 0x8d9   : > { %v2500_v3 = vpop.f32.mrf.mxu1  ;;  %v2536_v21 = vpop.f32.mrf.mxu3 }
 0x8da   : > { %v2619_v23 = vmul.f32 0.35355338, %v2536_v21  ;;  %v2636_v47 = vsel %vm1265_vm11, %v2620_v53, -inf }
 0x8db   : > { %2628 = vmax.xlane.f32.xlu1 %v2627_v48 }
 0x8dc   : > { %v2633_v51 = vsel %vm1265_vm11, %v2619_v23, -inf }
 0x8dd   : > { %2634 = vmax.xlane.f32.xlu2 %v2633_v51 }
 0x8df   : > { %v2557_v0 = vpop.f32.mrf.mxu0  ;;  %v2593_v19 = vpop.f32.mrf.mxu2 }
 0x8e0   : > { %v2622_v2 = vmul.f32 0.35355338, %v2593_v19 }
 0x8e1   : > { %v2538_v34 = vpop.f32.mrf.mxu3  ;;  %v2574_v45 = vpop.f32.mrf.mxu1 }
 0x8e2   : > { %v2642_v28 = vsel %vm1265_vm11, %v2622_v2, -inf  ;;  %v2621_v43 = vmul.f32 0.35355338, %v2574_v45 }
 0x8e3   : > { %2637 = vmax.xlane.f32.xlu1 %v2636_v47 }
 0x8e4   : > { %v2639_v10 = vsel %vm1265_vm11, %v2621_v43, -inf }
 0x8e5   : > { %2643 = vmax.xlane.f32.xlu2 %v2642_v28 }
 0x8e7   : > { %v2595_v39 = vpop.f32.mrf.mxu2 }
 0x8e9   : > { %v2576_v9 = vpop.f32.mrf.mxu1  ;;  %v2612_v60 = vpop.f32.mrf.mxu3 }
 0x8ea   : > { %v2623_v6 = vmul.f32 0.35355338, %v2612_v60 }
 0x8ec   : > { %v2645_v58 = vsel %vm1265_vm11, %v2623_v6, -inf }
 0x8ed   : > { %2646 = vmax.xlane.f32.xlu0 %v2645_v58  ;;  %2640 = vmax.xlane.f32.xlu2 %v2639_v10 }
 0x8f1   : > { %v2614_v41 = vpop.f32.mrf.mxu3 }
 0x93e   : > { %v2626_v27 = vpop.xlane.xlu0 %2625 }
 0x93f   : > { %v2648_v8 = vsub.f32 %v2616_v30, %v2626_v27 }
 0x941   : > { %v2656_v36 = vmul.f32 1.442695, %v2648_v8 }
 0x943   : > { %4609 = vpow2.f32 %v2656_v36 }
 0x946   : > { %v2632_v50 = vpop.xlane.xlu1 %2631 }
 0x947   : > { %v2650_v32 = vsub.f32 %v2618_v38, %v2632_v50 }
 0x949   : > { %v4610_v37 = vpop.eup %4609  ;;  %v2660_v59 = vmul.f32 1.442695, %v2650_v32 }
 0x94a   : > { %v2672_v52 = vsel %vm1265_vm11, %v4610_v37, 0.0 }
 0x94b   : > { %4611 = vpow2.f32 %v2660_v59  ;;  %2673 = vadd.xlane.f32.xlu2 %v2672_v52 }
 0x94e   : > { %v2629_v49 = vpop.xlane.xlu1 %2628 }
 0x94f   : > { %v2649_v57 = vsub.f32 %v2617_v63, %v2629_v49 }
 0x950   : > { %v2635_v56 = vpop.xlane.xlu2 %2634 }
 0x951   : > { %v4612_v5 = vpop.eup %4611  ;;  %v2658_v15 = vmul.f32 1.442695, %v2649_v57  ;;  %v2651_v4 = vsub.f32 %v2619_v23, %v2635_v56 }
 0x952   : > { %v2678_v33 = vsel %vm1265_vm11, %v4612_v5, 0.0 }
 0x953   : > { %4613 = vpow2.f32 %v2658_v15  ;;  %2679 = vadd.xlane.f32.xlu0 %v2678_v33  ;;  %v2662_v20 = vmul.f32 1.442695, %v2651_v4 }
 0x955   : > { %4615 = vpow2.f32 %v2662_v20 }
 0x956   : > { %v2638_v35 = vpop.xlane.xlu1 %2637 }
 0x957   : > { %v2652_v11 = vsub.f32 %v2620_v53, %v2638_v35 }
 0x958   : > { %v2644_v24 = vpop.xlane.xlu2 %2643 }
 0x959   : > { %v4614_v18 = vpop.eup %4613  ;;  %v2664_v25 = vmul.f32 1.442695, %v2652_v11  ;;  %v2654_v1 = vsub.f32 %v2622_v2, %v2644_v24 }
 0x95a   : > { %v2675_v26 = vsel %vm1265_vm11, %v4614_v18, 0.0 }
 0x95b   : > { %4617 = vpow2.f32 %v2664_v25  ;;  %2676 = vadd.xlane.f32.xlu0 %v2675_v26  ;;  %v4616_v62 = vpop.eup %4615  ;;  %v2668_v29 = vmul.f32 1.442695, %v2654_v1 }
 0x95c   : > { %v2681_v14 = vsel %vm1265_vm11, %v4616_v62, 0.0 }
 0x95d   : > { %4619 = vpow2.f32 %v2668_v29  ;;  %2682 = vadd.xlane.f32.xlu1 %v2681_v14 }
 0x960   : > { %v2647_v61 = vpop.xlane.xlu0 %2646  ;;  %v2641_v30 = vpop.xlane.xlu2 %2640 }
 0x961   : > { %v4618_v16 = vpop.eup %4617  ;;  %v2655_v55 = vsub.f32 %v2623_v6, %v2647_v61  ;;  %v2653_v46 = vsub.f32 %v2621_v43, %v2641_v30 }
 0x962   : > { %v2684_v31 = vsel %vm1265_vm11, %v4618_v16, 0.0 }
 0x963   : > { %2685 = vadd.xlane.f32.xlu0 %v2684_v31  ;;  %v4620_v38 = vpop.eup %4619  ;;  %v2670_v42 = vmul.f32 1.442695, %v2655_v55  ;;  %v2666_v54 = vmul.f32 1.442695, %v2653_v46 }
 0x964   : > { %v2690_v63 = vsel %vm1265_vm11, %v4620_v38, 0.0 }
 0x965   : > { %4621 = vpow2.f32 %v2670_v42  ;;  %2691 = vadd.xlane.f32.xlu1 %v2690_v63 }
 0x966   : > { %4623 = vpow2.f32 %v2666_v54 }
 0x96b   : > { %v4622_v40 = vpop.eup %4621 }
 0x96c   : > { %v4624_v44 = vpop.eup %4623  ;;  %v2693_v3 = vsel %vm1265_vm11, %v4622_v40, 0.0 }
 0x96d   : > { %2694 = vadd.xlane.f32.xlu2 %v2693_v3  ;;  %v2687_v21 = vsel %vm1265_vm11, %v4624_v44, 0.0 }
 0x96e   : > { %2688 = vadd.xlane.f32.xlu1 %v2687_v21 }
 0x985   : > { %2906 = vrot.lane.b32.xlu2 %v5569_v17, %s4944_s7 }
 0x98d   : > { %2904 = vrot.lane.b32.xlu2 %v5576_v22, %s4944_s7 }
 0x9be   : > { %v2674_v48 = vpop.xlane.xlu2 %2673 }
 0x9bf   : > { %4625 = vrcp.f32 %v2674_v48 }
 0x9c5   : > { %v4626_v23 = vpop.eup %4625 }
 0x9c6   : > { %v2704_v51 = vmul.f32 %v4626_v23, %v4610_v37  ;;  %v2680_v53 = vpop.xlane.xlu0 %2679 }
 0x9c7   : > { %4627 = vrcp.f32 %v2680_v53 }
 0x9c8   : > { %v2712_v0 = vpack.c.bf16 %v2704_v51, %v2704_v51 }
 0x9ca   : > { %4070 = vmatmul.msk.bf16.vlgmr.msrb.gmra.mxu0 %vm1265_vm11, %v2712_v0 }
 0x9cd   : > { %v4628_v19 = vpop.eup %4627 }
 0x9ce   : > { %v2706_v2 = vmul.f32 %v4628_v19, %v4612_v5  ;;  %v2677_v34 = vpop.xlane.xlu0 %2676 }
 0x9cf   : > { %4629 = vrcp.f32 %v2677_v34 }
 0x9d0   : > { %v2714_v45 = vpack.c.bf16 %v2706_v2, %v2706_v2  ;;  %v2683_v47 = vpop.xlane.xlu1 %2682 }
 0x9d1   : > { %4631 = vrcp.f32 %v2683_v47 }
 0x9d2   : > { %4072 = vmatmul.msk.bf16.vlgmr.msrb.gmra.mxu2 %vm1265_vm11, %v2714_v45  ;;  %v4649_v45 = vld [vmem:[%s5208_s3] sm:$0xff] }
 0x9d3   : > { %v2903_v47 = vperm.slane %v4649_v45, 7 }
 0x9d5   : > { %v4630_v17 = vpop.eup %4629 }
 0x9d6   : > { %v2705_v22 = vmul.f32 %v4630_v17, %v4614_v18  ;;  %v2686_v28 = vpop.xlane.xlu0 %2685 }
 0x9d7   : > { %4633 = vrcp.f32 %v2686_v28  ;;  %v4632_v39 = vpop.eup %4631 }
 0x9d8   : > { %v2713_v43 = vpack.c.bf16 %v2705_v22, %v2705_v22  ;;  %v2707_v9 = vmul.f32 %v4632_v39, %v4616_v62  ;;  %v2692_v60 = vpop.xlane.xlu1 %2691 }
 0x9d9   : > { %4635 = vrcp.f32 %v2692_v60 }
 0x9da   : > { %4071 = vmatmul.msk.bf16.vlgmr.msrb.gmra.mxu1 %vm1265_vm11, %v2713_v43  ;;  %v2715_v6 = vpack.c.bf16 %v2707_v9, %v2707_v9 }
 0x9dc   : > { %4073 = vmatmul.msk.bf16.vlgmr.msrb.gmra.mxu3 %vm1265_vm11, %v2715_v6 }
 0x9dd   : > { %v4634_v58 = vpop.eup %4633 }
 0x9de   : > { %v2708_v10 = vmul.f32 %v4634_v58, %v4618_v16 }
 0x9df   : > { %v4636_v41 = vpop.eup %4635 }
 0x9e0   : > { %v2716_v27 = vpack.c.bf16 %v2708_v10, %v2708_v10  ;;  %v2710_v8 = vmul.f32 %v4636_v41, %v4620_v38  ;;  %v2695_v36 = vpop.xlane.xlu2 %2694 }
 0x9e1   : > { %v2689_v50 = vpop.xlane.xlu1 %2688  ;;  %4637 = vrcp.f32 %v2695_v36 }
 0x9e2   : > { %4074 = vmatmul.msk.bf16.vlgmr.msra.gmra.mxu0 %vm1265_vm11, %v2716_v27  ;;  %v2718_v32 = vpack.c.bf16 %v2710_v8, %v2710_v8  ;;  %4639 = vrcp.f32 %v2689_v50 }
 0x9e4   : > { %4076 = vmatmul.msk.bf16.vlgmr.msra.gmra.mxu2 %vm1265_vm11, %v2718_v32 }
 0x9e7   : > { %v4638_v37 = vpop.eup %4637 }
 0x9e8   : > { %v4640_v59 = vpop.eup %4639  ;;  %v2711_v52 = vmul.f32 %v4638_v37, %v4622_v40  ;;  %v2907_v46 = vpop.permute.xlu2 %2906 }
 0x9e9   : > { %v2709_v49 = vmul.f32 %v4640_v59, %v4624_v44  ;;  %2919 = vmatpush.bf16.msrb.mxu0 %v2907_v46  ;;  %v4364_v46 = vld [vmem:[%s5202_s22 + $0xc] sm:$0xf] }
 0x9ea   : > { %v2719_v57 = vpack.c.bf16 %v2711_v52, %v2711_v52 }
 0x9eb   : > { %v2717_v5 = vpack.c.bf16 %v2709_v49, %v2709_v49  ;;  %v4145_v49 = vld [vmem:[%s5202_s22 + $0x80] sm:$0xf] }
 0x9ec   : > { %4077 = vmatmul.msk.bf16.vlgmr.msra.gmra.mxu3 %vm1265_vm11, %v2719_v57  ;;  %v4387_v57 = vld [vmem:[%s5202_s22 + $0xbc] sm:$0xf0] }
 0x9ed   : > { %4075 = vmatmul.msk.bf16.vlgmr.msra.gmra.mxu1 %vm1265_vm11, %v2717_v5  ;;  %v4379_v5 = vld [vmem:[%s5202_s22 + $0x84] sm:$0xf] }
 0x9f0   : > { %v2905_v31 = vpop.permute.xlu2 %2904 }
 0x9f1   : > { %2920 = vmatpush.bf16.msrb.mxu0 %v2905_v31 }
 0xa47   : > { %v2735_v15 = vpop.f32.mrf.mxu0 }
 0xa4f   : > { %v2737_v56 = vpop.f32.mrf.mxu0 }
 0xa50   : > { %v4147_v56 = vld [vmem:[%s5202_s22 + $0xc0] sm:$0xf0] }
 0xa55   : > { %v2773_v4 = vpop.f32.mrf.mxu2 }
 0xa57   : > { %v2754_v33 = vpop.f32.mrf.mxu1 }
 0xa5d   : > { %v2775_v20 = vpop.f32.mrf.mxu2 }
 0xa5e   : > { %v4150_v20 = vor.u32 %v4379_v5, %v4147_v56  ;;  %v6086_v56 = vld [vmem:[%s5208_s3 + $0x8] sm:$0xff] }
 0xa5f   : > { %v2756_v35 = vpop.f32.mrf.mxu1  ;;  %v2811_v11 = vpop.f32.mrf.mxu0 }
 0xa60   : > { %v2792_v18 = vpop.f32.mrf.mxu3  ;;  %3197 = vmatpush.bf16.msrb.mxu2 %v4150_v20 }
 0xa61   : > { %v4552_v25 = vpack.i.bf16 %v2792_v18, %v2773_v4  ;;  %v4153_v4 = vld [vmem:[%s5202_s22 + $0x88] sm:$0xf]  ;;  %v4155_v18 = vld [vmem:[%s5202_s22 + $0xc8] sm:$0xf0] }
 0xa63   : > { %4553 = vrot.lane.b32.xlu0 %v4552_v25, %s4958_s9  ;;  %v4081_v25 = vld [vmem:[%s5202_s22] sm:$0xf] }
 0xa67   : > { %v2813_v24 = vpop.f32.mrf.mxu0  ;;  %v2849_v26 = vpop.f32.mrf.mxu2 }
 0xa68   : > { %v2794_v1 = vpop.f32.mrf.mxu3 }
 0xa6a   : > { %v2830_v62 = vpop.f32.mrf.mxu1 }
 0xa6b   : > { %v4557_v29 = vpack.i.bf16 %v2830_v62, %v2811_v11  ;;  %v4380_v11 = vld [vmem:[%s5202_s22 + $0x8c] sm:$0xf]  ;;  %v4363_v62 = vld [vmem:[%s5202_s22 + $0x4] sm:$0xf] }
 0xa6c   : > { %v4158_v1 = vor.u32 %v4380_v11, %v4155_v18 }
 0xa6d   : > { %4558 = vrot.lane.b32.xlu1 %v4557_v29, %s4959_s13  ;;  %v4083_v29 = vld [vmem:[%s5202_s22 + $0x40] sm:$0xf0] }
 0xa6e   : > { %3225 = vmatpush.bf16.msra.mxu0 %v4158_v1  ;;  %v4391_v1 = vld [vmem:[%s5202_s22 + $0xdc] sm:$0xf0] }
 0xa6f   : > { %v2851_v14 = vpop.f32.mrf.mxu2 }
 0xa70   : > { %v2868_v16 = vpop.f32.mrf.mxu3 }
 0xa71   : > { %v4562_v61 = vpack.i.bf16 %v2868_v16, %v2849_v26  ;;  %v4371_v26 = vld [vmem:[%s5202_s22 + $0x3c] sm:$0xf0] }
 0xa72   : > { %v2832_v30 = vpop.f32.mrf.mxu1  ;;  %v4082_v16 = vor.u32 %v4371_v26, %v4081_v25  ;;  %v4383_v26 = vld [vmem:[%s5202_s22 + $0xa4] sm:$0xf] }
 0xa73   : > { %4563 = vrot.lane.b32.xlu0 %v4562_v61, %s4960_s17  ;;  %v4086_v61 = vor.u32 %v4363_v62, %v4083_v29  ;;  %v4089_v30 = vld [vmem:[%s5202_s22 + $0x8] sm:$0xf] }
 0xa74   : > { %v4185_v62 = vld [vmem:[%s5202_s22 + $0xa8] sm:$0xf] }
 0xa75   : > { %3198 = vmatpush.bf16.msrb.mxu2 %v4086_v61  ;;  %v4384_v61 = vld [vmem:[%s5202_s22 + $0xac] sm:$0xf] }
 0xa78   : > { %v2870_v55 = vpop.f32.mrf.mxu3 }
 0xa79   : > { %v4372_v55 = vld [vmem:[%s5202_s22 + $0x44] sm:$0xf0] }
 0xa7a   : > { %v4090_v31 = vor.u32 %v4372_v55, %v4089_v30  ;;  %v4187_v30 = vld [vmem:[%s5202_s22 + $0xe8] sm:$0xf0] }
 0xad5   : > { %v4554_v38 = vpop.permute.xlu0 %4553 }
 0xad6   : > { %v4556_v54 = vunpack.i.h.bf16 %v4554_v38  ;;  %v4555_v63 = vunpack.i.l.bf16 %v4554_v38  ;;  %v4091_v38 = vld [vmem:[%s5202_s22 + $0x48] sm:$0xf0] }
 0xad8   : > { %v2897_v21 = vsel %vm1265_vm11, %v2754_v33, %v4556_v54  ;;  %v2896_v48 = vsel %vm1265_vm11, %v2735_v15, %v4555_v63  ;;  %v4146_v15 = vor.u32 %v4387_v57, %v4145_v49  ;;  %v4388_v33 = vld [vmem:[%s5202_s22 + $0xc4] sm:$0xf0]  ;;  %v4389_v54 = vld [vmem:[%s5202_s22 + $0xcc] sm:$0xf0] }
 0xad9   : > { %v4154_v35 = vor.u32 %v4388_v33, %v4153_v4  ;;  %v2973_v4 = vperm.slane %v6086_v56, 5 }
 0xada   : > { %3183 = vmatpush.bf16.msrb.mxu1 %v4146_v15 }
 0xadb   : > { %3211 = vmatpush.bf16.msrb.mxu3 %v4154_v35  ;;  %v2976_v35 = vperm.slane %v6086_v56, 6 }
 0xade   : > { %3184 = vmatpush.bf16.msrb.mxu1 %v4082_v16  ;;  %v4392_v16 = vld [vmem:[%s5202_s22 + $0xe4] sm:$0xf0] }
 0xadf   : > { %v4559_v42 = vpop.permute.xlu1 %4558  ;;  %3212 = vmatpush.bf16.msrb.mxu3 %v4090_v31  ;;  %v4113_v31 = vld [vmem:[%s5202_s22 + $0x20] sm:$0xf] }
 0xae0   : > { %v4561_v40 = vunpack.i.h.bf16 %v4559_v42  ;;  %v4560_v44 = vunpack.i.l.bf16 %v4559_v42  ;;  %v4161_v42 = vld [vmem:[%s5202_s22 + $0x90] sm:$0xf] }
 0xae2   : > { %v2899_v53 = vsel %vm1701_vm13, %v2897_v21, %v4561_v40  ;;  %v2898_v0 = vsel %vm1701_vm13, %v2896_v48, %v4560_v44  ;;  %v4094_v40 = vor.u32 %v4364_v46, %v4091_v38  ;;  %v4162_v44 = vor.u32 %v4389_v54, %v4161_v42  ;;  %v4163_v21 = vld [vmem:[%s5202_s22 + $0xd0] sm:$0xf0]  ;;  %v4375_v38 = vld [vmem:[%s5202_s22 + $0x5c] sm:$0xf0] }
 0xae3   : > { %v4186_v42 = vor.u32 %v4392_v16, %v4185_v62  ;;  %v4190_v54 = vor.u32 %v4384_v61, %v4187_v30  ;;  %v4396_v62 = vld [vmem:[%s5204_s8 + $0xc] sm:$0xf]  ;;  %v4395_v61 = vld [vmem:[%s5204_s8 + $0x4] sm:$0xf] }
 0xae4   : > { %3226 = vmatpush.bf16.msra.mxu0 %v4094_v40  ;;  %3239 = vmatpush.bf16.msra.mxu1 %v4162_v44  ;;  %v4121_v40 = vld [vmem:[%s5202_s22 + $0x28] sm:$0xf]  ;;  %v4227_v30 = vld [vmem:[%s5204_s8 + $0x40] sm:$0xf0] }
 0xae5   : > { %v4564_v3 = vpop.permute.xlu0 %4563  ;;  %v4376_v44 = vld [vmem:[%s5202_s22 + $0x64] sm:$0xf0] }
 0xae6   : > { %v4566_v23 = vunpack.i.h.bf16 %v4564_v3  ;;  %v4565_v51 = vunpack.i.l.bf16 %v4564_v3  ;;  %v4381_v3 = vld [vmem:[%s5202_s22 + $0x94] sm:$0xf] }
 0xae8   : > { %v2901_v19 = vsel %vm1704_vm14, %v2899_v53, %v4566_v23  ;;  %v2900_v2 = vsel %vm1704_vm14, %v2898_v0, %v4565_v51  ;;  %v4166_v23 = vor.u32 %v4381_v3, %v4163_v21  ;;  %v4169_v51 = vld [vmem:[%s5202_s22 + $0x98] sm:$0xf]  ;;  %v4382_v0 = vld [vmem:[%s5202_s22 + $0x9c] sm:$0xf]  ;;  %v4368_v3 = vld [vmem:[%s5202_s22 + $0x2c] sm:$0xf] }
 0xae9   : > { %v2902_v34 = vpack.c.bf16 %v2901_v19, %v2900_v2  ;;  %v4390_v53 = vld [vmem:[%s5202_s22 + $0xd4] sm:$0xf0]  ;;  %v4171_v2 = vld [vmem:[%s5202_s22 + $0xd8] sm:$0xf0]  ;;  %v4123_v21 = vld [vmem:[%s5202_s22 + $0x68] sm:$0xf0] }
 0xaea   : > { %v4170_v19 = vor.u32 %v4390_v53, %v4169_v51  ;;  %3253 = vmatpush.bf16.msra.mxu2 %v4166_v23  ;;  %v4122_v51 = vor.u32 %v4376_v44, %v4121_v40  ;;  %v4126_v53 = vor.u32 %v4368_v3, %v4123_v21  ;;  %v4413_v44 = vld [vmem:[%s5204_s8 + $0x94] sm:$0xf]  ;;  %v4313_v21 = vld [vmem:[%s5204_s8 + $0x98] sm:$0xf] }
 0xaeb   : > { %4078 = vmatmul.msk.bf16.vlgmr.msrb.gmra.mxu0 %vm555_vm1, %v2902_v34  ;;  %v4097_v34 = vld [vmem:[%s5202_s22 + $0x10] sm:$0xf]  ;;  %v4307_v3 = vld [vmem:[%s5204_s8 + $0xd0] sm:$0xf0] }
 0xaec   : > { %3267 = vmatpush.bf16.msra.mxu3 %v4170_v19  ;;  %v4393_v19 = vld [vmem:[%s5202_s22 + $0xec] sm:$0xf0] }
 0xb68   : > { %v2922_v17 = vpop.f32.mrf.mxu0 }
 0xb69   : > { %v2923_v22 = vadd.f32 %v2922_v17, %v2903_v47  ;;  %v4373_v17 = vld [vmem:[%s5202_s22 + $0x4c] sm:$0xf0] }
 0xb6b   : > { %v6023_v28 = vadd.f32 %v2923_v22, %v5559_v7  ;;  %v4365_v22 = vld [vmem:[%s5202_s22 + $0x14] sm:$0xf] }
 0xb6d   : > { %v2929_v39 = vsel %vm555_vm1, %v6023_v28, 0.0 }
 0xb6e   : > { %2930 = vadd.xlane.f32.xlu0 %v2929_v39  ;;  %v4099_v39 = vld [vmem:[%s5202_s22 + $0x50] sm:$0xf0] }
 0xb70   : > { %v2924_v43 = vpop.f32.mrf.mxu0 }
 0xb71   : > { %v2925_v9 = vadd.f32 %v2924_v43, %v2903_v47  ;;  %v4174_v47 = vor.u32 %v4382_v0, %v4171_v2  ;;  %v4098_v43 = vor.u32 %v4373_v17, %v4097_v34  ;;  %v4193_v0 = vld [vmem:[%s5202_s22 + $0xb0] sm:$0xf]  ;;  %v4385_v2 = vld [vmem:[%s5202_s22 + $0xb4] sm:$0xf]  ;;  %v4386_v17 = vld [vmem:[%s5202_s22 + $0xbc] sm:$0xf] }
 0xb72   : > { %v4195_v34 = vld [vmem:[%s5202_s22 + $0xf0] sm:$0xf0] }
 0xb73   : > { %v6028_v60 = vadd.f32 %v2925_v9, %v5563_v13  ;;  %v4102_v9 = vor.u32 %v4365_v22, %v4099_v39  ;;  %3281 = vmatpush.bf16.msrb.mxu0 %v4174_v47  ;;  %3240 = vmatpush.bf16.msra.mxu1 %v4098_v43  ;;  %v4394_v47 = vld [vmem:[%s5202_s22 + $0xf4] sm:$0xf0]  ;;  %v4203_v22 = vld [vmem:[%s5202_s22 + $0xf8] sm:$0xf0]  ;;  %v4194_v39 = vor.u32 %v4393_v19, %v4193_v0  ;;  %v4405_v0 = vld [vmem:[%s5204_s8 + $0x4c] sm:$0xf0] }
 0xb74   : > { %v4198_v43 = vor.u32 %v4385_v2, %v4195_v34  ;;  %v4398_v19 = vld [vmem:[%s5204_s8 + $0x1c] sm:$0xf] }
 0xb75   : > { %v2932_v6 = vsel %vm555_vm1, %v6028_v60, 0.0  ;;  %3254 = vmatpush.bf16.msra.mxu2 %v4102_v9  ;;  %v4129_v9 = vld [vmem:[%s5202_s22 + $0x30] sm:$0xf]  ;;  %v4251_v34 = vld [vmem:[%s5204_s8 + $0x58] sm:$0xf0] }
 0xb76   : > { %2933 = vadd.xlane.f32.xlu2 %v2932_v6  ;;  %v4105_v6 = vld [vmem:[%s5202_s22 + $0x18] sm:$0xf] }
 0xbe1   : > { %v2931_v58 = vpop.xlane.xlu0 %2930 }
 0xbe2   : > { %v2935_v10 = vmul.f32 %v2931_v58, %v5214_v12  ;;  %v4374_v58 = vld [vmem:[%s5202_s22 + $0x54] sm:$0xf0] }
 0xbe4   : > { %v6034_v7 = vsub.f32 %v6023_v28, %v2935_v10  ;;  %v4366_v10 = vld [vmem:[%s5202_s22 + $0x1c] sm:$0xf] }
 0xbe6   : > { %v2939_v41 = vmul.f32 %v6034_v7, %v6034_v7 }
 0xbe8   : > { %v2941_v27 = vsel %vm555_vm1, %v2939_v41, 0.0 }
 0xbe9   : > { %v2934_v13 = vpop.xlane.xlu2 %2933  ;;  %2942 = vadd.xlane.f32.xlu1 %v2941_v27  ;;  %v4106_v27 = vor.u32 %v4374_v58, %v4105_v6  ;;  %v4377_v6 = vld [vmem:[%s5202_s22 + $0x6c] sm:$0xf0] }
 0xbea   : > { %v2936_v8 = vmul.f32 %v2934_v13, %v5214_v12  ;;  %v4107_v13 = vld [vmem:[%s5202_s22 + $0x58] sm:$0xf0] }
 0xbeb   : > { %3268 = vmatpush.bf16.msra.mxu3 %v4106_v27  ;;  %v4131_v27 = vld [vmem:[%s5202_s22 + $0x70] sm:$0xf0] }
 0xbec   : > { %v6041_v36 = vsub.f32 %v6028_v60, %v2936_v8  ;;  %v4110_v8 = vor.u32 %v4366_v10, %v4107_v13  ;;  %v4206_v10 = vor.u32 %v4386_v17, %v4203_v22  ;;  %v4137_v13 = vld [vmem:[%s5202_s22 + $0x38] sm:$0xf]  ;;  %v4254_v17 = vor.u32 %v4398_v19, %v4251_v34 }
 0xbee   : > { %v2940_v50 = vmul.f32 %v6041_v36, %v6041_v36  ;;  %3282 = vmatpush.bf16.msrb.mxu0 %v4110_v8  ;;  %v4378_v8 = vld [vmem:[%s5202_s22 + $0x74] sm:$0xf0] }
 0xbf0   : > { %v2944_v32 = vsel %vm555_vm1, %v2940_v50, 0.0 }
 0xbf1   : > { %2945 = vadd.xlane.f32.xlu2 %v2944_v32 }
 0xc5c   : > { %v2943_v37 = vpop.xlane.xlu1 %2942 }
 0xc5d   : > { %v2947_v59 = vmul.f32 %v2943_v37, %v5214_v12 }
 0xc5f   : > { %v6047_v52 = vadd.f32 1e-05, %v2947_v59 }
 0xc61   : > { %4641 = vrsqrt.f32 %v6047_v52  ;;  %vm2957_vm7 = vweird.f32 %v6047_v52 }
 0xc64   : > { %v2946_v24 = vpop.xlane.xlu2 %2945 }
 0xc65   : > { %v2948_v14 = vmul.f32 %v2946_v24, %v5214_v12  ;;  %v4177_v24 = vld [vmem:[%s5202_s22 + $0xa0] sm:$0xf] }
 0xc67   : > { %v4642_v63 = vpop.eup %4641  ;;  %v2950_v12 = vadd.f32 1e-05, %v2948_v14 }
 0xc68   : > { %v2952_v48 = vmul.f32 %v4642_v63, %v6047_v52  ;;  %vm2958_vm6 = vweird.f32 %v4642_v63 }
 0xc69   : > { %4643 = vrsqrt.f32 %v2950_v12  ;;  %vm2959_vm8 = vmor %vm2957_vm7, %vm2958_vm6  ;;  %vm2967_vm10 = vweird.f32 %v2950_v12 }
 0xc6a   : > { %v2953_v45 = vmul.f32 %v4642_v63, %v2952_v48  ;;  %v4114_v48 = vor.u32 %v4375_v38, %v4113_v31  ;;  %v4305_v31 = vld [vmem:[%s5204_s8 + $0x90] sm:$0xf] }
 0xc6c   : > { %v2954_v41 = vmul.f32 0.5, %v2953_v45  ;;  %v4201_v45 = vld [vmem:[%s5202_s22 + $0xb8] sm:$0xf] }
 0xc6d   : > { %v4202_v58 = vor.u32 %v4394_v47, %v4201_v45  ;;  %v6187_v45 = vld [vmem:[%s5206_s0] sm:$0xff] }
 0xc6e   : > { %v2955_v50 = vsub.f32 1.5, %v2954_v41  ;;  %v4369_v41 = vld [vmem:[%s5202_s22 + $0x34] sm:$0xf] }
 0xc6f   : > { %v4644_v32 = vpop.eup %4643 }
 0xc70   : > { %v2956_v37 = vmul.f32 %v4642_v63, %v2955_v50  ;;  %v2962_v59 = vmul.f32 %v4644_v32, %v2950_v12  ;;  %vm2968_vm9 = vweird.f32 %v4644_v32  ;;  %v4115_v12 = vld [vmem:[%s5202_s22 + $0x60] sm:$0xf0]  ;;  %v4370_v50 = vld [vmem:[%s5202_s22 + $0x3c] sm:$0xf] }
 0xc71   : > { %vm2969_vm11 = vmor %vm2967_vm10, %vm2968_vm9 }
 0xc72   : > { %v2963_v49 = vmul.f32 %v4644_v32, %v2962_v59  ;;  %v2960_v57 = vsel %vm2959_vm8, %v4642_v63, %v2956_v37  ;;  %v4367_v63 = vld [vmem:[%s5202_s22 + $0x24] sm:$0xf]  ;;  %v4130_v37 = vor.u32 %v4377_v6, %v4129_v9  ;;  %v4134_v59 = vor.u32 %v4369_v41, %v4131_v27  ;;  %v4397_v9 = vld [vmem:[%s5204_s8 + $0x14] sm:$0xf]  ;;  %v4406_v41 = vld [vmem:[%s5204_s8 + $0x54] sm:$0xf0] }
 0xc73   : > { %v2971_v33 = vmul.f32 %v2960_v57, %v6034_v7  ;;  %v4179_v7 = vld [vmem:[%s5202_s22 + $0xe0] sm:$0xf0]  ;;  %v4118_v23 = vor.u32 %v4367_v63, %v4115_v12  ;;  %v4315_v63 = vld [vmem:[%s5204_s8 + $0xd8] sm:$0xf0]  ;;  %v4243_v6 = vld [vmem:[%s5204_s8 + $0x50] sm:$0xf0] }
 0xc74   : > { %v2964_v5 = vmul.f32 0.5, %v2963_v49  ;;  %v4182_v46 = vor.u32 %v4383_v26, %v4179_v7  ;;  %v4138_v49 = vor.u32 %v4378_v8, %v4137_v13  ;;  %v4225_v26 = vld [vmem:[%s5204_s8] sm:$0xf] }
 0xc75   : > { %v2974_v11 = vmul.f32 %v2973_v4, %v2971_v33  ;;  %v4403_v7 = vld [vmem:[%s5204_s8 + $0x3c] sm:$0xf0] }
 0xc76   : > { %v2965_v15 = vsub.f32 1.5, %v2964_v5  ;;  %v4289_v5 = vld [vmem:[%s5204_s8 + $0x80] sm:$0xf] }
 0xc77   : > { %v2977_v29 = vadd.f32 %v2976_v35, %v2974_v11  ;;  %v4291_v11 = vld [vmem:[%s5204_s8 + $0xc0] sm:$0xf0] }
 0xc78   : > { %v2966_v20 = vmul.f32 %v4644_v32, %v2965_v15  ;;  %v4419_v15 = vld [vmem:[%s5204_s8 + $0xbc] sm:$0xf0] }
 0xc79   : > { %v4290_v33 = vor.u32 %v4419_v15, %v4289_v5  ;;  %v4321_v5 = vld [vmem:[%s5204_s8 + $0xa0] sm:$0xf] }
 0xc7a   : > { %v2970_v52 = vsel %vm2969_vm11, %v4644_v32, %v2966_v20  ;;  %v4139_v32 = vld [vmem:[%s5202_s22 + $0x78] sm:$0xf0]  ;;  %v4299_v20 = vld [vmem:[%s5204_s8 + $0xc8] sm:$0xf0]  ;;  %v4423_v15 = vld [vmem:[%s5204_s8 + $0xdc] sm:$0xf0] }
 0xc7b   : > { %v2972_v18 = vmul.f32 %v2970_v52, %v6041_v36  ;;  %v4178_v36 = vor.u32 %v4391_v1, %v4177_v24  ;;  %v4142_v57 = vor.u32 %v4370_v50, %v4139_v32  ;;  %v4420_v24 = vld [vmem:[%s5204_s8 + $0xc4] sm:$0xf0]  ;;  %s4962_s22 = smov 128  }
 0xc7d   : > { %v2975_v25 = vmul.f32 %v2973_v4, %v2972_v18  ;;  %v4412_v4 = vld [vmem:[%s5204_s8 + $0x8c] sm:$0xf]  ;;  %v4297_v18 = vld [vmem:[%s5204_s8 + $0x88] sm:$0xf] }
 0xc7e   : > { %v4302_v52 = vor.u32 %v4412_v4, %v4299_v20  ;;  %v4298_v1 = vor.u32 %v4420_v24, %v4297_v18  ;;  %v2984_v4 = vperm.slane %v6187_v45, 2  ;;  %v4416_v20 = vld [vmem:[%s5204_s8 + $0xac] sm:$0xf]  ;;  %v4322_v24 = vor.u32 %v4423_v15, %v4321_v5  ;;  %v4347_v5 = vld [vmem:[%s5204_s8 + $0xf8] sm:$0xf0] }
 0xc7f   : > { %v2978_v14 = vadd.f32 %v2976_v35, %v2975_v25  ;;  %v4411_v35 = vld [vmem:[%s5204_s8 + $0x84] sm:$0xf] }
 0xc80   : > { %v4294_v25 = vor.u32 %v4411_v35, %v4291_v11 }
 0xc81   : > { %v6100_v55 = vpack.c.bf16 %v2978_v14, %v2977_v29  ;;  %v4226_v29 = vor.u32 %v4403_v7, %v4225_v26  ;;  %v4235_v14 = vld [vmem:[%s5204_s8 + $0x48] sm:$0xf0] }
 0xc82   : > { %v4238_v16 = vor.u32 %v4396_v62, %v4235_v14 }
 0xc83   : > { %4207 = vmatmul.msk.bf16.vlgmr.msrb.gmra.mxu1 %vm555_vm1, %v6100_v55  ;;  %4208 = vmatmul.msk.bf16.vlgmr.msrb.gmra.mxu2 %vm555_vm1, %v6100_v55 }
 0xc84   : > { %4209 = vmatmul.msk.bf16.vlgmr.msrb.gmra.mxu3 %vm555_vm1, %v6100_v55  ;;  %4210 = vmatmul.msk.bf16.vlgmr.msra.gmra.mxu0 %vm555_vm1, %v6100_v55 }
 0xc85   : > { %3295 = vmatpush.bf16.msrb.mxu1 %v4178_v36  ;;  %3309 = vmatpush.bf16.msrb.mxu2 %v4182_v46  ;;  %v4230_v36 = vor.u32 %v4395_v61, %v4227_v30  ;;  %v4404_v46 = vld [vmem:[%s5204_s8 + $0x44] sm:$0xf0]  ;;  %v4415_v30 = vld [vmem:[%s5204_s8 + $0xa4] sm:$0xf] }
 0xc86   : > { %3323 = vmatpush.bf16.msrb.mxu3 %v4186_v42  ;;  %3337 = vmatpush.bf16.msra.mxu0 %v4190_v54  ;;  %v4421_v42 = vld [vmem:[%s5204_s8 + $0xcc] sm:$0xf0]  ;;  %v4414_v54 = vld [vmem:[%s5204_s8 + $0x9c] sm:$0xf] }
 0xc87   : > { %v4306_v12 = vor.u32 %v4421_v42, %v4305_v31  ;;  %v4318_v40 = vor.u32 %v4414_v54, %v4315_v63  ;;  %v4329_v31 = vld [vmem:[%s5204_s8 + $0xa8] sm:$0xf] }
 0xc89   : > { %3296 = vmatpush.bf16.msrb.mxu1 %v4114_v48  ;;  %3310 = vmatpush.bf16.msrb.mxu2 %v4118_v23  ;;  %v4310_v48 = vor.u32 %v4413_v44, %v4307_v3  ;;  %v4422_v23 = vld [vmem:[%s5204_s8 + $0xd4] sm:$0xf0] }
 0xc8a   : > { %3324 = vmatpush.bf16.msrb.mxu3 %v4122_v51  ;;  %3338 = vmatpush.bf16.msra.mxu0 %v4126_v53  ;;  %v4314_v51 = vor.u32 %v4422_v23, %v4313_v21  ;;  %v4241_v53 = vld [vmem:[%s5204_s8 + $0x10] sm:$0xf]  ;;  %v4267_v23 = vld [vmem:[%s5204_s8 + $0x68] sm:$0xf0] }
 0xc8b   : > { %v4242_v2 = vor.u32 %v4405_v0, %v4241_v53  ;;  %v2986_v53 = vperm.slane %v6187_v45, 4 }
 0xc93   : > { %4211 = vmatmul.msk.bf16.vlgmr.msra.gmra.mxu1 %vm555_vm1, %v6100_v55  ;;  %4212 = vmatmul.msk.bf16.vlgmr.msra.gmra.mxu2 %vm555_vm1, %v6100_v55 }
 0xc94   : > { %4213 = vmatmul.msk.bf16.vlgmr.msra.gmra.mxu3 %vm555_vm1, %v6100_v55  ;;  %4214 = vmatmul.msk.bf16.vlgmr.msrb.gmra.mxu0 %vm555_vm1, %v6100_v55 }
 0xc95   : > { %3351 = vmatpush.bf16.msra.mxu1 %v4194_v39  ;;  %3365 = vmatpush.bf16.msra.mxu2 %v4198_v43  ;;  %v2982_v39 = vperm.slane %v6187_v45, 0  ;;  %v2985_v43 = vperm.slane %v6187_v45, 3 }
 0xc96   : > { %3379 = vmatpush.bf16.msra.mxu3 %v4202_v58  ;;  %3393 = vmatpush.bf16.msrb.mxu0 %v4206_v10  ;;  %v4246_v58 = vor.u32 %v4397_v9, %v4243_v6  ;;  %v4249_v10 = vld [vmem:[%s5204_s8 + $0x18] sm:$0xf]  ;;  %v4259_v9 = vld [vmem:[%s5204_s8 + $0x60] sm:$0xf0] }
 0xc97   : > { %v4250_v13 = vor.u32 %v4406_v41, %v4249_v10  ;;  %v4265_v10 = vld [vmem:[%s5204_s8 + $0x28] sm:$0xf] }
 0xc98   : > { %v4408_v41 = vld [vmem:[%s5204_s8 + $0x64] sm:$0xf0] }
 0xc99   : > { %3352 = vmatpush.bf16.msra.mxu1 %v4130_v37  ;;  %3366 = vmatpush.bf16.msra.mxu2 %v4134_v59  ;;  %v2983_v59 = vperm.slane %v6187_v45, 1 }
 0xc9a   : > { %3380 = vmatpush.bf16.msra.mxu3 %v4138_v49  ;;  %3394 = vmatpush.bf16.msrb.mxu0 %v4142_v57 }
 0xca3   : > { %4215 = vmatmul.msk.bf16.vlgmr.msrb.gmra.mxu1 %vm555_vm1, %v6100_v55  ;;  %4216 = vmatmul.msk.bf16.vlgmr.msrb.gmra.mxu2 %vm555_vm1, %v6100_v55 }
 0xca4   : > { %4217 = vmatmul.msk.bf16.vlgmr.msrb.gmra.mxu3 %vm555_vm1, %v6100_v55  ;;  %4218 = vmatmul.msk.bf16.vlgmr.msra.gmra.mxu0 %vm555_vm1, %v6100_v55 }
 0xca5   : > { %3616 = vmatpush.bf16.xpose.msrb.mxu1 %v4290_v33  ;;  %3658 = vmatpush.bf16.xpose.msra.mxu0 %v4302_v52  ;;  %v4331_v52 = vld [vmem:[%s5204_s8 + $0xe8] sm:$0xf0] }
 0xca6   : > { %3630 = vmatpush.bf16.xpose.msrb.mxu2 %v4294_v25  ;;  %3644 = vmatpush.bf16.xpose.msrb.mxu3 %v4298_v1  ;;  %v4334_v7 = vor.u32 %v4416_v20, %v4331_v52 }
 0xcad   : > { %3617 = vmatpush.bf16.xpose.msrb.mxu1 %v4226_v29  ;;  %3659 = vmatpush.bf16.xpose.msra.mxu0 %v4238_v16 }
 0xcae   : > { %3631 = vmatpush.bf16.xpose.msrb.mxu2 %v4230_v36 }
 0xcb3   : > { %4219 = vmatmul.msk.bf16.vlgmr.msra.gmra.mxu1 %vm555_vm1, %v6100_v55  ;;  %4220 = vmatmul.msk.bf16.vlgmr.msra.gmra.mxu2 %vm555_vm1, %v6100_v55 }
 0xcb4   : > { %4221 = vmatmul.msk.bf16.vlgmr.msra.gmra.mxu3 %vm555_vm1, %v6100_v55  ;;  %4222 = vmatmul.msk.bf16.vlgmr.msrb.gmra.mxu0 %vm555_vm1, %v6100_v55  ;;  %v4233_v55 = vld [vmem:[%s5204_s8 + $0x8] sm:$0xf] }
 0xcb5   : > { %v4234_v38 = vor.u32 %v4404_v46, %v4233_v55  ;;  %3672 = vmatpush.bf16.xpose.msra.mxu1 %v4306_v12  ;;  %3714 = vmatpush.bf16.xpose.msrb.mxu0 %v4318_v40  ;;  %v4323_v55 = vld [vmem:[%s5204_s8 + $0xe0] sm:$0xf0]  ;;  %v4257_v12 = vld [vmem:[%s5204_s8 + $0x20] sm:$0xf] }
 0xcb6   : > { %3686 = vmatpush.bf16.xpose.msra.mxu2 %v4310_v48  ;;  %v4407_v40 = vld [vmem:[%s5204_s8 + $0x5c] sm:$0xf0]  ;;  %v4326_v21 = vor.u32 %v4415_v30, %v4323_v55  ;;  %v4400_v48 = vld [vmem:[%s5204_s8 + $0x2c] sm:$0xf]  ;;  %v4345_v30 = vld [vmem:[%s5204_s8 + $0xb8] sm:$0xf] }
 0xcb7   : > { %3645 = vmatpush.bf16.xpose.msrb.mxu3 %v4234_v38  ;;  %v4424_v38 = vld [vmem:[%s5204_s8 + $0xe4] sm:$0xf0]  ;;  %v4258_v34 = vor.u32 %v4407_v40, %v4257_v12  ;;  %v4426_v55 = vld [vmem:[%s5204_s8 + $0xf4] sm:$0xf0]  ;;  %v4402_v40 = vld [vmem:[%s5204_s8 + $0x3c] sm:$0xf] }
 0xcb8   : > { %v4330_v0 = vor.u32 %v4424_v38, %v4329_v31  ;;  %v4273_v38 = vld [vmem:[%s5204_s8 + $0x30] sm:$0xf] }
 0xcbd   : > { %3673 = vmatpush.bf16.xpose.msra.mxu1 %v4242_v2  ;;  %3715 = vmatpush.bf16.xpose.msrb.mxu0 %v4254_v17  ;;  %v2989_v2 = vperm.slane %v6187_v45, 7 }
 0xcbe   : > { %3687 = vmatpush.bf16.xpose.msra.mxu2 %v4246_v58 }
 0xcbf   : > { %3700 = vmatpush.bf16.xpose.msra.mxu3 %v4314_v51 }
 0xcc7   : > { %3701 = vmatpush.bf16.xpose.msra.mxu3 %v4250_v13 }
 0xd00   : > { %v3186_v47 = vpop.f32.mrf.mxu1 }
 0xd01   : > { %v3228_v22 = vpop.f32.mrf.mxu0  ;;  %v3187_v8 = vadd.f32 %v3186_v47, %v2982_v39  ;;  %v4270_v47 = vor.u32 %v4400_v48, %v4267_v23  ;;  %v4346_v48 = vor.u32 %v4426_v55, %v4345_v30 }
 0xd02   : > { %v3229_v32 = vadd.f32 %v3228_v22, %v2985_v43 }
 0xd03   : > { %v3401_v35 = vmax.f32 %v3187_v8, 0.0 }
 0xd04   : > { %v3404_v18 = vmax.f32 %v3229_v32, 0.0  ;;  %v4425_v32 = vld [vmem:[%s5204_s8 + $0xec] sm:$0xf0] }
 0xd06   : > { %v3200_v27 = vpop.f32.mrf.mxu2 }
 0xd07   : > { %v3214_v50 = vpop.f32.mrf.mxu3  ;;  %v3201_v1 = vadd.f32 %v3200_v27, %v2983_v59  ;;  %v2987_v27 = vperm.slane %v6187_v45, 5 }
 0xd08   : > { %v3188_v37 = vpop.f32.mrf.mxu1  ;;  %v3215_v62 = vadd.f32 %v3214_v50, %v2984_v4  ;;  %v4337_v50 = vld [vmem:[%s5204_s8 + $0xb0] sm:$0xf] }
 0xd09   : > { %v3189_v49 = vadd.f32 %v3188_v37, %v2982_v39  ;;  %v3230_v57 = vpop.f32.mrf.mxu0  ;;  %v3402_v42 = vmax.f32 %v3201_v1, 0.0  ;;  %v2988_v37 = vperm.slane %v6187_v45, 6 }
 0xd0a   : > { %v3231_v33 = vadd.f32 %v3230_v57, %v2985_v43  ;;  %v3403_v44 = vmax.f32 %v3215_v62, 0.0  ;;  %v4399_v43 = vld [vmem:[%s5204_s8 + $0x24] sm:$0xf]  ;;  %v4418_v57 = vld [vmem:[%s5204_s8 + $0xbc] sm:$0xf] }
 0xd0b   : > { %v3417_v11 = vmax.f32 %v3189_v49, 0.0  ;;  %v4262_v49 = vor.u32 %v4399_v43, %v4259_v9  ;;  %v4417_v62 = vld [vmem:[%s5204_s8 + $0xb4] sm:$0xf]  ;;  %v4281_v43 = vld [vmem:[%s5204_s8 + $0x38] sm:$0xf] }
 0xd0c   : > { %v3420_v25 = vmax.f32 %v3231_v33, 0.0  ;;  %v4266_v33 = vor.u32 %v4408_v41, %v4265_v10  ;;  %v4410_v9 = vld [vmem:[%s5204_s8 + $0x74] sm:$0xf0] }
 0xd0d   : > { %v3433_v26 = vpack.c.bf16 %v3417_v11, %v3401_v35  ;;  %v4338_v35 = vor.u32 %v4425_v32, %v4337_v50  ;;  %v4282_v32 = vor.u32 %v4410_v9, %v4281_v43 }
 0xd0e   : > { %v3436_v29 = vpack.c.bf16 %v3420_v25, %v3404_v18  ;;  %v3202_v14 = vpop.f32.mrf.mxu2  ;;  %v4350_v25 = vor.u32 %v4418_v57, %v4347_v5 }
 0xd0f   : > { %v3203_v16 = vadd.f32 %v3202_v14, %v2983_v59  ;;  %v3216_v61 = vpop.f32.mrf.mxu3  ;;  %3618 = vmatmul.bf16.vlgmr.msrb.gmra.mxu1 %v3433_v26 }
 0xd10   : > { %v3217_v36 = vadd.f32 %v3216_v61, %v2984_v4  ;;  %3660 = vmatmul.bf16.vlgmr.msra.gmra.mxu0 %v3436_v29  ;;  %v3242_v46 = vpop.f32.mrf.mxu1  ;;  %3728 = vmatpush.bf16.xpose.msrb.mxu1 %v4322_v24  ;;  %v4339_v29 = vld [vmem:[%s5204_s8 + $0xf0] sm:$0xf0] }
 0xd11   : > { %v3418_v54 = vmax.f32 %v3203_v16, 0.0  ;;  %v3284_v63 = vpop.f32.mrf.mxu0  ;;  %3770 = vmatpush.bf16.xpose.msra.mxu0 %v4334_v7  ;;  %v3243_v22 = vadd.f32 %v3242_v46, %v2986_v53  ;;  %v6224_v16 = vld [vmem:[%s5206_s0 + $0x8] sm:$0xff]  ;;  %v4342_v12 = vor.u32 %v4417_v62, %v4339_v29 }
 0xd12   : > { %v3419_v3 = vmax.f32 %v3217_v36, 0.0  ;;  %v3285_v6 = vadd.f32 %v3284_v63, %v2989_v2  ;;  %v2992_v41 = vperm.slane %v6224_v16, 2  ;;  %v2997_v62 = vperm.slane %v6224_v16, 7 }
 0xd13   : > { %v3434_v51 = vpack.c.bf16 %v3418_v54, %v3402_v42  ;;  %v3405_v15 = vmax.f32 %v3243_v22, 0.0  ;;  %v4409_v42 = vld [vmem:[%s5204_s8 + $0x6c] sm:$0xf0] }
 0xd14   : > { %v3435_v19 = vpack.c.bf16 %v3419_v3, %v3403_v44  ;;  %v3408_v20 = vmax.f32 %v3285_v6, 0.0  ;;  %v4283_v44 = vld [vmem:[%s5204_s8 + $0x78] sm:$0xf0]  ;;  %v2991_v6 = vperm.slane %v6224_v16, 1 }
 0xd15   : > { %3632 = vmatmul.bf16.vlgmr.msrb.gmra.mxu2 %v3434_v51  ;;  %v2993_v51 = vperm.slane %v6224_v16, 3 }
 0xd16   : > { %3646 = vmatmul.bf16.vlgmr.msrb.gmra.mxu3 %v3435_v19  ;;  %v3256_v17 = vpop.f32.mrf.mxu2  ;;  %3742 = vmatpush.bf16.xpose.msrb.mxu2 %v4326_v21  ;;  %v2990_v21 = vperm.slane %v6224_v16, 0 }
 0xd17   : > { %v3270_v39 = vpop.f32.mrf.mxu3  ;;  %3756 = vmatpush.bf16.xpose.msrb.mxu3 %v4330_v0  ;;  %v3257_v11 = vadd.f32 %v3256_v17, %v2987_v27  ;;  %v4286_v0 = vor.u32 %v4402_v40, %v4283_v44  ;;  %v4275_v17 = vld [vmem:[%s5204_s8 + $0x70] sm:$0xf0] }
 0xd18   : > { %v3244_v58 = vpop.f32.mrf.mxu1  ;;  %3729 = vmatpush.bf16.xpose.msrb.mxu1 %v4258_v34  ;;  %v3271_v24 = vadd.f32 %v3270_v39, %v2988_v37 }
 0xd19   : > { %v3245_v13 = vadd.f32 %v3244_v58, %v2986_v53  ;;  %v3286_v8 = vpop.f32.mrf.mxu0  ;;  %3771 = vmatpush.bf16.xpose.msra.mxu0 %v4270_v47  ;;  %v3406_v36 = vmax.f32 %v3257_v11, 0.0  ;;  %v4274_v53 = vor.u32 %v4409_v42, %v4273_v38  ;;  %v4401_v47 = vld [vmem:[%s5204_s8 + $0x34] sm:$0xf]  ;;  %v2996_v38 = vperm.slane %v6224_v16, 6 }
 0xd1a   : > { %v3287_v59 = vadd.f32 %v3286_v8, %v2989_v2  ;;  %v3407_v54 = vmax.f32 %v3271_v24, 0.0 }
 0xd1b   : > { %v3421_v4 = vmax.f32 %v3245_v13, 0.0  ;;  %v4278_v13 = vor.u32 %v4401_v47, %v4275_v17 }
 0xd1c   : > { %v3424_v52 = vmax.f32 %v3287_v59, 0.0 }
 0xd1d   : > { %v3437_v18 = vpack.c.bf16 %v3421_v4, %v3405_v15 }
 0xd1e   : > { %v3440_v45 = vpack.c.bf16 %v3424_v52, %v3408_v20  ;;  %v3258_v1 = vpop.f32.mrf.mxu2  ;;  %3743 = vmatpush.bf16.xpose.msrb.mxu2 %v4262_v49 }
 0xd1f   : > { %v3259_v26 = vadd.f32 %v3258_v1, %v2987_v27  ;;  %v3272_v7 = vpop.f32.mrf.mxu3  ;;  %3674 = vmatmul.bf16.vlgmr.msra.gmra.mxu1 %v3437_v18  ;;  %3757 = vmatpush.bf16.xpose.msrb.mxu3 %v4266_v33 }
 0xd20   : > { %v3273_v14 = vadd.f32 %v3272_v7, %v2988_v37  ;;  %3716 = vmatmul.bf16.vlgmr.msrb.gmra.mxu0 %v3440_v45  ;;  %v3298_v61 = vpop.f32.mrf.mxu1  ;;  %3784 = vmatpush.bf16.xpose.msra.mxu1 %v4338_v35 }
 0xd21   : > { %v3422_v46 = vmax.f32 %v3259_v26, 0.0  ;;  %v3340_v31 = vpop.f32.mrf.mxu0  ;;  %3826 = vmatpush.bf16.xpose.msrb.mxu0 %v4350_v25  ;;  %v3299_v2 = vadd.f32 %v3298_v61, %v2990_v21  ;;  %v2994_v26 = vperm.slane %v6224_v16, 4 }
 0xd22   : > { %v3423_v63 = vmax.f32 %v3273_v14, 0.0  ;;  %v3341_v22 = vadd.f32 %v3340_v31, %v2993_v51 }
 0xd23   : > { %v3438_v3 = vpack.c.bf16 %v3422_v46, %v3406_v36  ;;  %v3409_v8 = vmax.f32 %v3299_v2, 0.0  ;;  %v2995_v36 = vperm.slane %v6224_v16, 5 }
 0xd24   : > { %v3439_v23 = vpack.c.bf16 %v3423_v63, %v3407_v54  ;;  %v3412_v37 = vmax.f32 %v3341_v22, 0.0 }
 0xd25   : > { %3688 = vmatmul.bf16.vlgmr.msra.gmra.mxu2 %v3438_v3 }
 0xd26   : > { %3702 = vmatmul.bf16.vlgmr.msra.gmra.mxu3 %v3439_v23  ;;  %v3312_v19 = vpop.f32.mrf.mxu2  ;;  %3798 = vmatpush.bf16.xpose.msra.mxu2 %v4342_v12 }
 0xd27   : > { %v3326_v34 = vpop.f32.mrf.mxu3  ;;  %3812 = vmatpush.bf16.xpose.msra.mxu3 %v4346_v48  ;;  %v3313_v49 = vadd.f32 %v3312_v19, %v2991_v6 }
 0xd28   : > { %v3300_v39 = vpop.f32.mrf.mxu1  ;;  %3785 = vmatpush.bf16.xpose.msra.mxu1 %v4274_v53  ;;  %v3327_v5 = vadd.f32 %v3326_v34, %v2992_v41 }
 0xd29   : > { %v3301_v58 = vadd.f32 %v3300_v39, %v2990_v21  ;;  %v3342_v10 = vpop.f32.mrf.mxu0  ;;  %3827 = vmatpush.bf16.xpose.msrb.mxu0 %v4286_v0  ;;  %v3410_v11 = vmax.f32 %v3313_v49, 0.0 }
 0xd2a   : > { %v3343_v27 = vadd.f32 %v3342_v10, %v2993_v51  ;;  %v3411_v24 = vmax.f32 %v3327_v5, 0.0 }
 0xd2b   : > { %v3425_v50 = vmax.f32 %v3301_v58, 0.0  ;;  %v3449_v58 = vperm.slane %v6086_v56, 0 }
 0xd2c   : > { %v3428_v59 = vmax.f32 %v3343_v27, 0.0 }
 0xd2d   : > { %v3441_v57 = vpack.c.bf16 %v3425_v50, %v3409_v8 }
 0xd2e   : > { %v3444_v15 = vpack.c.bf16 %v3428_v59, %v3412_v37  ;;  %v3314_v4 = vpop.f32.mrf.mxu2  ;;  %3799 = vmatpush.bf16.xpose.msra.mxu2 %v4278_v13 }
 0xd2f   : > { %v3315_v33 = vadd.f32 %v3314_v4, %v2991_v6  ;;  %v3328_v20 = vpop.f32.mrf.mxu3  ;;  %3730 = vmatmul.bf16.vlgmr.msrb.gmra.mxu1 %v3441_v57  ;;  %3813 = vmatpush.bf16.xpose.msra.mxu3 %v4282_v32 }
 0xd30   : > { %v3329_v52 = vadd.f32 %v3328_v20, %v2992_v41  ;;  %3772 = vmatmul.bf16.vlgmr.msra.gmra.mxu0 %v3444_v15  ;;  %v3354_v35 = vpop.f32.mrf.mxu1 }
 0xd31   : > { %v3426_v18 = vmax.f32 %v3315_v33, 0.0  ;;  %v3396_v25 = vpop.f32.mrf.mxu0  ;;  %v3355_v14 = vadd.f32 %v3354_v35, %v2994_v26 }
 0xd32   : > { %v3427_v45 = vmax.f32 %v3329_v52, 0.0  ;;  %v3397_v30 = vadd.f32 %v3396_v25, %v2997_v62 }
 0xd33   : > { %v3442_v1 = vpack.c.bf16 %v3426_v18, %v3410_v11  ;;  %v3413_v54 = vmax.f32 %v3355_v14, 0.0 }
 0xd34   : > { %v3443_v7 = vpack.c.bf16 %v3427_v45, %v3411_v24  ;;  %v3416_v12 = vmax.f32 %v3397_v30, 0.0 }
 0xd35   : > { %3744 = vmatmul.bf16.vlgmr.msrb.gmra.mxu2 %v3442_v1 }
 0xd36   : > { %3758 = vmatmul.bf16.vlgmr.msrb.gmra.mxu3 %v3443_v7  ;;  %v3368_v29 = vpop.f32.mrf.mxu2 }
 0xd37   : > { %v3382_v61 = vpop.f32.mrf.mxu3  ;;  %v3369_v44 = vadd.f32 %v3368_v29, %v2995_v36 }
 0xd38   : > { %v3356_v55 = vpop.f32.mrf.mxu1  ;;  %v3383_v21 = vadd.f32 %v3382_v61, %v2996_v38 }
 0xd39   : > { %v3357_v46 = vadd.f32 %v3356_v55, %v2994_v26  ;;  %v3398_v31 = vpop.f32.mrf.mxu0  ;;  %v3414_v19 = vmax.f32 %v3369_v44, 0.0 }
 0xd3a   : > { %v3399_v42 = vadd.f32 %v3398_v31, %v2997_v62  ;;  %v3415_v34 = vmax.f32 %v3383_v21, 0.0 }
 0xd3b   : > { %v3429_v63 = vmax.f32 %v3357_v46, 0.0 }
 0xd3c   : > { %v3432_v40 = vmax.f32 %v3399_v42, 0.0 }
 0xd3d   : > { %v3445_v3 = vpack.c.bf16 %v3429_v63, %v3413_v54 }
 0xd3e   : > { %v3448_v48 = vpack.c.bf16 %v3432_v40, %v3416_v12  ;;  %v3370_v23 = vpop.f32.mrf.mxu2 }
 0xd3f   : > { %v3371_v51 = vadd.f32 %v3370_v23, %v2995_v36  ;;  %v3384_v53 = vpop.f32.mrf.mxu3  ;;  %3786 = vmatmul.bf16.vlgmr.msra.gmra.mxu1 %v3445_v3 }
 0xd40   : > { %v3385_v0 = vadd.f32 %v3384_v53, %v2996_v38  ;;  %3828 = vmatmul.bf16.vlgmr.msrb.gmra.mxu0 %v3448_v48 }
 0xd41   : > { %v3430_v2 = vmax.f32 %v3371_v51, 0.0 }
 0xd42   : > { %v3431_v47 = vmax.f32 %v3385_v0, 0.0 }
 0xd43   : > { %v3446_v16 = vpack.c.bf16 %v3430_v2, %v3414_v19 }
 0xd44   : > { %v3447_v17 = vpack.c.bf16 %v3431_v47, %v3415_v34 }
 0xd45   : > { %3800 = vmatmul.bf16.vlgmr.msra.gmra.mxu2 %v3446_v16 }
 0xd46   : > { %3814 = vmatmul.bf16.vlgmr.msra.gmra.mxu3 %v3447_v17 }
 0xd8c   : > { %v3619_v22 = vpop.f32.mrf.mxu1 }
 0xd8d   : > { %v3661_v39 = vpop.f32.mrf.mxu0  ;;  %v3620_v27 = vadd.f32 %v3619_v22, %v3449_v58 }
 0xd94   : > { %v3621_v43 = vpop.f32.mrf.mxu1 }
 0xd95   : > { %v3663_v9 = vpop.f32.mrf.mxu0  ;;  %v3622_v59 = vadd.f32 %v3621_v43, %v3449_v58 }
 0xd98   : > { %v3633_v6 = vpop.f32.mrf.mxu2 }
 0xd99   : > { %v3647_v10 = vpop.f32.mrf.mxu3  ;;  %v3634_v13 = vadd.f32 %v3633_v6, %v3620_v27 }
 0xd9b   : > { %v3648_v37 = vadd.f32 %v3647_v10, %v3634_v13 }
 0xd9c   : > { %v3675_v41 = vpop.f32.mrf.mxu1 }
 0xd9d   : > { %v3717_v32 = vpop.f32.mrf.mxu0  ;;  %v3662_v57 = vadd.f32 %v3661_v39, %v3648_v37 }
 0xd9f   : > { %v3676_v33 = vadd.f32 %v3675_v41, %v3662_v57 }
 0xda0   : > { %v3635_v8 = vpop.f32.mrf.mxu2 }
 0xda1   : > { %v3649_v50 = vpop.f32.mrf.mxu3  ;;  %v3636_v5 = vadd.f32 %v3635_v8, %v3622_v59 }
 0xda3   : > { %v3650_v20 = vadd.f32 %v3649_v50, %v3636_v5 }
 0xda4   : > { %v3677_v49 = vpop.f32.mrf.mxu1 }
 0xda5   : > { %v3719_v52 = vpop.f32.mrf.mxu0  ;;  %v3664_v11 = vadd.f32 %v3663_v9, %v3650_v20 }
 0xda7   : > { %v3678_v45 = vadd.f32 %v3677_v49, %v3664_v11 }
 0xda8   : > { %v3689_v15 = vpop.f32.mrf.mxu2 }
 0xda9   : > { %v3703_v4 = vpop.f32.mrf.mxu3  ;;  %v3690_v35 = vadd.f32 %v3689_v15, %v3676_v33 }
 0xdab   : > { %v3704_v25 = vadd.f32 %v3703_v4, %v3690_v35 }
 0xdac   : > { %v3731_v56 = vpop.f32.mrf.mxu1 }
 0xdad   : > { %v3718_v1 = vadd.f32 %v3717_v32, %v3704_v25  ;;  %v3773_v7 = vpop.f32.mrf.mxu0 }
 0xdaf   : > { %v3732_v29 = vadd.f32 %v3731_v56, %v3718_v1 }
 0xdb0   : > { %v3691_v18 = vpop.f32.mrf.mxu2 }
 0xdb1   : > { %v3705_v24 = vpop.f32.mrf.mxu3  ;;  %v3692_v26 = vadd.f32 %v3691_v18, %v3678_v45 }
 0xdb3   : > { %v3706_v14 = vadd.f32 %v3705_v24, %v3692_v26 }
 0xdb4   : > { %v3733_v30 = vpop.f32.mrf.mxu1 }
 0xdb5   : > { %v3720_v36 = vadd.f32 %v3719_v52, %v3706_v14  ;;  %v3775_v31 = vpop.f32.mrf.mxu0 }
 0xdb7   : > { %v3734_v42 = vadd.f32 %v3733_v30, %v3720_v36 }
 0xdb8   : > { %v3745_v62 = vpop.f32.mrf.mxu2 }
 0xdb9   : > { %v3759_v61 = vpop.f32.mrf.mxu3  ;;  %v3746_v55 = vadd.f32 %v3745_v62, %v3732_v29 }
 0xdbb   : > { %v3760_v46 = vadd.f32 %v3759_v61, %v3746_v55 }
 0xdbc   : > { %v3787_v40 = vpop.f32.mrf.mxu1 }
 0xdbd   : > { %v3774_v63 = vadd.f32 %v3773_v7, %v3760_v46  ;;  %v3829_v51 = vpop.f32.mrf.mxu0 }
 0xdbf   : > { %v3788_v44 = vadd.f32 %v3787_v40, %v3774_v63 }
 0xdc0   : > { %v3747_v38 = vpop.f32.mrf.mxu2 }
 0xdc1   : > { %v3761_v54 = vpop.f32.mrf.mxu3  ;;  %v3748_v12 = vadd.f32 %v3747_v38, %v3734_v42 }
 0xdc3   : > { %v3762_v3 = vadd.f32 %v3761_v54, %v3748_v12 }
 0xdc4   : > { %v3789_v2 = vpop.f32.mrf.mxu1 }
 0xdc5   : > { %v3776_v53 = vadd.f32 %v3775_v31, %v3762_v3  ;;  %v3831_v43 = vpop.f32.mrf.mxu0 }
 0xdc7   : > { %v3790_v34 = vadd.f32 %v3789_v2, %v3776_v53 }
 0xdc8   : > { %v3801_v21 = vpop.f32.mrf.mxu2 }
 0xdc9   : > { %v3802_v48 = vadd.f32 %v3801_v21, %v3788_v44  ;;  %v3815_v23 = vpop.f32.mrf.mxu3 }
 0xdcb   : > { %v3816_v0 = vadd.f32 %v3815_v23, %v3802_v48 }
 0xdcd   : > { %v3830_v19 = vadd.f32 %v3829_v51, %v3816_v0 }
 0xdcf   : > { %v3834_v47 = vadd.f32 %v3830_v19, %v6023_v28 }
 0xdd0   : > { %v3803_v16 = vpop.f32.mrf.mxu2 }
 0xdd1   : > { %3836 = vst.msk [vmem:[#allocation12] sm:$0xff] %vm555_vm1, %v3834_v47  ;;  %v3804_v17 = vadd.f32 %v3803_v16, %v3790_v34  ;;  %v3817_v22 = vpop.f32.mrf.mxu3 }
 0xdd3   : > { %v3818_v39 = vadd.f32 %v3817_v22, %v3804_v17 }
 0xdd5   : > { %v3832_v9 = vadd.f32 %v3831_v43, %v3818_v39 }
 0xdd7   : > { %v3835_v6 = vadd.f32 %v3832_v9, %v6028_v60 }
 0xdd9   : > { %3837 = vst.msk [vmem:[#allocation12 + $0x8] sm:$0xff] %vm555_vm1, %v3835_v6 }
 0xdda   : > { %4446 = dma.vmem_to_hbm [thread:$0]  (%p4477_p1), %s3844_s18, 256, %s3846_s2, [#allocation4], %s4962_s22, %s4962_s22, %s4958_s9  }
 0xddb   : > { %4918 = dma.done.wait (%p4477_p1), [#allocation4], 256  }
 0xddc   : > { %4920 = vsyncadd (%p4477_p1), [#allocation4], 4294967040 }
 0xddd PF: > { %s6308_s27 = sld [smem:[#allocation19_spill]]  ;;  %s6311_s24 = smov %s4927_s25 }
 0xdde   : > { %s6309_s8 = sld [smem:[#allocation17_spill]] }
 0xddf   : > { %s6310_s26 = sld [smem:[#allocation20_spill]] }
 0xde3   : > { %p17_p4 = scmp.ge.s32.totalorder %s6308_s27, 4  }
 0xde4   : > { %s6312_s25 = smov %s6309_s8 }
 0xde5   :  { %19 = sbr.rel (!%p17_p4) target bundleno = 9 (0x9), region = 140 }
 0xdea   :  { %3862 = vsyncpa [#allocation3], 1 }
 0xdeb   :  { %3864 = vsyncpa [#allocation3 + $0x1], 1 }
 0xdec   :  { %3865 = vsyncpa [#allocation6], 1 }
 0xded   :  { %3866 = vsyncpa [#allocation4], 1 }
 0xdee   :  { %3868 = vsyncpa [#allocation4 + $0x1], 1 }

// kernel: tpu_custom_call.1
= control target key start
LH: loop header
LB: loop body
LE: loop exit
PB: predicated region body
PF: predicated region fallthrough
CT: control target
= control target key end

     0   :  { %s4646_s0 = inlined_call_operand.hbm [shape: f32[2,8,32], index: 0, kind: input, shape index: {}]   ;;  %s4647_s1 = inlined_call_operand.hbm [shape: f32[2,8,32], index: 1, kind: input, shape index: {}]   ;;  %s4648_s2 = inlined_call_operand.hbm [shape: bf16[2,32,256], index: 2, kind: input, shape index: {}]   ;;  %s4649_s3 = inlined_call_operand.hbm [shape: bf16[2,32,2048], index: 3, kind: input, shape index: {}]   ;;  %s4650_s4 = inlined_call_operand.hbm [shape: bf16[2,32,2048], index: 4, kind: input, shape index: {}]   ;;  %s4651_s5 = inlined_call_operand.hbm [shape: f32[2,1,2048], index: 5, kind: input, shape index: {}]   ;;  %s4652_s6 = inlined_call_operand.hbm [shape: f32[2,16,32], index: 6, kind: input, shape index: {}]   ;;  %s4653_s7 = inlined_call_operand.hbm [shape: f32[2,8,32], index: 7, kind: output, shape index: {}]  }
   0x1   :  { %4664 = sst [smem:[#allocation21_spill]] %s4646_s0 }
   0x2   :  { %4665 = sst [smem:[#allocation22_spill]] %s4648_s2 }
   0x3   :  { %4666 = sst [smem:[#allocation23_spill]] %s4649_s3 }
   0x4   :  { %4667 = sst [smem:[#allocation24_spill]] %s4653_s7 }
   0x5   :  { %12 = vsyncpa [#allocation3], 0 }
   0x6   :  { %13 = vsyncpa [#allocation6], 0 }
   0x7   :  { %14 = vsyncpa [#allocation4], 0  ;;  %s3856_s24 = smov 0   ;;  %s3858_s25 = smov 0  }
   0x8   :  { %s3860_s26 = smov 0   ;;  %s3862_s27 = smov 0  }
   0x9 LB: > { %4668 = sst [smem:[#allocation17_spill]] %s3786_s26  ;;  %s3875_s28 = sadd.s32 4294967295, %s3790_s27   ;;  %s3790_s27 = sphi %s3862_s27, %s4687_s27   ;;  %s3786_s26 = sphi %s3860_s26, %s4689_s26   ;;  %s3782_s25 = sphi %s3858_s25, %s4691_s25   ;;  %s3778_s24 = sphi %s3856_s24, %s4690_s24  }
   0xa   : > { %p82_p0 = scmp.ne.s32.totalorder %s3782_s25, %s3778_s24  ;;  %p83_p1 = scmp.eq.s32.totalorder %s3875_s28, 0 }
   0xb   : > { %p2860_p2 = scmp.ge.s32.totalorder %s3790_s27, 1  ;;  %p218_p3 = scmp.lt.s32.totalorder %s3790_s27, 3 }
   0xc   : > { %p2861_p4 = scmp.ne.s32.totalorder %s3875_s28, 0  ;;  %p3884_p5 = por %p83_p1, %p82_p0 }
   0xd   : > { %s4671_s0 = sld [smem:[#allocation21_spill]]  ;;  %p3891_p6 = pnand %p2860_p2, %p218_p3 }
   0xe   : > { %s4669_s29 = scalar_select %p3884_p5, 1, 0 }
   0xf   : > { %p3310_p7 = pneg %p3891_p6  ;;  %s3792_s11 = smov [#allocation2]  }
  0x10   : > { %4670 = sst [smem:[#allocation18_spill]] %s4669_s29  ;;  %s231_s12 = sshll.u32 %s3792_s11, 4  ;;  %s232_s12 = int_to_ptr.vmem [resolvable:$true] %s231_s12 }
  0x11   : > { %p3899_p8 = pnand %p3310_p7, %p83_p1  ;;  %s3904_s14 = sadd.s32 1, %s3790_s27  }
  0x12   : > { %4674 = sst [smem:[#allocation19_spill]] %s3904_s14  ;;  %s4654_s15 = smov 128  }
  0x13   : > { %s229_s9 = sshll.u32 %s4671_s0, 4  ;;  %s4656_s16 = smov 8   ;;  %s230_s9 = int_to_ptr.hbm [resolvable:$true] %s229_s9 }
  0x14   : > { %3313 = dma.hbm_to_vmem [thread:$0]  (!%p3899_p8), %s230_s9, 256, %s232_s12, [#allocation3], %s4654_s15, %s4654_s15, %s4656_s16  }
  0x15   : > { %s66_s17 = ssub.s32 %s3790_s27, %s3904_s14  ;;  %s69_s18 = sadd.s32 1, %s3786_s26 }
  0x16   : > { %p67_p9 = scmp.eq.s32.totalorder %s66_s17, 0  ;;  %p76_p10 = scmp.ne.s32.totalorder %s3786_s26, %s3782_s25 }
  0x17   : > { %p77_p11 = scmp.eq.s32.totalorder %s3790_s27, 0  ;;  %p3335_p12 = scmp.lt.s32.totalorder %s3790_s27, 2 }
  0x18   : > { %s3919_s19 = scalar_select %p67_p9, %s3786_s26, %s69_s18  }
  0x19   : > { %p78_p13 = por %p77_p11, %p76_p10  ;;  %s259_s20 = sand.u32 1, %s3790_s27  }
  0x1a   : > { %4675 = sst [smem:[#allocation20_spill]] %s3919_s19  ;;  %s3923_s21 = sand.u32 1, %s3786_s26  }
  0x1b   : > { %s2864_s22 = sshll.u32 %s3923_s21, 5  ;;  %s3216_s23 = sshll.u32 %s3790_s27, 5 }
  0x1c   : > { %s4676_s2 = sld [smem:[#allocation22_spill]]  ;;  %s263_s11 = scalar_lea.vmem [#allocation7], %s2864_s22 }
  0x1d   : > { %s271_s12 = sshll.u32 %s263_s11, 4  ;;  %p3932_p0 = pnand %p3335_p12, %p78_p13  ;;  %s272_s12 = int_to_ptr.vmem [resolvable:$true] %s271_s12 }
  0x1e   : > { %s4658_s15 = sshll.u32 %s3790_s27, 8  ;;  %s4678_s3 = sld [smem:[#allocation23_spill]] }
  0x1f   : > { %s3943_s24 = scalar_lea.sflag [#allocation3], %s259_s20  ;;  %p3947_p3 = pneg %p3932_p0 }
  0x22   : > { %s268_s8 = scalar_lea.hbm %s4676_s2, %s3216_s23  ;;  %s3543_s0 = scalar_lea.hbm %s4676_s2, 64 }
  0x23   : > { %s269_s9 = sshll.u32 %s268_s8, 4  ;;  %s270_s9 = int_to_ptr.hbm [resolvable:$true] %s269_s9 }
  0x24   : > { %s290_s19 = scalar_lea.hbm %s4678_s3, %s4658_s15  ;;  %s3536_s23 = sshra.s32 %s270_s9, 4  ;;  %s3537_s23 = int_to_ptr.hbm [resolvable:$true] %s3536_s23 }
  0x25   : > { %s3538_s22 = scalar_lea.hbm %s3537_s23, 32  ;;  %p3544_p10 = scmp.lt.s32.totalorder %s3537_s23, %s4676_s2 }
  0x26   : > { %p3539_p2 = scmp.ne.s32.totalorder %s3537_s23, %s3538_s22  ;;  %p3545_p11 = scmp.lt.s32.totalorder %s3543_s0, %s3538_s22 }
  0x28   : > { %p3541_p7 = pnand %p3947_p3, %p3539_p2  ;;  %p3546_p12 = por %p3545_p11, %p3544_p10 }
  0x2a   : > { %p3542_p9 = pneg %p3541_p7 }
  0x2c   : > { %p3547_p13 = pnand %p3546_p12, %p3542_p9 }
  0x2e   : > { %3550 = shalt.err (!%p3547_p13)
}
  0x2f   : > { %s4680_s15 = smov 8   ;;  %s4681_s18 = smov 128  }
  0x30   : > { %3320 = dma.hbm_to_vmem [thread:$0]  (!%p3932_p0), %s270_s9, 512, %s272_s12, %s3943_s24, %s4681_s18, %s4681_s18, %s4680_s15  }
  0x31   : > { %s291_s26 = sshll.u32 %s290_s19, 4  ;;  %s4682_s8 = sshll.u32 %s3923_s21, 8  ;;  %s292_s26 = int_to_ptr.hbm [resolvable:$true] %s291_s26 }
  0x32   : > { %s285_s11 = scalar_lea.vmem [#allocation8], %s4682_s8  ;;  %s3566_s23 = sshra.s32 %s292_s26, 4  ;;  %s3567_s23 = int_to_ptr.hbm [resolvable:$true] %s3566_s23 }
  0x33   : > { %s293_s14 = sshll.u32 %s285_s11, 4  ;;  %s3568_s22 = scalar_lea.hbm %s3567_s23, 256  ;;  %s294_s14 = int_to_ptr.vmem [resolvable:$true] %s293_s14 }
  0x34   : > { %p3569_p2 = scmp.ne.s32.totalorder %s3567_s23, %s3568_s22  ;;  %s3573_s20 = scalar_lea.hbm %s4678_s3, 512 }
  0x35   : > { %p3574_p10 = scmp.lt.s32.totalorder %s3567_s23, %s4678_s3  ;;  %p3575_p11 = scmp.lt.s32.totalorder %s3573_s20, %s3568_s22 }
  0x36   : > { %p3571_p7 = pnand %p3569_p2, %p3947_p3 }
  0x37   : > { %p3576_p12 = por %p3575_p11, %p3574_p10 }
  0x38   : > { %p3572_p9 = pneg %p3571_p7 }
  0x3a   : > { %p3577_p13 = pnand %p3576_p12, %p3572_p9 }
  0x3c   : > { %3580 = shalt.err (!%p3577_p13)
}
  0x3d   : > { %s3795_s19 = smov 1024   ;;  %s3796_s9 = smov 64  }
  0x3e   : > { %3323 = dma.hbm_to_vmem [thread:$0]  (!%p3932_p0), %s292_s26, 4096, %s294_s14, %s3943_s24, %s3795_s19, %s3795_s19, %s3796_s9  }
  0x3f   : > { %s4683_s12 = sshll.u32 %s3790_s27, 8  ;;  %s4684_s7 = sshll.u32 %s3923_s21, 8 }
  0x40   : > { %s312_s0 = scalar_lea.hbm %s4650_s4, %s4683_s12  ;;  %s307_s23 = scalar_lea.vmem [#allocation9], %s4684_s7 }
  0x41   : > { %s313_s2 = sshll.u32 %s312_s0, 4  ;;  %s315_s22 = sshll.u32 %s307_s23, 4  ;;  %s314_s2 = int_to_ptr.hbm [resolvable:$true] %s313_s2  ;;  %s316_s22 = int_to_ptr.vmem [resolvable:$true] %s315_s22 }
  0x42   : > { %s3596_s16 = sshra.s32 %s314_s2, 4  ;;  %s3603_s14 = scalar_lea.hbm %s4650_s4, 512  ;;  %s3597_s16 = int_to_ptr.hbm [resolvable:$true] %s3596_s16 }
  0x43   : > { %s3598_s20 = scalar_lea.hbm %s3597_s16, 256  ;;  %p3604_p10 = scmp.lt.s32.totalorder %s3597_s16, %s4650_s4 }
  0x44   : > { %p3599_p2 = scmp.ne.s32.totalorder %s3597_s16, %s3598_s20  ;;  %p3605_p11 = scmp.lt.s32.totalorder %s3603_s14, %s3598_s20 }
  0x46   : > { %p3601_p7 = pnand %p3599_p2, %p3947_p3  ;;  %p3606_p12 = por %p3605_p11, %p3604_p10 }
  0x48   : > { %p3602_p9 = pneg %p3601_p7 }
  0x4a   : > { %p3607_p13 = pnand %p3606_p12, %p3602_p9 }
  0x4c   : > { %3610 = shalt.err (!%p3607_p13)
}
  0x4d   : > { %3326 = dma.hbm_to_vmem [thread:$0]  (!%p3932_p0), %s314_s2, 4096, %s316_s22, %s3943_s24, %s3795_s19, %s3795_s19, %s3796_s9  }
  0x4e   : > { %s2873_s12 = sshll.u32 %s3923_s21, 4  ;;  %s2874_s11 = sshll.u32 %s3790_s27, 4 }
  0x4f   : > { %s333_s7 = scalar_lea.hbm %s4651_s5, %s2874_s11  ;;  %s329_s29 = scalar_lea.vmem [#allocation10], %s2873_s12 }
  0x50   : > { %s335_s23 = sshll.u32 %s333_s7, 4  ;;  %s337_s16 = sshll.u32 %s329_s29, 4  ;;  %s336_s23 = int_to_ptr.hbm [resolvable:$true] %s335_s23  ;;  %s338_s16 = int_to_ptr.vmem [resolvable:$true] %s337_s16 }
  0x51   : > { %s3626_s20 = sshra.s32 %s336_s23, 4  ;;  %s3633_s27 = scalar_lea.hbm %s4651_s5, 32  ;;  %s3627_s20 = int_to_ptr.hbm [resolvable:$true] %s3626_s20 }
  0x52   : > { %s3628_s26 = scalar_lea.hbm %s3627_s20, 16  ;;  %p3634_p10 = scmp.lt.s32.totalorder %s3627_s20, %s4651_s5 }
  0x53   : > { %p3629_p2 = scmp.ne.s32.totalorder %s3627_s20, %s3628_s26  ;;  %p3635_p11 = scmp.lt.s32.totalorder %s3633_s27, %s3628_s26 }
  0x55   : > { %p3631_p7 = pnand %p3629_p2, %p3947_p3  ;;  %p3636_p12 = por %p3635_p11, %p3634_p10 }
  0x57   : > { %p3632_p9 = pneg %p3631_p7 }
  0x59   : > { %p3637_p13 = pnand %p3636_p12, %p3632_p9 }
  0x5b   : > { %3640 = shalt.err (!%p3637_p13)
}
  0x5c   : > { %3329 = dma.hbm_to_vmem [thread:$0]  (!%p3932_p0), %s336_s23, 256, %s338_s16, %s3943_s24  }
  0x5d   : > { %s353_s8 = scalar_lea.hbm %s4652_s6, %s2874_s11  ;;  %s348_s3 = scalar_lea.vmem [#allocation11], %s2873_s12 }
  0x5e   : > { %s354_s0 = sshll.u32 %s353_s8, 4  ;;  %s356_s7 = sshll.u32 %s348_s3, 4  ;;  %s355_s0 = int_to_ptr.hbm [resolvable:$true] %s354_s0  ;;  %s357_s7 = int_to_ptr.vmem [resolvable:$true] %s356_s7 }
  0x5f   : > { %s243_s26 = sshll.u32 %s4647_s1, 4  ;;  %s3797_s14 = smov [#allocation5]   ;;  %s244_s26 = int_to_ptr.hbm [resolvable:$true] %s243_s26 }
  0x60   : > { %s245_s19 = sshll.u32 %s3797_s14, 4  ;;  %s3686_s11 = sshra.s32 %s355_s0, 4  ;;  %s246_s19 = int_to_ptr.vmem [resolvable:$true] %s245_s19  ;;  %s3687_s11 = int_to_ptr.hbm [resolvable:$true] %s3686_s11 }
  0x61   : > { %3316 = dma.hbm_to_vmem [thread:$0]  (!%p3899_p8), %s244_s26, 256, %s246_s19, [#allocation6], %s4681_s18, %s4681_s18, %s4680_s15  }
  0x62   : > { %s3688_s23 = scalar_lea.hbm %s3687_s11, 16  ;;  %s3693_s27 = scalar_lea.hbm %s4652_s6, 32 }
  0x63   : > { %p3689_p2 = scmp.ne.s32.totalorder %s3687_s11, %s3688_s23  ;;  %p3694_p10 = scmp.lt.s32.totalorder %s3687_s11, %s4652_s6 }
  0x64   : > { %p3695_p11 = scmp.lt.s32.totalorder %s3693_s27, %s3688_s23 }
  0x65   : > { %p3691_p7 = pnand %p3689_p2, %p3947_p3 }
  0x66   : > { %p3696_p12 = por %p3695_p11, %p3694_p10 }
  0x67   : > { %p3692_p9 = pneg %p3691_p7 }
  0x69   : > { %p3697_p13 = pnand %p3696_p12, %p3692_p9 }
  0x6b   : > { %3700 = shalt.err (!%p3697_p13)
}
  0x6c   : > { %3332 = dma.hbm_to_vmem [thread:$0]  (!%p3932_p0), %s355_s0, 256, %s357_s7, %s3943_s24, %s4681_s18, %s4681_s18, %s4680_s15  }
  0x6d   : > { %368 = sbr.rel (%p3891_p6) target bundleno = 3445 (0xd75), region = 48 }
  0x72   : > { %3761 = dma.done.wait (%p83_p1), [#allocation3], 256  }
  0x73   : > { %3763 = vsyncadd (%p83_p1), [#allocation3], 4294967040 }
  0x74   : > { %3765 = dma.done.wait (%p83_p1), [#allocation6], 256  }
  0x75   : > { %3767 = vsyncadd (%p83_p1), [#allocation6], 4294967040  ;;  %s380_s17 = sand.u32 1, %s3875_s28   ;;  %s382_s15 = sand.u32 1, %s3782_s25  }
  0x76   : > { %s2881_s18 = sshll.u32 %s382_s15, 5  ;;  %s381_s10 = scalar_lea.sflag [#allocation3], %s380_s17 }
  0x77   : > { %s4049_s24 = scalar_lea.vmem [#allocation7], %s2881_s18 }
  0x78   : > { %3769 = dma.done.wait (%p3884_p5), %s381_s10, 9216  }
  0x79   : > { %3771 = vsyncadd (%p3884_p5), %s381_s10, 4294958080  ;;  %s2882_s30 = sshll.u32 %s382_s15, 8  ;;  %s2884_s2 = sshll.u32 %s382_s15, 4 }
  0x7a   : > { %s4055_s22 = scalar_lea.vmem [#allocation8], %s2882_s30  ;;  %s4057_s8 = scalar_lea.vmem [#allocation9], %s2882_s30 }
  0x7b   : > { %s4059_s0 = scalar_lea.vmem [#allocation10], %s2884_s2  ;;  %s4061_s3 = scalar_lea.vmem [#allocation11], %s2884_s2 }
  0x7c   : > { %475 = sbr.rel (%p2861_p4) target bundleno = 132 (0x84), region = 80 }
  0x81   : > { %v476_v0 = vld [vmem:[#allocation2] sm:$0xff]  ;;  %vm478_vm0 = vcmask 261120   ;;  %v477_v1 = vld [vmem:[#allocation2 + $0x8] sm:$0xff] }
  0x82   : > { %479 = vst.msk [vmem:[#allocation12] sm:$0xff] %vm478_vm0, %v476_v0 }
  0x83   : > { %480 = vst.msk [vmem:[#allocation12 + $0x8] sm:$0xff] %vm478_vm0, %v477_v1 }
  0x84 PF: > { %vm555_vm1 = vcmask 261120   ;;  %v3798_v6 = vmov 32.0   ;;  %v2893_v23 = vld [vmem:[%s4049_s24 + $0x10] sm:$0xf]  ;;  %v3223_v24 = vld [vmem:[%s4049_s24 + $0x14] sm:$0xf0] }
  0x85   : > { %3426 = vrcp.f32 %v3798_v6  ;;  %v4083_v25 = vor.u32 %v3223_v24, %v2893_v23  ;;  %v2889_v26 = vld [vmem:[%s4049_s24] sm:$0xf]  ;;  %v3221_v27 = vld [vmem:[%s4049_s24 + $0x4] sm:$0xf0]  ;;  %s3799_s7 = smov 32   ;;  %s3800_s29 = smov 64  }
  0x86   : > { %v4088_v29 = vor.u32 %v3221_v27, %v2889_v26  ;;  %v4093_v32 = vld [vmem:[%s4061_s3] sm:$0xff]  ;;  %v4101_v49 = vld [vmem:[%s4061_s3 + $0x8] sm:$0xff]  ;;  %vm623_vm9 = vcmask 523264   ;;  %s3801_s20 = smov 120   ;;  %s3802_s26 = smov 88   ;;  %vm704_vm10 = vcmask 64512  }
  0x87   : > { %648 = vmatpush.bf16.msra.mxu0 %v4083_v25  ;;  %v614_v34 = vrot.slane %v4093_v32, 1  ;;  %v618_v40 = vrot.slane %v4093_v32, 2  ;;  %v607_v52 = vperm.slane %v4101_v49, 1  ;;  %v610_v57 = vperm.slane %v4101_v49, 2  ;;  %s3803_s14 = smov 96   ;;  %s3804_s19 = smov 80  }
  0x88   : > { %s3805_s11 = smov 112   ;;  %s3806_s23 = smov 72   ;;  %vm964_vm11 = vcmask 1043456   ;;  %vm1140_vm12 = vcmask 130048   ;;  %vm1143_vm13 = vcmask 195584  }
  0x89   : > { %v4065_v2 = vld [vmem:[#allocation12] sm:$0xff]  ;;  %615 = vrot.lane.b32.xlu2 %v614_v34, %s3799_s7  ;;  %s3807_s12 = smov 104   ;;  %s3808_s16 = smov 56  }
  0x8a   : > { %v556_v3 = vsel %vm555_vm1, %v4065_v2, 0.0  ;;  %v4069_v4 = vld [vmem:[#allocation12 + $0x8] sm:$0xff]  ;;  %s3809_s27 = smov 48   ;;  %s3810_s21 = smov 40  }
  0x8b   : > { %557 = vadd.xlane.f32.xlu0 %v556_v3  ;;  %v559_v5 = vsel %vm555_vm1, %v4069_v4, 0.0  ;;  %v3427_v7 = vpop.eup %3426  ;;  %649 = vmatpush.bf16.msra.mxu0 %v4088_v29  ;;  %s3811_s9 = smov 8   ;;  %s3812_s13 = smov 24  }
  0x8c   : > { %v563_v8 = vmul.f32 32.0, %v3427_v7  ;;  %vm567_vm2 = vweird.f32 %v3427_v7  ;;  %s3813_s17 = smov 16   ;;  %s3814_s15 = smov [#allocation12]  }
  0x8d   : > { %s2704_s18 = sshll.u32 %s3814_s15, 4  ;;  %s4686_s30 = sld [smem:[#allocation24_spill]]  ;;  %s2705_s18 = int_to_ptr.vmem [resolvable:$true] %s2704_s18 }
  0x8e   : > { %v564_v9 = vsub.f32 1.0, %v563_v8  ;;  %p3338_p1 = scmp.eq.s32.totalorder %s3875_s28, 1 }
  0x90   : > { %v565_v10 = vmul.f32 %v3427_v7, %v564_v9 }
  0x91   : > { %619 = vrot.lane.b32.xlu2 %v618_v40, %s3800_s29 }
  0x92   : > { %v566_v11 = vadd.f32 %v3427_v7, %v565_v10 }
  0x93   : > { %560 = vadd.xlane.f32.xlu0 %v559_v5  ;;  %s2706_s2 = sshll.u32 %s4686_s30, 4  ;;  %s2707_s2 = int_to_ptr.hbm [resolvable:$true] %s2706_s2 }
  0x94   : > { %v4073_v12 = vsel %vm567_vm2, %v3427_v7, %v566_v11 }
  0xe3   : > { %v616_v62 = vpop.permute.xlu2 %615 }
  0xe4   : > { %v4108_v63 = vsel %vm555_vm1, %v4093_v32, %v616_v62 }
  0xeb   : > { %v620_v0 = vpop.permute.xlu2 %619 }
  0xec   : > { %v624_v1 = vsel %vm623_vm9, %v4108_v63, %v620_v0 }
  0xed   : > { %v626_v3 = vperm.slane %v624_v1, 0 }
  0xfe   : > { %v558_v13 = vpop.xlane.xlu0 %557 }
  0xff   : > { %v569_v14 = vmul.f32 %v4073_v12, %v558_v13 }
 0x101   : > { %v571_v15 = vsub.f32 %v4065_v2, %v569_v14 }
 0x103   : > { %v573_v16 = vmul.f32 %v571_v15, %v571_v15 }
 0x105   : > { %v575_v17 = vsel %vm555_vm1, %v573_v16, 0.0 }
 0x106   : > { %576 = vadd.xlane.f32.xlu1 %v575_v17  ;;  %v561_v18 = vpop.xlane.xlu0 %560 }
 0x107   : > { %v570_v19 = vmul.f32 %v4073_v12, %v561_v18 }
 0x109   : > { %v572_v20 = vsub.f32 %v4069_v4, %v570_v19 }
 0x10b   : > { %v574_v21 = vmul.f32 %v572_v20, %v572_v20 }
 0x10d   : > { %v578_v22 = vsel %vm555_vm1, %v574_v21, 0.0 }
 0x10e   : > { %579 = vadd.xlane.f32.xlu1 %v578_v22 }
 0x179   : > { %v577_v28 = vpop.xlane.xlu1 %576 }
 0x17a   : > { %v581_v30 = vmul.f32 %v577_v28, %v4073_v12 }
 0x17c   : > { %v583_v31 = vadd.f32 1e-05, %v581_v30 }
 0x17e   : > { %3428 = vrsqrt.f32 %v583_v31  ;;  %vm591_vm4 = vweird.f32 %v583_v31 }
 0x181   : > { %v580_v33 = vpop.xlane.xlu1 %579 }
 0x182   : > { %v582_v35 = vmul.f32 %v580_v33, %v4073_v12 }
 0x184   : > { %v3429_v36 = vpop.eup %3428  ;;  %v584_v37 = vadd.f32 1e-05, %v582_v35 }
 0x185   : > { %v586_v38 = vmul.f32 %v3429_v36, %v583_v31  ;;  %vm592_vm3 = vweird.f32 %v3429_v36 }
 0x186   : > { %3430 = vrsqrt.f32 %v584_v37  ;;  %vm593_vm5 = vmor %vm591_vm4, %vm592_vm3  ;;  %vm601_vm7 = vweird.f32 %v584_v37 }
 0x187   : > { %v587_v39 = vmul.f32 %v3429_v36, %v586_v38 }
 0x189   : > { %v588_v41 = vmul.f32 0.5, %v587_v39 }
 0x18b   : > { %v589_v42 = vsub.f32 1.5, %v588_v41 }
 0x18c   : > { %v3431_v43 = vpop.eup %3430 }
 0x18d   : > { %v590_v44 = vmul.f32 %v3429_v36, %v589_v42  ;;  %v596_v45 = vmul.f32 %v3431_v43, %v584_v37  ;;  %vm602_vm6 = vweird.f32 %v3431_v43 }
 0x18e   : > { %vm603_vm8 = vmor %vm601_vm7, %vm602_vm6 }
 0x18f   : > { %v597_v46 = vmul.f32 %v3431_v43, %v596_v45  ;;  %v594_v47 = vsel %vm593_vm5, %v3429_v36, %v590_v44 }
 0x190   : > { %v605_v51 = vmul.f32 %v594_v47, %v571_v15 }
 0x191   : > { %v598_v48 = vmul.f32 0.5, %v597_v46 }
 0x192   : > { %v608_v56 = vmul.f32 %v607_v52, %v605_v51 }
 0x193   : > { %v599_v50 = vsub.f32 1.5, %v598_v48 }
 0x194   : > { %v611_v59 = vadd.f32 %v610_v57, %v608_v56 }
 0x195   : > { %v600_v53 = vmul.f32 %v3431_v43, %v599_v50 }
 0x197   : > { %v604_v54 = vsel %vm603_vm8, %v3431_v43, %v600_v53 }
 0x198   : > { %v606_v55 = vmul.f32 %v604_v54, %v572_v20 }
 0x19a   : > { %v609_v58 = vmul.f32 %v607_v52, %v606_v55 }
 0x19c   : > { %v612_v60 = vadd.f32 %v610_v57, %v609_v58 }
 0x19e   : > { %v625_v61 = vpack.c.bf16 %v612_v60, %v611_v59 }
 0x1a0   : > { %2895 = vmatmul.msk.bf16.vlgmr.msra.gmra.mxu0 %vm555_vm1, %v625_v61 }
 0x21d   : > { %v651_v5 = vpop.f32.mrf.mxu0 }
 0x21e   : > { %v652_v6 = vadd.f32 %v651_v5, %v626_v3 }
 0x220   : > { %v4111_v7 = vpack.c.bf16 %v652_v6, %v652_v6 }
 0x222   : > { %660 = vrot.lane.b32.xlu2 %v4111_v7, %s3801_s20  ;;  %676 = vrot.lane.b32.xlu1 %v4111_v7, %s3802_s26 }
 0x225   : > { %v653_v8 = vpop.f32.mrf.mxu0 }
 0x226   : > { %v654_v9 = vadd.f32 %v653_v8, %v626_v3 }
 0x228   : > { %v4117_v10 = vpack.c.bf16 %v654_v9, %v654_v9 }
 0x22a   : > { %674 = vrot.lane.b32.xlu0 %v4117_v10, %s3803_s14  ;;  %672 = vrot.lane.b32.xlu2 %v4111_v7, %s3803_s14 }
 0x22b   : > { %662 = vrot.lane.b32.xlu1 %v4117_v10, %s3801_s20 }
 0x232   : > { %682 = vrot.lane.b32.xlu0 %v4117_v10, %s3804_s19  ;;  %678 = vrot.lane.b32.xlu2 %v4117_v10, %s3802_s26 }
 0x233   : > { %680 = vrot.lane.b32.xlu1 %v4111_v7, %s3804_s19 }
 0x23a   : > { %666 = vrot.lane.b32.xlu0 %v4117_v10, %s3805_s11  ;;  %684 = vrot.lane.b32.xlu2 %v4111_v7, %s3806_s23 }
 0x23b   : > { %670 = vrot.lane.b32.xlu1 %v4117_v10, %s3807_s12 }
 0x242   : > { %686 = vrot.lane.b32.xlu0 %v4117_v10, %s3806_s23  ;;  %668 = vrot.lane.b32.xlu2 %v4111_v7, %s3807_s12 }
 0x24a   : > { %690 = vrot.lane.b32.xlu0 %v4117_v10, %s3800_s29  ;;  %664 = vrot.lane.b32.xlu2 %v4111_v7, %s3805_s11 }
 0x27c   : > { %v661_v11 = vpop.permute.xlu2 %660 }
 0x284   : > { %v673_v13 = vpop.permute.xlu2 %672 }
 0x285   : > { %v709_v14 = vsel %vm704_vm10, %v673_v13, 0 }
 0x286   : > { %718 = vmatpush.bf16.xpose.msra.mxu1 %v709_v14 }
 0x28c   : > { %v679_v15 = vpop.permute.xlu2 %678 }
 0x28d   : > { %2896 = vmatmul.msk.bf16.vlgmr.msra.gmra.mxu1 %vm704_vm10, %v4111_v7  ;;  %v766_v16 = vsel %vm704_vm10, %v679_v15, 0 }
 0x28e   : > { %775 = vmatpush.bf16.xpose.msrb.mxu0 %v766_v16 }
 0x294   : > { %v685_v17 = vpop.permute.xlu2 %684  ;;  %v677_v18 = vpop.permute.xlu1 %676 }
 0x295   : > { %v747_v19 = vsel %vm704_vm10, %v677_v18, 0  ;;  %v823_v20 = vsel %vm704_vm10, %v685_v17, 0 }
 0x296   : > { %756 = vmatpush.bf16.xpose.msra.mxu3 %v747_v19 }
 0x29c   : > { %v675_v21 = vpop.permute.xlu0 %674  ;;  %v669_v24 = vpop.permute.xlu2 %668 }
 0x29d   : > { %v663_v22 = vpop.permute.xlu1 %662  ;;  %2898 = vmatmul.msk.bf16.vlgmr.msra.gmra.mxu3 %vm704_vm10, %v661_v11  ;;  %v728_v23 = vsel %vm704_vm10, %v675_v21, 0 }
 0x29e   : > { %832 = vmatpush.bf16.xpose.msrb.mxu3 %v823_v20  ;;  %2899 = vmatmul.msk.bf16.vlgmr.msrb.gmra.mxu0 %vm704_vm10, %v663_v22 }
 0x29f   : > { %737 = vmatpush.bf16.xpose.msra.mxu2 %v728_v23 }
 0x2a4   : > { %v683_v26 = vpop.permute.xlu0 %682  ;;  %v665_v33 = vpop.permute.xlu2 %664 }
 0x2a5   : > { %v681_v27 = vpop.permute.xlu1 %680  ;;  %v804_v28 = vsel %vm704_vm10, %v683_v26, 0 }
 0x2a6   : > { %2897 = vmatmul.msk.bf16.vlgmr.msra.gmra.mxu2 %vm704_vm10, %v4117_v10  ;;  %v785_v30 = vsel %vm704_vm10, %v681_v27, 0 }
 0x2a7   : > { %813 = vmatpush.bf16.xpose.msrb.mxu2 %v804_v28  ;;  %794 = vmatpush.bf16.xpose.msrb.mxu1 %v785_v30 }
 0x2ac   : > { %v667_v31 = vpop.permute.xlu0 %666 }
 0x2ad   : > { %2902 = vmatmul.msk.bf16.vlgmr.msrb.gmra.mxu3 %vm704_vm10, %v669_v24  ;;  %v671_v36 = vpop.permute.xlu1 %670 }
 0x2ae   : > { %2900 = vmatmul.msk.bf16.vlgmr.msrb.gmra.mxu1 %vm704_vm10, %v665_v33 }
 0x2b4   : > { %v687_v34 = vpop.permute.xlu0 %686 }
 0x2b5   : > { %v842_v35 = vsel %vm704_vm10, %v687_v34, 0 }
 0x2b6   : > { %2901 = vmatmul.msk.bf16.vlgmr.msrb.gmra.mxu2 %vm704_vm10, %v667_v31  ;;  %851 = vmatpush.bf16.xpose.msra.mxu0 %v842_v35 }
 0x2bc   : > { %v691_v37 = vpop.permute.xlu0 %690 }
 0x2bd   : > { %v985_v38 = vsel %vm964_vm11, %v691_v37, 0  ;;  %2903 = vmatmul.msk.bf16.vlgmr.msra.gmra.mxu0 %vm704_vm10, %v671_v36 }
 0x2be   : > { %994 = vmatpush.bf16.msra.mxu2 %v985_v38 }
 0x30a   : > { %v720_v39 = vpop.f32.mrf.mxu1 }
 0x30b   : > { %v857_v40 = vmul.f32 0.35355338, %v720_v39 }
 0x30d   : > { %v865_v41 = vsel %vm704_vm10, %v857_v40, -inf }
 0x30e   : > { %866 = vmax.xlane.f32.xlu1 %v865_v41 }
 0x312   : > { %v722_v42 = vpop.f32.mrf.mxu1 }
 0x31b   : > { %v777_v43 = vpop.f32.mrf.mxu0 }
 0x31c   : > { %v860_v44 = vmul.f32 0.35355338, %v777_v43 }
 0x31e   : > { %v874_v45 = vsel %vm704_vm10, %v860_v44, -inf }
 0x31f   : > { %875 = vmax.xlane.f32.xlu0 %v874_v45 }
 0x320   : > { %v758_v46 = vpop.f32.mrf.mxu3 }
 0x321   : > { %v859_v47 = vmul.f32 0.35355338, %v758_v46 }
 0x323   : > { %v779_v48 = vpop.f32.mrf.mxu0  ;;  %v871_v50 = vsel %vm704_vm10, %v859_v47, -inf }
 0x324   : > { %872 = vmax.xlane.f32.xlu2 %v871_v50 }
 0x328   : > { %v760_v52 = vpop.f32.mrf.mxu3 }
 0x329   : > { %v739_v51 = vpop.f32.mrf.mxu2 }
 0x32a   : > { %v858_v53 = vmul.f32 0.35355338, %v739_v51 }
 0x32b   : > { %v796_v54 = vpop.f32.mrf.mxu1 }
 0x32c   : > { %v868_v55 = vsel %vm704_vm10, %v858_v53, -inf  ;;  %v861_v56 = vmul.f32 0.35355338, %v796_v54 }
 0x32d   : > { %869 = vmax.xlane.f32.xlu0 %v868_v55 }
 0x32e   : > { %v877_v62 = vsel %vm704_vm10, %v861_v56, -inf }
 0x330   : > { %v834_v58 = vpop.f32.mrf.mxu3 }
 0x331   : > { %v741_v57 = vpop.f32.mrf.mxu2  ;;  %v863_v59 = vmul.f32 0.35355338, %v834_v58 }
 0x333   : > { %v798_v60 = vpop.f32.mrf.mxu1  ;;  %v883_v61 = vsel %vm704_vm10, %v863_v59, -inf }
 0x334   : > { %884 = vmax.xlane.f32.xlu1 %v883_v61 }
 0x335   : > { %878 = vmax.xlane.f32.xlu0 %v877_v62 }
 0x338   : > { %v836_v1 = vpop.f32.mrf.mxu3 }
 0x339   : > { %v815_v0 = vpop.f32.mrf.mxu2 }
 0x33a   : > { %v853_v3 = vpop.f32.mrf.mxu0  ;;  %v862_v9 = vmul.f32 0.35355338, %v815_v0 }
 0x33b   : > { %v864_v5 = vmul.f32 0.35355338, %v853_v3 }
 0x33c   : > { %v880_v13 = vsel %vm704_vm10, %v862_v9, -inf }
 0x33d   : > { %v886_v6 = vsel %vm704_vm10, %v864_v5, -inf }
 0x33e   : > { %887 = vmax.xlane.f32.xlu2 %v886_v6 }
 0x341   : > { %v817_v8 = vpop.f32.mrf.mxu2 }
 0x342   : > { %v855_v11 = vpop.f32.mrf.mxu0 }
 0x346   : > { %881 = vmax.xlane.f32.xlu2 %v880_v13 }
 0x349   : > { %694 = vrot.lane.b32.xlu0 %v4117_v10, %s3808_s16 }
 0x34d   : > { %688 = vrot.lane.b32.xlu1 %v4111_v7, %s3800_s29 }
 0x351   : > { %698 = vrot.lane.b32.xlu0 %v4117_v10, %s3809_s27 }
 0x35e   : > { %692 = vrot.lane.b32.xlu2 %v4111_v7, %s3808_s16 }
 0x381   : > { %v867_v14 = vpop.xlane.xlu1 %866 }
 0x382   : > { %v889_v15 = vsub.f32 %v857_v40, %v867_v14 }
 0x384   : > { %v897_v16 = vmul.f32 1.442695, %v889_v15 }
 0x386   : > { %3432 = vpow2.f32 %v897_v16 }
 0x38c   : > { %v4178_v17 = vpop.eup %3432 }
 0x38d   : > { %v913_v18 = vsel %vm704_vm10, %v4178_v17, 0.0 }
 0x38e   : > { %914 = vadd.xlane.f32.xlu2 %v913_v18 }
 0x392   : > { %v876_v19 = vpop.xlane.xlu0 %875 }
 0x393   : > { %v892_v20 = vsub.f32 %v860_v44, %v876_v19 }
 0x395   : > { %v903_v21 = vmul.f32 1.442695, %v892_v20 }
 0x397   : > { %3434 = vpow2.f32 %v903_v21  ;;  %v873_v22 = vpop.xlane.xlu2 %872 }
 0x398   : > { %v891_v23 = vsub.f32 %v859_v47, %v873_v22 }
 0x39a   : > { %v901_v24 = vmul.f32 1.442695, %v891_v23 }
 0x39c   : > { %3436 = vpow2.f32 %v901_v24 }
 0x39d   : > { %v4182_v26 = vpop.eup %3434 }
 0x39e   : > { %v922_v27 = vsel %vm704_vm10, %v4182_v26, 0.0 }
 0x39f   : > { %923 = vadd.xlane.f32.xlu1 %v922_v27 }
 0x3a0   : > { %v870_v28 = vpop.xlane.xlu0 %869 }
 0x3a1   : > { %v890_v30 = vsub.f32 %v858_v53, %v870_v28 }
 0x3a2   : > { %v4186_v31 = vpop.eup %3436 }
 0x3a3   : > { %v899_v33 = vmul.f32 1.442695, %v890_v30  ;;  %v919_v34 = vsel %vm704_vm10, %v4186_v31, 0.0 }
 0x3a4   : > { %920 = vadd.xlane.f32.xlu0 %v919_v34 }
 0x3a5   : > { %3438 = vpow2.f32 %v899_v33 }
 0x3a7   : > { %v885_v36 = vpop.xlane.xlu1 %884 }
 0x3a8   : > { %v879_v35 = vpop.xlane.xlu0 %878  ;;  %v895_v38 = vsub.f32 %v863_v59, %v885_v36 }
 0x3a9   : > { %v893_v37 = vsub.f32 %v861_v56, %v879_v35 }
 0x3aa   : > { %v909_v41 = vmul.f32 1.442695, %v895_v38 }
 0x3ab   : > { %v4190_v39 = vpop.eup %3438  ;;  %v905_v40 = vmul.f32 1.442695, %v893_v37 }
 0x3ac   : > { %v916_v42 = vsel %vm704_vm10, %v4190_v39, 0.0 }
 0x3ad   : > { %3440 = vpow2.f32 %v905_v40  ;;  %917 = vadd.xlane.f32.xlu1 %v916_v42 }
 0x3ae   : > { %3442 = vpow2.f32 %v909_v41 }
 0x3b1   : > { %v888_v43 = vpop.xlane.xlu2 %887 }
 0x3b2   : > { %v896_v45 = vsub.f32 %v864_v5, %v888_v43 }
 0x3b3   : > { %v4194_v44 = vpop.eup %3440 }
 0x3b4   : > { %v4196_v46 = vpop.eup %3442  ;;  %v925_v47 = vsel %vm704_vm10, %v4194_v44, 0.0  ;;  %v911_v48 = vmul.f32 1.442695, %v896_v45 }
 0x3b5   : > { %926 = vadd.xlane.f32.xlu1 %v925_v47  ;;  %v931_v50 = vsel %vm704_vm10, %v4196_v46, 0.0 }
 0x3b6   : > { %932 = vadd.xlane.f32.xlu0 %v931_v50  ;;  %3444 = vpow2.f32 %v911_v48 }
 0x3b9   : > { %v882_v51 = vpop.xlane.xlu2 %881 }
 0x3ba   : > { %v894_v52 = vsub.f32 %v862_v9, %v882_v51 }
 0x3bb   : > { %v695_v53 = vpop.permute.xlu0 %694 }
 0x3bc   : > { %v1023_v54 = vsel %vm964_vm11, %v695_v53, 0  ;;  %v3445_v55 = vpop.eup %3444  ;;  %v907_v56 = vmul.f32 1.442695, %v894_v52 }
 0x3bd   : > { %1032 = vmatpush.bf16.msrb.mxu0 %v1023_v54  ;;  %v934_v57 = vsel %vm704_vm10, %v3445_v55, 0.0 }
 0x3be   : > { %3446 = vpow2.f32 %v907_v56  ;;  %935 = vadd.xlane.f32.xlu2 %v934_v57 }
 0x3bf   : > { %v689_v58 = vpop.permute.xlu1 %688 }
 0x3c0   : > { %v966_v59 = vsel %vm964_vm11, %v689_v58, 0 }
 0x3c1   : > { %v693_v60 = vpop.permute.xlu2 %692  ;;  %975 = vmatpush.bf16.msra.mxu1 %v966_v59 }
 0x3c2   : > { %v1004_v61 = vsel %vm964_vm11, %v693_v60, 0 }
 0x3c3   : > { %v699_v62 = vpop.permute.xlu0 %698  ;;  %1013 = vmatpush.bf16.msra.mxu3 %v1004_v61 }
 0x3c4   : > { %v1061_v0 = vsel %vm964_vm11, %v699_v62, 0  ;;  %v3447_v1 = vpop.eup %3446 }
 0x3c5   : > { %1070 = vmatpush.bf16.msrb.mxu2 %v1061_v0  ;;  %v928_v3 = vsel %vm704_vm10, %v3447_v1, 0.0 }
 0x3c6   : > { %929 = vadd.xlane.f32.xlu2 %v928_v3 }
 0x3ca   : > { %702 = vrot.lane.b32.xlu0 %v4117_v10, %s3810_s21 }
 0x3ce   : > { %700 = vrot.lane.b32.xlu1 %v4111_v7, %s3810_s21 }
 0x3d6   : > { %1150 = vrot.lane.b32.xlu1 %v4083_v25, %s3799_s7 }
 0x3de   : > { %696 = vrot.lane.b32.xlu2 %v4111_v7, %s3809_s27 }
 0x401   : > { %v915_v5 = vpop.xlane.xlu2 %914 }
 0x402   : > { %3448 = vrcp.f32 %v915_v5 }
 0x408   : > { %v3449_v6 = vpop.eup %3448 }
 0x409   : > { %v945_v8 = vmul.f32 %v3449_v6, %v4178_v17 }
 0x40b   : > { %v953_v9 = vpack.c.bf16 %v945_v8, %v945_v8 }
 0x40d   : > { %2904 = vmatmul.msk.bf16.vlgmr.msra.gmra.mxu1 %vm704_vm10, %v953_v9 }
 0x412   : > { %v924_v11 = vpop.xlane.xlu1 %923 }
 0x413   : > { %3450 = vrcp.f32 %v924_v11 }
 0x417   : > { %v921_v13 = vpop.xlane.xlu0 %920 }
 0x418   : > { %3452 = vrcp.f32 %v921_v13 }
 0x419   : > { %v3451_v10 = vpop.eup %3450 }
 0x41a   : > { %v948_v14 = vmul.f32 %v3451_v10, %v4182_v26 }
 0x41c   : > { %v956_v15 = vpack.c.bf16 %v948_v14, %v948_v14 }
 0x41e   : > { %v3453_v25 = vpop.eup %3452  ;;  %2907 = vmatmul.msk.bf16.vlgmr.msrb.gmra.mxu0 %vm704_vm10, %v956_v15 }
 0x41f   : > { %v947_v7 = vmul.f32 %v3453_v25, %v4186_v31 }
 0x420   : > { %v918_v16 = vpop.xlane.xlu1 %917 }
 0x421   : > { %3454 = vrcp.f32 %v918_v16  ;;  %v955_v18 = vpack.c.bf16 %v947_v7, %v947_v7 }
 0x423   : > { %2906 = vmatmul.msk.bf16.vlgmr.msra.gmra.mxu3 %vm704_vm10, %v955_v18 }
 0x427   : > { %v3455_v17 = vpop.eup %3454 }
 0x428   : > { %v946_v19 = vmul.f32 %v3455_v17, %v4190_v39  ;;  %v927_v23 = vpop.xlane.xlu1 %926 }
 0x429   : > { %v933_v22 = vpop.xlane.xlu0 %932 }
 0x42a   : > { %v954_v20 = vpack.c.bf16 %v946_v19, %v946_v19 }
 0x42c   : > { %2905 = vmatmul.msk.bf16.vlgmr.msra.gmra.mxu2 %vm704_vm10, %v954_v20 }
 0x431   : > { %v936_v21 = vpop.xlane.xlu2 %935 }
 0x432   : > { %3456 = vrcp.f32 %v936_v21 }
 0x433   : > { %3458 = vrcp.f32 %v933_v22  ;;  %v1147_v22 = vperm.slane %v4093_v32, 3 }
 0x434   : > { %3460 = vrcp.f32 %v927_v23 }
 0x438   : > { %v3457_v24 = vpop.eup %3456 }
 0x439   : > { %v930_v26 = vpop.xlane.xlu2 %929  ;;  %v952_v27 = vmul.f32 %v3457_v24, %v3445_v55  ;;  %v3459_v28 = vpop.eup %3458 }
 0x43a   : > { %3462 = vrcp.f32 %v930_v26  ;;  %v3461_v33 = vpop.eup %3460  ;;  %v951_v34 = vmul.f32 %v3459_v28, %v4196_v46 }
 0x43b   : > { %v960_v35 = vpack.c.bf16 %v952_v27, %v952_v27  ;;  %v949_v38 = vmul.f32 %v3461_v33, %v4194_v44 }
 0x43c   : > { %v703_v30 = vpop.permute.xlu0 %702  ;;  %v959_v42 = vpack.c.bf16 %v951_v34, %v951_v34  ;;  %v3222_v34 = vld [vmem:[%s4049_s24 + $0x14] sm:$0xf] }
 0x43d   : > { %v1099_v31 = vsel %vm964_vm11, %v703_v30, 0  ;;  %v957_v47 = vpack.c.bf16 %v949_v38, %v949_v38 }
 0x43e   : > { %1108 = vmatpush.bf16.msra.mxu0 %v1099_v31 }
 0x440   : > { %v701_v36 = vpop.permute.xlu1 %700  ;;  %v3463_v37 = vpop.eup %3462 }
 0x441   : > { %2911 = vmatmul.msk.bf16.vlgmr.msra.gmra.mxu0 %vm704_vm10, %v960_v35  ;;  %v1080_v39 = vsel %vm964_vm11, %v701_v36, 0  ;;  %v950_v40 = vmul.f32 %v3463_v37, %v3447_v1  ;;  %v697_v41 = vpop.permute.xlu2 %696  ;;  %v2917_v35 = vld [vmem:[%s4049_s24 + $0x18] sm:$0xf0]  ;;  %v3220_v37 = vld [vmem:[%s4049_s24 + $0x4] sm:$0xf] }
 0x442   : > { %1089 = vmatpush.bf16.msrb.mxu3 %v1080_v39  ;;  %v1042_v43 = vsel %vm964_vm11, %v697_v41, 0  ;;  %v4256_v36 = vor.u32 %v3222_v34, %v2917_v35 }
 0x443   : > { %v958_v45 = vpack.c.bf16 %v950_v40, %v950_v40  ;;  %1051 = vmatpush.bf16.msrb.mxu1 %v1042_v43 }
 0x444   : > { %1242 = vmatpush.bf16.msra.mxu2 %v4256_v36 }
 0x445   : > { %2910 = vmatmul.msk.bf16.vlgmr.msrb.gmra.mxu3 %vm704_vm10, %v959_v42  ;;  %2909 = vmatmul.msk.bf16.vlgmr.msrb.gmra.mxu2 %vm704_vm10, %v958_v45 }
 0x446   : > { %2908 = vmatmul.msk.bf16.vlgmr.msrb.gmra.mxu1 %vm704_vm10, %v957_v47 }
 0x448   : > { %v1151_v5 = vpop.permute.xlu1 %1150 }
 0x449   : > { %1163 = vmatpush.bf16.msra.mxu1 %v1151_v5 }
 0x48a   : > { %v977_v44 = vpop.f32.mrf.mxu1 }
 0x492   : > { %v979_v46 = vpop.f32.mrf.mxu1 }
 0x49b   : > { %v1034_v48 = vpop.f32.mrf.mxu0 }
 0x4a3   : > { %v1036_v50 = vpop.f32.mrf.mxu0 }
 0x4a6   : > { %v1015_v51 = vpop.f32.mrf.mxu3 }
 0x4a7   : > { %v3396_v52 = vpack.i.bf16 %v1034_v48, %v1015_v51 }
 0x4a9   : > { %3397 = vrot.lane.b32.xlu0 %v3396_v52, %s3811_s9 }
 0x4ae   : > { %v1017_v54 = vpop.f32.mrf.mxu3 }
 0x4af   : > { %v996_v53 = vpop.f32.mrf.mxu2 }
 0x4b1   : > { %1148 = vrot.lane.b32.xlu0 %v4088_v29, %s3799_s7 }
 0x4b7   : > { %v998_v55 = vpop.f32.mrf.mxu2 }
 0x4be   : > { %v1110_v56 = vpop.f32.mrf.mxu0 }
 0x4c3   : > { %v1053_v57 = vpop.f32.mrf.mxu1 }
 0x4c6   : > { %v1112_v58 = vpop.f32.mrf.mxu0 }
 0x4c8   : > { %v1091_v59 = vpop.f32.mrf.mxu3  ;;  %v1072_v61 = vpop.f32.mrf.mxu2 }
 0x4c9   : > { %v3406_v60 = vpack.i.bf16 %v1110_v56, %v1091_v59  ;;  %v3401_v62 = vpack.i.bf16 %v1072_v61, %v1053_v57  ;;  %v1251_v61 = vld [vmem:[#allocation5 + $0x8] sm:$0xff] }
 0x4cb   : > { %3407 = vrot.lane.b32.xlu1 %v3406_v60, %s3812_s13  ;;  %3402 = vrot.lane.b32.xlu2 %v3401_v62, %s3813_s17  ;;  %v1055_v0 = vpop.f32.mrf.mxu1  ;;  %v1250_v60 = vld [vmem:[#allocation5] sm:$0xff] }
 0x4d0   : > { %v1093_v1 = vpop.f32.mrf.mxu3  ;;  %v1074_v3 = vpop.f32.mrf.mxu2 }
 0x4d1   : > { %v1252_v3 = vpack.c.bf16 %v1251_v61, %v1250_v60 }
 0x51b   : > { %v3398_v29 = vpop.permute.xlu0 %3397 }
 0x51c   : > { %v3400_v9 = vunpack.i.h.bf16 %v3398_v29  ;;  %v3399_v11 = vunpack.i.l.bf16 %v3398_v29 }
 0x51e   : > { %v1138_v15 = vsel %vm704_vm10, %v977_v44, %v3399_v11  ;;  %v1139_v25 = vsel %vm704_vm10, %v996_v53, %v3400_v9 }
 0x523   : > { %v1149_v6 = vpop.permute.xlu0 %1148 }
 0x524   : > { %1164 = vmatpush.bf16.msra.mxu1 %v1149_v6 }
 0x525   : > { %v3403_v8 = vpop.permute.xlu2 %3402 }
 0x526   : > { %v3405_v13 = vunpack.i.h.bf16 %v3403_v8  ;;  %v3404_v10 = vunpack.i.l.bf16 %v3403_v8 }
 0x528   : > { %v1142_v18 = vsel %vm1140_vm12, %v1139_v25, %v3405_v13  ;;  %v1141_v17 = vsel %vm1140_vm12, %v1138_v15, %v3404_v10  ;;  %v1217_v13 = vperm.slane %v4101_v49, 3  ;;  %v1220_v25 = vperm.slane %v4101_v49, 4 }
 0x53d   : > { %v3408_v14 = vpop.permute.xlu1 %3407 }
 0x53e   : > { %v3410_v7 = vunpack.i.h.bf16 %v3408_v14  ;;  %v3409_v16 = vunpack.i.l.bf16 %v3408_v14 }
 0x540   : > { %v1145_v19 = vsel %vm1143_vm13, %v1142_v18, %v3410_v7  ;;  %v1144_v20 = vsel %vm1143_vm13, %v1141_v17, %v3409_v16 }
 0x541   : > { %v1146_v21 = vpack.c.bf16 %v1145_v19, %v1144_v20 }
 0x543   : > { %2912 = vmatmul.msk.bf16.vlgmr.msra.gmra.mxu1 %vm555_vm1, %v1146_v21  ;;  %v1253_v21 = vperm.slane %v4108_v63, 5 }
 0x5c0   : > { %v1166_v23 = vpop.f32.mrf.mxu1 }
 0x5c1   : > { %v1167_v24 = vadd.f32 %v1166_v23, %v1147_v22 }
 0x5c3   : > { %v4245_v26 = vadd.f32 %v1167_v24, %v4065_v2  ;;  %v2913_v2 = vld [vmem:[%s4049_s24 + $0x8] sm:$0xf0] }
 0x5c4   : > { %v4263_v38 = vor.u32 %v3220_v37, %v2913_v2 }
 0x5c5   : > { %v1173_v27 = vsel %vm555_vm1, %v4245_v26, 0.0 }
 0x5c6   : > { %1174 = vadd.xlane.f32.xlu2 %v1173_v27  ;;  %1243 = vmatpush.bf16.msra.mxu2 %v4263_v38 }
 0x5c8   : > { %v1168_v28 = vpop.f32.mrf.mxu1 }
 0x5c9   : > { %v1169_v30 = vadd.f32 %v1168_v28, %v1147_v22 }
 0x5cb   : > { %v4250_v31 = vadd.f32 %v1169_v30, %v4069_v4 }
 0x5cd   : > { %v1176_v33 = vsel %vm555_vm1, %v4250_v31, 0.0 }
 0x5ce   : > { %1177 = vadd.xlane.f32.xlu1 %v1176_v33  ;;  %v1224_v33 = vperm.slane %v4093_v32, 4 }
 0x5e7   : > { %1256 = vrot.lane.b32.xlu1 %v4256_v36, %s3803_s14 }
 0x639   : > { %v1175_v4 = vpop.xlane.xlu2 %1174 }
 0x63a   : > { %v1179_v39 = vmul.f32 %v1175_v4, %v4073_v12 }
 0x63c   : > { %v1181_v40 = vsub.f32 %v4245_v26, %v1179_v39 }
 0x63e   : > { %v1183_v41 = vmul.f32 %v1181_v40, %v1181_v40 }
 0x640   : > { %v1185_v42 = vsel %vm555_vm1, %v1183_v41, 0.0 }
 0x641   : > { %v1178_v43 = vpop.xlane.xlu1 %1177  ;;  %1186 = vadd.xlane.f32.xlu0 %v1185_v42 }
 0x642   : > { %v1180_v45 = vmul.f32 %v1178_v43, %v4073_v12 }
 0x644   : > { %v1182_v47 = vsub.f32 %v4250_v31, %v1180_v45 }
 0x646   : > { %v1184_v44 = vmul.f32 %v1182_v47, %v1182_v47 }
 0x648   : > { %v1188_v46 = vsel %vm555_vm1, %v1184_v44, 0.0 }
 0x649   : > { %1189 = vadd.xlane.f32.xlu2 %v1188_v46 }
 0x655   : > { %1254 = vrot.lane.b32.xlu0 %v4263_v38, %s3803_s14 }
 0x659   : > { %v1257_v48 = vpop.permute.xlu1 %1256 }
 0x65a   : > { %1269 = vmatpush.bf16.msra.mxu3 %v1257_v48 }
 0x6b4   : > { %v1187_v50 = vpop.xlane.xlu0 %1186 }
 0x6b5   : > { %v1191_v51 = vmul.f32 %v1187_v50, %v4073_v12 }
 0x6b7   : > { %v1193_v52 = vadd.f32 1e-05, %v1191_v51 }
 0x6b9   : > { %3464 = vrsqrt.f32 %v1193_v52  ;;  %vm1201_vm15 = vweird.f32 %v1193_v52 }
 0x6bc   : > { %v1190_v53 = vpop.xlane.xlu2 %1189 }
 0x6bd   : > { %v1192_v54 = vmul.f32 %v1190_v53, %v4073_v12 }
 0x6bf   : > { %v3465_v55 = vpop.eup %3464  ;;  %v1194_v56 = vadd.f32 1e-05, %v1192_v54 }
 0x6c0   : > { %v1196_v57 = vmul.f32 %v3465_v55, %v1193_v52  ;;  %vm1202_vm14 = vweird.f32 %v3465_v55 }
 0x6c1   : > { %3466 = vrsqrt.f32 %v1194_v56  ;;  %vm1203_vm0 = vmor %vm1201_vm15, %vm1202_vm14  ;;  %vm1211_vm3 = vweird.f32 %v1194_v56 }
 0x6c2   : > { %v1197_v58 = vmul.f32 %v3465_v55, %v1196_v57 }
 0x6c4   : > { %v1198_v59 = vmul.f32 0.5, %v1197_v58 }
 0x6c6   : > { %v1199_v62 = vsub.f32 1.5, %v1198_v59 }
 0x6c7   : > { %v3467_v0 = vpop.eup %3466  ;;  %v1255_v1 = vpop.permute.xlu0 %1254 }
 0x6c8   : > { %v1200_v5 = vmul.f32 %v3465_v55, %v1199_v62  ;;  %v1206_v29 = vmul.f32 %v3467_v0, %v1194_v56  ;;  %1270 = vmatpush.bf16.msra.mxu3 %v1255_v1  ;;  %vm1212_vm2 = vweird.f32 %v3467_v0 }
 0x6c9   : > { %vm1213_vm4 = vmor %vm1211_vm3, %vm1212_vm2 }
 0x6ca   : > { %v1207_v6 = vmul.f32 %v3467_v0, %v1206_v29  ;;  %v1204_v8 = vsel %vm1203_vm0, %v3465_v55, %v1200_v5 }
 0x6cb   : > { %2922 = vmatmul.msk.bf16.vlgmr.msra.gmra.mxu3 %vm555_vm1, %v1252_v3  ;;  %v1215_v10 = vmul.f32 %v1204_v8, %v1181_v40 }
 0x6cc   : > { %v1208_v9 = vmul.f32 0.5, %v1207_v6 }
 0x6cd   : > { %v1218_v7 = vmul.f32 %v1217_v13, %v1215_v10 }
 0x6ce   : > { %v1209_v11 = vsub.f32 1.5, %v1208_v9 }
 0x6cf   : > { %v1221_v17 = vadd.f32 %v1220_v25, %v1218_v7 }
 0x6d0   : > { %v1210_v14 = vmul.f32 %v3467_v0, %v1209_v11 }
 0x6d2   : > { %v1214_v15 = vsel %vm1213_vm4, %v3467_v0, %v1210_v14 }
 0x6d3   : > { %v1216_v16 = vmul.f32 %v1214_v15, %v1182_v47 }
 0x6d5   : > { %v1219_v18 = vmul.f32 %v1217_v13, %v1216_v16 }
 0x6d7   : > { %v1222_v19 = vadd.f32 %v1220_v25, %v1219_v18 }
 0x6d9   : > { %v1223_v20 = vpack.c.bf16 %v1222_v19, %v1221_v17 }
 0x6db   : > { %2921 = vmatmul.msk.bf16.vlgmr.msra.gmra.mxu2 %vm555_vm1, %v1223_v20 }
 0x74e   : > { %v1272_v22 = vpop.f32.mrf.mxu3 }
 0x74f   : > { %v1273_v23 = vadd.f32 %v1272_v22, %v1253_v21 }
 0x751   : > { %v4281_v24 = vpack.c.bf16 %v1273_v23, %v1273_v23 }
 0x753   : > { %1297 = vrot.lane.b32.xlu2 %v4281_v24, %s3801_s20  ;;  %v1329_v49 = vsel %vm704_vm10, %v4281_v24, 0 }
 0x754   : > { %1338 = vmatpush.bf16.xpose.msrb.mxu0 %v1329_v49 }
 0x756   : > { %v1274_v27 = vpop.f32.mrf.mxu3 }
 0x757   : > { %v1275_v28 = vadd.f32 %v1274_v27, %v1253_v21 }
 0x759   : > { %v4287_v30 = vpack.c.bf16 %v1275_v28, %v1275_v28 }
 0x75b   : > { %1299 = vrot.lane.b32.xlu0 %v4287_v30, %s3801_s20  ;;  %v1348_v63 = vsel %vm704_vm10, %v4287_v30, 0 }
 0x75c   : > { %1357 = vmatpush.bf16.xpose.msrb.mxu1 %v1348_v63 }
 0x75e   : > { %v1245_v34 = vpop.f32.mrf.mxu2 }
 0x75f   : > { %v1246_v35 = vadd.f32 %v1245_v34, %v1224_v33 }
 0x761   : > { %v1277_v37 = vpack.c.bf16 %v1246_v35, %v1246_v35 }
 0x763   : > { %1305 = vrot.lane.b32.xlu0 %v4281_v24, %s3807_s12  ;;  %1281 = vrot.lane.b32.xlu1 %v1277_v37, %s3801_s20 }
 0x764   : > { %2923 = vmatmul.msk.bf16.vlgmr.msrb.gmra.mxu0 %vm704_vm10, %v1277_v37 }
 0x766   : > { %v1247_v2 = vpop.f32.mrf.mxu2 }
 0x767   : > { %v1248_v4 = vadd.f32 %v1247_v2, %v1224_v33 }
 0x769   : > { %v1278_v39 = vpack.c.bf16 %v1248_v4, %v1248_v4 }
 0x76b   : > { %1291 = vrot.lane.b32.xlu0 %v1278_v39, %s3807_s12  ;;  %1283 = vrot.lane.b32.xlu2 %v1278_v39, %s3801_s20 }
 0x76c   : > { %2924 = vmatmul.msk.bf16.vlgmr.msrb.gmra.mxu1 %vm704_vm10, %v1278_v39  ;;  %1307 = vrot.lane.b32.xlu1 %v4287_v30, %s3807_s12 }
 0x773   : > { %1285 = vrot.lane.b32.xlu0 %v1277_v37, %s3805_s11  ;;  %1289 = vrot.lane.b32.xlu2 %v1277_v37, %s3807_s12 }
 0x774   : > { %1301 = vrot.lane.b32.xlu1 %v4281_v24, %s3805_s11 }
 0x77b   : > { %1315 = vrot.lane.b32.xlu0 %v4287_v30, %s3802_s26  ;;  %1303 = vrot.lane.b32.xlu2 %v4287_v30, %s3805_s11 }
 0x77c   : > { %1287 = vrot.lane.b32.xlu1 %v1278_v39, %s3805_s11 }
 0x7ad   : > { %v1298_v32 = vpop.permute.xlu2 %1297 }
 0x7ae   : > { %v1367_v40 = vsel %vm704_vm10, %v1298_v32, 0 }
 0x7af   : > { %1376 = vmatpush.bf16.xpose.msrb.mxu2 %v1367_v40 }
 0x7c5   : > { %v1284_v41 = vpop.permute.xlu2 %1283 }
 0x7cd   : > { %v1300_v42 = vpop.permute.xlu0 %1299  ;;  %v1290_v43 = vpop.permute.xlu2 %1289 }
 0x7ce   : > { %v1386_v45 = vsel %vm704_vm10, %v1300_v42, 0 }
 0x7cf   : > { %1395 = vmatpush.bf16.xpose.msrb.mxu3 %v1386_v45 }
 0x7d5   : > { %v1306_v47 = vpop.permute.xlu0 %1305  ;;  %v1282_v44 = vpop.permute.xlu1 %1281 }
 0x7d6   : > { %v1443_v46 = vsel %vm704_vm10, %v1306_v47, 0  ;;  %v1304_v48 = vpop.permute.xlu2 %1303  ;;  %2925 = vmatmul.msk.bf16.vlgmr.msrb.gmra.mxu2 %vm704_vm10, %v1282_v44  ;;  %2926 = vmatmul.msk.bf16.vlgmr.msrb.gmra.mxu3 %vm704_vm10, %v1284_v41 }
 0x7d7   : > { %v1424_v50 = vsel %vm704_vm10, %v1304_v48, 0  ;;  %1452 = vmatpush.bf16.xpose.msra.mxu2 %v1443_v46 }
 0x7d8   : > { %1433 = vmatpush.bf16.xpose.msra.mxu1 %v1424_v50 }
 0x7dd   : > { %v1292_v51 = vpop.permute.xlu0 %1291 }
 0x7de   : > { %v1308_v52 = vpop.permute.xlu1 %1307 }
 0x7df   : > { %v1462_v53 = vsel %vm704_vm10, %v1308_v52, 0 }
 0x7e0   : > { %1471 = vmatpush.bf16.xpose.msra.mxu3 %v1462_v53 }
 0x7e1   : > { %v1340_v54 = vpop.f32.mrf.mxu0 }
 0x7e2   : > { %v1477_v55 = vmul.f32 0.35355338, %v1340_v54 }
 0x7e4   : > { %v1485_v56 = vsel %vm704_vm10, %v1477_v55, -inf }
 0x7e5   : > { %1486 = vmax.xlane.f32.xlu1 %v1485_v56  ;;  %v1286_v57 = vpop.permute.xlu0 %1285 }
 0x7e6   : > { %v1302_v58 = vpop.permute.xlu1 %1301  ;;  %2929 = vmatmul.msk.bf16.vlgmr.msra.gmra.mxu2 %vm704_vm10, %v1290_v43 }
 0x7e7   : > { %v1405_v59 = vsel %vm704_vm10, %v1302_v58, 0  ;;  %2930 = vmatmul.msk.bf16.vlgmr.msra.gmra.mxu3 %vm704_vm10, %v1292_v51 }
 0x7e8   : > { %1414 = vmatpush.bf16.xpose.msra.mxu0 %v1405_v59 }
 0x7e9   : > { %v1342_v60 = vpop.f32.mrf.mxu0  ;;  %v1359_v61 = vpop.f32.mrf.mxu1 }
 0x7ea   : > { %v1478_v62 = vmul.f32 0.35355338, %v1359_v61 }
 0x7ec   : > { %v1488_v0 = vsel %vm704_vm10, %v1478_v62, -inf }
 0x7ed   : > { %1489 = vmax.xlane.f32.xlu2 %v1488_v0  ;;  %v1316_v1 = vpop.permute.xlu0 %1315 }
 0x7ee   : > { %v1642_v3 = vsel %vm964_vm11, %v1316_v1, 0  ;;  %v1288_v5 = vpop.permute.xlu1 %1287 }
 0x7ef   : > { %2927 = vmatmul.msk.bf16.vlgmr.msra.gmra.mxu0 %vm704_vm10, %v1286_v57  ;;  %2928 = vmatmul.msk.bf16.vlgmr.msra.gmra.mxu1 %vm704_vm10, %v1288_v5 }
 0x7f0   : > { %1651 = vmatpush.bf16.msrb.mxu3 %v1642_v3 }
 0x7f1   : > { %v1361_v29 = vpop.f32.mrf.mxu1 }
 0x858   : > { %v1487_v14 = vpop.xlane.xlu1 %1486 }
 0x859   : > { %v1378_v6 = vpop.f32.mrf.mxu2  ;;  %v1397_v8 = vpop.f32.mrf.mxu3  ;;  %v1509_v25 = vsub.f32 %v1477_v55, %v1487_v14 }
 0x85a   : > { %v1479_v34 = vmul.f32 0.35355338, %v1378_v6  ;;  %v1480_v40 = vmul.f32 0.35355338, %v1397_v8 }
 0x85b   : > { %v1517_v16 = vmul.f32 1.442695, %v1509_v25 }
 0x85c   : > { %v1491_v39 = vsel %vm704_vm10, %v1479_v34, -inf  ;;  %v1494_v41 = vsel %vm704_vm10, %v1480_v40, -inf }
 0x860   : > { %v1490_v9 = vpop.xlane.xlu2 %1489 }
 0x861   : > { %v1510_v11 = vsub.f32 %v1478_v62, %v1490_v9  ;;  %v1380_v13 = vpop.f32.mrf.mxu2  ;;  %v1399_v10 = vpop.f32.mrf.mxu3 }
 0x863   : > { %v1519_v15 = vmul.f32 1.442695, %v1510_v11 }
 0x865   : > { %3468 = vpow2.f32 %v1519_v15 }
 0x866   : > { %3470 = vpow2.f32 %v1517_v16 }
 0x869   : > { %v1454_v7 = vpop.f32.mrf.mxu2 }
 0x86a   : > { %v1473_v18 = vpop.f32.mrf.mxu3  ;;  %v1483_v42 = vmul.f32 0.35355338, %v1454_v7 }
 0x86b   : > { %v4327_v17 = vpop.eup %3468  ;;  %v1484_v28 = vmul.f32 0.35355338, %v1473_v18 }
 0x86c   : > { %v1416_v19 = vpop.f32.mrf.mxu0  ;;  %v1435_v20 = vpop.f32.mrf.mxu1  ;;  %v1536_v21 = vsel %vm704_vm10, %v4327_v17, 0.0  ;;  %v1503_v43 = vsel %vm704_vm10, %v1483_v42, -inf }
 0x86d   : > { %v1481_v22 = vmul.f32 0.35355338, %v1416_v19  ;;  %v1482_v23 = vmul.f32 0.35355338, %v1435_v20  ;;  %1537 = vadd.xlane.f32.xlu1 %v1536_v21  ;;  %v3471_v35 = vpop.eup %3470  ;;  %v1506_v4 = vsel %vm704_vm10, %v1484_v28, -inf }
 0x86e   : > { %v1533_v32 = vsel %vm704_vm10, %v3471_v35, 0.0 }
 0x86f   : > { %v1497_v49 = vsel %vm704_vm10, %v1481_v22, -inf  ;;  %v1500_v27 = vsel %vm704_vm10, %v1482_v23, -inf }
 0x870   : > { %1498 = vmax.xlane.f32.xlu2 %v1497_v49  ;;  %1501 = vmax.xlane.f32.xlu0 %v1500_v27 }
 0x871   : > { %v1456_v63 = vpop.f32.mrf.mxu2 }
 0x872   : > { %v1475_v33 = vpop.f32.mrf.mxu3 }
 0x874   : > { %v1418_v37 = vpop.f32.mrf.mxu0  ;;  %v1437_v2 = vpop.f32.mrf.mxu1 }
 0x875   : > { %1507 = vmax.xlane.f32.xlu1 %v1506_v4 }
 0x878   : > { %1492 = vmax.xlane.f32.xlu2 %v1491_v39  ;;  %1534 = vadd.xlane.f32.xlu0 %v1533_v32 }
 0x880   : > { %1495 = vmax.xlane.f32.xlu0 %v1494_v41 }
 0x888   : > { %1504 = vmax.xlane.f32.xlu0 %v1503_v43 }
 0x88e   : > { %1309 = vrot.lane.b32.xlu1 %v4281_v24, %s3803_s14 }
 0x890   : > { %1313 = vrot.lane.b32.xlu2 %v4281_v24, %s3802_s26 }
 0x89c   : > { %1311 = vrot.lane.b32.xlu0 %v4287_v30, %s3803_s14 }
 0x8a4   : > { %1323 = vrot.lane.b32.xlu0 %v4287_v30, %s3806_s23 }
 0x8e0   : > { %v1538_v45 = vpop.xlane.xlu1 %1537 }
 0x8e3   : > { %v1502_v47 = vpop.xlane.xlu0 %1501  ;;  %v1499_v44 = vpop.xlane.xlu2 %1498 }
 0x8e4   : > { %v1514_v46 = vsub.f32 %v1482_v23, %v1502_v47  ;;  %v1513_v48 = vsub.f32 %v1481_v22, %v1499_v44 }
 0x8e6   : > { %v1527_v50 = vmul.f32 1.442695, %v1514_v46  ;;  %v1525_v51 = vmul.f32 1.442695, %v1513_v48 }
 0x8e8   : > { %3472 = vpow2.f32 %v1527_v50  ;;  %v1508_v52 = vpop.xlane.xlu1 %1507 }
 0x8e9   : > { %3474 = vpow2.f32 %v1525_v51  ;;  %v1516_v53 = vsub.f32 %v1484_v28, %v1508_v52 }
 0x8eb   : > { %v1531_v54 = vmul.f32 1.442695, %v1516_v53  ;;  %v1535_v55 = vpop.xlane.xlu0 %1534  ;;  %v1493_v56 = vpop.xlane.xlu2 %1492 }
 0x8ec   : > { %v1511_v57 = vsub.f32 %v1479_v34, %v1493_v56 }
 0x8ed   : > { %3476 = vpow2.f32 %v1531_v54 }
 0x8ee   : > { %v4346_v58 = vpop.eup %3472  ;;  %v1521_v59 = vmul.f32 1.442695, %v1511_v57 }
 0x8ef   : > { %v4348_v60 = vpop.eup %3474  ;;  %v1548_v61 = vsel %vm704_vm10, %v4346_v58, 0.0 }
 0x8f0   : > { %3478 = vpow2.f32 %v1521_v59  ;;  %1549 = vadd.xlane.f32.xlu2 %v1548_v61  ;;  %v1545_v62 = vsel %vm704_vm10, %v4348_v60, 0.0 }
 0x8f1   : > { %1546 = vadd.xlane.f32.xlu1 %v1545_v62  ;;  %3480 = vrcp.f32 %v1535_v55 }
 0x8f3   : > { %v4354_v0 = vpop.eup %3476  ;;  %v1496_v1 = vpop.xlane.xlu0 %1495 }
 0x8f4   : > { %v1314_v3 = vpop.permute.xlu2 %1313  ;;  %v1512_v5 = vsub.f32 %v1480_v40, %v1496_v1  ;;  %v1554_v6 = vsel %vm704_vm10, %v4354_v0, 0.0 }
 0x8f5   : > { %v1623_v29 = vsel %vm964_vm11, %v1314_v3, 0  ;;  %1555 = vadd.xlane.f32.xlu0 %v1554_v6 }
 0x8f6   : > { %1632 = vmatpush.bf16.msrb.mxu2 %v1623_v29  ;;  %v3479_v8 = vpop.eup %3478  ;;  %v1523_v9 = vmul.f32 1.442695, %v1512_v5 }
 0x8f7   : > { %v1539_v11 = vsel %vm704_vm10, %v3479_v8, 0.0  ;;  %v3481_v10 = vpop.eup %3480 }
 0x8f8   : > { %3482 = vpow2.f32 %v1523_v9  ;;  %v1565_v7 = vmul.f32 %v3481_v10, %v3471_v35 }
 0x8f9   : > { %1540 = vadd.xlane.f32.xlu1 %v1539_v11 }
 0x8fa   : > { %v1573_v20 = vpack.c.bf16 %v1565_v7, %v1565_v7 }
 0x8fb   : > { %v1505_v13 = vpop.xlane.xlu0 %1504 }
 0x8fc   : > { %v1515_v14 = vsub.f32 %v1483_v42, %v1505_v13 }
 0x8fe   : > { %v3483_v15 = vpop.eup %3482  ;;  %v1529_v25 = vmul.f32 1.442695, %v1515_v14 }
 0x8ff   : > { %v1542_v16 = vsel %vm704_vm10, %v3483_v15, 0.0 }
 0x900   : > { %3484 = vpow2.f32 %v1529_v25  ;;  %1543 = vadd.xlane.f32.xlu2 %v1542_v16  ;;  %v1310_v18 = vpop.permute.xlu1 %1309 }
 0x901   : > { %v1585_v19 = vsel %vm964_vm11, %v1310_v18, 0  ;;  %3486 = vrcp.f32 %v1538_v45 }
 0x902   : > { %1594 = vmatpush.bf16.msrb.mxu0 %v1585_v19 }
 0x905   : > { %2931 = vmatmul.msk.bf16.vlgmr.msrb.gmra.mxu0 %vm704_vm10, %v1573_v20 }
 0x906   : > { %v3485_v21 = vpop.eup %3484 }
 0x907   : > { %v1551_v22 = vsel %vm704_vm10, %v3485_v21, 0.0  ;;  %v3487_v23 = vpop.eup %3486 }
 0x908   : > { %1552 = vadd.xlane.f32.xlu2 %v1551_v22  ;;  %v1566_v49 = vmul.f32 %v3487_v23, %v4327_v17 }
 0x909   : > { %1319 = vrot.lane.b32.xlu0 %v4287_v30, %s3804_s19 }
 0x90a   : > { %v1574_v63 = vpack.c.bf16 %v1566_v49, %v1566_v49 }
 0x90e   : > { %v1312_v27 = vpop.permute.xlu0 %1311 }
 0x90f   : > { %v1604_v28 = vsel %vm964_vm11, %v1312_v27, 0 }
 0x910   : > { %1613 = vmatpush.bf16.msrb.mxu1 %v1604_v28 }
 0x912   : > { %1317 = vrot.lane.b32.xlu1 %v4281_v24, %s3804_s19 }
 0x913   : > { %2932 = vmatmul.msk.bf16.vlgmr.msrb.gmra.mxu1 %vm704_vm10, %v1574_v63 }
 0x916   : > { %v1324_v33 = vpop.permute.xlu0 %1323 }
 0x917   : > { %v1718_v34 = vsel %vm964_vm11, %v1324_v33, 0 }
 0x918   : > { %1727 = vmatpush.bf16.msra.mxu3 %v1718_v34 }
 0x920   : > { %1321 = vrot.lane.b32.xlu2 %v4281_v24, %s3806_s23 }
 0x928   : > { %1767 = vrot.lane.b32.xlu2 %v4256_v36, %s3799_s7 }
 0x963   : > { %v1550_v17 = vpop.xlane.xlu2 %1549 }
 0x964   : > { %v1547_v30 = vpop.xlane.xlu1 %1546 }
 0x968   : > { %v1556_v2 = vpop.xlane.xlu0 %1555 }
 0x96c   : > { %v1541_v35 = vpop.xlane.xlu1 %1540 }
 0x96d   : > { %3488 = vrcp.f32 %v1541_v35 }
 0x96e   : > { %3490 = vrcp.f32 %v1550_v17 }
 0x973   : > { %v3489_v37 = vpop.eup %3488  ;;  %v1544_v4 = vpop.xlane.xlu2 %1543 }
 0x974   : > { %v1567_v39 = vmul.f32 %v3489_v37, %v3479_v8  ;;  %3492 = vrcp.f32 %v1544_v4  ;;  %v3491_v40 = vpop.eup %3490 }
 0x975   : > { %3494 = vrcp.f32 %v1547_v30  ;;  %v1570_v24 = vmul.f32 %v3491_v40, %v4346_v58 }
 0x976   : > { %v1575_v32 = vpack.c.bf16 %v1567_v39, %v1567_v39  ;;  %v3504_v39 = vld [vmem:[%s4061_s3] sm:$0xff] }
 0x977   : > { %v1578_v44 = vpack.c.bf16 %v1570_v24, %v1570_v24 }
 0x978   : > { %2933 = vmatmul.msk.bf16.vlgmr.msrb.gmra.mxu2 %vm704_vm10, %v1575_v32  ;;  %v1764_v32 = vperm.slane %v3504_v39, 7 }
 0x97a   : > { %v3493_v41 = vpop.eup %3492 }
 0x97b   : > { %v1568_v42 = vmul.f32 %v3493_v41, %v3483_v15  ;;  %v1320_v36 = vpop.permute.xlu0 %1319  ;;  %v1553_v43 = vpop.xlane.xlu2 %1552 }
 0x97c   : > { %v1680_v45 = vsel %vm964_vm11, %v1320_v36, 0  ;;  %3496 = vrcp.f32 %v1553_v43  ;;  %v3495_v46 = vpop.eup %3494 }
 0x97d   : > { %v1576_v47 = vpack.c.bf16 %v1568_v42, %v1568_v42  ;;  %1689 = vmatpush.bf16.msra.mxu1 %v1680_v45  ;;  %3498 = vrcp.f32 %v1556_v2  ;;  %v1569_v51 = vmul.f32 %v3495_v46, %v4348_v60 }
 0x97f   : > { %2934 = vmatmul.msk.bf16.vlgmr.msrb.gmra.mxu3 %vm704_vm10, %v1576_v47  ;;  %v1577_v59 = vpack.c.bf16 %v1569_v51, %v1569_v51 }
 0x980   : > { %2936 = vmatmul.msk.bf16.vlgmr.msra.gmra.mxu1 %vm704_vm10, %v1578_v44 }
 0x982   : > { %v3497_v48 = vpop.eup %3496  ;;  %v1596_v50 = vpop.f32.mrf.mxu0 }
 0x983   : > { %v1571_v52 = vmul.f32 %v3497_v48, %v3485_v21  ;;  %v1322_v53 = vpop.permute.xlu2 %1321  ;;  %v3499_v58 = vpop.eup %3498 }
 0x984   : > { %v1318_v54 = vpop.permute.xlu1 %1317  ;;  %v1699_v55 = vsel %vm964_vm11, %v1322_v53, 0  ;;  %v1572_v61 = vmul.f32 %v3499_v58, %v4354_v0 }
 0x985   : > { %v1579_v56 = vpack.c.bf16 %v1571_v52, %v1571_v52  ;;  %v1661_v57 = vsel %vm964_vm11, %v1318_v54, 0  ;;  %1708 = vmatpush.bf16.msra.mxu2 %v1699_v55  ;;  %v3006_v55 = vld [vmem:[%s4055_s22 + $0x80] sm:$0xf] }
 0x986   : > { %1670 = vmatpush.bf16.msra.mxu0 %v1661_v57  ;;  %v1580_v60 = vpack.c.bf16 %v1572_v61, %v1572_v61  ;;  %v3240_v57 = vld [vmem:[%s4055_s22 + $0x84] sm:$0xf]  ;;  %v3014_v61 = vld [vmem:[%s4055_s22 + $0x88] sm:$0xf] }
 0x988   : > { %2937 = vmatmul.msk.bf16.vlgmr.msra.gmra.mxu2 %vm704_vm10, %v1579_v56  ;;  %v3248_v56 = vld [vmem:[%s4055_s22 + $0xbc] sm:$0xf0] }
 0x989   : > { %2935 = vmatmul.msk.bf16.vlgmr.msra.gmra.mxu0 %vm704_vm10, %v1577_v59  ;;  %v3007_v58 = vor.u32 %v3248_v56, %v3006_v55  ;;  %v3008_v59 = vld [vmem:[%s4055_s22 + $0xc0] sm:$0xf0] }
 0x98a   : > { %v1598_v62 = vpop.f32.mrf.mxu0 }
 0x98b   : > { %v1768_v5 = vpop.permute.xlu2 %1767  ;;  %v3249_v62 = vld [vmem:[%s4055_s22 + $0xc4] sm:$0xf0]  ;;  %2044 = vmatpush.bf16.msrb.mxu1 %v3007_v58 }
 0x98c   : > { %1780 = vmatpush.bf16.msrb.mxu0 %v1768_v5  ;;  %v3241_v5 = vld [vmem:[%s4055_s22 + $0x8c] sm:$0xf] }
 0x98f   : > { %2938 = vmatmul.msk.bf16.vlgmr.msra.gmra.mxu3 %vm704_vm10, %v1580_v60 }
 0x990   : > { %v1615_v1 = vpop.f32.mrf.mxu1 }
 0x998   : > { %v1617_v3 = vpop.f32.mrf.mxu1 }
 0x999   : > { %v3015_v3 = vor.u32 %v3249_v62, %v3014_v61  ;;  %v4465_v62 = vld [vmem:[%s4061_s3 + $0x8] sm:$0xff] }
 0x99b   : > { %2072 = vmatpush.bf16.msrb.mxu3 %v3015_v3 }
 0x9fb   : > { %v1634_v29 = vpop.f32.mrf.mxu2 }
 0x9fd   : > { %v1691_v6 = vpop.f32.mrf.mxu1 }
 0xa02   : > { %v1653_v8 = vpop.f32.mrf.mxu3 }
 0xa03   : > { %v1636_v9 = vpop.f32.mrf.mxu2  ;;  %v3416_v11 = vpack.i.bf16 %v1653_v8, %v1634_v29  ;;  %v3016_v29 = vld [vmem:[%s4055_s22 + $0xc8] sm:$0xf0] }
 0xa04   : > { %v3019_v8 = vor.u32 %v3241_v5, %v3016_v29  ;;  %v2942_v9 = vld [vmem:[%s4055_s22] sm:$0xf]  ;;  %v1837_v29 = vperm.slane %v4465_v62, 6 }
 0xa05   : > { %v1693_v13 = vpop.f32.mrf.mxu1  ;;  %3417 = vrot.lane.b32.xlu1 %v3416_v11, %s3811_s9  ;;  %v3232_v11 = vld [vmem:[%s4055_s22 + $0x3c] sm:$0xf0] }
 0xa06   : > { %v1672_v10 = vpop.f32.mrf.mxu0  ;;  %v3224_v13 = vld [vmem:[%s4055_s22 + $0x4] sm:$0xf] }
 0xa07   : > { %v3411_v0 = vpack.i.bf16 %v1691_v6, %v1672_v10 }
 0xa09   : > { %3412 = vrot.lane.b32.xlu0 %v3411_v0, %s3813_s17  ;;  %v2943_v0 = vor.u32 %v3232_v11, %v2942_v9  ;;  %v3038_v11 = vld [vmem:[%s4055_s22 + $0xa0] sm:$0xf] }
 0xa0a   : > { %v1655_v14 = vpop.f32.mrf.mxu3 }
 0xa0b   : > { %v1710_v15 = vpop.f32.mrf.mxu2  ;;  %v2944_v14 = vld [vmem:[%s4055_s22 + $0x40] sm:$0xf0]  ;;  %2045 = vmatpush.bf16.msrb.mxu1 %v2943_v0  ;;  %v3046_v0 = vld [vmem:[%s4055_s22 + $0xa8] sm:$0xf] }
 0xa0d   : > { %1765 = vrot.lane.b32.xlu1 %v4263_v38, %s3799_s7 }
 0xa0e   : > { %v1674_v25 = vpop.f32.mrf.mxu0 }
 0xa0f   : > { %v2947_v25 = vor.u32 %v3224_v13, %v2944_v14  ;;  %v3252_v13 = vld [vmem:[%s4055_s22 + $0xdc] sm:$0xf0] }
 0xa12   : > { %v1729_v7 = vpop.f32.mrf.mxu3 }
 0xa13   : > { %v3421_v16 = vpack.i.bf16 %v1729_v7, %v1710_v15  ;;  %v1712_v18 = vpop.f32.mrf.mxu2  ;;  %v2950_v15 = vld [vmem:[%s4055_s22 + $0x8] sm:$0xf] }
 0xa14   : > { %v3233_v7 = vld [vmem:[%s4055_s22 + $0x44] sm:$0xf0]  ;;  %v2952_v18 = vld [vmem:[%s4055_s22 + $0x48] sm:$0xf0] }
 0xa15   : > { %3422 = vrot.lane.b32.xlu2 %v3421_v16, %s3812_s13  ;;  %v3225_v16 = vld [vmem:[%s4055_s22 + $0xc] sm:$0xf] }
 0xa1a   : > { %v1731_v19 = vpop.f32.mrf.mxu3 }
 0xa1b   : > { %v2951_v19 = vor.u32 %v3233_v7, %v2950_v15  ;;  %v3245_v7 = vld [vmem:[%s4055_s22 + $0xac] sm:$0xf] }
 0xa1d   : > { %2073 = vmatpush.bf16.msrb.mxu3 %v2951_v19 }
 0xa6f   : > { %v3423_v23 = vpop.permute.xlu2 %3422 }
 0xa70   : > { %v3425_v63 = vunpack.i.h.bf16 %v3423_v23  ;;  %v3424_v33 = vunpack.i.l.bf16 %v3423_v23  ;;  %v3250_v23 = vld [vmem:[%s4055_s22 + $0xcc] sm:$0xf0] }
 0xa77   : > { %v3418_v20 = vpop.permute.xlu1 %3417 }
 0xa78   : > { %v3420_v21 = vunpack.i.h.bf16 %v3418_v20  ;;  %v3419_v22 = vunpack.i.l.bf16 %v3418_v20  ;;  %v2955_v20 = vor.u32 %v3225_v16, %v2952_v18  ;;  %v3048_v16 = vld [vmem:[%s4055_s22 + $0xe8] sm:$0xf0] }
 0xa7a   : > { %v1758_v34 = vsel %vm704_vm10, %v1615_v1, %v3420_v21  ;;  %v1757_v38 = vsel %vm704_vm10, %v1596_v50, %v3419_v22  ;;  %v3011_v1 = vor.u32 %v3240_v57, %v3008_v59  ;;  %v3022_v22 = vld [vmem:[%s4055_s22 + $0x90] sm:$0xf] }
 0xa7b   : > { %v3413_v49 = vpop.permute.xlu0 %3412 }
 0xa7c   : > { %v3415_v27 = vunpack.i.h.bf16 %v3413_v49  ;;  %v3414_v28 = vunpack.i.l.bf16 %v3413_v49  ;;  %2058 = vmatpush.bf16.msrb.mxu2 %v3011_v1  ;;  %v3242_v49 = vld [vmem:[%s4055_s22 + $0x94] sm:$0xf] }
 0xa7e   : > { %v1759_v30 = vsel %vm1140_vm12, %v1757_v38, %v3414_v28  ;;  %v1760_v17 = vsel %vm1140_vm12, %v1758_v34, %v3415_v27  ;;  %v3023_v28 = vor.u32 %v3250_v23, %v3022_v22  ;;  %v3251_v34 = vld [vmem:[%s4055_s22 + $0xd4] sm:$0xf0]  ;;  %v3051_v23 = vor.u32 %v3245_v7, %v3048_v16  ;;  %v3256_v7 = vld [vmem:[%s4057_s8 + $0x4] sm:$0xf] }
 0xa7f   : > { %v1761_v35 = vsel %vm1143_vm13, %v1759_v30, %v3424_v33  ;;  %v1762_v37 = vsel %vm1143_vm13, %v1760_v17, %v3425_v63  ;;  %v1766_v2 = vpop.permute.xlu1 %1765  ;;  %v3024_v63 = vld [vmem:[%s4055_s22 + $0xd0] sm:$0xf0]  ;;  %v3030_v33 = vld [vmem:[%s4055_s22 + $0x98] sm:$0xf]  ;;  %v3243_v17 = vld [vmem:[%s4055_s22 + $0x9c] sm:$0xf] }
 0xa80   : > { %1781 = vmatpush.bf16.msrb.mxu0 %v1766_v2  ;;  %v1763_v4 = vpack.c.bf16 %v1762_v37, %v1761_v35  ;;  %2059 = vmatpush.bf16.msrb.mxu2 %v2947_v25  ;;  %v3027_v38 = vor.u32 %v3242_v49, %v3024_v63  ;;  %v3031_v30 = vor.u32 %v3251_v34, %v3030_v33  ;;  %v3032_v35 = vld [vmem:[%s4055_s22 + $0xd8] sm:$0xf0]  ;;  %v2958_v37 = vld [vmem:[%s4055_s22 + $0x10] sm:$0xf]  ;;  %v3253_v25 = vld [vmem:[%s4055_s22 + $0xe4] sm:$0xf0] }
 0xa81   : > { %2100 = vmatpush.bf16.msra.mxu1 %v3023_v28  ;;  %v3035_v39 = vor.u32 %v3243_v17, %v3032_v35  ;;  %v3047_v22 = vor.u32 %v3253_v25, %v3046_v0  ;;  %v3228_v49 = vld [vmem:[%s4055_s22 + $0x24] sm:$0xf]  ;;  %v2982_v28 = vld [vmem:[%s4055_s22 + $0x28] sm:$0xf]  ;;  %v3229_v33 = vld [vmem:[%s4055_s22 + $0x2c] sm:$0xf] }
 0xa82   : > { %2128 = vmatpush.bf16.msra.mxu3 %v3031_v30  ;;  %v3237_v63 = vld [vmem:[%s4055_s22 + $0x64] sm:$0xf0]  ;;  %v2984_v34 = vld [vmem:[%s4055_s22 + $0x68] sm:$0xf0]  ;;  %v3088_v16 = vld [vmem:[%s4057_s8 + $0x40] sm:$0xf0] }
 0xa83   : > { %2939 = vmatmul.msk.bf16.vlgmr.msrb.gmra.mxu0 %vm555_vm1, %v1763_v4  ;;  %v2983_v17 = vor.u32 %v3237_v63, %v2982_v28  ;;  %v2987_v35 = vor.u32 %v3229_v33, %v2984_v34  ;;  %v3274_v63 = vld [vmem:[%s4057_s8 + $0x94] sm:$0xf]  ;;  %v3174_v34 = vld [vmem:[%s4057_s8 + $0x98] sm:$0xf] }
 0xa84   : > { %2086 = vmatpush.bf16.msra.mxu0 %v3019_v8  ;;  %2114 = vmatpush.bf16.msra.mxu2 %v3027_v38  ;;  %v3168_v33 = vld [vmem:[%s4057_s8 + $0xd0] sm:$0xf0] }
 0xa88   : > { %2087 = vmatpush.bf16.msra.mxu0 %v2955_v20  ;;  %v2974_v20 = vld [vmem:[%s4055_s22 + $0x20] sm:$0xf] }
 0xa8c   : > { %2142 = vmatpush.bf16.msrb.mxu0 %v3035_v39  ;;  %v3056_v39 = vld [vmem:[%s4055_s22 + $0xf0] sm:$0xf0] }
 0xb00   : > { %v1783_v40 = vpop.f32.mrf.mxu0 }
 0xb01   : > { %v1784_v41 = vadd.f32 %v1783_v40, %v1764_v32 }
 0xb03   : > { %v4402_v24 = vadd.f32 %v1784_v41, %v4245_v26 }
 0xb05   : > { %v1790_v42 = vsel %vm555_vm1, %v4402_v24, 0.0 }
 0xb06   : > { %1791 = vadd.xlane.f32.xlu0 %v1790_v42  ;;  %v2960_v42 = vld [vmem:[%s4055_s22 + $0x50] sm:$0xf0] }
 0xb08   : > { %v1785_v36 = vpop.f32.mrf.mxu0 }
 0xb09   : > { %v1786_v43 = vadd.f32 %v1785_v36, %v1764_v32  ;;  %v3234_v32 = vld [vmem:[%s4055_s22 + $0x4c] sm:$0xf0]  ;;  %v2966_v36 = vld [vmem:[%s4055_s22 + $0x18] sm:$0xf] }
 0xb0a   : > { %v2959_v41 = vor.u32 %v3234_v32, %v2958_v37  ;;  %v3054_v37 = vld [vmem:[%s4055_s22 + $0xb0] sm:$0xf]  ;;  %v3062_v32 = vld [vmem:[%s4055_s22 + $0xb8] sm:$0xf] }
 0xb0b   : > { %v4407_v45 = vadd.f32 %v1786_v43, %v4250_v31  ;;  %v3235_v43 = vld [vmem:[%s4055_s22 + $0x54] sm:$0xf0] }
 0xb0c   : > { %2101 = vmatpush.bf16.msra.mxu1 %v2959_v41  ;;  %v3064_v41 = vld [vmem:[%s4055_s22 + $0xf8] sm:$0xf0] }
 0xb0d   : > { %v1793_v47 = vsel %vm555_vm1, %v4407_v45, 0.0 }
 0xb0e   : > { %1794 = vadd.xlane.f32.xlu2 %v1793_v47 }
 0xb79   : > { %v1792_v44 = vpop.xlane.xlu0 %1791 }
 0xb7a   : > { %v1796_v26 = vmul.f32 %v1792_v44, %v4073_v12  ;;  %v2967_v44 = vor.u32 %v3235_v43, %v2966_v36  ;;  %v2990_v43 = vld [vmem:[%s4055_s22 + $0x30] sm:$0xf] }
 0xb7c   : > { %v4413_v46 = vsub.f32 %v4402_v24, %v1796_v26  ;;  %v3227_v26 = vld [vmem:[%s4055_s22 + $0x1c] sm:$0xf]  ;;  %2129 = vmatpush.bf16.msra.mxu3 %v2967_v44 }
 0xb7e   : > { %v1800_v48 = vmul.f32 %v4413_v46, %v4413_v46 }
 0xb80   : > { %v1802_v31 = vsel %vm555_vm1, %v1800_v48, 0.0  ;;  %v2968_v48 = vld [vmem:[%s4055_s22 + $0x58] sm:$0xf0] }
 0xb81   : > { %v1795_v50 = vpop.xlane.xlu2 %1794  ;;  %1803 = vadd.xlane.f32.xlu1 %v1802_v31 }
 0xb82   : > { %v1797_v51 = vmul.f32 %v1795_v50, %v4073_v12  ;;  %v2971_v50 = vor.u32 %v3227_v26, %v2968_v48  ;;  %v3230_v48 = vld [vmem:[%s4055_s22 + $0x34] sm:$0xf] }
 0xb84   : > { %v4420_v52 = vsub.f32 %v4407_v45, %v1797_v51  ;;  %2143 = vmatpush.bf16.msrb.mxu0 %v2971_v50  ;;  %v2998_v50 = vld [vmem:[%s4055_s22 + $0x38] sm:$0xf] }
 0xb86   : > { %v1801_v53 = vmul.f32 %v4420_v52, %v4420_v52 }
 0xb88   : > { %v1805_v54 = vsel %vm555_vm1, %v1801_v53, 0.0 }
 0xb89   : > { %1806 = vadd.xlane.f32.xlu0 %v1805_v54 }
 0xbf4   : > { %v1804_v60 = vpop.xlane.xlu1 %1803 }
 0xbf5   : > { %v1808_v6 = vmul.f32 %v1804_v60, %v4073_v12  ;;  %v1834_v60 = vperm.slane %v4465_v62, 5 }
 0xbf7   : > { %v4437_v10 = vadd.f32 1e-05, %v1808_v6 }
 0xbf9   : > { %3500 = vrsqrt.f32 %v4437_v10  ;;  %vm1818_vm6 = vweird.f32 %v4437_v10 }
 0xbfc   : > { %v1807_v21 = vpop.xlane.xlu0 %1806 }
 0xbfd   : > { %v1809_v27 = vmul.f32 %v1807_v21, %v4073_v12  ;;  %v3226_v12 = vld [vmem:[%s4055_s22 + $0x14] sm:$0xf]  ;;  %v3236_v21 = vld [vmem:[%s4055_s22 + $0x5c] sm:$0xf0] }
 0xbfe   : > { %v2963_v47 = vor.u32 %v3226_v12, %v2960_v42  ;;  %v2975_v38 = vor.u32 %v3236_v21, %v2974_v20  ;;  %v3255_v12 = vld [vmem:[%s4055_s22 + $0xf4] sm:$0xf0]  ;;  %v3166_v21 = vld [vmem:[%s4057_s8 + $0x90] sm:$0xf] }
 0xbff   : > { %v3501_v2 = vpop.eup %3500  ;;  %v1811_v4 = vadd.f32 1e-05, %v1809_v27  ;;  %v2976_v27 = vld [vmem:[%s4055_s22 + $0x60] sm:$0xf0]  ;;  %v3063_v44 = vor.u32 %v3255_v12, %v3062_v32  ;;  %v3258_v12 = vld [vmem:[%s4057_s8 + $0x14] sm:$0xf] }
 0xc00   : > { %v1813_v40 = vmul.f32 %v3501_v2, %v4437_v10  ;;  %2115 = vmatpush.bf16.msra.mxu2 %v2963_v47  ;;  %vm1819_vm5 = vweird.f32 %v3501_v2  ;;  %v3244_v10 = vld [vmem:[%s4055_s22 + $0xa4] sm:$0xf]  ;;  %v2979_v30 = vor.u32 %v3228_v49, %v2976_v27  ;;  %v3238_v47 = vld [vmem:[%s4055_s22 + $0x6c] sm:$0xf0]  ;;  %v3176_v27 = vld [vmem:[%s4057_s8 + $0xd8] sm:$0xf0] }
 0xc01   : > { %3502 = vrsqrt.f32 %v1811_v4  ;;  %vm1820_vm7 = vmor %vm1818_vm6, %vm1819_vm5  ;;  %vm1828_vm9 = vweird.f32 %v1811_v4 }
 0xc02   : > { %v1814_v31 = vmul.f32 %v3501_v2, %v1813_v40  ;;  %v3247_v40 = vld [vmem:[%s4055_s22 + $0xbc] sm:$0xf] }
 0xc03   : > { %v3067_v26 = vor.u32 %v3247_v40, %v3064_v41  ;;  %v3104_v40 = vld [vmem:[%s4057_s8 + $0x50] sm:$0xf0]  ;;  %v3110_v41 = vld [vmem:[%s4057_s8 + $0x18] sm:$0xf] }
 0xc04   : > { %v1815_v51 = vmul.f32 0.5, %v1814_v31  ;;  %v2992_v31 = vld [vmem:[%s4055_s22 + $0x70] sm:$0xf0] }
 0xc06   : > { %v1816_v53 = vsub.f32 1.5, %v1815_v51  ;;  %v3239_v51 = vld [vmem:[%s4055_s22 + $0x74] sm:$0xf0] }
 0xc07   : > { %v3503_v54 = vpop.eup %3502 }
 0xc08   : > { %v1817_v55 = vmul.f32 %v3501_v2, %v1816_v53  ;;  %v1823_v56 = vmul.f32 %v3503_v54, %v1811_v4  ;;  %vm1829_vm8 = vweird.f32 %v3503_v54  ;;  %v3246_v4 = vld [vmem:[%s4055_s22 + $0xb4] sm:$0xf]  ;;  %v3231_v53 = vld [vmem:[%s4055_s22 + $0x3c] sm:$0xf] }
 0xc09   : > { %vm1830_vm10 = vmor %vm1828_vm9, %vm1829_vm8  ;;  %v3059_v36 = vor.u32 %v3246_v4, %v3056_v39  ;;  %v3259_v4 = vld [vmem:[%s4057_s8 + $0x1c] sm:$0xf] }
 0xc0a   : > { %v1824_v57 = vmul.f32 %v3503_v54, %v1823_v56  ;;  %v1821_v58 = vsel %vm1820_vm7, %v3501_v2, %v1817_v55  ;;  %v3254_v2 = vld [vmem:[%s4055_s22 + $0xec] sm:$0xf0]  ;;  %v2991_v55 = vor.u32 %v3238_v47, %v2990_v43  ;;  %v2995_v56 = vor.u32 %v3230_v48, %v2992_v31  ;;  %v3112_v39 = vld [vmem:[%s4057_s8 + $0x58] sm:$0xf0] }
 0xc0b   : > { %v1832_v1 = vmul.f32 %v1821_v58, %v4413_v46  ;;  %v3040_v46 = vld [vmem:[%s4055_s22 + $0xe0] sm:$0xf0]  ;;  %v3055_v42 = vor.u32 %v3254_v2, %v3054_v37  ;;  %v3266_v37 = vld [vmem:[%s4057_s8 + $0x4c] sm:$0xf0]  ;;  %v3115_v32 = vor.u32 %v3259_v4, %v3112_v39 }
 0xc0c   : > { %v1825_v59 = vmul.f32 0.5, %v1824_v57  ;;  %v3043_v19 = vor.u32 %v3244_v10, %v3040_v46  ;;  %v2999_v57 = vor.u32 %v3239_v51, %v2998_v50  ;;  %v3086_v10 = vld [vmem:[%s4057_s8] sm:$0xf] }
 0xc0d   : > { %v1835_v6 = vmul.f32 %v1834_v60, %v1832_v1  ;;  %v3264_v46 = vld [vmem:[%s4057_s8 + $0x3c] sm:$0xf0] }
 0xc0e   : > { %v1826_v61 = vsub.f32 1.5, %v1825_v59  ;;  %v3150_v59 = vld [vmem:[%s4057_s8 + $0x80] sm:$0xf]  ;;  %v3087_v0 = vor.u32 %v3264_v46, %v3086_v10 }
 0xc0f   : > { %v1838_v14 = vadd.f32 %v1837_v29, %v1835_v6  ;;  %v3152_v6 = vld [vmem:[%s4057_s8 + $0xc0] sm:$0xf0] }
 0xc10   : > { %v1827_v3 = vmul.f32 %v3503_v54, %v1826_v61  ;;  %v3280_v61 = vld [vmem:[%s4057_s8 + $0xbc] sm:$0xf0] }
 0xc11   : > { %v3151_v1 = vor.u32 %v3280_v61, %v3150_v59  ;;  %v4570_v47 = vld [vmem:[%s4059_s0] sm:$0xff] }
 0xc12   : > { %v1831_v5 = vsel %vm1830_vm10, %v3503_v54, %v1827_v3  ;;  %v3000_v54 = vld [vmem:[%s4055_s22 + $0x78] sm:$0xf0]  ;;  %v3160_v3 = vld [vmem:[%s4057_s8 + $0xc8] sm:$0xf0]  ;;  %v1843_v48 = vperm.slane %v4570_v47, 0  ;;  %v1846_v31 = vperm.slane %v4570_v47, 3 }
 0xc13   : > { %v1833_v8 = vmul.f32 %v1831_v5, %v4420_v52  ;;  %v3039_v52 = vor.u32 %v3252_v13, %v3038_v11  ;;  %v3003_v58 = vor.u32 %v3231_v53, %v3000_v54  ;;  %v3281_v11 = vld [vmem:[%s4057_s8 + $0xc4] sm:$0xf0]  ;;  %v3182_v59 = vld [vmem:[%s4057_s8 + $0xa0] sm:$0xf]  ;;  %v1850_v4 = vperm.slane %v4570_v47, 7  ;;  %s3815_s22 = smov 128  }
 0xc14   : > { %v3284_v61 = vld [vmem:[%s4057_s8 + $0xdc] sm:$0xf0] }
 0xc15   : > { %v1836_v9 = vmul.f32 %v1834_v60, %v1833_v8  ;;  %v3273_v60 = vld [vmem:[%s4057_s8 + $0x8c] sm:$0xf] }
 0xc16   : > { %v3163_v5 = vor.u32 %v3273_v60, %v3160_v3  ;;  %v1845_v60 = vperm.slane %v4570_v47, 2  ;;  %v3277_v3 = vld [vmem:[%s4057_s8 + $0xac] sm:$0xf] }
 0xc17   : > { %v1839_v15 = vadd.f32 %v1837_v29, %v1836_v9  ;;  %v3272_v29 = vld [vmem:[%s4057_s8 + $0x84] sm:$0xf]  ;;  %v3158_v9 = vld [vmem:[%s4057_s8 + $0x88] sm:$0xf] }
 0xc18   : > { %v3155_v8 = vor.u32 %v3272_v29, %v3152_v6  ;;  %v3159_v13 = vor.u32 %v3281_v11, %v3158_v9  ;;  %v3183_v11 = vor.u32 %v3284_v61, %v3182_v59  ;;  %v3208_v59 = vld [vmem:[%s4057_s8 + $0xf8] sm:$0xf0] }
 0xc19   : > { %v4479_v18 = vpack.c.bf16 %v1839_v15, %v1838_v14  ;;  %v3257_v14 = vld [vmem:[%s4057_s8 + $0xc] sm:$0xf] }
 0xc1a   : > { %v3096_v15 = vld [vmem:[%s4057_s8 + $0x48] sm:$0xf0] }
 0xc1b   : > { %3068 = vmatmul.msk.bf16.vlgmr.msrb.gmra.mxu1 %vm555_vm1, %v4479_v18  ;;  %3069 = vmatmul.msk.bf16.vlgmr.msrb.gmra.mxu2 %vm555_vm1, %v4479_v18  ;;  %v3099_v25 = vor.u32 %v3257_v14, %v3096_v15 }
 0xc1c   : > { %3070 = vmatmul.msk.bf16.vlgmr.msrb.gmra.mxu3 %vm555_vm1, %v4479_v18  ;;  %3071 = vmatmul.msk.bf16.vlgmr.msra.gmra.mxu0 %vm555_vm1, %v4479_v18 }
 0xc1d   : > { %2156 = vmatpush.bf16.msrb.mxu1 %v3039_v52  ;;  %2170 = vmatpush.bf16.msrb.mxu2 %v3043_v19  ;;  %v3091_v52 = vor.u32 %v3256_v7, %v3088_v16  ;;  %v3265_v19 = vld [vmem:[%s4057_s8 + $0x44] sm:$0xf0]  ;;  %v3276_v16 = vld [vmem:[%s4057_s8 + $0xa4] sm:$0xf] }
 0xc1e   : > { %2184 = vmatpush.bf16.msrb.mxu3 %v3047_v22  ;;  %2198 = vmatpush.bf16.msra.mxu0 %v3051_v23  ;;  %v3282_v22 = vld [vmem:[%s4057_s8 + $0xcc] sm:$0xf0]  ;;  %v3275_v23 = vld [vmem:[%s4057_s8 + $0x9c] sm:$0xf] }
 0xc1f   : > { %v3167_v49 = vor.u32 %v3282_v22, %v3166_v21  ;;  %v3179_v28 = vor.u32 %v3275_v23, %v3176_v27  ;;  %v3285_v21 = vld [vmem:[%s4057_s8 + $0xe4] sm:$0xf0]  ;;  %v3118_v27 = vld [vmem:[%s4057_s8 + $0x20] sm:$0xf] }
 0xc21   : > { %2157 = vmatpush.bf16.msrb.mxu1 %v2975_v38  ;;  %2171 = vmatpush.bf16.msrb.mxu2 %v2979_v30  ;;  %v3171_v38 = vor.u32 %v3274_v63, %v3168_v33  ;;  %v3283_v30 = vld [vmem:[%s4057_s8 + $0xd4] sm:$0xf0] }
 0xc22   : > { %2185 = vmatpush.bf16.msrb.mxu3 %v2983_v17  ;;  %2199 = vmatpush.bf16.msra.mxu0 %v2987_v35  ;;  %v3175_v17 = vor.u32 %v3283_v30, %v3174_v34  ;;  %v3102_v35 = vld [vmem:[%s4057_s8 + $0x10] sm:$0xf]  ;;  %v3128_v30 = vld [vmem:[%s4057_s8 + $0x68] sm:$0xf0] }
 0xc23   : > { %v3103_v2 = vor.u32 %v3266_v37, %v3102_v35  ;;  %v1847_v35 = vperm.slane %v4570_v47, 4 }
 0xc2b   : > { %3072 = vmatmul.msk.bf16.vlgmr.msra.gmra.mxu1 %vm555_vm1, %v4479_v18  ;;  %3073 = vmatmul.msk.bf16.vlgmr.msra.gmra.mxu2 %vm555_vm1, %v4479_v18 }
 0xc2c   : > { %3074 = vmatmul.msk.bf16.vlgmr.msra.gmra.mxu3 %vm555_vm1, %v4479_v18  ;;  %3075 = vmatmul.msk.bf16.vlgmr.msrb.gmra.mxu0 %vm555_vm1, %v4479_v18 }
 0xc2d   : > { %2212 = vmatpush.bf16.msra.mxu1 %v3055_v42  ;;  %2226 = vmatpush.bf16.msra.mxu2 %v3059_v36  ;;  %v3107_v42 = vor.u32 %v3258_v12, %v3104_v40  ;;  %v3267_v36 = vld [vmem:[%s4057_s8 + $0x54] sm:$0xf0] }
 0xc2e   : > { %2240 = vmatpush.bf16.msra.mxu3 %v3063_v44  ;;  %2254 = vmatpush.bf16.msrb.mxu0 %v3067_v26  ;;  %v3111_v43 = vor.u32 %v3267_v36, %v3110_v41  ;;  %v3120_v36 = vld [vmem:[%s4057_s8 + $0x60] sm:$0xf0] }
 0xc31   : > { %2213 = vmatpush.bf16.msra.mxu1 %v2991_v55  ;;  %2227 = vmatpush.bf16.msra.mxu2 %v2995_v56  ;;  %v1844_v56 = vperm.slane %v4570_v47, 1 }
 0xc32   : > { %2241 = vmatpush.bf16.msra.mxu3 %v2999_v57  ;;  %2255 = vmatpush.bf16.msrb.mxu0 %v3003_v58 }
 0xc3b   : > { %3076 = vmatmul.msk.bf16.vlgmr.msrb.gmra.mxu1 %vm555_vm1, %v4479_v18  ;;  %3077 = vmatmul.msk.bf16.vlgmr.msrb.gmra.mxu2 %vm555_vm1, %v4479_v18 }
 0xc3c   : > { %3078 = vmatmul.msk.bf16.vlgmr.msrb.gmra.mxu3 %vm555_vm1, %v4479_v18  ;;  %3079 = vmatmul.msk.bf16.vlgmr.msra.gmra.mxu0 %vm555_vm1, %v4479_v18 }
 0xc3d   : > { %2477 = vmatpush.bf16.xpose.msrb.mxu1 %v3151_v1  ;;  %2519 = vmatpush.bf16.xpose.msra.mxu0 %v3163_v5  ;;  %v3192_v5 = vld [vmem:[%s4057_s8 + $0xe8] sm:$0xf0] }
 0xc3e   : > { %2491 = vmatpush.bf16.xpose.msrb.mxu2 %v3155_v8  ;;  %2505 = vmatpush.bf16.xpose.msrb.mxu3 %v3159_v13  ;;  %v3195_v46 = vor.u32 %v3277_v3, %v3192_v5 }
 0xc45   : > { %2478 = vmatpush.bf16.xpose.msrb.mxu1 %v3087_v0  ;;  %2520 = vmatpush.bf16.xpose.msra.mxu0 %v3099_v25 }
 0xc46   : > { %2492 = vmatpush.bf16.xpose.msrb.mxu2 %v3091_v52 }
 0xc4b   : > { %3080 = vmatmul.msk.bf16.vlgmr.msra.gmra.mxu1 %vm555_vm1, %v4479_v18  ;;  %3081 = vmatmul.msk.bf16.vlgmr.msra.gmra.mxu2 %vm555_vm1, %v4479_v18 }
 0xc4c   : > { %3082 = vmatmul.msk.bf16.vlgmr.msra.gmra.mxu3 %vm555_vm1, %v4479_v18  ;;  %3083 = vmatmul.msk.bf16.vlgmr.msrb.gmra.mxu0 %vm555_vm1, %v4479_v18  ;;  %v3094_v18 = vld [vmem:[%s4057_s8 + $0x8] sm:$0xf] }
 0xc4d   : > { %v3095_v20 = vor.u32 %v3265_v19, %v3094_v18  ;;  %2533 = vmatpush.bf16.xpose.msra.mxu1 %v3167_v49  ;;  %2575 = vmatpush.bf16.xpose.msrb.mxu0 %v3179_v28  ;;  %v3184_v18 = vld [vmem:[%s4057_s8 + $0xe0] sm:$0xf0]  ;;  %v3268_v28 = vld [vmem:[%s4057_s8 + $0x5c] sm:$0xf0] }
 0xc4e   : > { %2547 = vmatpush.bf16.xpose.msra.mxu2 %v3171_v38  ;;  %v3187_v34 = vor.u32 %v3276_v16, %v3184_v18  ;;  %v3261_v38 = vld [vmem:[%s4057_s8 + $0x2c] sm:$0xf]  ;;  %v3119_v39 = vor.u32 %v3268_v28, %v3118_v27  ;;  %v3206_v16 = vld [vmem:[%s4057_s8 + $0xb8] sm:$0xf]  ;;  %v3263_v28 = vld [vmem:[%s4057_s8 + $0x3c] sm:$0xf] }
 0xc4f   : > { %2506 = vmatpush.bf16.xpose.msrb.mxu3 %v3095_v20  ;;  %v3190_v20 = vld [vmem:[%s4057_s8 + $0xa8] sm:$0xf]  ;;  %v3287_v18 = vld [vmem:[%s4057_s8 + $0xf4] sm:$0xf0] }
 0xc50   : > { %v3191_v37 = vor.u32 %v3285_v21, %v3190_v20  ;;  %v3134_v21 = vld [vmem:[%s4057_s8 + $0x30] sm:$0xf] }
 0xc55   : > { %2534 = vmatpush.bf16.xpose.msra.mxu1 %v3103_v2  ;;  %2576 = vmatpush.bf16.xpose.msrb.mxu0 %v3115_v32  ;;  %v3131_v32 = vor.u32 %v3261_v38, %v3128_v30  ;;  %v3207_v38 = vor.u32 %v3287_v18, %v3206_v16 }
 0xc56   : > { %2548 = vmatpush.bf16.xpose.msra.mxu2 %v3107_v42  ;;  %v3260_v42 = vld [vmem:[%s4057_s8 + $0x24] sm:$0xf] }
 0xc57   : > { %2561 = vmatpush.bf16.xpose.msra.mxu3 %v3175_v17 }
 0xc5f   : > { %2562 = vmatpush.bf16.xpose.msra.mxu3 %v3111_v43 }
 0xc98   : > { %v2047_v44 = vpop.f32.mrf.mxu1 }
 0xc99   : > { %v2089_v26 = vpop.f32.mrf.mxu0  ;;  %v2048_v51 = vadd.f32 %v2047_v44, %v1843_v48 }
 0xc9a   : > { %v2090_v54 = vadd.f32 %v2089_v26, %v1846_v31  ;;  %v3126_v26 = vld [vmem:[%s4057_s8 + $0x28] sm:$0xf] }
 0xc9b   : > { %v2262_v29 = vmax.f32 %v2048_v51, 0.0 }
 0xc9c   : > { %v2265_v8 = vmax.f32 %v2090_v54, 0.0  ;;  %v3286_v54 = vld [vmem:[%s4057_s8 + $0xec] sm:$0xf0] }
 0xc9e   : > { %v2061_v50 = vpop.f32.mrf.mxu2 }
 0xc9f   : > { %v2075_v53 = vpop.f32.mrf.mxu3  ;;  %v2062_v13 = vadd.f32 %v2061_v50, %v1844_v56 }
 0xca0   : > { %v2049_v55 = vpop.f32.mrf.mxu1  ;;  %v2076_v0 = vadd.f32 %v2075_v53, %v1845_v60  ;;  %v3198_v53 = vld [vmem:[%s4057_s8 + $0xb0] sm:$0xf] }
 0xca1   : > { %v2050_v57 = vadd.f32 %v2049_v55, %v1843_v48  ;;  %v2091_v58 = vpop.f32.mrf.mxu0  ;;  %v2263_v22 = vmax.f32 %v2062_v13, 0.0  ;;  %v3269_v48 = vld [vmem:[%s4057_s8 + $0x64] sm:$0xf0]  ;;  %v1849_v55 = vperm.slane %v4570_v47, 6 }
 0xca2   : > { %v2092_v1 = vadd.f32 %v2091_v58, %v1846_v31  ;;  %v2264_v63 = vmax.f32 %v2076_v0, 0.0  ;;  %v1848_v31 = vperm.slane %v4570_v47, 5  ;;  %v3279_v58 = vld [vmem:[%s4057_s8 + $0xbc] sm:$0xf]  ;;  %v3278_v0 = vld [vmem:[%s4057_s8 + $0xb4] sm:$0xf] }
 0xca3   : > { %v2278_v6 = vmax.f32 %v2050_v57, 0.0  ;;  %v3123_v57 = vor.u32 %v3260_v42, %v3120_v36  ;;  %v3142_v42 = vld [vmem:[%s4057_s8 + $0x38] sm:$0xf] }
 0xca4   : > { %v2281_v9 = vmax.f32 %v2092_v1, 0.0  ;;  %v3127_v1 = vor.u32 %v3269_v48, %v3126_v26  ;;  %v3271_v36 = vld [vmem:[%s4057_s8 + $0x74] sm:$0xf0] }
 0xca5   : > { %v2294_v10 = vpack.c.bf16 %v2278_v6, %v2262_v29  ;;  %v3199_v29 = vor.u32 %v3286_v54, %v3198_v53  ;;  %v3143_v54 = vor.u32 %v3271_v36, %v3142_v42 }
 0xca6   : > { %v2297_v14 = vpack.c.bf16 %v2281_v9, %v2265_v8  ;;  %v2063_v15 = vpop.f32.mrf.mxu2  ;;  %v3211_v9 = vor.u32 %v3279_v58, %v3208_v59 }
 0xca7   : > { %v2064_v25 = vadd.f32 %v2063_v15, %v1844_v56  ;;  %v2077_v7 = vpop.f32.mrf.mxu3  ;;  %2479 = vmatmul.bf16.vlgmr.msrb.gmra.mxu1 %v2294_v10 }
 0xca8   : > { %v2078_v52 = vadd.f32 %v2077_v7, %v1845_v60  ;;  %2521 = vmatmul.bf16.vlgmr.msra.gmra.mxu0 %v2297_v14  ;;  %v2103_v19 = vpop.f32.mrf.mxu1  ;;  %2589 = vmatpush.bf16.xpose.msrb.mxu1 %v3183_v11  ;;  %v3200_v14 = vld [vmem:[%s4057_s8 + $0xf0] sm:$0xf0] }
 0xca9   : > { %v2279_v23 = vmax.f32 %v2064_v25, 0.0  ;;  %v2145_v49 = vpop.f32.mrf.mxu0  ;;  %2631 = vmatpush.bf16.xpose.msra.mxu0 %v3195_v46  ;;  %v2104_v40 = vadd.f32 %v2103_v19, %v1847_v35  ;;  %v4603_v25 = vld [vmem:[%s4059_s0 + $0x8] sm:$0xff]  ;;  %v3203_v27 = vor.u32 %v3278_v0, %v3200_v14 }
 0xcaa   : > { %v2280_v33 = vmax.f32 %v2078_v52, 0.0  ;;  %v2146_v43 = vadd.f32 %v2145_v49, %v1850_v4  ;;  %v1853_v48 = vperm.slane %v4603_v25, 2  ;;  %v1858_v0 = vperm.slane %v4603_v25, 7 }
 0xcab   : > { %v2295_v17 = vpack.c.bf16 %v2279_v23, %v2263_v22  ;;  %v2266_v61 = vmax.f32 %v2104_v40, 0.0  ;;  %v3270_v22 = vld [vmem:[%s4057_s8 + $0x6c] sm:$0xf0] }
 0xcac   : > { %v2296_v2 = vpack.c.bf16 %v2280_v33, %v2264_v63  ;;  %v2269_v3 = vmax.f32 %v2146_v43, 0.0  ;;  %v3144_v63 = vld [vmem:[%s4057_s8 + $0x78] sm:$0xf0]  ;;  %v1852_v43 = vperm.slane %v4603_v25, 1 }
 0xcad   : > { %2493 = vmatmul.bf16.vlgmr.msrb.gmra.mxu2 %v2295_v17  ;;  %v1854_v17 = vperm.slane %v4603_v25, 3 }
 0xcae   : > { %2507 = vmatmul.bf16.vlgmr.msrb.gmra.mxu3 %v2296_v2  ;;  %v2117_v12 = vpop.f32.mrf.mxu2  ;;  %2603 = vmatpush.bf16.xpose.msrb.mxu2 %v3187_v34  ;;  %v1851_v34 = vperm.slane %v4603_v25, 0 }
 0xcaf   : > { %v2131_v41 = vpop.f32.mrf.mxu3  ;;  %2617 = vmatpush.bf16.xpose.msrb.mxu3 %v3191_v37  ;;  %v2118_v6 = vadd.f32 %v2117_v12, %v1848_v31  ;;  %v3147_v37 = vor.u32 %v3263_v28, %v3144_v63  ;;  %v3136_v12 = vld [vmem:[%s4057_s8 + $0x70] sm:$0xf0] }
 0xcb0   : > { %v2105_v44 = vpop.f32.mrf.mxu1  ;;  %2590 = vmatpush.bf16.xpose.msrb.mxu1 %v3119_v39  ;;  %v2132_v11 = vadd.f32 %v2131_v41, %v1849_v55 }
 0xcb1   : > { %v2106_v50 = vadd.f32 %v2105_v44, %v1847_v35  ;;  %v2147_v51 = vpop.f32.mrf.mxu0  ;;  %2632 = vmatpush.bf16.xpose.msra.mxu0 %v3131_v32  ;;  %v2267_v52 = vmax.f32 %v2118_v6, 0.0  ;;  %v3135_v35 = vor.u32 %v3270_v22, %v3134_v21  ;;  %v3262_v32 = vld [vmem:[%s4057_s8 + $0x34] sm:$0xf]  ;;  %v1857_v21 = vperm.slane %v4603_v25, 6 }
 0xcb2   : > { %v2148_v56 = vadd.f32 %v2147_v51, %v1850_v4  ;;  %v2268_v23 = vmax.f32 %v2132_v11, 0.0 }
 0xcb3   : > { %v2282_v60 = vmax.f32 %v2106_v50, 0.0  ;;  %v3139_v50 = vor.u32 %v3262_v32, %v3136_v12 }
 0xcb4   : > { %v2285_v5 = vmax.f32 %v2148_v56, 0.0 }
 0xcb5   : > { %v2298_v8 = vpack.c.bf16 %v2282_v60, %v2266_v61 }
 0xcb6   : > { %v2301_v47 = vpack.c.bf16 %v2285_v5, %v2269_v3  ;;  %v2119_v13 = vpop.f32.mrf.mxu2  ;;  %2604 = vmatpush.bf16.xpose.msrb.mxu2 %v3123_v57 }
 0xcb7   : > { %v2120_v10 = vadd.f32 %v2119_v13, %v1848_v31  ;;  %v2133_v46 = vpop.f32.mrf.mxu3  ;;  %2535 = vmatmul.bf16.vlgmr.msra.gmra.mxu1 %v2298_v8  ;;  %2618 = vmatpush.bf16.xpose.msrb.mxu3 %v3127_v1 }
 0xcb8   : > { %v2134_v15 = vadd.f32 %v2133_v46, %v1849_v55  ;;  %2577 = vmatmul.bf16.vlgmr.msrb.gmra.mxu0 %v2301_v47  ;;  %v2159_v7 = vpop.f32.mrf.mxu1  ;;  %2645 = vmatpush.bf16.xpose.msra.mxu1 %v3199_v29 }
 0xcb9   : > { %v2283_v19 = vmax.f32 %v2120_v10, 0.0  ;;  %v2201_v20 = vpop.f32.mrf.mxu0  ;;  %2687 = vmatpush.bf16.xpose.msrb.mxu0 %v3211_v9  ;;  %v2160_v4 = vadd.f32 %v2159_v7, %v1851_v34  ;;  %v1855_v10 = vperm.slane %v4603_v25, 4 }
 0xcba   : > { %v2284_v49 = vmax.f32 %v2134_v15, 0.0  ;;  %v2202_v40 = vadd.f32 %v2201_v20, %v1854_v17 }
 0xcbb   : > { %v2299_v33 = vpack.c.bf16 %v2283_v19, %v2267_v52  ;;  %v2270_v51 = vmax.f32 %v2160_v4, 0.0  ;;  %v1856_v52 = vperm.slane %v4603_v25, 5 }
 0xcbc   : > { %v2300_v30 = vpack.c.bf16 %v2284_v49, %v2268_v23  ;;  %v2273_v55 = vmax.f32 %v2202_v40, 0.0 }
 0xcbd   : > { %2549 = vmatmul.bf16.vlgmr.msra.gmra.mxu2 %v2299_v33 }
 0xcbe   : > { %2563 = vmatmul.bf16.vlgmr.msra.gmra.mxu3 %v2300_v30  ;;  %v2173_v2 = vpop.f32.mrf.mxu2  ;;  %2659 = vmatpush.bf16.xpose.msra.mxu2 %v3203_v27 }
 0xcbf   : > { %v2187_v39 = vpop.f32.mrf.mxu3  ;;  %2673 = vmatpush.bf16.xpose.msra.mxu3 %v3207_v38  ;;  %v2174_v57 = vadd.f32 %v2173_v2, %v1852_v43 }
 0xcc0   : > { %v2161_v41 = vpop.f32.mrf.mxu1  ;;  %2646 = vmatpush.bf16.xpose.msra.mxu1 %v3135_v35  ;;  %v2188_v59 = vadd.f32 %v2187_v39, %v1853_v48 }
 0xcc1   : > { %v2162_v44 = vadd.f32 %v2161_v41, %v1851_v34  ;;  %v2203_v26 = vpop.f32.mrf.mxu0  ;;  %2688 = vmatpush.bf16.xpose.msrb.mxu0 %v3147_v37  ;;  %v2271_v6 = vmax.f32 %v2174_v57, 0.0 }
 0xcc2   : > { %v2204_v31 = vadd.f32 %v2203_v26, %v1854_v17  ;;  %v2272_v11 = vmax.f32 %v2188_v59, 0.0 }
 0xcc3   : > { %v2286_v53 = vmax.f32 %v2162_v44, 0.0  ;;  %v2310_v44 = vperm.slane %v4465_v62, 0 }
 0xcc4   : > { %v2289_v56 = vmax.f32 %v2204_v31, 0.0 }
 0xcc5   : > { %v2302_v58 = vpack.c.bf16 %v2286_v53, %v2270_v51 }
 0xcc6   : > { %v2305_v61 = vpack.c.bf16 %v2289_v56, %v2273_v55  ;;  %v2175_v60 = vpop.f32.mrf.mxu2  ;;  %2660 = vmatpush.bf16.xpose.msra.mxu2 %v3139_v50 }
 0xcc7   : > { %v2176_v1 = vadd.f32 %v2175_v60, %v1852_v43  ;;  %v2189_v3 = vpop.f32.mrf.mxu3  ;;  %2591 = vmatmul.bf16.vlgmr.msrb.gmra.mxu1 %v2302_v58  ;;  %2674 = vmatpush.bf16.xpose.msra.mxu3 %v3143_v54 }
 0xcc8   : > { %v2190_v5 = vadd.f32 %v2189_v3, %v1853_v48  ;;  %2633 = vmatmul.bf16.vlgmr.msra.gmra.mxu0 %v2305_v61  ;;  %v2215_v29 = vpop.f32.mrf.mxu1 }
 0xcc9   : > { %v2287_v8 = vmax.f32 %v2176_v1, 0.0  ;;  %v2257_v9 = vpop.f32.mrf.mxu0  ;;  %v2216_v15 = vadd.f32 %v2215_v29, %v1855_v10 }
 0xcca   : > { %v2288_v47 = vmax.f32 %v2190_v5, 0.0  ;;  %v2258_v16 = vadd.f32 %v2257_v9, %v1858_v0 }
 0xccb   : > { %v2303_v13 = vpack.c.bf16 %v2287_v8, %v2271_v6  ;;  %v2274_v23 = vmax.f32 %v2216_v15, 0.0 }
 0xccc   : > { %v2304_v46 = vpack.c.bf16 %v2288_v47, %v2272_v11  ;;  %v2277_v27 = vmax.f32 %v2258_v16, 0.0 }
 0xccd   : > { %2605 = vmatmul.bf16.vlgmr.msrb.gmra.mxu2 %v2303_v13 }
 0xcce   : > { %2619 = vmatmul.bf16.vlgmr.msrb.gmra.mxu3 %v2304_v46  ;;  %v2229_v14 = vpop.f32.mrf.mxu2 }
 0xccf   : > { %v2243_v7 = vpop.f32.mrf.mxu3  ;;  %v2230_v63 = vadd.f32 %v2229_v14, %v1856_v52 }
 0xcd0   : > { %v2217_v18 = vpop.f32.mrf.mxu1  ;;  %v2244_v34 = vadd.f32 %v2243_v7, %v1857_v21 }
 0xcd1   : > { %v2218_v19 = vadd.f32 %v2217_v18, %v1855_v10  ;;  %v2259_v20 = vpop.f32.mrf.mxu0  ;;  %v2275_v2 = vmax.f32 %v2230_v63, 0.0 }
 0xcd2   : > { %v2260_v22 = vadd.f32 %v2259_v20, %v1858_v0  ;;  %v2276_v39 = vmax.f32 %v2244_v34, 0.0 }
 0xcd3   : > { %v2290_v49 = vmax.f32 %v2218_v19, 0.0 }
 0xcd4   : > { %v2293_v28 = vmax.f32 %v2260_v22, 0.0 }
 0xcd5   : > { %v2306_v33 = vpack.c.bf16 %v2290_v49, %v2274_v23 }
 0xcd6   : > { %v2309_v38 = vpack.c.bf16 %v2293_v28, %v2277_v27  ;;  %v2231_v30 = vpop.f32.mrf.mxu2 }
 0xcd7   : > { %v2232_v17 = vadd.f32 %v2231_v30, %v1856_v52  ;;  %v2245_v35 = vpop.f32.mrf.mxu3  ;;  %2647 = vmatmul.bf16.vlgmr.msra.gmra.mxu1 %v2306_v33 }
 0xcd8   : > { %v2246_v37 = vadd.f32 %v2245_v35, %v1857_v21  ;;  %2689 = vmatmul.bf16.vlgmr.msrb.gmra.mxu0 %v2309_v38 }
 0xcd9   : > { %v2291_v4 = vmax.f32 %v2232_v17, 0.0 }
 0xcda   : > { %v2292_v32 = vmax.f32 %v2246_v37, 0.0 }
 0xcdb   : > { %v2307_v25 = vpack.c.bf16 %v2291_v4, %v2275_v2 }
 0xcdc   : > { %v2308_v12 = vpack.c.bf16 %v2292_v32, %v2276_v39 }
 0xcdd   : > { %2661 = vmatmul.bf16.vlgmr.msra.gmra.mxu2 %v2307_v25 }
 0xcde   : > { %2675 = vmatmul.bf16.vlgmr.msra.gmra.mxu3 %v2308_v12 }
 0xd24   : > { %v2480_v40 = vpop.f32.mrf.mxu1 }
 0xd25   : > { %v2522_v41 = vpop.f32.mrf.mxu0  ;;  %v2481_v31 = vadd.f32 %v2480_v40, %v2310_v44 }
 0xd2c   : > { %v2482_v42 = vpop.f32.mrf.mxu1 }
 0xd2d   : > { %v2524_v36 = vpop.f32.mrf.mxu0  ;;  %v2483_v56 = vadd.f32 %v2482_v42, %v2310_v44 }
 0xd30   : > { %v2494_v43 = vpop.f32.mrf.mxu2 }
 0xd31   : > { %v2508_v26 = vpop.f32.mrf.mxu3  ;;  %v2495_v50 = vadd.f32 %v2494_v43, %v2481_v31 }
 0xd33   : > { %v2509_v55 = vadd.f32 %v2508_v26, %v2495_v50 }
 0xd34   : > { %v2536_v48 = vpop.f32.mrf.mxu1 }
 0xd35   : > { %v2578_v54 = vpop.f32.mrf.mxu0  ;;  %v2523_v58 = vadd.f32 %v2522_v41, %v2509_v55 }
 0xd37   : > { %v2537_v1 = vadd.f32 %v2536_v48, %v2523_v58 }
 0xd38   : > { %v2496_v51 = vpop.f32.mrf.mxu2 }
 0xd39   : > { %v2510_v53 = vpop.f32.mrf.mxu3  ;;  %v2497_v59 = vadd.f32 %v2496_v51, %v2483_v56 }
 0xd3b   : > { %v2511_v3 = vadd.f32 %v2510_v53, %v2497_v59 }
 0xd3c   : > { %v2538_v57 = vpop.f32.mrf.mxu1 }
 0xd3d   : > { %v2580_v5 = vpop.f32.mrf.mxu0  ;;  %v2525_v6 = vadd.f32 %v2524_v36, %v2511_v3 }
 0xd3f   : > { %v2539_v47 = vadd.f32 %v2538_v57, %v2525_v6 }
 0xd40   : > { %v2550_v61 = vpop.f32.mrf.mxu2 }
 0xd41   : > { %v2564_v60 = vpop.f32.mrf.mxu3  ;;  %v2551_v29 = vadd.f32 %v2550_v61, %v2537_v1 }
 0xd43   : > { %v2565_v9 = vadd.f32 %v2564_v60, %v2551_v29 }
 0xd44   : > { %v2592_v62 = vpop.f32.mrf.mxu1 }
 0xd45   : > { %v2579_v13 = vadd.f32 %v2578_v54, %v2565_v9  ;;  %v2634_v46 = vpop.f32.mrf.mxu0 }
 0xd47   : > { %v2593_v14 = vadd.f32 %v2592_v62, %v2579_v13 }
 0xd48   : > { %v2552_v8 = vpop.f32.mrf.mxu2 }
 0xd49   : > { %v2566_v11 = vpop.f32.mrf.mxu3  ;;  %v2553_v10 = vadd.f32 %v2552_v8, %v2539_v47 }
 0xd4b   : > { %v2567_v15 = vadd.f32 %v2566_v11, %v2553_v10 }
 0xd4c   : > { %v2594_v16 = vpop.f32.mrf.mxu1 }
 0xd4d   : > { %v2581_v52 = vadd.f32 %v2580_v5, %v2567_v15  ;;  %v2636_v20 = vpop.f32.mrf.mxu0 }
 0xd4f   : > { %v2595_v22 = vadd.f32 %v2594_v16, %v2581_v52 }
 0xd50   : > { %v2606_v0 = vpop.f32.mrf.mxu2 }
 0xd51   : > { %v2620_v7 = vpop.f32.mrf.mxu3  ;;  %v2607_v18 = vadd.f32 %v2606_v0, %v2593_v14 }
 0xd53   : > { %v2621_v19 = vadd.f32 %v2620_v7, %v2607_v18 }
 0xd54   : > { %v2648_v28 = vpop.f32.mrf.mxu1 }
 0xd55   : > { %v2635_v49 = vadd.f32 %v2634_v46, %v2621_v19  ;;  %v2690_v17 = vpop.f32.mrf.mxu0 }
 0xd57   : > { %v2649_v63 = vadd.f32 %v2648_v28, %v2635_v49 }
 0xd58   : > { %v2608_v21 = vpop.f32.mrf.mxu2 }
 0xd59   : > { %v2622_v23 = vpop.f32.mrf.mxu3  ;;  %v2609_v27 = vadd.f32 %v2608_v21, %v2595_v22 }
 0xd5b   : > { %v2623_v33 = vadd.f32 %v2622_v23, %v2609_v27 }
 0xd5c   : > { %v2650_v4 = vpop.f32.mrf.mxu1 }
 0xd5d   : > { %v2637_v35 = vadd.f32 %v2636_v20, %v2623_v33  ;;  %v2692_v42 = vpop.f32.mrf.mxu0 }
 0xd5f   : > { %v2651_v39 = vadd.f32 %v2650_v4, %v2637_v35 }
 0xd60   : > { %v2662_v34 = vpop.f32.mrf.mxu2 }
 0xd61   : > { %v2663_v38 = vadd.f32 %v2662_v34, %v2649_v63  ;;  %v2676_v30 = vpop.f32.mrf.mxu3 }
 0xd63   : > { %v2677_v37 = vadd.f32 %v2676_v30, %v2663_v38 }
 0xd65   : > { %v2691_v2 = vadd.f32 %v2690_v17, %v2677_v37 }
 0xd67   : > { %v2695_v32 = vadd.f32 %v2691_v2, %v4402_v24 }
 0xd68   : > { %v2664_v25 = vpop.f32.mrf.mxu2 }
 0xd69   : > { %2697 = vst.msk [vmem:[#allocation12] sm:$0xff] %vm555_vm1, %v2695_v32  ;;  %v2665_v12 = vadd.f32 %v2664_v25, %v2651_v39  ;;  %v2678_v40 = vpop.f32.mrf.mxu3 }
 0xd6b   : > { %v2679_v41 = vadd.f32 %v2678_v40, %v2665_v12 }
 0xd6d   : > { %v2693_v36 = vadd.f32 %v2692_v42, %v2679_v41 }
 0xd6f   : > { %v2696_v43 = vadd.f32 %v2693_v36, %v4407_v45 }
 0xd71   : > { %2698 = vst.msk [vmem:[#allocation12 + $0x8] sm:$0xff] %vm555_vm1, %v2696_v43 }
 0xd72   : > { %3307 = dma.vmem_to_hbm [thread:$0]  (%p3338_p1), %s2705_s18, 256, %s2707_s2, [#allocation4], %s3815_s22, %s3815_s22, %s3811_s9  }
 0xd73   : > { %3773 = dma.done.wait (%p3338_p1), [#allocation4], 256  }
 0xd74   : > { %3775 = vsyncadd (%p3338_p1), [#allocation4], 4294967040 }
 0xd75 PF: > { %s4687_s27 = sld [smem:[#allocation19_spill]]  ;;  %s4690_s24 = smov %s3782_s25 }
 0xd76   : > { %s4688_s8 = sld [smem:[#allocation17_spill]] }
 0xd77   : > { %s4689_s26 = sld [smem:[#allocation20_spill]] }
 0xd7b   : > { %p17_p4 = scmp.ge.s32.totalorder %s4687_s27, 4  }
 0xd7c   : > { %s4691_s25 = smov %s4688_s8 }
 0xd7d   :  { %19 = sbr.rel (!%p17_p4) target bundleno = 9 (0x9), region = 140 }
 0xd82   :  { %2723 = vsyncpa [#allocation3], 1 }
 0xd83   :  { %2725 = vsyncpa [#allocation3 + $0x1], 1 }
 0xd84   :  { %2726 = vsyncpa [#allocation6], 1 }
 0xd85   :  { %2727 = vsyncpa [#allocation4], 1 }
 0xd86   :  { %2729 = vsyncpa [#allocation4 + $0x1], 1 }

</bundles_post_ra>
